<compile_context>
chip_gen: v6e
topology: v6e:2x2x1
jax: 0.10.0
libtpu: 0.0.40
codegen_flags: <defaults>
</compile_context>

<pallas_src>
import functools

import jax
import jax.numpy as jnp
from jax import lax
from jax.experimental import pallas as pl
from jax.experimental.pallas import tpu as pltpu

H1 = 128   # embed_dim1 (lstm1 hidden)
H2 = 64    # embed_dim2 (lstm2 hidden)
H2P = 128  # lane-padded layer-2 gate width


def _lstm_kernel(x_ref, wih1_ref, whh1_ref, b1_ref,
                 wih2_ref, whh2_ref, b2_ref,
                 wout_ref, bout_ref,
                 o_ref, *, T, NP, H1, H2P):
    P = o_ref.shape[-1]

    # ---- hoisted layer-1 input projection for the whole sequence ----------
    # (T*NP, F) @ (F, 4*H1) -> (T*NP, 4*H1), bias folded in once.
    g1_all = (jnp.dot(x_ref[...], wih1_ref[...],
                      preferred_element_type=jnp.float32)
              + b1_ref[...])

    # Weights / biases loaded (and broadcast) once, outside the time loop.
    whh1 = whh1_ref[...]
    wih2 = wih2_ref[...]
    whh2 = whh2_ref[...]
    wout = wout_ref[...]
    b2 = jnp.broadcast_to(b2_ref[...], (NP, 4 * H2P))
    bout = jnp.broadcast_to(bout_ref[...], (NP, P))

    h1 = jnp.zeros((NP, H1), jnp.float32)
    c1 = jnp.zeros((NP, H1), jnp.float32)
    h2 = jnp.zeros((NP, H2P), jnp.float32)
    c2 = jnp.zeros((NP, H2P), jnp.float32)

    # T is a static Python int: this loop fully unrolls at trace time, giving
    # the scheduler cross-timestep visibility (equivalent to unroll=True).
    for t in range(T):
        # ---- LSTM layer 1 (only the recurrent matmul stays in the loop) ---
        g1 = (g1_all[t * NP:(t + 1) * NP, :]
              + jnp.dot(h1, whh1, preferred_element_type=jnp.float32))
        i1 = jax.nn.sigmoid(g1[:, 0 * H1:1 * H1])
        f1 = jax.nn.sigmoid(g1[:, 1 * H1:2 * H1])
        gg1 = jnp.tanh(g1[:, 2 * H1:3 * H1])
        o1 = jax.nn.sigmoid(g1[:, 3 * H1:4 * H1])
        c1 = f1 * c1 + i1 * gg1
        h1 = o1 * jnp.tanh(c1)
        y1 = jnp.tanh(h1)                          # extra tanh (module)

        # ---- LSTM layer 2 (gates lane-padded to 128 per gate block) -------
        g2 = (jnp.dot(y1, wih2, preferred_element_type=jnp.float32)
              + jnp.dot(h2, whh2, preferred_element_type=jnp.float32)
              + b2)
        i2 = jax.nn.sigmoid(g2[:, 0 * H2P:1 * H2P])
        f2 = jax.nn.sigmoid(g2[:, 1 * H2P:2 * H2P])
        gg2 = jnp.tanh(g2[:, 2 * H2P:3 * H2P])
        o2 = jax.nn.sigmoid(g2[:, 3 * H2P:4 * H2P])
        c2 = f2 * c2 + i2 * gg2                    # padded lanes stay exactly 0
        h2 = o2 * jnp.tanh(c2)
        y2 = jnp.tanh(h2)                          # extra tanh (module)

        # ---- output linear (VMEM store only; single HBM writeback at end) -
        out_t = jnp.dot(y2, wout, preferred_element_type=jnp.float32) + bout
        o_ref[t] = out_t.astype(o_ref.dtype)


def _pad_gates_lanes(w, h, hp):
    """Pad each of the 4 gate blocks along the last axis from h to hp lanes."""
    pads = [(0, 0)] * (w.ndim - 1) + [(0, hp - h)]
    parts = [jnp.pad(w[..., k * h:(k + 1) * h], pads) for k in range(4)]
    return jnp.concatenate(parts, axis=-1)


def custom_lstm_forward(batch_x, params):
    """batch_x: (T, N, F, 1) float32.  Returns (T, N, pred_len, 1)."""
    x = batch_x[..., 0]                                   # squeeze(-1) -> (T, N, F)
    T, N, F = x.shape
    wih1T, whh1T, b1, wih2T, whh2T, b2, woutT, bout = params
    P = woutT.shape[1]

    # Pad batch to a sublane multiple so per-step gate row-slices are aligned.
    NP = max(8, -(-N // 8) * 8)
    x_p = jnp.pad(x, ((0, 0), (0, NP - N), (0, 0)))
    x2d = x_p.reshape(T * NP, F)

    # Lane-pad layer-2 params: each gate occupies its own 128-lane block.
    wih2T_p = _pad_gates_lanes(wih2T, H2, H2P)                       # (H1, 4*H2P)
    whh2T_p = jnp.pad(_pad_gates_lanes(whh2T, H2, H2P),
                      ((0, H2P - H2), (0, 0)))                       # (H2P, 4*H2P)
    b2_p = _pad_gates_lanes(b2, H2, H2P)                             # (1, 4*H2P)
    woutT_p = jnp.pad(woutT, ((0, H2P - H2), (0, 0)))                # (H2P, P)

    kernel = functools.partial(_lstm_kernel, T=T, NP=NP, H1=H1, H2P=H2P)

    full = lambda a: pl.BlockSpec(a.shape, lambda i, _nd=a.ndim: (0,) * _nd)

    out = pl.pallas_call(
        kernel,
        out_shape=jax.ShapeDtypeStruct((T, NP, P), jnp.float32),
        grid_spec=pltpu.PrefetchScalarGridSpec(
            num_scalar_prefetch=0,
            grid=(1,),                     # single invocation: recurrence fused in-kernel
            in_specs=[
                full(x2d),
                full(wih1T), full(whh1T), full(b1),
                full(wih2T_p), full(whh2T_p), full(b2_p),
                full(woutT_p), full(bout),
            ],
            out_specs=pl.BlockSpec((T, NP, P), lambda i: (0, 0, 0)),
        ),
        compiler_params=pltpu.CompilerParams(
            dimension_semantics=("arbitrary",)),
    )(x2d, wih1T, whh1T, b1, wih2T_p, whh2T_p, b2_p, woutT_p, bout)

    return out[:, :N, :][..., None]                       # trim batch pad, unsqueeze(-1)


# ------------------------- pure-JAX reference ---------------------------
def _lstm_layer_ref(x_seq, wihT, whhT, b, H):
    N = x_seq.shape[1]

    def step(carry, x_t):
        h, c = carry
        g = x_t @ wihT + h @ whhT + b
        i = jax.nn.sigmoid(g[:, :H])
        f = jax.nn.sigmoid(g[:, H:2 * H])
        gg = jnp.tanh(g[:, 2 * H:3 * H])
        o = jax.nn.sigmoid(g[:, 3 * H:])
        c = f * c + i * gg
        h = o * jnp.tanh(c)
        return (h, c), h

    init = (jnp.zeros((N, H), jnp.float32), jnp.zeros((N, H), jnp.float32))
    _, hs = lax.scan(step, init, x_seq)
    return hs


def custom_lstm_ref(batch_x, params):
    x = batch_x[..., 0]
    wih1T, whh1T, b1, wih2T, whh2T, b2, woutT, bout = params
    x = jnp.tanh(_lstm_layer_ref(x, wih1T, whh1T, b1, H1))
    x = jnp.tanh(_lstm_layer_ref(x, wih2T, whh2T, b2, H2))
    return (x @ woutT + bout)[..., None]


# ------------------------------ main ------------------------------------
if __name__ == "__main__":
    seq_len = 16    # LSTM1 input_size (module's `seq_len`)
    pred_len = 4
    T = 8           # sequence (time) length fed to the LSTM
    N = 2           # batch

    key = jax.random.PRNGKey(0)
    ks = jax.random.split(key, 10)
    scale = 0.1

    # Weights stored pre-transposed so the kernel does x @ W^T directly.
    wih1T = scale * jax.random.normal(ks[0], (seq_len, 4 * H1), jnp.float32)
    whh1T = scale * jax.random.normal(ks[1], (H1, 4 * H1), jnp.float32)
    b1 = scale * jax.random.normal(ks[2], (1, 4 * H1), jnp.float32)   # b_ih + b_hh
    wih2T = scale * jax.random.normal(ks[3], (H1, 4 * H2), jnp.float32)
    whh2T = scale * jax.random.normal(ks[4], (H2, 4 * H2), jnp.float32)
    b2 = scale * jax.random.normal(ks[5], (1, 4 * H2), jnp.float32)
    woutT = scale * jax.random.normal(ks[6], (H2, pred_len), jnp.float32)
    bout = scale * jax.random.normal(ks[7], (1, pred_len), jnp.float32)
    params = (wih1T, whh1T, b1, wih2T, whh2T, b2, woutT, bout)

    batch_x = jax.random.normal(ks[8], (T, N, seq_len, 1), jnp.float32)

    out = jax.block_until_ready(custom_lstm_forward(batch_x, params))
    ref = jax.block_until_ready(custom_lstm_ref(batch_x, params))

    assert out.shape == (T, N, pred_len, 1), out.shape
    assert jnp.allclose(out, ref, rtol=2e-4, atol=2e-4), (
        float(jnp.max(jnp.abs(out - ref))))

    print("KERNEL_OK")
</pallas_src>

<mosaic_0001>
module attributes {stable_mosaic.version = 11 : i64} {
  func.func @_lstm_kernel(%arg0: i32, %arg1: memref<64x16xf32, #tpu.memory_space<vmem>>, %arg2: memref<16x512xf32, #tpu.memory_space<vmem>>, %arg3: memref<128x512xf32, #tpu.memory_space<vmem>>, %arg4: memref<1x512xf32, #tpu.memory_space<vmem>>, %arg5: memref<128x512xf32, #tpu.memory_space<vmem>>, %arg6: memref<128x512xf32, #tpu.memory_space<vmem>>, %arg7: memref<1x512xf32, #tpu.memory_space<vmem>>, %arg8: memref<128x4xf32, #tpu.memory_space<vmem>>, %arg9: memref<1x4xf32, #tpu.memory_space<vmem>>, %arg10: memref<8x8x4xf32, #tpu.memory_space<vmem>>) attributes {dimension_semantics = [#tpu.dimension_semantics<arbitrary>], iteration_bounds = array<i64: 1>, scalar_prefetch = 0 : i64, scratch_operands = 0 : i64, tpu.core_type = #tpu.core_type<tc>, window_params = [{pipeline_mode = #tpu.pipeline_mode<synchronous>, transform_indices = @transform_0, window_bounds = array<i64: 64, 16>}, {pipeline_mode = #tpu.pipeline_mode<synchronous>, transform_indices = @transform_1, window_bounds = array<i64: 16, 512>}, {pipeline_mode = #tpu.pipeline_mode<synchronous>, transform_indices = @transform_2, window_bounds = array<i64: 128, 512>}, {pipeline_mode = #tpu.pipeline_mode<synchronous>, transform_indices = @transform_3, window_bounds = array<i64: 1, 512>}, {pipeline_mode = #tpu.pipeline_mode<synchronous>, transform_indices = @transform_4, window_bounds = array<i64: 128, 512>}, {pipeline_mode = #tpu.pipeline_mode<synchronous>, transform_indices = @transform_5, window_bounds = array<i64: 128, 512>}, {pipeline_mode = #tpu.pipeline_mode<synchronous>, transform_indices = @transform_6, window_bounds = array<i64: 1, 512>}, {pipeline_mode = #tpu.pipeline_mode<synchronous>, transform_indices = @transform_7, window_bounds = array<i64: 128, 4>}, {pipeline_mode = #tpu.pipeline_mode<synchronous>, transform_indices = @transform_8, window_bounds = array<i64: 1, 4>}, {pipeline_mode = #tpu.pipeline_mode<synchronous>, transform_indices = @transform_9, window_bounds = array<i64: 8, 8, 4>}]} {
    %c0 = arith.constant 0 : index
    %c0_0 = arith.constant 0 : index
    %0 = vector.load %arg1[%c0, %c0_0] : memref<64x16xf32, #tpu.memory_space<vmem>>, vector<64x16xf32>
    %c0_1 = arith.constant 0 : index
    %c0_2 = arith.constant 0 : index
    %1 = vector.load %arg2[%c0_1, %c0_2] : memref<16x512xf32, #tpu.memory_space<vmem>>, vector<16x512xf32>
    %cst = arith.constant dense<0.000000e+00> : vector<64x512xf32>
    %2 = tpu.matmul %0, %1, %cst {dimension_numbers = #tpu.dot_dimension_numbers<[1], [0], [0], [1], [0, 0, 1, 1], [], []>} : vector<64x16xf32>, vector<16x512xf32>, vector<64x512xf32> -> vector<64x512xf32>
    %c0_3 = arith.constant 0 : index
    %c0_4 = arith.constant 0 : index
    %3 = vector.load %arg4[%c0_3, %c0_4] : memref<1x512xf32, #tpu.memory_space<vmem>>, vector<1x512xf32>
    %4 = vector.broadcast %3 : vector<1x512xf32> to vector<64x512xf32>
    %5 = arith.addf %2, %4 : vector<64x512xf32>
    %c0_5 = arith.constant 0 : index
    %c0_6 = arith.constant 0 : index
    %6 = vector.load %arg3[%c0_5, %c0_6] : memref<128x512xf32, #tpu.memory_space<vmem>>, vector<128x512xf32>
    %c0_7 = arith.constant 0 : index
    %c0_8 = arith.constant 0 : index
    %7 = vector.load %arg5[%c0_7, %c0_8] : memref<128x512xf32, #tpu.memory_space<vmem>>, vector<128x512xf32>
    %c0_9 = arith.constant 0 : index
    %c0_10 = arith.constant 0 : index
    %8 = vector.load %arg6[%c0_9, %c0_10] : memref<128x512xf32, #tpu.memory_space<vmem>>, vector<128x512xf32>
    %c0_11 = arith.constant 0 : index
    %c0_12 = arith.constant 0 : index
    %9 = vector.load %arg8[%c0_11, %c0_12] : memref<128x4xf32, #tpu.memory_space<vmem>>, vector<128x4xf32>
    %c0_13 = arith.constant 0 : index
    %c0_14 = arith.constant 0 : index
    %10 = vector.load %arg7[%c0_13, %c0_14] : memref<1x512xf32, #tpu.memory_space<vmem>>, vector<1x512xf32>
    %11 = vector.shape_cast %10 : vector<1x512xf32> to vector<1x512xf32>
    %12 = vector.broadcast %11 : vector<1x512xf32> to vector<8x512xf32>
    %c0_15 = arith.constant 0 : index
    %c0_16 = arith.constant 0 : index
    %13 = vector.load %arg9[%c0_15, %c0_16] : memref<1x4xf32, #tpu.memory_space<vmem>>, vector<1x4xf32>
    %14 = vector.shape_cast %13 : vector<1x4xf32> to vector<1x4xf32>
    %15 = vector.broadcast %14 : vector<1x4xf32> to vector<8x4xf32>
    %cst_17 = arith.constant 0.000000e+00 : f32
    %16 = vector.broadcast %cst_17 : f32 to vector<8x128xf32>
    %cst_18 = arith.constant 0.000000e+00 : f32
    %17 = vector.broadcast %cst_18 : f32 to vector<8x128xf32>
    %cst_19 = arith.constant 0.000000e+00 : f32
    %18 = vector.broadcast %cst_19 : f32 to vector<8x128xf32>
    %cst_20 = arith.constant 0.000000e+00 : f32
    %19 = vector.broadcast %cst_20 : f32 to vector<8x128xf32>
    %20 = vector.extract_strided_slice %5 {offsets = [0, 0], sizes = [8, 512], strides = [1, 1]} : vector<64x512xf32> to vector<8x512xf32>
    %cst_21 = arith.constant dense<0.000000e+00> : vector<8x512xf32>
    %21 = tpu.matmul %16, %6, %cst_21 {dimension_numbers = #tpu.dot_dimension_numbers<[1], [0], [0], [1], [0, 0, 1, 1], [], []>} : vector<8x128xf32>, vector<128x512xf32>, vector<8x512xf32> -> vector<8x512xf32>
    %22 = arith.addf %20, %21 : vector<8x512xf32>
    %23 = vector.extract_strided_slice %22 {offsets = [0, 0], sizes = [8, 128], strides = [1, 1]} : vector<8x512xf32> to vector<8x128xf32>
    %24 = arith.negf %23 : vector<8x128xf32>
    %25 = math.exp %24 : vector<8x128xf32>
    %cst_22 = arith.constant 1.000000e+00 : f32
    %26 = vector.broadcast %cst_22 : f32 to vector<8x128xf32>
    %27 = arith.addf %26, %25 : vector<8x128xf32>
    %28 = arith.divf %26, %27 : vector<8x128xf32>
    %29 = vector.extract_strided_slice %22 {offsets = [0, 128], sizes = [8, 128], strides = [1, 1]} : vector<8x512xf32> to vector<8x128xf32>
    %30 = arith.negf %29 : vector<8x128xf32>
    %31 = math.exp %30 : vector<8x128xf32>
    %cst_23 = arith.constant 1.000000e+00 : f32
    %32 = vector.broadcast %cst_23 : f32 to vector<8x128xf32>
    %33 = arith.addf %32, %31 : vector<8x128xf32>
    %34 = arith.divf %32, %33 : vector<8x128xf32>
    %35 = vector.extract_strided_slice %22 {offsets = [0, 256], sizes = [8, 128], strides = [1, 1]} : vector<8x512xf32> to vector<8x128xf32>
    %36 = math.tanh %35 : vector<8x128xf32>
    %37 = vector.extract_strided_slice %22 {offsets = [0, 384], sizes = [8, 128], strides = [1, 1]} : vector<8x512xf32> to vector<8x128xf32>
    %38 = arith.negf %37 : vector<8x128xf32>
    %39 = math.exp %38 : vector<8x128xf32>
    %cst_24 = arith.constant 1.000000e+00 : f32
    %40 = vector.broadcast %cst_24 : f32 to vector<8x128xf32>
    %41 = arith.addf %40, %39 : vector<8x128xf32>
    %42 = arith.divf %40, %41 : vector<8x128xf32>
    %43 = arith.mulf %34, %17 : vector<8x128xf32>
    %44 = arith.mulf %28, %36 : vector<8x128xf32>
    %45 = arith.addf %43, %44 : vector<8x128xf32>
    %46 = math.tanh %45 : vector<8x128xf32>
    %47 = arith.mulf %42, %46 : vector<8x128xf32>
    %48 = math.tanh %47 : vector<8x128xf32>
    %cst_25 = arith.constant dense<0.000000e+00> : vector<8x512xf32>
    %49 = tpu.matmul %48, %7, %cst_25 {dimension_numbers = #tpu.dot_dimension_numbers<[1], [0], [0], [1], [0, 0, 1, 1], [], []>} : vector<8x128xf32>, vector<128x512xf32>, vector<8x512xf32> -> vector<8x512xf32>
    %cst_26 = arith.constant dense<0.000000e+00> : vector<8x512xf32>
    %50 = tpu.matmul %18, %8, %cst_26 {dimension_numbers = #tpu.dot_dimension_numbers<[1], [0], [0], [1], [0, 0, 1, 1], [], []>} : vector<8x128xf32>, vector<128x512xf32>, vector<8x512xf32> -> vector<8x512xf32>
    %51 = arith.addf %49, %50 : vector<8x512xf32>
    %52 = arith.addf %51, %12 : vector<8x512xf32>
    %53 = vector.extract_strided_slice %52 {offsets = [0, 0], sizes = [8, 128], strides = [1, 1]} : vector<8x512xf32> to vector<8x128xf32>
    %54 = arith.negf %53 : vector<8x128xf32>
    %55 = math.exp %54 : vector<8x128xf32>
    %cst_27 = arith.constant 1.000000e+00 : f32
    %56 = vector.broadcast %cst_27 : f32 to vector<8x128xf32>
    %57 = arith.addf %56, %55 : vector<8x128xf32>
    %58 = arith.divf %56, %57 : vector<8x128xf32>
    %59 = vector.extract_strided_slice %52 {offsets = [0, 128], sizes = [8, 128], strides = [1, 1]} : vector<8x512xf32> to vector<8x128xf32>
    %60 = arith.negf %59 : vector<8x128xf32>
    %61 = math.exp %60 : vector<8x128xf32>
    %cst_28 = arith.constant 1.000000e+00 : f32
    %62 = vector.broadcast %cst_28 : f32 to vector<8x128xf32>
    %63 = arith.addf %62, %61 : vector<8x128xf32>
    %64 = arith.divf %62, %63 : vector<8x128xf32>
    %65 = vector.extract_strided_slice %52 {offsets = [0, 256], sizes = [8, 128], strides = [1, 1]} : vector<8x512xf32> to vector<8x128xf32>
    %66 = math.tanh %65 : vector<8x128xf32>
    %67 = vector.extract_strided_slice %52 {offsets = [0, 384], sizes = [8, 128], strides = [1, 1]} : vector<8x512xf32> to vector<8x128xf32>
    %68 = arith.negf %67 : vector<8x128xf32>
    %69 = math.exp %68 : vector<8x128xf32>
    %cst_29 = arith.constant 1.000000e+00 : f32
    %70 = vector.broadcast %cst_29 : f32 to vector<8x128xf32>
    %71 = arith.addf %70, %69 : vector<8x128xf32>
    %72 = arith.divf %70, %71 : vector<8x128xf32>
    %73 = arith.mulf %64, %19 : vector<8x128xf32>
    %74 = arith.mulf %58, %66 : vector<8x128xf32>
    %75 = arith.addf %73, %74 : vector<8x128xf32>
    %76 = math.tanh %75 : vector<8x128xf32>
    %77 = arith.mulf %72, %76 : vector<8x128xf32>
    %78 = math.tanh %77 : vector<8x128xf32>
    %cst_30 = arith.constant dense<0.000000e+00> : vector<8x4xf32>
    %79 = tpu.matmul %78, %9, %cst_30 {dimension_numbers = #tpu.dot_dimension_numbers<[1], [0], [0], [1], [0, 0, 1, 1], [], []>} : vector<8x128xf32>, vector<128x4xf32>, vector<8x4xf32> -> vector<8x4xf32>
    %80 = arith.addf %79, %15 : vector<8x4xf32>
    %c0_31 = arith.constant 0 : index
    %c0_32 = arith.constant 0 : index
    %c0_33 = arith.constant 0 : index
    %81 = vector.load %arg10[%c0_31, %c0_32, %c0_33] : memref<8x8x4xf32, #tpu.memory_space<vmem>>, vector<1x8x4xf32>
    %82 = vector.shape_cast %81 : vector<1x8x4xf32> to vector<8x4xf32>
    %83 = vector.shape_cast %80 : vector<8x4xf32> to vector<1x8x4xf32>
    tpu.vector_store %arg10[%c0_31, %c0_32, %c0_33], %83 {strides = array<i32>} : memref<8x8x4xf32, #tpu.memory_space<vmem>>, vector<1x8x4xf32>,
    %84 = vector.extract_strided_slice %5 {offsets = [8, 0], sizes = [8, 512], strides = [1, 1]} : vector<64x512xf32> to vector<8x512xf32>
    %cst_34 = arith.constant dense<0.000000e+00> : vector<8x512xf32>
    %85 = tpu.matmul %47, %6, %cst_34 {dimension_numbers = #tpu.dot_dimension_numbers<[1], [0], [0], [1], [0, 0, 1, 1], [], []>} : vector<8x128xf32>, vector<128x512xf32>, vector<8x512xf32> -> vector<8x512xf32>
    %86 = arith.addf %84, %85 : vector<8x512xf32>
    %87 = vector.extract_strided_slice %86 {offsets = [0, 0], sizes = [8, 128], strides = [1, 1]} : vector<8x512xf32> to vector<8x128xf32>
    %88 = arith.negf %87 : vector<8x128xf32>
    %89 = math.exp %88 : vector<8x128xf32>
    %cst_35 = arith.constant 1.000000e+00 : f32
    %90 = vector.broadcast %cst_35 : f32 to vector<8x128xf32>
    %91 = arith.addf %90, %89 : vector<8x128xf32>
    %92 = arith.divf %90, %91 : vector<8x128xf32>
    %93 = vector.extract_strided_slice %86 {offsets = [0, 128], sizes = [8, 128], strides = [1, 1]} : vector<8x512xf32> to vector<8x128xf32>
    %94 = arith.negf %93 : vector<8x128xf32>
    %95 = math.exp %94 : vector<8x128xf32>
    %cst_36 = arith.constant 1.000000e+00 : f32
    %96 = vector.broadcast %cst_36 : f32 to vector<8x128xf32>
    %97 = arith.addf %96, %95 : vector<8x128xf32>
    %98 = arith.divf %96, %97 : vector<8x128xf32>
    %99 = vector.extract_strided_slice %86 {offsets = [0, 256], sizes = [8, 128], strides = [1, 1]} : vector<8x512xf32> to vector<8x128xf32>
    %100 = math.tanh %99 : vector<8x128xf32>
    %101 = vector.extract_strided_slice %86 {offsets = [0, 384], sizes = [8, 128], strides = [1, 1]} : vector<8x512xf32> to vector<8x128xf32>
    %102 = arith.negf %101 : vector<8x128xf32>
    %103 = math.exp %102 : vector<8x128xf32>
    %cst_37 = arith.constant 1.000000e+00 : f32
    %104 = vector.broadcast %cst_37 : f32 to vector<8x128xf32>
    %105 = arith.addf %104, %103 : vector<8x128xf32>
    %106 = arith.divf %104, %105 : vector<8x128xf32>
    %107 = arith.mulf %98, %45 : vector<8x128xf32>
    %108 = arith.mulf %92, %100 : vector<8x128xf32>
    %109 = arith.addf %107, %108 : vector<8x128xf32>
    %110 = math.tanh %109 : vector<8x128xf32>
    %111 = arith.mulf %106, %110 : vector<8x128xf32>
    %112 = math.tanh %111 : vector<8x128xf32>
    %cst_38 = arith.constant dense<0.000000e+00> : vector<8x512xf32>
    %113 = tpu.matmul %112, %7, %cst_38 {dimension_numbers = #tpu.dot_dimension_numbers<[1], [0], [0], [1], [0, 0, 1, 1], [], []>} : vector<8x128xf32>, vector<128x512xf32>, vector<8x512xf32> -> vector<8x512xf32>
    %cst_39 = arith.constant dense<0.000000e+00> : vector<8x512xf32>
    %114 = tpu.matmul %77, %8, %cst_39 {dimension_numbers = #tpu.dot_dimension_numbers<[1], [0], [0], [1], [0, 0, 1, 1], [], []>} : vector<8x128xf32>, vector<128x512xf32>, vector<8x512xf32> -> vector<8x512xf32>
    %115 = arith.addf %113, %114 : vector<8x512xf32>
    %116 = arith.addf %115, %12 : vector<8x512xf32>
    %117 = vector.extract_strided_slice %116 {offsets = [0, 0], sizes = [8, 128], strides = [1, 1]} : vector<8x512xf32> to vector<8x128xf32>
    %118 = arith.negf %117 : vector<8x128xf32>
    %119 = math.exp %118 : vector<8x128xf32>
    %cst_40 = arith.constant 1.000000e+00 : f32
    %120 = vector.broadcast %cst_40 : f32 to vector<8x128xf32>
    %121 = arith.addf %120, %119 : vector<8x128xf32>
    %122 = arith.divf %120, %121 : vector<8x128xf32>
    %123 = vector.extract_strided_slice %116 {offsets = [0, 128], sizes = [8, 128], strides = [1, 1]} : vector<8x512xf32> to vector<8x128xf32>
    %124 = arith.negf %123 : vector<8x128xf32>
    %125 = math.exp %124 : vector<8x128xf32>
    %cst_41 = arith.constant 1.000000e+00 : f32
    %126 = vector.broadcast %cst_41 : f32 to vector<8x128xf32>
    %127 = arith.addf %126, %125 : vector<8x128xf32>
    %128 = arith.divf %126, %127 : vector<8x128xf32>
    %129 = vector.extract_strided_slice %116 {offsets = [0, 256], sizes = [8, 128], strides = [1, 1]} : vector<8x512xf32> to vector<8x128xf32>
    %130 = math.tanh %129 : vector<8x128xf32>
    %131 = vector.extract_strided_slice %116 {offsets = [0, 384], sizes = [8, 128], strides = [1, 1]} : vector<8x512xf32> to vector<8x128xf32>
    %132 = arith.negf %131 : vector<8x128xf32>
    %133 = math.exp %132 : vector<8x128xf32>
    %cst_42 = arith.constant 1.000000e+00 : f32
    %134 = vector.broadcast %cst_42 : f32 to vector<8x128xf32>
    %135 = arith.addf %134, %133 : vector<8x128xf32>
    %136 = arith.divf %134, %135 : vector<8x128xf32>
    %137 = arith.mulf %128, %75 : vector<8x128xf32>
    %138 = arith.mulf %122, %130 : vector<8x128xf32>
    %139 = arith.addf %137, %138 : vector<8x128xf32>
    %140 = math.tanh %139 : vector<8x128xf32>
    %141 = arith.mulf %136, %140 : vector<8x128xf32>
    %142 = math.tanh %141 : vector<8x128xf32>
    %cst_43 = arith.constant dense<0.000000e+00> : vector<8x4xf32>
    %143 = tpu.matmul %142, %9, %cst_43 {dimension_numbers = #tpu.dot_dimension_numbers<[1], [0], [0], [1], [0, 0, 1, 1], [], []>} : vector<8x128xf32>, vector<128x4xf32>, vector<8x4xf32> -> vector<8x4xf32>
    %144 = arith.addf %143, %15 : vector<8x4xf32>
    %c1 = arith.constant 1 : index
    %c0_44 = arith.constant 0 : index
    %c0_45 = arith.constant 0 : index
    %145 = vector.load %arg10[%c1, %c0_44, %c0_45] : memref<8x8x4xf32, #tpu.memory_space<vmem>>, vector<1x8x4xf32>
    %146 = vector.shape_cast %145 : vector<1x8x4xf32> to vector<8x4xf32>
    %147 = vector.shape_cast %144 : vector<8x4xf32> to vector<1x8x4xf32>
    tpu.vector_store %arg10[%c1, %c0_44, %c0_45], %147 {strides = array<i32>} : memref<8x8x4xf32, #tpu.memory_space<vmem>>, vector<1x8x4xf32>,
    %148 = vector.extract_strided_slice %5 {offsets = [16, 0], sizes = [8, 512], strides = [1, 1]} : vector<64x512xf32> to vector<8x512xf32>
    %cst_46 = arith.constant dense<0.000000e+00> : vector<8x512xf32>
    %149 = tpu.matmul %111, %6, %cst_46 {dimension_numbers = #tpu.dot_dimension_numbers<[1], [0], [0], [1], [0, 0, 1, 1], [], []>} : vector<8x128xf32>, vector<128x512xf32>, vector<8x512xf32> -> vector<8x512xf32>
    %150 = arith.addf %148, %149 : vector<8x512xf32>
    %151 = vector.extract_strided_slice %150 {offsets = [0, 0], sizes = [8, 128], strides = [1, 1]} : vector<8x512xf32> to vector<8x128xf32>
    %152 = arith.negf %151 : vector<8x128xf32>
    %153 = math.exp %152 : vector<8x128xf32>
    %cst_47 = arith.constant 1.000000e+00 : f32
    %154 = vector.broadcast %cst_47 : f32 to vector<8x128xf32>
    %155 = arith.addf %154, %153 : vector<8x128xf32>
    %156 = arith.divf %154, %155 : vector<8x128xf32>
    %157 = vector.extract_strided_slice %150 {offsets = [0, 128], sizes = [8, 128], strides = [1, 1]} : vector<8x512xf32> to vector<8x128xf32>
    %158 = arith.negf %157 : vector<8x128xf32>
    %159 = math.exp %158 : vector<8x128xf32>
    %cst_48 = arith.constant 1.000000e+00 : f32
    %160 = vector.broadcast %cst_48 : f32 to vector<8x128xf32>
    %161 = arith.addf %160, %159 : vector<8x128xf32>
    %162 = arith.divf %160, %161 : vector<8x128xf32>
    %163 = vector.extract_strided_slice %150 {offsets = [0, 256], sizes = [8, 128], strides = [1, 1]} : vector<8x512xf32> to vector<8x128xf32>
    %164 = math.tanh %163 : vector<8x128xf32>
    %165 = vector.extract_strided_slice %150 {offsets = [0, 384], sizes = [8, 128], strides = [1, 1]} : vector<8x512xf32> to vector<8x128xf32>
    %166 = arith.negf %165 : vector<8x128xf32>
    %167 = math.exp %166 : vector<8x128xf32>
    %cst_49 = arith.constant 1.000000e+00 : f32
    %168 = vector.broadcast %cst_49 : f32 to vector<8x128xf32>
    %169 = arith.addf %168, %167 : vector<8x128xf32>
    %170 = arith.divf %168, %169 : vector<8x128xf32>
    %171 = arith.mulf %162, %109 : vector<8x128xf32>
    %172 = arith.mulf %156, %164 : vector<8x128xf32>
    %173 = arith.addf %171, %172 : vector<8x128xf32>
    %174 = math.tanh %173 : vector<8x128xf32>
    %175 = arith.mulf %170, %174 : vector<8x128xf32>
    %176 = math.tanh %175 : vector<8x128xf32>
    %cst_50 = arith.constant dense<0.000000e+00> : vector<8x512xf32>
    %177 = tpu.matmul %176, %7, %cst_50 {dimension_numbers = #tpu.dot_dimension_numbers<[1], [0], [0], [1], [0, 0, 1, 1], [], []>} : vector<8x128xf32>, vector<128x512xf32>, vector<8x512xf32> -> vector<8x512xf32>
    %cst_51 = arith.constant dense<0.000000e+00> : vector<8x512xf32>
    %178 = tpu.matmul %141, %8, %cst_51 {dimension_numbers = #tpu.dot_dimension_numbers<[1], [0], [0], [1], [0, 0, 1, 1], [], []>} : vector<8x128xf32>, vector<128x512xf32>, vector<8x512xf32> -> vector<8x512xf32>
    %179 = arith.addf %177, %178 : vector<8x512xf32>
    %180 = arith.addf %179, %12 : vector<8x512xf32>
    %181 = vector.extract_strided_slice %180 {offsets = [0, 0], sizes = [8, 128], strides = [1, 1]} : vector<8x512xf32> to vector<8x128xf32>
    %182 = arith.negf %181 : vector<8x128xf32>
    %183 = math.exp %182 : vector<8x128xf32>
    %cst_52 = arith.constant 1.000000e+00 : f32
    %184 = vector.broadcast %cst_52 : f32 to vector<8x128xf32>
    %185 = arith.addf %184, %183 : vector<8x128xf32>
    %186 = arith.divf %184, %185 : vector<8x128xf32>
    %187 = vector.extract_strided_slice %180 {offsets = [0, 128], sizes = [8, 128], strides = [1, 1]} : vector<8x512xf32> to vector<8x128xf32>
    %188 = arith.negf %187 : vector<8x128xf32>
    %189 = math.exp %188 : vector<8x128xf32>
    %cst_53 = arith.constant 1.000000e+00 : f32
    %190 = vector.broadcast %cst_53 : f32 to vector<8x128xf32>
    %191 = arith.addf %190, %189 : vector<8x128xf32>
    %192 = arith.divf %190, %191 : vector<8x128xf32>
    %193 = vector.extract_strided_slice %180 {offsets = [0, 256], sizes = [8, 128], strides = [1, 1]} : vector<8x512xf32> to vector<8x128xf32>
    %194 = math.tanh %193 : vector<8x128xf32>
    %195 = vector.extract_strided_slice %180 {offsets = [0, 384], sizes = [8, 128], strides = [1, 1]} : vector<8x512xf32> to vector<8x128xf32>
    %196 = arith.negf %195 : vector<8x128xf32>
    %197 = math.exp %196 : vector<8x128xf32>
    %cst_54 = arith.constant 1.000000e+00 : f32
    %198 = vector.broadcast %cst_54 : f32 to vector<8x128xf32>
    %199 = arith.addf %198, %197 : vector<8x128xf32>
    %200 = arith.divf %198, %199 : vector<8x128xf32>
    %201 = arith.mulf %192, %139 : vector<8x128xf32>
    %202 = arith.mulf %186, %194 : vector<8x128xf32>
    %203 = arith.addf %201, %202 : vector<8x128xf32>
    %204 = math.tanh %203 : vector<8x128xf32>
    %205 = arith.mulf %200, %204 : vector<8x128xf32>
    %206 = math.tanh %205 : vector<8x128xf32>
    %cst_55 = arith.constant dense<0.000000e+00> : vector<8x4xf32>
    %207 = tpu.matmul %206, %9, %cst_55 {dimension_numbers = #tpu.dot_dimension_numbers<[1], [0], [0], [1], [0, 0, 1, 1], [], []>} : vector<8x128xf32>, vector<128x4xf32>, vector<8x4xf32> -> vector<8x4xf32>
    %208 = arith.addf %207, %15 : vector<8x4xf32>
    %c2 = arith.constant 2 : index
    %c0_56 = arith.constant 0 : index
    %c0_57 = arith.constant 0 : index
    %209 = vector.load %arg10[%c2, %c0_56, %c0_57] : memref<8x8x4xf32, #tpu.memory_space<vmem>>, vector<1x8x4xf32>
    %210 = vector.shape_cast %209 : vector<1x8x4xf32> to vector<8x4xf32>
    %211 = vector.shape_cast %208 : vector<8x4xf32> to vector<1x8x4xf32>
    tpu.vector_store %arg10[%c2, %c0_56, %c0_57], %211 {strides = array<i32>} : memref<8x8x4xf32, #tpu.memory_space<vmem>>, vector<1x8x4xf32>,
    %212 = vector.extract_strided_slice %5 {offsets = [24, 0], sizes = [8, 512], strides = [1, 1]} : vector<64x512xf32> to vector<8x512xf32>
    %cst_58 = arith.constant dense<0.000000e+00> : vector<8x512xf32>
    %213 = tpu.matmul %175, %6, %cst_58 {dimension_numbers = #tpu.dot_dimension_numbers<[1], [0], [0], [1], [0, 0, 1, 1], [], []>} : vector<8x128xf32>, vector<128x512xf32>, vector<8x512xf32> -> vector<8x512xf32>
    %214 = arith.addf %212, %213 : vector<8x512xf32>
    %215 = vector.extract_strided_slice %214 {offsets = [0, 0], sizes = [8, 128], strides = [1, 1]} : vector<8x512xf32> to vector<8x128xf32>
    %216 = arith.negf %215 : vector<8x128xf32>
    %217 = math.exp %216 : vector<8x128xf32>
    %cst_59 = arith.constant 1.000000e+00 : f32
    %218 = vector.broadcast %cst_59 : f32 to vector<8x128xf32>
    %219 = arith.addf %218, %217 : vector<8x128xf32>
    %220 = arith.divf %218, %219 : vector<8x128xf32>
    %221 = vector.extract_strided_slice %214 {offsets = [0, 128], sizes = [8, 128], strides = [1, 1]} : vector<8x512xf32> to vector<8x128xf32>
    %222 = arith.negf %221 : vector<8x128xf32>
    %223 = math.exp %222 : vector<8x128xf32>
    %cst_60 = arith.constant 1.000000e+00 : f32
    %224 = vector.broadcast %cst_60 : f32 to vector<8x128xf32>
    %225 = arith.addf %224, %223 : vector<8x128xf32>
    %226 = arith.divf %224, %225 : vector<8x128xf32>
    %227 = vector.extract_strided_slice %214 {offsets = [0, 256], sizes = [8, 128], strides = [1, 1]} : vector<8x512xf32> to vector<8x128xf32>
    %228 = math.tanh %227 : vector<8x128xf32>
    %229 = vector.extract_strided_slice %214 {offsets = [0, 384], sizes = [8, 128], strides = [1, 1]} : vector<8x512xf32> to vector<8x128xf32>
    %230 = arith.negf %229 : vector<8x128xf32>
    %231 = math.exp %230 : vector<8x128xf32>
    %cst_61 = arith.constant 1.000000e+00 : f32
    %232 = vector.broadcast %cst_61 : f32 to vector<8x128xf32>
    %233 = arith.addf %232, %231 : vector<8x128xf32>
    %234 = arith.divf %232, %233 : vector<8x128xf32>
    %235 = arith.mulf %226, %173 : vector<8x128xf32>
    %236 = arith.mulf %220, %228 : vector<8x128xf32>
    %237 = arith.addf %235, %236 : vector<8x128xf32>
    %238 = math.tanh %237 : vector<8x128xf32>
    %239 = arith.mulf %234, %238 : vector<8x128xf32>
    %240 = math.tanh %239 : vector<8x128xf32>
    %cst_62 = arith.constant dense<0.000000e+00> : vector<8x512xf32>
    %241 = tpu.matmul %240, %7, %cst_62 {dimension_numbers = #tpu.dot_dimension_numbers<[1], [0], [0], [1], [0, 0, 1, 1], [], []>} : vector<8x128xf32>, vector<128x512xf32>, vector<8x512xf32> -> vector<8x512xf32>
    %cst_63 = arith.constant dense<0.000000e+00> : vector<8x512xf32>
    %242 = tpu.matmul %205, %8, %cst_63 {dimension_numbers = #tpu.dot_dimension_numbers<[1], [0], [0], [1], [0, 0, 1, 1], [], []>} : vector<8x128xf32>, vector<128x512xf32>, vector<8x512xf32> -> vector<8x512xf32>
    %243 = arith.addf %241, %242 : vector<8x512xf32>
    %244 = arith.addf %243, %12 : vector<8x512xf32>
    %245 = vector.extract_strided_slice %244 {offsets = [0, 0], sizes = [8, 128], strides = [1, 1]} : vector<8x512xf32> to vector<8x128xf32>
    %246 = arith.negf %245 : vector<8x128xf32>
    %247 = math.exp %246 : vector<8x128xf32>
    %cst_64 = arith.constant 1.000000e+00 : f32
    %248 = vector.broadcast %cst_64 : f32 to vector<8x128xf32>
    %249 = arith.addf %248, %247 : vector<8x128xf32>
    %250 = arith.divf %248, %249 : vector<8x128xf32>
    %251 = vector.extract_strided_slice %244 {offsets = [0, 128], sizes = [8, 128], strides = [1, 1]} : vector<8x512xf32> to vector<8x128xf32>
    %252 = arith.negf %251 : vector<8x128xf32>
    %253 = math.exp %252 : vector<8x128xf32>
    %cst_65 = arith.constant 1.000000e+00 : f32
    %254 = vector.broadcast %cst_65 : f32 to vector<8x128xf32>
    %255 = arith.addf %254, %253 : vector<8x128xf32>
    %256 = arith.divf %254, %255 : vector<8x128xf32>
    %257 = vector.extract_strided_slice %244 {offsets = [0, 256], sizes = [8, 128], strides = [1, 1]} : vector<8x512xf32> to vector<8x128xf32>
    %258 = math.tanh %257 : vector<8x128xf32>
    %259 = vector.extract_strided_slice %244 {offsets = [0, 384], sizes = [8, 128], strides = [1, 1]} : vector<8x512xf32> to vector<8x128xf32>
    %260 = arith.negf %259 : vector<8x128xf32>
    %261 = math.exp %260 : vector<8x128xf32>
    %cst_66 = arith.constant 1.000000e+00 : f32
    %262 = vector.broadcast %cst_66 : f32 to vector<8x128xf32>
    %263 = arith.addf %262, %261 : vector<8x128xf32>
    %264 = arith.divf %262, %263 : vector<8x128xf32>
    %265 = arith.mulf %256, %203 : vector<8x128xf32>
    %266 = arith.mulf %250, %258 : vector<8x128xf32>
    %267 = arith.addf %265, %266 : vector<8x128xf32>
    %268 = math.tanh %267 : vector<8x128xf32>
    %269 = arith.mulf %264, %268 : vector<8x128xf32>
    %270 = math.tanh %269 : vector<8x128xf32>
    %cst_67 = arith.constant dense<0.000000e+00> : vector<8x4xf32>
    %271 = tpu.matmul %270, %9, %cst_67 {dimension_numbers = #tpu.dot_dimension_numbers<[1], [0], [0], [1], [0, 0, 1, 1], [], []>} : vector<8x128xf32>, vector<128x4xf32>, vector<8x4xf32> -> vector<8x4xf32>
    %272 = arith.addf %271, %15 : vector<8x4xf32>
    %c3 = arith.constant 3 : index
    %c0_68 = arith.constant 0 : index
    %c0_69 = arith.constant 0 : index
    %273 = vector.load %arg10[%c3, %c0_68, %c0_69] : memref<8x8x4xf32, #tpu.memory_space<vmem>>, vector<1x8x4xf32>
    %274 = vector.shape_cast %273 : vector<1x8x4xf32> to vector<8x4xf32>
    %275 = vector.shape_cast %272 : vector<8x4xf32> to vector<1x8x4xf32>
    tpu.vector_store %arg10[%c3, %c0_68, %c0_69], %275 {strides = array<i32>} : memref<8x8x4xf32, #tpu.memory_space<vmem>>, vector<1x8x4xf32>,
    %276 = vector.extract_strided_slice %5 {offsets = [32, 0], sizes = [8, 512], strides = [1, 1]} : vector<64x512xf32> to vector<8x512xf32>
    %cst_70 = arith.constant dense<0.000000e+00> : vector<8x512xf32>
    %277 = tpu.matmul %239, %6, %cst_70 {dimension_numbers = #tpu.dot_dimension_numbers<[1], [0], [0], [1], [0, 0, 1, 1], [], []>} : vector<8x128xf32>, vector<128x512xf32>, vector<8x512xf32> -> vector<8x512xf32>
    %278 = arith.addf %276, %277 : vector<8x512xf32>
    %279 = vector.extract_strided_slice %278 {offsets = [0, 0], sizes = [8, 128], strides = [1, 1]} : vector<8x512xf32> to vector<8x128xf32>
    %280 = arith.negf %279 : vector<8x128xf32>
    %281 = math.exp %280 : vector<8x128xf32>
    %cst_71 = arith.constant 1.000000e+00 : f32
    %282 = vector.broadcast %cst_71 : f32 to vector<8x128xf32>
    %283 = arith.addf %282, %281 : vector<8x128xf32>
    %284 = arith.divf %282, %283 : vector<8x128xf32>
    %285 = vector.extract_strided_slice %278 {offsets = [0, 128], sizes = [8, 128], strides = [1, 1]} : vector<8x512xf32> to vector<8x128xf32>
    %286 = arith.negf %285 : vector<8x128xf32>
    %287 = math.exp %286 : vector<8x128xf32>
    %cst_72 = arith.constant 1.000000e+00 : f32
    %288 = vector.broadcast %cst_72 : f32 to vector<8x128xf32>
    %289 = arith.addf %288, %287 : vector<8x128xf32>
    %290 = arith.divf %288, %289 : vector<8x128xf32>
    %291 = vector.extract_strided_slice %278 {offsets = [0, 256], sizes = [8, 128], strides = [1, 1]} : vector<8x512xf32> to vector<8x128xf32>
    %292 = math.tanh %291 : vector<8x128xf32>
    %293 = vector.extract_strided_slice %278 {offsets = [0, 384], sizes = [8, 128], strides = [1, 1]} : vector<8x512xf32> to vector<8x128xf32>
    %294 = arith.negf %293 : vector<8x128xf32>
    %295 = math.exp %294 : vector<8x128xf32>
    %cst_73 = arith.constant 1.000000e+00 : f32
    %296 = vector.broadcast %cst_73 : f32 to vector<8x128xf32>
    %297 = arith.addf %296, %295 : vector<8x128xf32>
    %298 = arith.divf %296, %297 : vector<8x128xf32>
    %299 = arith.mulf %290, %237 : vector<8x128xf32>
    %300 = arith.mulf %284, %292 : vector<8x128xf32>
    %301 = arith.addf %299, %300 : vector<8x128xf32>
    %302 = math.tanh %301 : vector<8x128xf32>
    %303 = arith.mulf %298, %302 : vector<8x128xf32>
    %304 = math.tanh %303 : vector<8x128xf32>
    %cst_74 = arith.constant dense<0.000000e+00> : vector<8x512xf32>
    %305 = tpu.matmul %304, %7, %cst_74 {dimension_numbers = #tpu.dot_dimension_numbers<[1], [0], [0], [1], [0, 0, 1, 1], [], []>} : vector<8x128xf32>, vector<128x512xf32>, vector<8x512xf32> -> vector<8x512xf32>
    %cst_75 = arith.constant dense<0.000000e+00> : vector<8x512xf32>
    %306 = tpu.matmul %269, %8, %cst_75 {dimension_numbers = #tpu.dot_dimension_numbers<[1], [0], [0], [1], [0, 0, 1, 1], [], []>} : vector<8x128xf32>, vector<128x512xf32>, vector<8x512xf32> -> vector<8x512xf32>
    %307 = arith.addf %305, %306 : vector<8x512xf32>
    %308 = arith.addf %307, %12 : vector<8x512xf32>
    %309 = vector.extract_strided_slice %308 {offsets = [0, 0], sizes = [8, 128], strides = [1, 1]} : vector<8x512xf32> to vector<8x128xf32>
    %310 = arith.negf %309 : vector<8x128xf32>
    %311 = math.exp %310 : vector<8x128xf32>
    %cst_76 = arith.constant 1.000000e+00 : f32
    %312 = vector.broadcast %cst_76 : f32 to vector<8x128xf32>
    %313 = arith.addf %312, %311 : vector<8x128xf32>
    %314 = arith.divf %312, %313 : vector<8x128xf32>
    %315 = vector.extract_strided_slice %308 {offsets = [0, 128], sizes = [8, 128], strides = [1, 1]} : vector<8x512xf32> to vector<8x128xf32>
    %316 = arith.negf %315 : vector<8x128xf32>
    %317 = math.exp %316 : vector<8x128xf32>
    %cst_77 = arith.constant 1.000000e+00 : f32
    %318 = vector.broadcast %cst_77 : f32 to vector<8x128xf32>
    %319 = arith.addf %318, %317 : vector<8x128xf32>
    %320 = arith.divf %318, %319 : vector<8x128xf32>
    %321 = vector.extract_strided_slice %308 {offsets = [0, 256], sizes = [8, 128], strides = [1, 1]} : vector<8x512xf32> to vector<8x128xf32>
    %322 = math.tanh %321 : vector<8x128xf32>
    %323 = vector.extract_strided_slice %308 {offsets = [0, 384], sizes = [8, 128], strides = [1, 1]} : vector<8x512xf32> to vector<8x128xf32>
    %324 = arith.negf %323 : vector<8x128xf32>
    %325 = math.exp %324 : vector<8x128xf32>
    %cst_78 = arith.constant 1.000000e+00 : f32
    %326 = vector.broadcast %cst_78 : f32 to vector<8x128xf32>
    %327 = arith.addf %326, %325 : vector<8x128xf32>
    %328 = arith.divf %326, %327 : vector<8x128xf32>
    %329 = arith.mulf %320, %267 : vector<8x128xf32>
    %330 = arith.mulf %314, %322 : vector<8x128xf32>
    %331 = arith.addf %329, %330 : vector<8x128xf32>
    %332 = math.tanh %331 : vector<8x128xf32>
    %333 = arith.mulf %328, %332 : vector<8x128xf32>
    %334 = math.tanh %333 : vector<8x128xf32>
    %cst_79 = arith.constant dense<0.000000e+00> : vector<8x4xf32>
    %335 = tpu.matmul %334, %9, %cst_79 {dimension_numbers = #tpu.dot_dimension_numbers<[1], [0], [0], [1], [0, 0, 1, 1], [], []>} : vector<8x128xf32>, vector<128x4xf32>, vector<8x4xf32> -> vector<8x4xf32>
    %336 = arith.addf %335, %15 : vector<8x4xf32>
    %c4 = arith.constant 4 : index
    %c0_80 = arith.constant 0 : index
    %c0_81 = arith.constant 0 : index
    %337 = vector.load %arg10[%c4, %c0_80, %c0_81] : memref<8x8x4xf32, #tpu.memory_space<vmem>>, vector<1x8x4xf32>
    %338 = vector.shape_cast %337 : vector<1x8x4xf32> to vector<8x4xf32>
    %339 = vector.shape_cast %336 : vector<8x4xf32> to vector<1x8x4xf32>
    tpu.vector_store %arg10[%c4, %c0_80, %c0_81], %339 {strides = array<i32>} : memref<8x8x4xf32, #tpu.memory_space<vmem>>, vector<1x8x4xf32>,
    %340 = vector.extract_strided_slice %5 {offsets = [40, 0], sizes = [8, 512], strides = [1, 1]} : vector<64x512xf32> to vector<8x512xf32>
    %cst_82 = arith.constant dense<0.000000e+00> : vector<8x512xf32>
    %341 = tpu.matmul %303, %6, %cst_82 {dimension_numbers = #tpu.dot_dimension_numbers<[1], [0], [0], [1], [0, 0, 1, 1], [], []>} : vector<8x128xf32>, vector<128x512xf32>, vector<8x512xf32> -> vector<8x512xf32>
    %342 = arith.addf %340, %341 : vector<8x512xf32>
    %343 = vector.extract_strided_slice %342 {offsets = [0, 0], sizes = [8, 128], strides = [1, 1]} : vector<8x512xf32> to vector<8x128xf32>
    %344 = arith.negf %343 : vector<8x128xf32>
    %345 = math.exp %344 : vector<8x128xf32>
    %cst_83 = arith.constant 1.000000e+00 : f32
    %346 = vector.broadcast %cst_83 : f32 to vector<8x128xf32>
    %347 = arith.addf %346, %345 : vector<8x128xf32>
    %348 = arith.divf %346, %347 : vector<8x128xf32>
    %349 = vector.extract_strided_slice %342 {offsets = [0, 128], sizes = [8, 128], strides = [1, 1]} : vector<8x512xf32> to vector<8x128xf32>
    %350 = arith.negf %349 : vector<8x128xf32>
    %351 = math.exp %350 : vector<8x128xf32>
    %cst_84 = arith.constant 1.000000e+00 : f32
    %352 = vector.broadcast %cst_84 : f32 to vector<8x128xf32>
    %353 = arith.addf %352, %351 : vector<8x128xf32>
    %354 = arith.divf %352, %353 : vector<8x128xf32>
    %355 = vector.extract_strided_slice %342 {offsets = [0, 256], sizes = [8, 128], strides = [1, 1]} : vector<8x512xf32> to vector<8x128xf32>
    %356 = math.tanh %355 : vector<8x128xf32>
    %357 = vector.extract_strided_slice %342 {offsets = [0, 384], sizes = [8, 128], strides = [1, 1]} : vector<8x512xf32> to vector<8x128xf32>
    %358 = arith.negf %357 : vector<8x128xf32>
    %359 = math.exp %358 : vector<8x128xf32>
    %cst_85 = arith.constant 1.000000e+00 : f32
    %360 = vector.broadcast %cst_85 : f32 to vector<8x128xf32>
    %361 = arith.addf %360, %359 : vector<8x128xf32>
    %362 = arith.divf %360, %361 : vector<8x128xf32>
    %363 = arith.mulf %354, %301 : vector<8x128xf32>
    %364 = arith.mulf %348, %356 : vector<8x128xf32>
    %365 = arith.addf %363, %364 : vector<8x128xf32>
    %366 = math.tanh %365 : vector<8x128xf32>
    %367 = arith.mulf %362, %366 : vector<8x128xf32>
    %368 = math.tanh %367 : vector<8x128xf32>
    %cst_86 = arith.constant dense<0.000000e+00> : vector<8x512xf32>
    %369 = tpu.matmul %368, %7, %cst_86 {dimension_numbers = #tpu.dot_dimension_numbers<[1], [0], [0], [1], [0, 0, 1, 1], [], []>} : vector<8x128xf32>, vector<128x512xf32>, vector<8x512xf32> -> vector<8x512xf32>
    %cst_87 = arith.constant dense<0.000000e+00> : vector<8x512xf32>
    %370 = tpu.matmul %333, %8, %cst_87 {dimension_numbers = #tpu.dot_dimension_numbers<[1], [0], [0], [1], [0, 0, 1, 1], [], []>} : vector<8x128xf32>, vector<128x512xf32>, vector<8x512xf32> -> vector<8x512xf32>
    %371 = arith.addf %369, %370 : vector<8x512xf32>
    %372 = arith.addf %371, %12 : vector<8x512xf32>
    %373 = vector.extract_strided_slice %372 {offsets = [0, 0], sizes = [8, 128], strides = [1, 1]} : vector<8x512xf32> to vector<8x128xf32>
    %374 = arith.negf %373 : vector<8x128xf32>
    %375 = math.exp %374 : vector<8x128xf32>
    %cst_88 = arith.constant 1.000000e+00 : f32
    %376 = vector.broadcast %cst_88 : f32 to vector<8x128xf32>
    %377 = arith.addf %376, %375 : vector<8x128xf32>
    %378 = arith.divf %376, %377 : vector<8x128xf32>
    %379 = vector.extract_strided_slice %372 {offsets = [0, 128], sizes = [8, 128], strides = [1, 1]} : vector<8x512xf32> to vector<8x128xf32>
    %380 = arith.negf %379 : vector<8x128xf32>
    %381 = math.exp %380 : vector<8x128xf32>
    %cst_89 = arith.constant 1.000000e+00 : f32
    %382 = vector.broadcast %cst_89 : f32 to vector<8x128xf32>
    %383 = arith.addf %382, %381 : vector<8x128xf32>
    %384 = arith.divf %382, %383 : vector<8x128xf32>
    %385 = vector.extract_strided_slice %372 {offsets = [0, 256], sizes = [8, 128], strides = [1, 1]} : vector<8x512xf32> to vector<8x128xf32>
    %386 = math.tanh %385 : vector<8x128xf32>
    %387 = vector.extract_strided_slice %372 {offsets = [0, 384], sizes = [8, 128], strides = [1, 1]} : vector<8x512xf32> to vector<8x128xf32>
    %388 = arith.negf %387 : vector<8x128xf32>
    %389 = math.exp %388 : vector<8x128xf32>
    %cst_90 = arith.constant 1.000000e+00 : f32
    %390 = vector.broadcast %cst_90 : f32 to vector<8x128xf32>
    %391 = arith.addf %390, %389 : vector<8x128xf32>
    %392 = arith.divf %390, %391 : vector<8x128xf32>
    %393 = arith.mulf %384, %331 : vector<8x128xf32>
    %394 = arith.mulf %378, %386 : vector<8x128xf32>
    %395 = arith.addf %393, %394 : vector<8x128xf32>
    %396 = math.tanh %395 : vector<8x128xf32>
    %397 = arith.mulf %392, %396 : vector<8x128xf32>
    %398 = math.tanh %397 : vector<8x128xf32>
    %cst_91 = arith.constant dense<0.000000e+00> : vector<8x4xf32>
    %399 = tpu.matmul %398, %9, %cst_91 {dimension_numbers = #tpu.dot_dimension_numbers<[1], [0], [0], [1], [0, 0, 1, 1], [], []>} : vector<8x128xf32>, vector<128x4xf32>, vector<8x4xf32> -> vector<8x4xf32>
    %400 = arith.addf %399, %15 : vector<8x4xf32>
    %c5 = arith.constant 5 : index
    %c0_92 = arith.constant 0 : index
    %c0_93 = arith.constant 0 : index
    %401 = vector.load %arg10[%c5, %c0_92, %c0_93] : memref<8x8x4xf32, #tpu.memory_space<vmem>>, vector<1x8x4xf32>
    %402 = vector.shape_cast %401 : vector<1x8x4xf32> to vector<8x4xf32>
    %403 = vector.shape_cast %400 : vector<8x4xf32> to vector<1x8x4xf32>
    tpu.vector_store %arg10[%c5, %c0_92, %c0_93], %403 {strides = array<i32>} : memref<8x8x4xf32, #tpu.memory_space<vmem>>, vector<1x8x4xf32>,
    %404 = vector.extract_strided_slice %5 {offsets = [48, 0], sizes = [8, 512], strides = [1, 1]} : vector<64x512xf32> to vector<8x512xf32>
    %cst_94 = arith.constant dense<0.000000e+00> : vector<8x512xf32>
    %405 = tpu.matmul %367, %6, %cst_94 {dimension_numbers = #tpu.dot_dimension_numbers<[1], [0], [0], [1], [0, 0, 1, 1], [], []>} : vector<8x128xf32>, vector<128x512xf32>, vector<8x512xf32> -> vector<8x512xf32>
    %406 = arith.addf %404, %405 : vector<8x512xf32>
    %407 = vector.extract_strided_slice %406 {offsets = [0, 0], sizes = [8, 128], strides = [1, 1]} : vector<8x512xf32> to vector<8x128xf32>
    %408 = arith.negf %407 : vector<8x128xf32>
    %409 = math.exp %408 : vector<8x128xf32>
    %cst_95 = arith.constant 1.000000e+00 : f32
    %410 = vector.broadcast %cst_95 : f32 to vector<8x128xf32>
    %411 = arith.addf %410, %409 : vector<8x128xf32>
    %412 = arith.divf %410, %411 : vector<8x128xf32>
    %413 = vector.extract_strided_slice %406 {offsets = [0, 128], sizes = [8, 128], strides = [1, 1]} : vector<8x512xf32> to vector<8x128xf32>
    %414 = arith.negf %413 : vector<8x128xf32>
    %415 = math.exp %414 : vector<8x128xf32>
    %cst_96 = arith.constant 1.000000e+00 : f32
    %416 = vector.broadcast %cst_96 : f32 to vector<8x128xf32>
    %417 = arith.addf %416, %415 : vector<8x128xf32>
    %418 = arith.divf %416, %417 : vector<8x128xf32>
    %419 = vector.extract_strided_slice %406 {offsets = [0, 256], sizes = [8, 128], strides = [1, 1]} : vector<8x512xf32> to vector<8x128xf32>
    %420 = math.tanh %419 : vector<8x128xf32>
    %421 = vector.extract_strided_slice %406 {offsets = [0, 384], sizes = [8, 128], strides = [1, 1]} : vector<8x512xf32> to vector<8x128xf32>
    %422 = arith.negf %421 : vector<8x128xf32>
    %423 = math.exp %422 : vector<8x128xf32>
    %cst_97 = arith.constant 1.000000e+00 : f32
    %424 = vector.broadcast %cst_97 : f32 to vector<8x128xf32>
    %425 = arith.addf %424, %423 : vector<8x128xf32>
    %426 = arith.divf %424, %425 : vector<8x128xf32>
    %427 = arith.mulf %418, %365 : vector<8x128xf32>
    %428 = arith.mulf %412, %420 : vector<8x128xf32>
    %429 = arith.addf %427, %428 : vector<8x128xf32>
    %430 = math.tanh %429 : vector<8x128xf32>
    %431 = arith.mulf %426, %430 : vector<8x128xf32>
    %432 = math.tanh %431 : vector<8x128xf32>
    %cst_98 = arith.constant dense<0.000000e+00> : vector<8x512xf32>
    %433 = tpu.matmul %432, %7, %cst_98 {dimension_numbers = #tpu.dot_dimension_numbers<[1], [0], [0], [1], [0, 0, 1, 1], [], []>} : vector<8x128xf32>, vector<128x512xf32>, vector<8x512xf32> -> vector<8x512xf32>
    %cst_99 = arith.constant dense<0.000000e+00> : vector<8x512xf32>
    %434 = tpu.matmul %397, %8, %cst_99 {dimension_numbers = #tpu.dot_dimension_numbers<[1], [0], [0], [1], [0, 0, 1, 1], [], []>} : vector<8x128xf32>, vector<128x512xf32>, vector<8x512xf32> -> vector<8x512xf32>
    %435 = arith.addf %433, %434 : vector<8x512xf32>
    %436 = arith.addf %435, %12 : vector<8x512xf32>
    %437 = vector.extract_strided_slice %436 {offsets = [0, 0], sizes = [8, 128], strides = [1, 1]} : vector<8x512xf32> to vector<8x128xf32>
    %438 = arith.negf %437 : vector<8x128xf32>
    %439 = math.exp %438 : vector<8x128xf32>
    %cst_100 = arith.constant 1.000000e+00 : f32
    %440 = vector.broadcast %cst_100 : f32 to vector<8x128xf32>
    %441 = arith.addf %440, %439 : vector<8x128xf32>
    %442 = arith.divf %440, %441 : vector<8x128xf32>
    %443 = vector.extract_strided_slice %436 {offsets = [0, 128], sizes = [8, 128], strides = [1, 1]} : vector<8x512xf32> to vector<8x128xf32>
    %444 = arith.negf %443 : vector<8x128xf32>
    %445 = math.exp %444 : vector<8x128xf32>
    %cst_101 = arith.constant 1.000000e+00 : f32
    %446 = vector.broadcast %cst_101 : f32 to vector<8x128xf32>
    %447 = arith.addf %446, %445 : vector<8x128xf32>
    %448 = arith.divf %446, %447 : vector<8x128xf32>
    %449 = vector.extract_strided_slice %436 {offsets = [0, 256], sizes = [8, 128], strides = [1, 1]} : vector<8x512xf32> to vector<8x128xf32>
    %450 = math.tanh %449 : vector<8x128xf32>
    %451 = vector.extract_strided_slice %436 {offsets = [0, 384], sizes = [8, 128], strides = [1, 1]} : vector<8x512xf32> to vector<8x128xf32>
    %452 = arith.negf %451 : vector<8x128xf32>
    %453 = math.exp %452 : vector<8x128xf32>
    %cst_102 = arith.constant 1.000000e+00 : f32
    %454 = vector.broadcast %cst_102 : f32 to vector<8x128xf32>
    %455 = arith.addf %454, %453 : vector<8x128xf32>
    %456 = arith.divf %454, %455 : vector<8x128xf32>
    %457 = arith.mulf %448, %395 : vector<8x128xf32>
    %458 = arith.mulf %442, %450 : vector<8x128xf32>
    %459 = arith.addf %457, %458 : vector<8x128xf32>
    %460 = math.tanh %459 : vector<8x128xf32>
    %461 = arith.mulf %456, %460 : vector<8x128xf32>
    %462 = math.tanh %461 : vector<8x128xf32>
    %cst_103 = arith.constant dense<0.000000e+00> : vector<8x4xf32>
    %463 = tpu.matmul %462, %9, %cst_103 {dimension_numbers = #tpu.dot_dimension_numbers<[1], [0], [0], [1], [0, 0, 1, 1], [], []>} : vector<8x128xf32>, vector<128x4xf32>, vector<8x4xf32> -> vector<8x4xf32>
    %464 = arith.addf %463, %15 : vector<8x4xf32>
    %c6 = arith.constant 6 : index
    %c0_104 = arith.constant 0 : index
    %c0_105 = arith.constant 0 : index
    %465 = vector.load %arg10[%c6, %c0_104, %c0_105] : memref<8x8x4xf32, #tpu.memory_space<vmem>>, vector<1x8x4xf32>
    %466 = vector.shape_cast %465 : vector<1x8x4xf32> to vector<8x4xf32>
    %467 = vector.shape_cast %464 : vector<8x4xf32> to vector<1x8x4xf32>
    tpu.vector_store %arg10[%c6, %c0_104, %c0_105], %467 {strides = array<i32>} : memref<8x8x4xf32, #tpu.memory_space<vmem>>, vector<1x8x4xf32>,
    %468 = vector.extract_strided_slice %5 {offsets = [56, 0], sizes = [8, 512], strides = [1, 1]} : vector<64x512xf32> to vector<8x512xf32>
    %cst_106 = arith.constant dense<0.000000e+00> : vector<8x512xf32>
    %469 = tpu.matmul %431, %6, %cst_106 {dimension_numbers = #tpu.dot_dimension_numbers<[1], [0], [0], [1], [0, 0, 1, 1], [], []>} : vector<8x128xf32>, vector<128x512xf32>, vector<8x512xf32> -> vector<8x512xf32>
    %470 = arith.addf %468, %469 : vector<8x512xf32>
    %471 = vector.extract_strided_slice %470 {offsets = [0, 0], sizes = [8, 128], strides = [1, 1]} : vector<8x512xf32> to vector<8x128xf32>
    %472 = arith.negf %471 : vector<8x128xf32>
    %473 = math.exp %472 : vector<8x128xf32>
    %cst_107 = arith.constant 1.000000e+00 : f32
    %474 = vector.broadcast %cst_107 : f32 to vector<8x128xf32>
    %475 = arith.addf %474, %473 : vector<8x128xf32>
    %476 = arith.divf %474, %475 : vector<8x128xf32>
    %477 = vector.extract_strided_slice %470 {offsets = [0, 128], sizes = [8, 128], strides = [1, 1]} : vector<8x512xf32> to vector<8x128xf32>
    %478 = arith.negf %477 : vector<8x128xf32>
    %479 = math.exp %478 : vector<8x128xf32>
    %cst_108 = arith.constant 1.000000e+00 : f32
    %480 = vector.broadcast %cst_108 : f32 to vector<8x128xf32>
    %481 = arith.addf %480, %479 : vector<8x128xf32>
    %482 = arith.divf %480, %481 : vector<8x128xf32>
    %483 = vector.extract_strided_slice %470 {offsets = [0, 256], sizes = [8, 128], strides = [1, 1]} : vector<8x512xf32> to vector<8x128xf32>
    %484 = math.tanh %483 : vector<8x128xf32>
    %485 = vector.extract_strided_slice %470 {offsets = [0, 384], sizes = [8, 128], strides = [1, 1]} : vector<8x512xf32> to vector<8x128xf32>
    %486 = arith.negf %485 : vector<8x128xf32>
    %487 = math.exp %486 : vector<8x128xf32>
    %cst_109 = arith.constant 1.000000e+00 : f32
    %488 = vector.broadcast %cst_109 : f32 to vector<8x128xf32>
    %489 = arith.addf %488, %487 : vector<8x128xf32>
    %490 = arith.divf %488, %489 : vector<8x128xf32>
    %491 = arith.mulf %482, %429 : vector<8x128xf32>
    %492 = arith.mulf %476, %484 : vector<8x128xf32>
    %493 = arith.addf %491, %492 : vector<8x128xf32>
    %494 = math.tanh %493 : vector<8x128xf32>
    %495 = arith.mulf %490, %494 : vector<8x128xf32>
    %496 = math.tanh %495 : vector<8x128xf32>
    %cst_110 = arith.constant dense<0.000000e+00> : vector<8x512xf32>
    %497 = tpu.matmul %496, %7, %cst_110 {dimension_numbers = #tpu.dot_dimension_numbers<[1], [0], [0], [1], [0, 0, 1, 1], [], []>} : vector<8x128xf32>, vector<128x512xf32>, vector<8x512xf32> -> vector<8x512xf32>
    %cst_111 = arith.constant dense<0.000000e+00> : vector<8x512xf32>
    %498 = tpu.matmul %461, %8, %cst_111 {dimension_numbers = #tpu.dot_dimension_numbers<[1], [0], [0], [1], [0, 0, 1, 1], [], []>} : vector<8x128xf32>, vector<128x512xf32>, vector<8x512xf32> -> vector<8x512xf32>
    %499 = arith.addf %497, %498 : vector<8x512xf32>
    %500 = arith.addf %499, %12 : vector<8x512xf32>
    %501 = vector.extract_strided_slice %500 {offsets = [0, 0], sizes = [8, 128], strides = [1, 1]} : vector<8x512xf32> to vector<8x128xf32>
    %502 = arith.negf %501 : vector<8x128xf32>
    %503 = math.exp %502 : vector<8x128xf32>
    %cst_112 = arith.constant 1.000000e+00 : f32
    %504 = vector.broadcast %cst_112 : f32 to vector<8x128xf32>
    %505 = arith.addf %504, %503 : vector<8x128xf32>
    %506 = arith.divf %504, %505 : vector<8x128xf32>
    %507 = vector.extract_strided_slice %500 {offsets = [0, 128], sizes = [8, 128], strides = [1, 1]} : vector<8x512xf32> to vector<8x128xf32>
    %508 = arith.negf %507 : vector<8x128xf32>
    %509 = math.exp %508 : vector<8x128xf32>
    %cst_113 = arith.constant 1.000000e+00 : f32
    %510 = vector.broadcast %cst_113 : f32 to vector<8x128xf32>
    %511 = arith.addf %510, %509 : vector<8x128xf32>
    %512 = arith.divf %510, %511 : vector<8x128xf32>
    %513 = vector.extract_strided_slice %500 {offsets = [0, 256], sizes = [8, 128], strides = [1, 1]} : vector<8x512xf32> to vector<8x128xf32>
    %514 = math.tanh %513 : vector<8x128xf32>
    %515 = vector.extract_strided_slice %500 {offsets = [0, 384], sizes = [8, 128], strides = [1, 1]} : vector<8x512xf32> to vector<8x128xf32>
    %516 = arith.negf %515 : vector<8x128xf32>
    %517 = math.exp %516 : vector<8x128xf32>
    %cst_114 = arith.constant 1.000000e+00 : f32
    %518 = vector.broadcast %cst_114 : f32 to vector<8x128xf32>
    %519 = arith.addf %518, %517 : vector<8x128xf32>
    %520 = arith.divf %518, %519 : vector<8x128xf32>
    %521 = arith.mulf %512, %459 : vector<8x128xf32>
    %522 = arith.mulf %506, %514 : vector<8x128xf32>
    %523 = arith.addf %521, %522 : vector<8x128xf32>
    %524 = math.tanh %523 : vector<8x128xf32>
    %525 = arith.mulf %520, %524 : vector<8x128xf32>
    %526 = math.tanh %525 : vector<8x128xf32>
    %cst_115 = arith.constant dense<0.000000e+00> : vector<8x4xf32>
    %527 = tpu.matmul %526, %9, %cst_115 {dimension_numbers = #tpu.dot_dimension_numbers<[1], [0], [0], [1], [0, 0, 1, 1], [], []>} : vector<8x128xf32>, vector<128x4xf32>, vector<8x4xf32> -> vector<8x4xf32>
    %528 = arith.addf %527, %15 : vector<8x4xf32>
    %c7 = arith.constant 7 : index
    %c0_116 = arith.constant 0 : index
    %c0_117 = arith.constant 0 : index
    %529 = vector.load %arg10[%c7, %c0_116, %c0_117] : memref<8x8x4xf32, #tpu.memory_space<vmem>>, vector<1x8x4xf32>
    %530 = vector.shape_cast %529 : vector<1x8x4xf32> to vector<8x4xf32>
    %531 = vector.shape_cast %528 : vector<8x4xf32> to vector<1x8x4xf32>
    tpu.vector_store %arg10[%c7, %c0_116, %c0_117], %531 {strides = array<i32>} : memref<8x8x4xf32, #tpu.memory_space<vmem>>, vector<1x8x4xf32>,
    return
  }
  func.func @transform_0(%arg0: i32) -> (i32, i32) {
    %c0_i32 = arith.constant 0 : i32
    %c0_i32_0 = arith.constant 0 : i32
    %c0_i32_1 = arith.constant 0 : i32
    return %c0_i32, %c0_i32_0 : i32, i32
  }
  func.func @transform_1(%arg0: i32) -> (i32, i32) {
    %c0_i32 = arith.constant 0 : i32
    %c0_i32_0 = arith.constant 0 : i32
    %c0_i32_1 = arith.constant 0 : i32
    return %c0_i32, %c0_i32_0 : i32, i32
  }
  func.func @transform_2(%arg0: i32) -> (i32, i32) {
    %c0_i32 = arith.constant 0 : i32
    %c0_i32_0 = arith.constant 0 : i32
    %c0_i32_1 = arith.constant 0 : i32
    return %c0_i32, %c0_i32_0 : i32, i32
  }
  func.func @transform_3(%arg0: i32) -> (i32, i32) {
    %c0_i32 = arith.constant 0 : i32
    %c0_i32_0 = arith.constant 0 : i32
    %c0_i32_1 = arith.constant 0 : i32
    return %c0_i32, %c0_i32_0 : i32, i32
  }
  func.func @transform_4(%arg0: i32) -> (i32, i32) {
    %c0_i32 = arith.constant 0 : i32
    %c0_i32_0 = arith.constant 0 : i32
    %c0_i32_1 = arith.constant 0 : i32
    return %c0_i32, %c0_i32_0 : i32, i32
  }
  func.func @transform_5(%arg0: i32) -> (i32, i32) {
    %c0_i32 = arith.constant 0 : i32
    %c0_i32_0 = arith.constant 0 : i32
    %c0_i32_1 = arith.constant 0 : i32
    return %c0_i32, %c0_i32_0 : i32, i32
  }
  func.func @transform_6(%arg0: i32) -> (i32, i32) {
    %c0_i32 = arith.constant 0 : i32
    %c0_i32_0 = arith.constant 0 : i32
    %c0_i32_1 = arith.constant 0 : i32
    return %c0_i32, %c0_i32_0 : i32, i32
  }
  func.func @transform_7(%arg0: i32) -> (i32, i32) {
    %c0_i32 = arith.constant 0 : i32
    %c0_i32_0 = arith.constant 0 : i32
    %c0_i32_1 = arith.constant 0 : i32
    return %c0_i32, %c0_i32_0 : i32, i32
  }
  func.func @transform_8(%arg0: i32) -> (i32, i32) {
    %c0_i32 = arith.constant 0 : i32
    %c0_i32_0 = arith.constant 0 : i32
    %c0_i32_1 = arith.constant 0 : i32
    return %c0_i32, %c0_i32_0 : i32, i32
  }
  func.func @transform_9(%arg0: i32) -> (i32, i32, i32) {
    %c0_i32 = arith.constant 0 : i32
    %c0_i32_0 = arith.constant 0 : i32
    %c0_i32_1 = arith.constant 0 : i32
    %c0_i32_2 = arith.constant 0 : i32
    return %c0_i32, %c0_i32_0, %c0_i32_1 : i32, i32, i32
  }
}

</mosaic_0001>

<bundles_post_ra>
// kernel: tpu_custom_call.1
= control target key start
LH: loop header
LB: loop body
LE: loop exit
PB: predicated region body
PF: predicated region fallthrough
CT: control target
= control target key end

     0   :  { %14 = vsyncpa [#allocation3], 0  ;;  %s10537_s0 = inlined_call_operand.vmem [shape: f32[64,16], index: 0, kind: input, shape index: {}]   ;;  %s10538_s1 = inlined_call_operand.vmem [shape: f32[16,512], index: 1, kind: input, shape index: {}]   ;;  %s10539_s2 = inlined_call_operand.hbm [shape: f32[128,512], index: 2, kind: input, shape index: {}]   ;;  %s10540_s3 = inlined_call_operand.vmem [shape: f32[1,512], index: 3, kind: input, shape index: {}]   ;;  %s10541_s4 = inlined_call_operand.hbm [shape: f32[128,512], index: 4, kind: input, shape index: {}]   ;;  %s10542_s5 = inlined_call_operand.hbm [shape: f32[128,512], index: 5, kind: input, shape index: {}]   ;;  %s10543_s6 = inlined_call_operand.vmem [shape: f32[1,512], index: 6, kind: input, shape index: {}]   ;;  %s10544_s7 = inlined_call_operand.vmem [shape: f32[128,4], index: 7, kind: input, shape index: {}]   ;;  %s10545_s8 = inlined_call_operand.vmem [shape: f32[1,4], index: 8, kind: input, shape index: {}]   ;;  %s10546_s9 = inlined_call_operand.vmem [shape: f32[8,8,4], index: 9, kind: output, shape index: {}]  }
   0x1   :  { %15 = vsyncpa [#allocation5], 0  ;;  %s6601_s30 = smov [#allocation4]   ;;  %s6602_s11 = smov [#allocation2]  }
   0x2   :  { %s39_s10 = sshll.u32 %s6601_s30, 4  ;;  %s25_s12 = sshll.u32 %s6602_s11, 4  ;;  %s40_s10 = int_to_ptr.vmem [resolvable:$true] %s39_s10  ;;  %s26_s12 = int_to_ptr.vmem [resolvable:$true] %s25_s12 }
   0x3   :  { %s6545_s13 = scalar_lea.vmem %s40_s10, 8192  ;;  %p6550_p1 = scmp.lt.s32.totalorder %s40_s10, %s40_s10 }
   0x4   :  { %p6546_p0 = scmp.ne.s32.totalorder %s40_s10, %s6545_s13  ;;  %p6551_p2 = scmp.lt.s32.totalorder %s6545_s13, %s6545_s13 }
   0x6   :  { %p6552_p3 = por %p6551_p2, %p6550_p1 }
   0x8   :  { %p6553_p4 = pnand %p6552_p3, %p6546_p0 }
   0xa   :  { %6556 = shalt.err (!%p6553_p4)
}
   0xb   :  { %s6603_s14 = smov 512   ;;  %s6604_s15 = smov 32  }
   0xc   :  { %45 = dma.hbm_to_vmem [thread:$0]  %s10541_s4, 8192, %s40_s10, [#allocation5], %s6603_s14, %s6603_s14, %s6604_s15  }
   0xd   :  { %s6565_s18 = scalar_lea.vmem %s26_s12, 8192  ;;  %p6570_p6 = scmp.lt.s32.totalorder %s26_s12, %s26_s12 }
   0xe   :  { %p6566_p5 = scmp.ne.s32.totalorder %s26_s12, %s6565_s18  ;;  %p6571_p7 = scmp.lt.s32.totalorder %s6565_s18, %s6565_s18 }
  0x10   :  { %p6572_p8 = por %p6571_p7, %p6570_p6 }
  0x12   :  { %p6573_p9 = pnand %p6572_p8, %p6566_p5 }
  0x14   :  { %6576 = shalt.err (!%p6573_p9)
}
  0x15   :  { %31 = dma.hbm_to_vmem [thread:$0]  %s10539_s2, 8192, %s26_s12, [#allocation3], %s6603_s14, %s6603_s14, %s6604_s15  }
  0x16   :  { %s6605_s21 = smov [#allocation6]  }
  0x17   :  { %s51_s22 = sshll.u32 %s6605_s21, 4  ;;  %s52_s22 = int_to_ptr.vmem [resolvable:$true] %s51_s22 }
  0x18   :  { %s6585_s23 = scalar_lea.vmem %s52_s22, 8192  ;;  %p6590_p11 = scmp.lt.s32.totalorder %s52_s22, %s52_s22 }
  0x19   :  { %p6586_p10 = scmp.ne.s32.totalorder %s52_s22, %s6585_s23  ;;  %p6591_p12 = scmp.lt.s32.totalorder %s6585_s23, %s6585_s23 }
  0x1b   :  { %p6592_p13 = por %p6591_p12, %p6590_p11 }
  0x1d   :  { %p6593_p0 = pnand %p6592_p13, %p6586_p10 }
  0x1f   :  { %6596 = shalt.err (!%p6593_p0)
}
  0x20   :  { %57 = dma.hbm_to_vmem [thread:$0]  %s10542_s5, 8192, %s52_s22, [#allocation5], %s6603_s14, %s6603_s14, %s6604_s15  }
  0x21   :  { %6597 = dma.done.wait [#allocation3], 8192  }
  0x22   :  { %6598 = vsyncadd [#allocation3], 4294959104 }
  0x23   :  { %6599 = dma.done.wait [#allocation5], 16384  }
  0x24   :  { %6600 = vsyncadd [#allocation5], 4294950912  ;;  %v10547_v0 = vmov 0.0   ;;  %v86_v1 = vld [vmem:[%s10538_s1 + $0x28] sm:$0xff]  ;;  %v88_v2 = vld [vmem:[%s10538_s1 + $0x38] sm:$0xff]  ;;  %vm111_vm0 = vcmask 130048  }
  0x25   :  { %200 = vmatprep.mubr.f32.mxu0 %v10547_v0  ;;  %313 = vmatprep.mubr.f32.mxu1 %v10547_v0  ;;  %v85_v3 = vld [vmem:[%s10538_s1 + $0x20] sm:$0xff]  ;;  %v87_v4 = vld [vmem:[%s10538_s1 + $0x30] sm:$0xff]  ;;  %v82_v5 = vld [vmem:[%s10538_s1 + $0x8] sm:$0xff]  ;;  %vm6607_vm1 = vmmov 0   ;;  %vm1153_vm2 = vcmask 31744  }
  0x26   :  { %164 = vmatprep.subr.mxu0 %v86_v1  ;;  %277 = vmatprep.subr.mxu1 %v88_v2  ;;  %v84_v6 = vld [vmem:[%s10538_s1 + $0x18] sm:$0xff]  ;;  %v81_v7 = vld [vmem:[%s10538_s1] sm:$0xff]  ;;  %v83_v8 = vld [vmem:[%s10538_s1 + $0x10] sm:$0xff] }
  0x27   :  { %165 = vmatpush1.msra.mxu0 %v85_v3  ;;  %278 = vmatpush1.msra.mxu1 %v87_v4  ;;  %v73_v9 = vld [vmem:[%s10537_s0] sm:$0xff]  ;;  %v6696_v10 = vld [vmem:[#allocation2 + $0x1e8] sm:$0xff]  ;;  %v425_v11 = vld [vmem:[#allocation2 + $0x1f8] sm:$0xff] }
  0x28   :  { %166 = vmatprep.subr.mxu0 %v82_v5  ;;  %279 = vmatprep.subr.mxu1 %v84_v6  ;;  %v422_v12 = vld [vmem:[#allocation2 + $0x1e0] sm:$0xff]  ;;  %v424_v13 = vld [vmem:[#allocation2 + $0x1f0] sm:$0xff]  ;;  %v419_v14 = vld [vmem:[#allocation2 + $0x1c8] sm:$0xff] }
  0x29   :  { %167 = vmatpush1.msra.mxu0 %v81_v7  ;;  %280 = vmatpush1.msra.mxu1 %v83_v8  ;;  %v421_v15 = vld [vmem:[#allocation2 + $0x1d8] sm:$0xff]  ;;  %v418_v16 = vld [vmem:[#allocation2 + $0x1c0] sm:$0xff]  ;;  %v420_v17 = vld [vmem:[#allocation2 + $0x1d0] sm:$0xff] }
  0x2a   :  { %5053 = vmatmul.mubr.msk.f32.vlgmr.msra.gmra.mxu0 %vm111_vm0, %v73_v9  ;;  %5061 = vmatmul.mubr.msk.f32.vlgmr.msra.gmra.mxu1 %vm111_vm0, %v73_v9  ;;  %v74_v18 = vld [vmem:[%s10537_s0 + $0x8] sm:$0xff]  ;;  %v417_v20 = vld [vmem:[#allocation2 + $0x1b8] sm:$0xff]  ;;  %v414_v21 = vld [vmem:[#allocation2 + $0x1a0] sm:$0xff] }
  0x2b   :  { %599 = vmatprep.subr.mxu0 %v6696_v10  ;;  %670 = vmatprep.subr.mxu1 %v425_v11  ;;  %v415_v19 = vld [vmem:[#allocation2 + $0x1a8] sm:$0xff]  ;;  %v416_v22 = vld [vmem:[#allocation2 + $0x1b0] sm:$0xff]  ;;  %v413_v24 = vld [vmem:[#allocation2 + $0x198] sm:$0xff] }
  0x2c   :  { %600 = vmatpush1.msra.mxu0 %v422_v12  ;;  %671 = vmatpush1.msra.mxu1 %v424_v13  ;;  %v411_v23 = vld [vmem:[#allocation2 + $0x188] sm:$0xff]  ;;  %v410_v25 = vld [vmem:[#allocation2 + $0x180] sm:$0xff]  ;;  %v412_v26 = vld [vmem:[#allocation2 + $0x190] sm:$0xff] }
  0x2d   :  { %601 = vmatprep.subr.mxu0 %v419_v14  ;;  %672 = vmatprep.subr.mxu1 %v421_v15  ;;  %v75_v27 = vld [vmem:[%s10537_s0 + $0x10] sm:$0xff]  ;;  %v407_v28 = vld [vmem:[#allocation2 + $0x168] sm:$0xff]  ;;  %v409_v29 = vld [vmem:[#allocation2 + $0x178] sm:$0xff] }
  0x2e   :  { %206 = vmatprep.mubr.f32.mxu0 %v10547_v0  ;;  %319 = vmatprep.mubr.f32.mxu1 %v10547_v0  ;;  %v6713_v30 = vld [vmem:[#allocation2 + $0x160] sm:$0xff]  ;;  %v408_v31 = vld [vmem:[#allocation2 + $0x170] sm:$0xff]  ;;  %v6717_v32 = vld [vmem:[#allocation2 + $0x148] sm:$0xff] }
  0x2f   :  { %602 = vmatpush1.msra.mxu0 %v418_v16  ;;  %673 = vmatpush1.msra.mxu1 %v420_v17  ;;  %v405_v33 = vld [vmem:[#allocation2 + $0x158] sm:$0xff]  ;;  %v6720_v34 = vld [vmem:[#allocation2 + $0x140] sm:$0xff]  ;;  %v404_v35 = vld [vmem:[#allocation2 + $0x150] sm:$0xff] }
  0x30   :  { %5054 = vmatmul.mubr.msk.f32.gmra.mxu0 %vm111_vm0, %v74_v18  ;;  %5062 = vmatmul.mubr.msk.f32.gmra.mxu1 %vm111_vm0, %v74_v18  ;;  %v76_v36 = vld [vmem:[%s10537_s0 + $0x18] sm:$0xff]  ;;  %v6728_v37 = vld [vmem:[#allocation2 + $0x128] sm:$0xff]  ;;  %v6731_v39 = vld [vmem:[#allocation2 + $0x120] sm:$0xff] }
  0x31   :  { %603 = vmatprep.subr.mxu0 %v415_v19  ;;  %674 = vmatprep.subr.mxu1 %v417_v20  ;;  %v401_v38 = vld [vmem:[#allocation2 + $0x138] sm:$0xff]  ;;  %v400_v40 = vld [vmem:[#allocation2 + $0x130] sm:$0xff]  ;;  %v6735_v41 = vld [vmem:[#allocation2 + $0x108] sm:$0xff] }
  0x32   :  { %604 = vmatpush1.msra.mxu0 %v414_v21  ;;  %675 = vmatpush1.msra.mxu1 %v416_v22  ;;  %v397_v42 = vld [vmem:[#allocation2 + $0x118] sm:$0xff]  ;;  %v6739_v43 = vld [vmem:[#allocation2 + $0x100] sm:$0xff]  ;;  %v396_v44 = vld [vmem:[#allocation2 + $0x110] sm:$0xff] }
  0x33   :  { %605 = vmatprep.subr.mxu0 %v411_v23  ;;  %676 = vmatprep.subr.mxu1 %v413_v24  ;;  %v77_v45 = vld [vmem:[%s10537_s0 + $0x20] sm:$0xff]  ;;  %v6747_v46 = vld [vmem:[#allocation2 + $0xe8] sm:$0xff]  ;;  %v393_v47 = vld [vmem:[#allocation2 + $0xf8] sm:$0xff] }
  0x34   :  { %212 = vmatprep.mubr.f32.mxu0 %v10547_v0  ;;  %325 = vmatprep.mubr.f32.mxu1 %v10547_v0  ;;  %v6750_v48 = vld [vmem:[#allocation2 + $0xe0] sm:$0xff]  ;;  %v392_v49 = vld [vmem:[#allocation2 + $0xf0] sm:$0xff]  ;;  %v6754_v50 = vld [vmem:[#allocation2 + $0xc8] sm:$0xff] }
  0x35   :  { %606 = vmatpush1.msra.mxu0 %v410_v25  ;;  %677 = vmatpush1.msra.mxu1 %v412_v26  ;;  %v389_v51 = vld [vmem:[#allocation2 + $0xd8] sm:$0xff]  ;;  %v6758_v52 = vld [vmem:[#allocation2 + $0xc0] sm:$0xff]  ;;  %v388_v53 = vld [vmem:[#allocation2 + $0xd0] sm:$0xff] }
  0x36   :  { %5055 = vmatmul.mubr.msk.f32.gmra.mxu0 %vm111_vm0, %v75_v27  ;;  %5063 = vmatmul.mubr.msk.f32.gmra.mxu1 %vm111_vm0, %v75_v27  ;;  %v78_v54 = vld [vmem:[%s10537_s0 + $0x28] sm:$0xff]  ;;  %v385_v56 = vld [vmem:[#allocation2 + $0xb8] sm:$0xff]  ;;  %v6769_v57 = vld [vmem:[#allocation2 + $0xa0] sm:$0xff] }
  0x37   :  { %607 = vmatprep.subr.mxu0 %v407_v28  ;;  %678 = vmatprep.subr.mxu1 %v409_v29  ;;  %v6766_v55 = vld [vmem:[#allocation2 + $0xa8] sm:$0xff]  ;;  %v384_v58 = vld [vmem:[#allocation2 + $0xb0] sm:$0xff]  ;;  %v381_v60 = vld [vmem:[#allocation2 + $0x98] sm:$0xff] }
  0x38   :  { %608 = vmatpush1.msra.mxu0 %v6713_v30  ;;  %679 = vmatpush1.msra.mxu1 %v408_v31  ;;  %v6773_v59 = vld [vmem:[#allocation2 + $0x88] sm:$0xff]  ;;  %v6777_v61 = vld [vmem:[#allocation2 + $0x80] sm:$0xff]  ;;  %v380_v62 = vld [vmem:[#allocation2 + $0x90] sm:$0xff] }
  0x39   :  { %609 = vmatprep.subr.mxu0 %v6717_v32  ;;  %680 = vmatprep.subr.mxu1 %v405_v33  ;;  %v79_v63 = vld [vmem:[%s10537_s0 + $0x30] sm:$0xff]  ;;  %v6785_v1 = vld [vmem:[#allocation2 + $0x68] sm:$0xff]  ;;  %v377_v2 = vld [vmem:[#allocation2 + $0x78] sm:$0xff] }
  0x3a   :  { %218 = vmatprep.mubr.f32.mxu0 %v10547_v0  ;;  %331 = vmatprep.mubr.f32.mxu1 %v10547_v0  ;;  %v6788_v3 = vld [vmem:[#allocation2 + $0x60] sm:$0xff]  ;;  %v376_v4 = vld [vmem:[#allocation2 + $0x70] sm:$0xff]  ;;  %v6792_v5 = vld [vmem:[#allocation2 + $0x48] sm:$0xff] }
  0x3b   :  { %610 = vmatpush1.msra.mxu0 %v6720_v34  ;;  %681 = vmatpush1.msra.mxu1 %v404_v35  ;;  %v373_v6 = vld [vmem:[#allocation2 + $0x58] sm:$0xff]  ;;  %v6796_v7 = vld [vmem:[#allocation2 + $0x40] sm:$0xff]  ;;  %v372_v8 = vld [vmem:[#allocation2 + $0x50] sm:$0xff] }
  0x3c   :  { %5056 = vmatmul.mubr.msk.f32.gmra.mxu0 %vm111_vm0, %v76_v36  ;;  %5064 = vmatmul.mubr.msk.f32.gmra.mxu1 %vm111_vm0, %v76_v36  ;;  %v80_v9 = vld [vmem:[%s10537_s0 + $0x38] sm:$0xff]  ;;  %v6804_v11 = vld [vmem:[#allocation2 + $0x28] sm:$0xff]  ;;  %v6807_v13 = vld [vmem:[#allocation2 + $0x20] sm:$0xff] }
  0x3d   :  { %611 = vmatprep.subr.mxu0 %v6728_v37  ;;  %682 = vmatprep.subr.mxu1 %v401_v38  ;;  %v369_v12 = vld [vmem:[#allocation2 + $0x38] sm:$0xff]  ;;  %v368_v14 = vld [vmem:[#allocation2 + $0x30] sm:$0xff]  ;;  %v6811_v15 = vld [vmem:[#allocation2 + $0x8] sm:$0xff] }
  0x3e   :  { %612 = vmatpush1.msra.mxu0 %v6731_v39  ;;  %683 = vmatpush1.msra.mxu1 %v400_v40  ;;  %v365_v16 = vld [vmem:[#allocation2 + $0x18] sm:$0xff]  ;;  %v6814_v17 = vld [vmem:[#allocation2] sm:$0xff]  ;;  %v364_v18 = vld [vmem:[#allocation2 + $0x10] sm:$0xff] }
  0x3f   :  { %613 = vmatprep.subr.mxu0 %v6735_v41  ;;  %684 = vmatprep.subr.mxu1 %v397_v42  ;;  %v553_v19 = vld [vmem:[#allocation6 + $0x1f8] sm:$0xff]  ;;  %v6825_v20 = vld [vmem:[#allocation6 + $0x1e8] sm:$0xff]  ;;  %v552_v21 = vld [vmem:[#allocation6 + $0x1f0] sm:$0xff] }
  0x40   :  { %224 = vmatprep.mubr.f32.mxu0 %v10547_v0  ;;  %337 = vmatprep.mubr.f32.mxu1 %v10547_v0  ;;  %v6828_v22 = vld [vmem:[#allocation6 + $0x1e0] sm:$0xff]  ;;  %v549_v23 = vld [vmem:[#allocation6 + $0x1d8] sm:$0xff]  ;;  %v6831_v24 = vld [vmem:[#allocation6 + $0x1c8] sm:$0xff] }
  0x41   :  { %614 = vmatpush1.msra.mxu0 %v6739_v43  ;;  %685 = vmatpush1.msra.mxu1 %v396_v44  ;;  %v548_v25 = vld [vmem:[#allocation6 + $0x1d0] sm:$0xff]  ;;  %v6834_v26 = vld [vmem:[#allocation6 + $0x1c0] sm:$0xff]  ;;  %v545_v27 = vld [vmem:[#allocation6 + $0x1b8] sm:$0xff] }
  0x42   :  { %5057 = vmatmul.mubr.msk.f32.gmra.mxu0 %vm111_vm0, %v77_v45  ;;  %5065 = vmatmul.mubr.msk.f32.gmra.mxu1 %vm111_vm0, %v77_v45  ;;  %v6837_v28 = vld [vmem:[#allocation6 + $0x1a8] sm:$0xff]  ;;  %v544_v29 = vld [vmem:[#allocation6 + $0x1b0] sm:$0xff]  ;;  %v6840_v31 = vld [vmem:[#allocation6 + $0x1a0] sm:$0xff] }
  0x43   :  { %615 = vmatprep.subr.mxu0 %v6747_v46  ;;  %686 = vmatprep.subr.mxu1 %v393_v47  ;;  %v541_v33 = vld [vmem:[#allocation6 + $0x198] sm:$0xff]  ;;  %v6843_v35 = vld [vmem:[#allocation6 + $0x188] sm:$0xff]  ;;  %v540_v36 = vld [vmem:[#allocation6 + $0x190] sm:$0xff] }
  0x44   :  { %616 = vmatpush1.msra.mxu0 %v6750_v48  ;;  %687 = vmatpush1.msra.mxu1 %v392_v49  ;;  %v6846_v38 = vld [vmem:[#allocation6 + $0x180] sm:$0xff]  ;;  %v537_v40 = vld [vmem:[#allocation6 + $0x178] sm:$0xff]  ;;  %v6849_v42 = vld [vmem:[#allocation6 + $0x168] sm:$0xff] }
  0x45   :  { %617 = vmatprep.subr.mxu0 %v6754_v50  ;;  %688 = vmatprep.subr.mxu1 %v389_v51  ;;  %v536_v44 = vld [vmem:[#allocation6 + $0x170] sm:$0xff]  ;;  %v6852_v45 = vld [vmem:[#allocation6 + $0x160] sm:$0xff]  ;;  %v533_v47 = vld [vmem:[#allocation6 + $0x158] sm:$0xff] }
  0x46   :  { %230 = vmatprep.mubr.f32.mxu0 %v10547_v0  ;;  %343 = vmatprep.mubr.f32.mxu1 %v10547_v0  ;;  %v6855_v49 = vld [vmem:[#allocation6 + $0x148] sm:$0xff]  ;;  %v532_v51 = vld [vmem:[#allocation6 + $0x150] sm:$0xff] }
  0x47   :  { %618 = vmatpush1.msra.mxu0 %v6758_v52  ;;  %689 = vmatpush1.msra.mxu1 %v388_v53  ;;  %v6858_v53 = vld [vmem:[#allocation6 + $0x140] sm:$0xff] }
  0x48   :  { %5058 = vmatmul.mubr.msk.f32.gmra.mxu0 %vm111_vm0, %v78_v54  ;;  %5066 = vmatmul.mubr.msk.f32.gmra.mxu1 %vm111_vm0, %v78_v54  ;;  %v529_v54 = vld [vmem:[#allocation6 + $0x138] sm:$0xff] }
  0x49   :  { %619 = vmatprep.subr.mxu0 %v6766_v55  ;;  %690 = vmatprep.subr.mxu1 %v385_v56  ;;  %v6861_v56 = vld [vmem:[#allocation6 + $0x128] sm:$0xff] }
  0x4a   :  { %620 = vmatpush1.msra.mxu0 %v6769_v57  ;;  %691 = vmatpush1.msra.mxu1 %v384_v58  ;;  %v528_v58 = vld [vmem:[#allocation6 + $0x130] sm:$0xff] }
  0x4b   :  { %621 = vmatprep.subr.mxu0 %v6773_v59  ;;  %692 = vmatprep.subr.mxu1 %v381_v60  ;;  %v6864_v60 = vld [vmem:[#allocation6 + $0x120] sm:$0xff] }
  0x4c   :  { %236 = vmatprep.mubr.f32.mxu0 %v10547_v0  ;;  %349 = vmatprep.mubr.f32.mxu1 %v10547_v0 }
  0x4d   :  { %622 = vmatpush1.msra.mxu0 %v6777_v61  ;;  %693 = vmatpush1.msra.mxu1 %v380_v62  ;;  %v525_v62 = vld [vmem:[#allocation6 + $0x118] sm:$0xff] }
  0x4e   :  { %5059 = vmatmul.mubr.msk.f32.gmra.mxu0 %vm111_vm0, %v79_v63  ;;  %5067 = vmatmul.mubr.msk.f32.gmra.mxu1 %vm111_vm0, %v79_v63  ;;  %v6867_v63 = vld [vmem:[#allocation6 + $0x108] sm:$0xff] }
  0x4f   :  { %623 = vmatprep.subr.mxu0 %v6785_v1  ;;  %694 = vmatprep.subr.mxu1 %v377_v2  ;;  %v524_v2 = vld [vmem:[#allocation6 + $0x110] sm:$0xff] }
  0x50   :  { %624 = vmatpush1.msra.mxu0 %v6788_v3  ;;  %695 = vmatpush1.msra.mxu1 %v376_v4  ;;  %v6870_v4 = vld [vmem:[#allocation6 + $0x100] sm:$0xff] }
  0x51   :  { %625 = vmatprep.subr.mxu0 %v6792_v5  ;;  %696 = vmatprep.subr.mxu1 %v373_v6  ;;  %v521_v6 = vld [vmem:[#allocation6 + $0xf8] sm:$0xff] }
  0x52   :  { %242 = vmatprep.mubr.f32.mxu0 %v10547_v0  ;;  %355 = vmatprep.mubr.f32.mxu1 %v10547_v0 }
  0x53   :  { %626 = vmatpush1.msra.mxu0 %v6796_v7  ;;  %697 = vmatpush1.msra.mxu1 %v372_v8  ;;  %v6873_v8 = vld [vmem:[#allocation6 + $0xe8] sm:$0xff] }
  0x54   :  { %5060 = vmatmul.mubr.msk.f32.gmra.mxu0 %vm111_vm0, %v80_v9  ;;  %5068 = vmatmul.mubr.msk.f32.gmra.mxu1 %vm111_vm0, %v80_v9  ;;  %v520_v9 = vld [vmem:[#allocation6 + $0xf0] sm:$0xff] }
  0x55   :  { %627 = vmatprep.subr.mxu0 %v6804_v11  ;;  %698 = vmatprep.subr.mxu1 %v369_v12  ;;  %v6876_v12 = vld [vmem:[#allocation6 + $0xe0] sm:$0xff] }
  0x56   :  { %628 = vmatpush1.msra.mxu0 %v6807_v13  ;;  %699 = vmatpush1.msra.mxu1 %v368_v14  ;;  %11032 = vst [vmem:[#allocation9_spill] sm:$0xff] %v6876_v12  ;;  %v517_v14 = vld [vmem:[#allocation6 + $0xd8] sm:$0xff] }
  0x57   :  { %629 = vmatprep.subr.mxu0 %v6811_v15  ;;  %700 = vmatprep.subr.mxu1 %v365_v16  ;;  %v6879_v16 = vld [vmem:[#allocation6 + $0xc8] sm:$0xff] }
  0x58   :  { %630 = vmatpush1.msra.mxu0 %v6814_v17  ;;  %663 = vmatprep.mubr.f32.mxu0 %v10547_v0  ;;  %11033 = vst [vmem:[#allocation10_spill] sm:$0xff] %v6879_v16 }
  0x59   :  { %701 = vmatpush1.msra.mxu1 %v364_v18  ;;  %734 = vmatprep.mubr.f32.mxu1 %v10547_v0  ;;  %v516_v18 = vld [vmem:[#allocation6 + $0xd0] sm:$0xff] }
  0x5a   :  { %664 = vmatmul.mubr.f32.vlgmr.msra.gmra.mxu0 %v10547_v0  ;;  %735 = vmatmul.mubr.f32.vlgmr.msra.gmra.mxu1 %v10547_v0 }
  0x5b   :  { %834 = vmatprep.mubr.f32.mxu0 %v10547_v0  ;;  %905 = vmatprep.mubr.f32.mxu1 %v10547_v0 }
  0x5c   :  { %841 = vmatprep.subr.mxu1 %v553_v19  ;;  %770 = vmatprep.subr.mxu0 %v6825_v20  ;;  %v6882_v19 = vld [vmem:[#allocation6 + $0xc0] sm:$0xff] }
  0x5d   :  { %842 = vmatpush1.msra.mxu1 %v552_v21  ;;  %771 = vmatpush1.msra.mxu0 %v6828_v22  ;;  %11034 = vst [vmem:[#allocation11_spill] sm:$0xff] %v6882_v19  ;;  %v513_v21 = vld [vmem:[#allocation6 + $0xb8] sm:$0xff] }
  0x5e   :  { %843 = vmatprep.subr.mxu1 %v549_v23  ;;  %772 = vmatprep.subr.mxu0 %v6831_v24  ;;  %v6885_v23 = vld [vmem:[#allocation6 + $0xa8] sm:$0xff] }
  0x5f   :  { %844 = vmatpush1.msra.mxu1 %v548_v25  ;;  %773 = vmatpush1.msra.mxu0 %v6834_v26  ;;  %11035 = vst [vmem:[#allocation12_spill] sm:$0xff] %v6885_v23  ;;  %v512_v25 = vld [vmem:[#allocation6 + $0xb0] sm:$0xff] }
  0x60   :  { %845 = vmatprep.subr.mxu1 %v545_v27  ;;  %774 = vmatprep.subr.mxu0 %v6837_v28  ;;  %v6888_v27 = vld [vmem:[#allocation6 + $0xa0] sm:$0xff] }
  0x61   :  { %846 = vmatpush1.msra.mxu1 %v544_v29  ;;  %775 = vmatpush1.msra.mxu0 %v6840_v31  ;;  %11036 = vst [vmem:[#allocation13_spill] sm:$0xff] %v6888_v27  ;;  %v509_v29 = vld [vmem:[#allocation6 + $0x98] sm:$0xff] }
  0x62   :  { %847 = vmatprep.subr.mxu1 %v541_v33  ;;  %776 = vmatprep.subr.mxu0 %v6843_v35  ;;  %v6891_v33 = vld [vmem:[#allocation6 + $0x88] sm:$0xff] }
  0x63   :  { %848 = vmatpush1.msra.mxu1 %v540_v36  ;;  %777 = vmatpush1.msra.mxu0 %v6846_v38  ;;  %11037 = vst [vmem:[#allocation14_spill] sm:$0xff] %v6891_v33  ;;  %v508_v36 = vld [vmem:[#allocation6 + $0x90] sm:$0xff] }
  0x64   :  { %849 = vmatprep.subr.mxu1 %v537_v40  ;;  %778 = vmatprep.subr.mxu0 %v6849_v42  ;;  %v6894_v40 = vld [vmem:[#allocation6 + $0x80] sm:$0xff] }
  0x65   :  { %850 = vmatpush1.msra.mxu1 %v536_v44  ;;  %779 = vmatpush1.msra.mxu0 %v6852_v45  ;;  %11038 = vst [vmem:[#allocation15_spill] sm:$0xff] %v6894_v40  ;;  %v505_v44 = vld [vmem:[#allocation6 + $0x78] sm:$0xff] }
  0x66   :  { %851 = vmatprep.subr.mxu1 %v533_v47  ;;  %780 = vmatprep.subr.mxu0 %v6855_v49  ;;  %v6897_v47 = vld [vmem:[#allocation6 + $0x68] sm:$0xff] }
  0x67   :  { %852 = vmatpush1.msra.mxu1 %v532_v51  ;;  %781 = vmatpush1.msra.mxu0 %v6858_v53  ;;  %11039 = vst [vmem:[#allocation16_spill] sm:$0xff] %v6897_v47  ;;  %v504_v51 = vld [vmem:[#allocation6 + $0x70] sm:$0xff] }
  0x68   :  { %853 = vmatprep.subr.mxu1 %v529_v54  ;;  %782 = vmatprep.subr.mxu0 %v6861_v56  ;;  %v6900_v54 = vld [vmem:[#allocation6 + $0x60] sm:$0xff] }
  0x69   :  { %854 = vmatpush1.msra.mxu1 %v528_v58  ;;  %783 = vmatpush1.msra.mxu0 %v6864_v60  ;;  %11040 = vst [vmem:[#allocation17_spill] sm:$0xff] %v6900_v54  ;;  %v501_v58 = vld [vmem:[#allocation6 + $0x58] sm:$0xff] }
  0x6a   :  { %855 = vmatprep.subr.mxu1 %v525_v62  ;;  %784 = vmatprep.subr.mxu0 %v6867_v63  ;;  %v6903_v62 = vld [vmem:[#allocation6 + $0x48] sm:$0xff] }
  0x6b   :  { %856 = vmatpush1.msra.mxu1 %v524_v2  ;;  %785 = vmatpush1.msra.mxu0 %v6870_v4  ;;  %11041 = vst [vmem:[#allocation18_spill] sm:$0xff] %v6903_v62  ;;  %v500_v2 = vld [vmem:[#allocation6 + $0x50] sm:$0xff] }
  0x6c   :  { %857 = vmatprep.subr.mxu1 %v521_v6  ;;  %786 = vmatprep.subr.mxu0 %v6873_v8  ;;  %v6906_v6 = vld [vmem:[#allocation6 + $0x40] sm:$0xff] }
  0x6d   :  { %858 = vmatpush1.msra.mxu1 %v520_v9  ;;  %787 = vmatpush1.msra.mxu0 %v6876_v12  ;;  %11042 = vst [vmem:[#allocation19_spill] sm:$0xff] %v6906_v6  ;;  %v497_v9 = vld [vmem:[#allocation6 + $0x38] sm:$0xff] }
  0x6e   :  { %859 = vmatprep.subr.mxu1 %v517_v14  ;;  %788 = vmatprep.subr.mxu0 %v6879_v16  ;;  %v6909_v14 = vld [vmem:[#allocation6 + $0x28] sm:$0xff] }
  0x6f   :  { %860 = vmatpush1.msra.mxu1 %v516_v18  ;;  %789 = vmatpush1.msra.mxu0 %v6882_v19  ;;  %11043 = vst [vmem:[#allocation20_spill] sm:$0xff] %v6909_v14  ;;  %v496_v18 = vld [vmem:[#allocation6 + $0x30] sm:$0xff] }
  0x70   :  { %861 = vmatprep.subr.mxu1 %v513_v21  ;;  %790 = vmatprep.subr.mxu0 %v6885_v23  ;;  %v6912_v21 = vld [vmem:[#allocation6 + $0x20] sm:$0xff] }
  0x71   :  { %862 = vmatpush1.msra.mxu1 %v512_v25  ;;  %791 = vmatpush1.msra.mxu0 %v6888_v27  ;;  %11044 = vst [vmem:[#allocation21_spill] sm:$0xff] %v6912_v21  ;;  %v493_v25 = vld [vmem:[#allocation6 + $0x18] sm:$0xff] }
  0x72   :  { %863 = vmatprep.subr.mxu1 %v509_v29  ;;  %792 = vmatprep.subr.mxu0 %v6891_v33  ;;  %v6915_v29 = vld [vmem:[#allocation6 + $0x8] sm:$0xff] }
  0x73   :  { %864 = vmatpush1.msra.mxu1 %v508_v36  ;;  %793 = vmatpush1.msra.mxu0 %v6894_v40  ;;  %11045 = vst [vmem:[#allocation22_spill] sm:$0xff] %v6915_v29  ;;  %v492_v36 = vld [vmem:[#allocation6 + $0x10] sm:$0xff] }
  0x74   :  { %865 = vmatprep.subr.mxu1 %v505_v44  ;;  %794 = vmatprep.subr.mxu0 %v6897_v47  ;;  %v6918_v44 = vld [vmem:[#allocation6] sm:$0xff] }
  0x75   :  { %866 = vmatpush1.msra.mxu1 %v504_v51  ;;  %795 = vmatpush1.msra.mxu0 %v6900_v54  ;;  %11046 = vst [vmem:[#allocation23_spill] sm:$0xff] %v6918_v44  ;;  %v489_v51 = vld [vmem:[#allocation4 + $0x1f8] sm:$0xff] }
  0x76   :  { %867 = vmatprep.subr.mxu1 %v501_v58  ;;  %796 = vmatprep.subr.mxu0 %v6903_v62  ;;  %v6922_v58 = vld [vmem:[#allocation4 + $0x1e8] sm:$0xff] }
  0x77   :  { %868 = vmatpush1.msra.mxu1 %v500_v2  ;;  %797 = vmatpush1.msra.mxu0 %v6906_v6  ;;  %11047 = vst [vmem:[#allocation24_spill] sm:$0xff] %v6922_v58  ;;  %v488_v2 = vld [vmem:[#allocation4 + $0x1f0] sm:$0xff] }
  0x78   :  { %869 = vmatprep.subr.mxu1 %v497_v9  ;;  %798 = vmatprep.subr.mxu0 %v6909_v14  ;;  %v6926_v9 = vld [vmem:[#allocation4 + $0x1e0] sm:$0xff] }
  0x79   :  { %870 = vmatpush1.msra.mxu1 %v496_v18  ;;  %799 = vmatpush1.msra.mxu0 %v6912_v21  ;;  %11048 = vst [vmem:[#allocation25_spill] sm:$0xff] %v6926_v9  ;;  %v6928_v18 = vld [vmem:[#allocation4 + $0x1d8] sm:$0xff]  ;;  %v7063_v21 = vld [vmem:[#allocation4 + $0x70] sm:$0xff] }
  0x7a   :  { %871 = vmatprep.subr.mxu1 %v493_v25  ;;  %800 = vmatprep.subr.mxu0 %v6915_v29  ;;  %11049 = vst [vmem:[#allocation26_spill] sm:$0xff] %v6928_v18  ;;  %v6931_v25 = vld [vmem:[#allocation4 + $0x1c8] sm:$0xff]  ;;  %11095 = vst [vmem:[#allocation72_spill] sm:$0xff] %v7063_v21 }
  0x7b   :  { %872 = vmatpush1.msra.mxu1 %v492_v36  ;;  %801 = vmatpush1.msra.mxu0 %v6918_v44  ;;  %11050 = vst [vmem:[#allocation27_spill] sm:$0xff] %v6931_v25  ;;  %v6933_v36 = vld [vmem:[#allocation4 + $0x1d0] sm:$0xff]  ;;  %v7047_v29 = vld [vmem:[#allocation4 + $0x88] sm:$0xff] }
  0x7c   :  { %983 = vmatprep.subr.mxu1 %v489_v51  ;;  %835 = vmatmul.mubr.f32.vlgmr.msra.gmra.mxu0 %v10547_v0  ;;  %11051 = vst [vmem:[#allocation28_spill] sm:$0xff] %v6933_v36  ;;  %v6937_v51 = vld [vmem:[#allocation4 + $0x1c0] sm:$0xff]  ;;  %v7039_v44 = vld [vmem:[#allocation4 + $0xb0] sm:$0xff]  ;;  %11090 = vst [vmem:[#allocation67_spill] sm:$0xff] %v7047_v29 }
  0x7d   :  { %906 = vmatmul.mubr.f32.vlgmr.msra.gmra.mxu1 %v10547_v0  ;;  %912 = vmatprep.subr.mxu0 %v6922_v58  ;;  %11052 = vst [vmem:[#allocation29_spill] sm:$0xff] %v6937_v51  ;;  %v6939_v0 = vld [vmem:[#allocation4 + $0x1b8] sm:$0xff]  ;;  %v6943_v58 = vld [vmem:[#allocation4 + $0x1a8] sm:$0xff]  ;;  %11087 = vst [vmem:[#allocation64_spill] sm:$0xff] %v7039_v44 }
  0x7e   :  { %984 = vmatpush1.msra.mxu1 %v488_v2  ;;  %913 = vmatpush1.msra.mxu0 %v6926_v9  ;;  %11053 = vst [vmem:[#allocation30_spill] sm:$0xff] %v6939_v0  ;;  %11054 = vst [vmem:[#allocation31_spill] sm:$0xff] %v6943_v58  ;;  %v6945_v2 = vld [vmem:[#allocation4 + $0x1b0] sm:$0xff]  ;;  %v6949_v9 = vld [vmem:[#allocation4 + $0x1a0] sm:$0xff] }
  0x7f   :  { %985 = vmatprep.subr.mxu1 %v6928_v18  ;;  %914 = vmatprep.subr.mxu0 %v6931_v25  ;;  %11055 = vst [vmem:[#allocation32_spill] sm:$0xff] %v6945_v2  ;;  %11056 = vst [vmem:[#allocation33_spill] sm:$0xff] %v6949_v9  ;;  %v6951_v18 = vld [vmem:[#allocation4 + $0x198] sm:$0xff]  ;;  %v6955_v25 = vld [vmem:[#allocation4 + $0x188] sm:$0xff] }
  0x80   :  { %986 = vmatpush1.msra.mxu1 %v6933_v36  ;;  %915 = vmatpush1.msra.mxu0 %v6937_v51  ;;  %11057 = vst [vmem:[#allocation34_spill] sm:$0xff] %v6951_v18  ;;  %11058 = vst [vmem:[#allocation35_spill] sm:$0xff] %v6955_v25  ;;  %v6957_v36 = vld [vmem:[#allocation4 + $0x190] sm:$0xff]  ;;  %v6961_v51 = vld [vmem:[#allocation4 + $0x180] sm:$0xff] }
  0x81   :  { %987 = vmatprep.subr.mxu1 %v6939_v0  ;;  %916 = vmatprep.subr.mxu0 %v6943_v58  ;;  %11059 = vst [vmem:[#allocation36_spill] sm:$0xff] %v6957_v36  ;;  %11060 = vst [vmem:[#allocation37_spill] sm:$0xff] %v6961_v51  ;;  %v6963_v0 = vld [vmem:[#allocation4 + $0x178] sm:$0xff]  ;;  %v6967_v58 = vld [vmem:[#allocation4 + $0x168] sm:$0xff] }
  0x82   :  { %988 = vmatpush1.msra.mxu1 %v6945_v2  ;;  %917 = vmatpush1.msra.mxu0 %v6949_v9  ;;  %11061 = vst [vmem:[#allocation38_spill] sm:$0xff] %v6963_v0  ;;  %11062 = vst [vmem:[#allocation39_spill] sm:$0xff] %v6967_v58  ;;  %v6969_v2 = vld [vmem:[#allocation4 + $0x170] sm:$0xff]  ;;  %v6973_v9 = vld [vmem:[#allocation4 + $0x160] sm:$0xff] }
  0x83   :  { %989 = vmatprep.subr.mxu1 %v6951_v18  ;;  %918 = vmatprep.subr.mxu0 %v6955_v25  ;;  %11063 = vst [vmem:[#allocation40_spill] sm:$0xff] %v6969_v2  ;;  %11064 = vst [vmem:[#allocation41_spill] sm:$0xff] %v6973_v9  ;;  %v6975_v18 = vld [vmem:[#allocation4 + $0x158] sm:$0xff]  ;;  %v6979_v25 = vld [vmem:[#allocation4 + $0x148] sm:$0xff] }
  0x84   :  { %990 = vmatpush1.msra.mxu1 %v6957_v36  ;;  %919 = vmatpush1.msra.mxu0 %v6961_v51  ;;  %11065 = vst [vmem:[#allocation42_spill] sm:$0xff] %v6975_v18  ;;  %11066 = vst [vmem:[#allocation43_spill] sm:$0xff] %v6979_v25  ;;  %v6981_v36 = vld [vmem:[#allocation4 + $0x150] sm:$0xff]  ;;  %v6985_v51 = vld [vmem:[#allocation4 + $0x140] sm:$0xff] }
  0x85   :  { %991 = vmatprep.subr.mxu1 %v6963_v0  ;;  %920 = vmatprep.subr.mxu0 %v6967_v58  ;;  %11067 = vst [vmem:[#allocation44_spill] sm:$0xff] %v6981_v36  ;;  %11068 = vst [vmem:[#allocation45_spill] sm:$0xff] %v6985_v51  ;;  %v6987_v0 = vld [vmem:[#allocation4 + $0x138] sm:$0xff]  ;;  %v6991_v58 = vld [vmem:[#allocation4 + $0x128] sm:$0xff] }
  0x86   :  { %992 = vmatpush1.msra.mxu1 %v6969_v2  ;;  %921 = vmatpush1.msra.mxu0 %v6973_v9  ;;  %11069 = vst [vmem:[#allocation46_spill] sm:$0xff] %v6987_v0  ;;  %11070 = vst [vmem:[#allocation47_spill] sm:$0xff] %v6991_v58  ;;  %v6993_v2 = vld [vmem:[#allocation4 + $0x130] sm:$0xff]  ;;  %v6997_v9 = vld [vmem:[#allocation4 + $0x120] sm:$0xff] }
  0x87   :  { %993 = vmatprep.subr.mxu1 %v6975_v18  ;;  %922 = vmatprep.subr.mxu0 %v6979_v25  ;;  %11071 = vst [vmem:[#allocation48_spill] sm:$0xff] %v6993_v2  ;;  %11072 = vst [vmem:[#allocation49_spill] sm:$0xff] %v6997_v9  ;;  %v6999_v18 = vld [vmem:[#allocation4 + $0x118] sm:$0xff]  ;;  %v7003_v25 = vld [vmem:[#allocation4 + $0x108] sm:$0xff] }
  0x88   :  { %994 = vmatpush1.msra.mxu1 %v6981_v36  ;;  %923 = vmatpush1.msra.mxu0 %v6985_v51  ;;  %11073 = vst [vmem:[#allocation50_spill] sm:$0xff] %v6999_v18  ;;  %11074 = vst [vmem:[#allocation51_spill] sm:$0xff] %v7003_v25  ;;  %v7005_v36 = vld [vmem:[#allocation4 + $0x110] sm:$0xff]  ;;  %v7009_v51 = vld [vmem:[#allocation4 + $0x100] sm:$0xff] }
  0x89   :  { %995 = vmatprep.subr.mxu1 %v6987_v0  ;;  %924 = vmatprep.subr.mxu0 %v6991_v58  ;;  %11075 = vst [vmem:[#allocation52_spill] sm:$0xff] %v7005_v36  ;;  %11076 = vst [vmem:[#allocation53_spill] sm:$0xff] %v7009_v51  ;;  %v7011_v0 = vld [vmem:[#allocation4 + $0xf8] sm:$0xff]  ;;  %v7015_v58 = vld [vmem:[#allocation4 + $0xe8] sm:$0xff] }
  0x8a   :  { %996 = vmatpush1.msra.mxu1 %v6993_v2  ;;  %925 = vmatpush1.msra.mxu0 %v6997_v9  ;;  %11077 = vst [vmem:[#allocation54_spill] sm:$0xff] %v7011_v0  ;;  %11078 = vst [vmem:[#allocation55_spill] sm:$0xff] %v7015_v58  ;;  %v7017_v2 = vld [vmem:[#allocation4 + $0xf0] sm:$0xff]  ;;  %v7021_v9 = vld [vmem:[#allocation4 + $0xe0] sm:$0xff] }
  0x8b   :  { %997 = vmatprep.subr.mxu1 %v6999_v18  ;;  %926 = vmatprep.subr.mxu0 %v7003_v25  ;;  %11079 = vst [vmem:[#allocation56_spill] sm:$0xff] %v7017_v2  ;;  %11080 = vst [vmem:[#allocation57_spill] sm:$0xff] %v7021_v9  ;;  %v7023_v18 = vld [vmem:[#allocation4 + $0xd8] sm:$0xff]  ;;  %v7027_v25 = vld [vmem:[#allocation4 + $0xc8] sm:$0xff] }
  0x8c   :  { %998 = vmatpush1.msra.mxu1 %v7005_v36  ;;  %927 = vmatpush1.msra.mxu0 %v7009_v51  ;;  %11081 = vst [vmem:[#allocation58_spill] sm:$0xff] %v7023_v18  ;;  %11082 = vst [vmem:[#allocation59_spill] sm:$0xff] %v7027_v25  ;;  %v7029_v36 = vld [vmem:[#allocation4 + $0xd0] sm:$0xff]  ;;  %v7031_v51 = vld [vmem:[#allocation4 + $0xc0] sm:$0xff] }
  0x8d   :  { %999 = vmatprep.subr.mxu1 %v7011_v0  ;;  %928 = vmatprep.subr.mxu0 %v7015_v58  ;;  %11083 = vst [vmem:[#allocation60_spill] sm:$0xff] %v7029_v36  ;;  %11084 = vst [vmem:[#allocation61_spill] sm:$0xff] %v7031_v51  ;;  %v7035_v0 = vld [vmem:[#allocation4 + $0xb8] sm:$0xff]  ;;  %v7037_v58 = vld [vmem:[#allocation4 + $0xa8] sm:$0xff] }
  0x8e   :  { %1000 = vmatpush1.msra.mxu1 %v7017_v2  ;;  %929 = vmatpush1.msra.mxu0 %v7021_v9  ;;  %11085 = vst [vmem:[#allocation62_spill] sm:$0xff] %v7035_v0  ;;  %11086 = vst [vmem:[#allocation63_spill] sm:$0xff] %v7037_v58  ;;  %v7043_v2 = vld [vmem:[#allocation4 + $0xa0] sm:$0xff]  ;;  %v7045_v9 = vld [vmem:[#allocation4 + $0x98] sm:$0xff] }
  0x8f   :  { %1001 = vmatprep.subr.mxu1 %v7023_v18  ;;  %930 = vmatprep.subr.mxu0 %v7027_v25  ;;  %11088 = vst [vmem:[#allocation65_spill] sm:$0xff] %v7043_v2  ;;  %11089 = vst [vmem:[#allocation66_spill] sm:$0xff] %v7045_v9  ;;  %v7051_v18 = vld [vmem:[#allocation4 + $0x90] sm:$0xff]  ;;  %v7053_v25 = vld [vmem:[#allocation4 + $0x80] sm:$0xff] }
  0x90   :  { %1002 = vmatpush1.msra.mxu1 %v7029_v36  ;;  %931 = vmatpush1.msra.mxu0 %v7031_v51  ;;  %11091 = vst [vmem:[#allocation68_spill] sm:$0xff] %v7051_v18  ;;  %11092 = vst [vmem:[#allocation69_spill] sm:$0xff] %v7053_v25  ;;  %v7057_v36 = vld [vmem:[#allocation4 + $0x78] sm:$0xff]  ;;  %v7059_v51 = vld [vmem:[#allocation4 + $0x68] sm:$0xff] }
  0x91   :  { %1003 = vmatprep.subr.mxu1 %v7035_v0  ;;  %932 = vmatprep.subr.mxu0 %v7037_v58  ;;  %11093 = vst [vmem:[#allocation70_spill] sm:$0xff] %v7057_v36  ;;  %11094 = vst [vmem:[#allocation71_spill] sm:$0xff] %v7059_v51  ;;  %v7065_v0 = vld [vmem:[#allocation4 + $0x60] sm:$0xff]  ;;  %v7069_v58 = vld [vmem:[#allocation4 + $0x58] sm:$0xff] }
  0x92   :  { %1004 = vmatpush1.msra.mxu1 %v7039_v44  ;;  %933 = vmatpush1.msra.mxu0 %v7043_v2  ;;  %11096 = vst [vmem:[#allocation73_spill] sm:$0xff] %v7065_v0  ;;  %11097 = vst [vmem:[#allocation74_spill] sm:$0xff] %v7069_v58  ;;  %v7071_v44 = vld [vmem:[#allocation4 + $0x48] sm:$0xff]  ;;  %v7075_v2 = vld [vmem:[#allocation4 + $0x50] sm:$0xff] }
  0x93   :  { %1005 = vmatprep.subr.mxu1 %v7045_v9  ;;  %934 = vmatprep.subr.mxu0 %v7047_v29  ;;  %11098 = vst [vmem:[#allocation75_spill] sm:$0xff] %v7071_v44  ;;  %11099 = vst [vmem:[#allocation76_spill] sm:$0xff] %v7075_v2  ;;  %v7077_v9 = vld [vmem:[#allocation4 + $0x40] sm:$0xff]  ;;  %v7081_v29 = vld [vmem:[#allocation4 + $0x38] sm:$0xff] }
  0x94   :  { %1006 = vmatpush1.msra.mxu1 %v7051_v18  ;;  %935 = vmatpush1.msra.mxu0 %v7053_v25  ;;  %11100 = vst [vmem:[#allocation77_spill] sm:$0xff] %v7077_v9  ;;  %11101 = vst [vmem:[#allocation78_spill] sm:$0xff] %v7081_v29  ;;  %v7083_v18 = vld [vmem:[#allocation4 + $0x28] sm:$0xff]  ;;  %v7087_v25 = vld [vmem:[#allocation4 + $0x30] sm:$0xff] }
  0x95   :  { %1007 = vmatprep.subr.mxu1 %v7057_v36  ;;  %936 = vmatprep.subr.mxu0 %v7059_v51  ;;  %11102 = vst [vmem:[#allocation79_spill] sm:$0xff] %v7083_v18  ;;  %11103 = vst [vmem:[#allocation80_spill] sm:$0xff] %v7087_v25  ;;  %v7089_v36 = vld [vmem:[#allocation4 + $0x20] sm:$0xff]  ;;  %v7093_v51 = vld [vmem:[#allocation4 + $0x18] sm:$0xff] }
  0x96   :  { %1008 = vmatpush1.msra.mxu1 %v7063_v21  ;;  %937 = vmatpush1.msra.mxu0 %v7065_v0  ;;  %11104 = vst [vmem:[#allocation81_spill] sm:$0xff] %v7089_v36  ;;  %11105 = vst [vmem:[#allocation82_spill] sm:$0xff] %v7093_v51  ;;  %v7095_v21 = vld [vmem:[#allocation4 + $0x8] sm:$0xff]  ;;  %v7099_v0 = vld [vmem:[#allocation4 + $0x10] sm:$0xff] }
  0x97   :  { %1009 = vmatprep.subr.mxu1 %v7069_v58  ;;  %938 = vmatprep.subr.mxu0 %v7071_v44  ;;  %11106 = vst [vmem:[#allocation83_spill] sm:$0xff] %v7095_v21  ;;  %11107 = vst [vmem:[#allocation84_spill] sm:$0xff] %v7099_v0  ;;  %v7101_v58 = vld [vmem:[#allocation4] sm:$0xff] }
  0x98   :  { %1010 = vmatpush1.msra.mxu1 %v7075_v2  ;;  %939 = vmatpush1.msra.mxu0 %v7077_v9  ;;  %11108 = vst [vmem:[#allocation85_spill] sm:$0xff] %v7101_v58  ;;  %v11109_v2 = vmov 0.0  }
  0x99   :  { %1011 = vmatprep.subr.mxu1 %v7081_v29  ;;  %940 = vmatprep.subr.mxu0 %v7083_v18  ;;  %v91_v29 = vlaneseq }
  0x9a   :  { %1012 = vmatpush1.msra.mxu1 %v7087_v25  ;;  %941 = vmatpush1.msra.mxu0 %v7089_v36 }
  0x9b   :  { %1013 = vmatprep.subr.mxu1 %v7093_v51  ;;  %942 = vmatprep.subr.mxu0 %v7095_v21  ;;  %v7113_v25 = vshrl.u32 %v91_v29, 7 }
  0x9c   :  { %1014 = vmatpush1.msra.mxu1 %v7099_v0  ;;  %943 = vmatpush1.msra.mxu0 %v7101_v58  ;;  %v89_v58 = vld [vmem:[%s10540_s3] sm:$0xf] }
  0x9d   :  { %976 = vmatprep.mubr.f32.mxu0 %v11109_v2  ;;  %1047 = vmatprep.mubr.f32.mxu1 %v11109_v2  ;;  %v10622_v21 = vsub.s32 0, %v7113_v25  ;;  %v10624_v0 = vsub.s32 2, %v7113_v25  ;;  %v10629_v29 = vsub.s32 3, %v7113_v25 }
  0x9e   :  { %1155 = vmatprep.subr.mxu1 %v6696_v10  ;;  %5261 = vmatprep.subr.mxu0 %v11109_v2  ;;  %v10628_v10 = vsub.s32 1, %v7113_v25 }
  0x9f   :  { %v94_v44 = vrot.slane %v89_v58, %v10622_v21  ;;  %v7134_v14 = vrot.slane %v89_v58, %v10624_v0  ;;  %v7140_v47 = vrot.slane %v89_v58, %v10629_v29 }
  0xa0   :  { %v98_v54 = vrot.slane %v89_v58, %v10628_v10 }
  0xea   :  { %v7115_v36 = vpop.f32.mrf.mxu0  ;;  %v7117_v51 = vpop.f32.mrf.mxu1 }
  0xec   :  { %v7124_v18 = vpop.f32.mrf.mxu0  ;;  %v7126_v9 = vpop.f32.mrf.mxu1 }
  0xf0   :  { %v208_v6 = vpop.f32.mrf.mxu0  ;;  %v321_v62 = vpop.f32.mrf.mxu1 }
  0xf1   :  { %v7142_v40 = vadd.f32 %v208_v6, %v94_v44  ;;  %v7145_v33 = vadd.f32 %v321_v62, %v7134_v14 }
  0xf2   :  { %v210_v27 = vpop.f32.mrf.mxu0  ;;  %v323_v21 = vpop.f32.mrf.mxu1 }
  0xf3   :  { %11110 = vst [vmem:[#allocation86_spill] sm:$0xff] %v7142_v40  ;;  %11111 = vst [vmem:[#allocation87_spill] sm:$0xff] %v7145_v33  ;;  %v7147_v23 = vadd.f32 %v210_v27, %v98_v54  ;;  %v7150_v0 = vadd.f32 %v323_v21, %v7140_v47 }
  0xf5   :  { %11112 = vst [vmem:[#allocation88_spill] sm:$0xff] %v7147_v23  ;;  %11113 = vst [vmem:[#allocation89_spill] sm:$0xff] %v7150_v0 }
  0xf6   :  { %v214_v19 = vpop.f32.mrf.mxu0  ;;  %v327_v16 = vpop.f32.mrf.mxu1 }
  0xf7   :  { %v7152_v12 = vadd.f32 %v214_v19, %v94_v44  ;;  %v7155_v10 = vadd.f32 %v327_v16, %v7134_v14 }
  0xf8   :  { %v216_v58 = vpop.f32.mrf.mxu0  ;;  %v329_v6 = vpop.f32.mrf.mxu1 }
  0xf9   :  { %11114 = vst [vmem:[#allocation90_spill] sm:$0xff] %v7152_v12  ;;  %11115 = vst [vmem:[#allocation91_spill] sm:$0xff] %v7155_v10  ;;  %v7157_v29 = vadd.f32 %v216_v58, %v98_v54  ;;  %v7160_v62 = vadd.f32 %v329_v6, %v7140_v47 }
  0xfb   :  { %11116 = vst [vmem:[#allocation92_spill] sm:$0xff] %v7157_v29  ;;  %11117 = vst [vmem:[#allocation93_spill] sm:$0xff] %v7160_v62 }
  0xfc   :  { %v220_v33 = vpop.f32.mrf.mxu0  ;;  %v333_v27 = vpop.f32.mrf.mxu1 }
  0xfd   :  { %v7162_v40 = vadd.f32 %v220_v33, %v94_v44  ;;  %v7165_v21 = vadd.f32 %v333_v27, %v7134_v14 }
  0xfe   :  { %v222_v0 = vpop.f32.mrf.mxu0  ;;  %v335_v19 = vpop.f32.mrf.mxu1 }
  0xff   :  { %11118 = vst [vmem:[#allocation94_spill] sm:$0xff] %v7162_v40  ;;  %11119 = vst [vmem:[#allocation95_spill] sm:$0xff] %v7165_v21  ;;  %v7167_v12 = vadd.f32 %v222_v0, %v98_v54  ;;  %v7170_v16 = vadd.f32 %v335_v19, %v7140_v47 }
 0x101   :  { %11120 = vst [vmem:[#allocation96_spill] sm:$0xff] %v7167_v12  ;;  %11121 = vst [vmem:[#allocation97_spill] sm:$0xff] %v7170_v16 }
 0x102   :  { %v226_v10 = vpop.f32.mrf.mxu0  ;;  %v339_v58 = vpop.f32.mrf.mxu1 }
 0x103   :  { %v7172_v29 = vadd.f32 %v226_v10, %v94_v44  ;;  %v7175_v6 = vadd.f32 %v339_v58, %v7134_v14 }
 0x104   :  { %v228_v62 = vpop.f32.mrf.mxu0  ;;  %v341_v33 = vpop.f32.mrf.mxu1 }
 0x105   :  { %11122 = vst [vmem:[#allocation98_spill] sm:$0xff] %v7172_v29  ;;  %11123 = vst [vmem:[#allocation99_spill] sm:$0xff] %v7175_v6  ;;  %v7177_v40 = vadd.f32 %v228_v62, %v98_v54  ;;  %v7180_v27 = vadd.f32 %v341_v33, %v7140_v47 }
 0x107   :  { %11124 = vst [vmem:[#allocation100_spill] sm:$0xff] %v7177_v40  ;;  %11125 = vst [vmem:[#allocation101_spill] sm:$0xff] %v7180_v27 }
 0x108   :  { %v232_v21 = vpop.f32.mrf.mxu0  ;;  %v345_v0 = vpop.f32.mrf.mxu1 }
 0x109   :  { %v7182_v12 = vadd.f32 %v232_v21, %v94_v44  ;;  %v7185_v19 = vadd.f32 %v345_v0, %v7134_v14 }
 0x10a   :  { %v234_v16 = vpop.f32.mrf.mxu0  ;;  %v347_v10 = vpop.f32.mrf.mxu1 }
 0x10b   :  { %11126 = vst [vmem:[#allocation102_spill] sm:$0xff] %v7182_v12  ;;  %11127 = vst [vmem:[#allocation103_spill] sm:$0xff] %v7185_v19  ;;  %v7187_v29 = vadd.f32 %v234_v16, %v98_v54  ;;  %v7190_v58 = vadd.f32 %v347_v10, %v7140_v47 }
 0x10d   :  { %11128 = vst [vmem:[#allocation104_spill] sm:$0xff] %v7187_v29  ;;  %11129 = vst [vmem:[#allocation105_spill] sm:$0xff] %v7190_v58 }
 0x10e   :  { %v238_v6 = vpop.f32.mrf.mxu0  ;;  %v351_v62 = vpop.f32.mrf.mxu1 }
 0x10f   :  { %v7192_v40 = vadd.f32 %v238_v6, %v94_v44  ;;  %v7195_v33 = vadd.f32 %v351_v62, %v7134_v14 }
 0x110   :  { %v240_v27 = vpop.f32.mrf.mxu0  ;;  %v353_v21 = vpop.f32.mrf.mxu1 }
 0x111   :  { %11130 = vst [vmem:[#allocation106_spill] sm:$0xff] %v7192_v40  ;;  %11131 = vst [vmem:[#allocation107_spill] sm:$0xff] %v7195_v33  ;;  %v7197_v12 = vadd.f32 %v240_v27, %v98_v54  ;;  %v7200_v0 = vadd.f32 %v353_v21, %v7140_v47  ;;  %v203_v27 = vadd.f32 %v7115_v36, %v94_v44 }
 0x112   :  { %v205_v21 = vadd.f32 %v7124_v18, %v98_v54 }
 0x113   :  { %11132 = vst [vmem:[#allocation108_spill] sm:$0xff] %v7197_v12  ;;  %11133 = vst [vmem:[#allocation109_spill] sm:$0xff] %v7200_v0 }
 0x114   :  { %v244_v19 = vpop.f32.mrf.mxu0  ;;  %v357_v16 = vpop.f32.mrf.mxu1 }
 0x115   :  { %v7202_v29 = vadd.f32 %v244_v19, %v94_v44  ;;  %v7205_v10 = vadd.f32 %v357_v16, %v7134_v14 }
 0x116   :  { %v246_v58 = vpop.f32.mrf.mxu0  ;;  %v359_v6 = vpop.f32.mrf.mxu1 }
 0x117   :  { %11134 = vst [vmem:[#allocation110_spill] sm:$0xff] %v7202_v29  ;;  %11135 = vst [vmem:[#allocation111_spill] sm:$0xff] %v7205_v10  ;;  %v7207_v40 = vadd.f32 %v246_v58, %v98_v54  ;;  %v7210_v62 = vadd.f32 %v359_v6, %v7140_v47  ;;  %v318_v58 = vadd.f32 %v7126_v9, %v7140_v47 }
 0x118   :  { %v316_v6 = vadd.f32 %v7117_v51, %v7134_v14 }
 0x119   :  { %11136 = vst [vmem:[#allocation112_spill] sm:$0xff] %v7207_v40  ;;  %11137 = vst [vmem:[#allocation113_spill] sm:$0xff] %v7210_v62 }
 0x11a   :  { %v665_v33 = vpop.f32.mrf.mxu0  ;;  %v736_v29 = vpop.f32.mrf.mxu1 }
 0x11b   :  { %v741_v0 = vadd.f32 %v665_v33, %v203_v27  ;;  %v743_v62 = vadd.f32 %v736_v29, %v316_v6  ;;  %v7237_v6 = vld [vmem:[#allocation2 + $0x1a0] sm:$0xff] }
 0x11c   :  { %v667_v12 = vpop.f32.mrf.mxu0  ;;  %v738_v10 = vpop.f32.mrf.mxu1 }
 0x11d   :  { %v5070_v23 = vmul.f32 -1.442695, %v741_v0  ;;  %v742_v19 = vadd.f32 %v667_v12, %v205_v21  ;;  %v744_v40 = vadd.f32 %v738_v10, %v318_v58  ;;  %v7234_v58 = vld [vmem:[#allocation2 + $0x1a8] sm:$0xff] }
 0x11f   :  { %5548 = vpow2.f32 %v5070_v23  ;;  %v5071_v16 = vmul.f32 -1.442695, %v742_v19  ;;  %v5072_v44 = vmul.f32 -1.442695, %v744_v40  ;;  %v7228_v19 = vld [vmem:[#allocation2 + $0x1c8] sm:$0xff] }
 0x121   :  { %5550 = vpow2.f32 %v5071_v16  ;;  %v7231_v16 = vld [vmem:[#allocation2 + $0x1c0] sm:$0xff] }
 0x122   :  { %5552 = vpow2.f32 %v5072_v44  ;;  %v7240_v44 = vld [vmem:[#allocation2 + $0x188] sm:$0xff] }
 0x12c   :  { %v5549_v36 = vpop.eup %5548 }
 0x12d   :  { %v748_v54 = vadd.f32 1.0, %v5549_v36  ;;  %v7243_v36 = vld [vmem:[#allocation2 + $0x180] sm:$0xff] }
 0x12e   :  { %v5551_v18 = vpop.eup %5550 }
 0x12f   :  { %5554 = vrcp.f32 %v748_v54  ;;  %v754_v12 = vadd.f32 1.0, %v5551_v18  ;;  %v5553_v23 = vpop.eup %5552  ;;  %v7246_v54 = vld [vmem:[#allocation2 + $0x168] sm:$0xff] }
 0x130   :  { %5556 = vtanh.f32 %v743_v62  ;;  %v761_v21 = vadd.f32 1.0, %v5553_v23  ;;  %v7224_v62 = vld [vmem:[#allocation2 + $0x1e0] sm:$0xff]  ;;  %v11155_v23 = vsub.s32 1, %v7113_v25 }
 0x131   :  { %5558 = vrcp.f32 %v754_v12 }
 0x132   :  { %5560 = vrcp.f32 %v761_v21 }
 0x13c   :  { %v5555_v33 = vpop.eup %5554 }
 0x13d   :  { %v5557_v0 = vpop.eup %5556 }
 0x13e   :  { %v5559_v27 = vpop.eup %5558  ;;  %v765_v9 = vmul.f32 %v5557_v0, %v5555_v33 }
 0x13f   :  { %v764_v47 = vmul.f32 0.0, %v5559_v27  ;;  %v5561_v40 = vpop.eup %5560 }
 0x141   :  { %v7218_v10 = vadd.f32 %v765_v9, %v764_v47 }
 0x143   :  { %5562 = vtanh.f32 %v7218_v10 }
 0x150   :  { %v5563_v14 = vpop.eup %5562 }
 0x151   :  { %v7221_v51 = vmul.f32 %v5563_v14, %v5561_v40 }
 0x153   :  { %5564 = vtanh.f32 %v7221_v51 }
 0x160   :  { %v5565_v29 = vpop.eup %5564 }
 0x161   :  { %977 = vmatmul.mubr.f32.vlgmr.msra.gmra.mxu0 %v5565_v29  ;;  %1048 = vmatmul.mubr.f32.vlgmr.msra.gmra.mxu1 %v5565_v29 }
 0x162   :  { %1156 = vmatpush1.msra.mxu1 %v7224_v62  ;;  %1219 = vmatprep.mubr.f32.mxu1 %v11109_v2 }
 0x163   :  { %1157 = vmatprep.subr.mxu1 %v7228_v19  ;;  %5293 = vmatprep.mubr.msk.f32.mxu0 %vm6607_vm1, %v11109_v2 }
 0x164   :  { %1158 = vmatpush1.msra.mxu1 %v7231_v16 }
 0x165   :  { %1159 = vmatprep.subr.mxu1 %v7234_v58 }
 0x166   :  { %1160 = vmatpush1.msra.mxu1 %v7237_v6 }
 0x167   :  { %1161 = vmatprep.subr.mxu1 %v7240_v44 }
 0x168   :  { %1162 = vmatpush1.msra.mxu1 %v7243_v36 }
 0x169   :  { %1163 = vmatprep.subr.mxu1 %v7246_v54 }
 0x16a   :  { %1164 = vmatpush1.msra.mxu1 %v6713_v30  ;;  %v11138_v30 = vld [vmem:[#allocation9_spill] sm:$0xff] }
 0x16b   :  { %1165 = vmatprep.subr.mxu1 %v6717_v32  ;;  %v11139_v32 = vld [vmem:[#allocation10_spill] sm:$0xff] }
 0x16c   :  { %1166 = vmatpush1.msra.mxu1 %v6720_v34  ;;  %v11140_v34 = vld [vmem:[#allocation11_spill] sm:$0xff] }
 0x16d   :  { %1167 = vmatprep.subr.mxu1 %v6728_v37  ;;  %v11141_v37 = vld [vmem:[#allocation12_spill] sm:$0xff] }
 0x16e   :  { %1168 = vmatpush1.msra.mxu1 %v6731_v39  ;;  %v11142_v39 = vld [vmem:[#allocation13_spill] sm:$0xff] }
 0x16f   :  { %1169 = vmatprep.subr.mxu1 %v6735_v41  ;;  %v11143_v41 = vld [vmem:[#allocation14_spill] sm:$0xff] }
 0x170   :  { %1170 = vmatpush1.msra.mxu1 %v6739_v43  ;;  %v11144_v43 = vld [vmem:[#allocation15_spill] sm:$0xff] }
 0x171   :  { %1171 = vmatprep.subr.mxu1 %v6747_v46  ;;  %v11145_v46 = vld [vmem:[#allocation16_spill] sm:$0xff] }
 0x172   :  { %1172 = vmatpush1.msra.mxu1 %v6750_v48  ;;  %v11146_v48 = vld [vmem:[#allocation17_spill] sm:$0xff] }
 0x173   :  { %1173 = vmatprep.subr.mxu1 %v6754_v50  ;;  %v11147_v50 = vld [vmem:[#allocation18_spill] sm:$0xff] }
 0x174   :  { %1174 = vmatpush1.msra.mxu1 %v6758_v52  ;;  %v11148_v52 = vld [vmem:[#allocation19_spill] sm:$0xff] }
 0x175   :  { %1175 = vmatprep.subr.mxu1 %v6766_v55  ;;  %v11149_v55 = vld [vmem:[#allocation20_spill] sm:$0xff] }
 0x176   :  { %1176 = vmatpush1.msra.mxu1 %v6769_v57  ;;  %v11150_v57 = vld [vmem:[#allocation21_spill] sm:$0xff] }
 0x177   :  { %1177 = vmatprep.subr.mxu1 %v6773_v59  ;;  %v11151_v59 = vld [vmem:[#allocation22_spill] sm:$0xff] }
 0x178   :  { %1178 = vmatpush1.msra.mxu1 %v6777_v61  ;;  %v11152_v61 = vld [vmem:[#allocation23_spill] sm:$0xff] }
 0x179   :  { %1179 = vmatprep.subr.mxu1 %v6785_v1  ;;  %v11153_v1 = vld [vmem:[#allocation24_spill] sm:$0xff] }
 0x17a   :  { %1180 = vmatpush1.msra.mxu1 %v6788_v3  ;;  %v7310_v3 = vld [vmem:[%s10544_s7 + $0x78] sm:$0xff] }
 0x17b   :  { %1181 = vmatprep.subr.mxu1 %v6792_v5  ;;  %5262 = vmatpush3.msra.mxu0 %v7310_v3  ;;  %v7317_v5 = vld [vmem:[%s10544_s7 + $0x70] sm:$0xff] }
 0x17c   :  { %1182 = vmatpush1.msra.mxu1 %v6796_v7  ;;  %5263 = vmatprep.subr.mxu0 %v11109_v2  ;;  %v7324_v7 = vld [vmem:[%s10544_s7 + $0x68] sm:$0xff] }
 0x17d   :  { %1183 = vmatprep.subr.mxu1 %v6804_v11  ;;  %5264 = vmatpush3.msra.mxu0 %v7317_v5  ;;  %v7331_v11 = vld [vmem:[%s10544_s7 + $0x60] sm:$0xff] }
 0x17e   :  { %1184 = vmatpush1.msra.mxu1 %v6807_v13  ;;  %5265 = vmatprep.subr.mxu0 %v11109_v2  ;;  %v7338_v13 = vld [vmem:[%s10544_s7 + $0x58] sm:$0xff] }
 0x17f   :  { %1185 = vmatprep.subr.mxu1 %v6811_v15  ;;  %5266 = vmatpush3.msra.mxu0 %v7324_v7  ;;  %v7345_v15 = vld [vmem:[%s10544_s7 + $0x50] sm:$0xff] }
 0x180   :  { %1186 = vmatpush1.msra.mxu1 %v6814_v17  ;;  %5267 = vmatprep.subr.mxu0 %v11109_v2  ;;  %v7352_v17 = vld [vmem:[%s10544_s7 + $0x48] sm:$0xff] }
 0x181   :  { %1220 = vmatmul.mubr.f32.vlgmr.msra.gmra.mxu1 %v7221_v51  ;;  %1326 = vmatprep.subr.mxu1 %v6825_v20  ;;  %v7359_v20 = vld [vmem:[%s10544_s7 + $0x40] sm:$0xff] }
 0x182   :  { %1327 = vmatpush1.msra.mxu1 %v6828_v22  ;;  %1390 = vmatprep.mubr.f32.mxu1 %v11109_v2  ;;  %v7364_v22 = vld [vmem:[%s10544_s7 + $0x38] sm:$0xff] }
 0x183   :  { %1328 = vmatprep.subr.mxu1 %v6831_v24  ;;  %5268 = vmatpush3.msra.mxu0 %v7331_v11  ;;  %v7371_v24 = vld [vmem:[%s10544_s7 + $0x30] sm:$0xff] }
 0x184   :  { %1329 = vmatpush1.msra.mxu1 %v6834_v26  ;;  %5269 = vmatprep.subr.mxu0 %v11109_v2  ;;  %v7378_v26 = vld [vmem:[%s10544_s7 + $0x28] sm:$0xff] }
 0x185   :  { %1330 = vmatprep.subr.mxu1 %v6837_v28  ;;  %5270 = vmatpush3.msra.mxu0 %v7338_v13  ;;  %v7387_v28 = vld [vmem:[%s10544_s7 + $0x20] sm:$0xff] }
 0x186   :  { %1331 = vmatpush1.msra.mxu1 %v6840_v31  ;;  %5271 = vmatprep.subr.mxu0 %v11109_v2  ;;  %v7394_v31 = vld [vmem:[%s10544_s7 + $0x18] sm:$0xff] }
 0x187   :  { %1332 = vmatprep.subr.mxu1 %v6843_v35  ;;  %5272 = vmatpush3.msra.mxu0 %v7345_v15  ;;  %v7401_v35 = vld [vmem:[%s10544_s7 + $0x10] sm:$0xff] }
 0x188   :  { %1333 = vmatpush1.msra.mxu1 %v6846_v38  ;;  %5273 = vmatprep.subr.mxu0 %v11109_v2  ;;  %v7408_v38 = vld [vmem:[%s10544_s7 + $0x8] sm:$0xff] }
 0x189   :  { %1334 = vmatprep.subr.mxu1 %v6849_v42  ;;  %5274 = vmatpush3.msra.mxu0 %v7352_v17  ;;  %v7415_v42 = vld [vmem:[%s10544_s7] sm:$0xff] }
 0x18a   :  { %1335 = vmatpush1.msra.mxu1 %v6852_v45  ;;  %5275 = vmatprep.subr.mxu0 %v11109_v2  ;;  %v7420_v45 = vld [vmem:[#allocation2 + $0x1f8] sm:$0xff] }
 0x18b   :  { %1336 = vmatprep.subr.mxu1 %v6855_v49  ;;  %5276 = vmatpush3.msra.mxu0 %v7359_v20  ;;  %v836_v49 = vpop.f32.mrf.mxu0 }
 0x18c   :  { %1337 = vmatpush1.msra.mxu1 %v6858_v53  ;;  %5277 = vmatprep.subr.mxu0 %v11109_v2  ;;  %v570_v53 = vld [vmem:[%s10543_s6] sm:$0xf] }
 0x18d   :  { %1338 = vmatprep.subr.mxu1 %v6861_v56  ;;  %5278 = vmatpush3.msra.mxu0 %v7364_v22  ;;  %v907_v56 = vpop.f32.mrf.mxu1  ;;  %v7432_v33 = vrot.slane %v570_v53, %v11155_v23  ;;  %v11159_v23 = vld [vmem:[#allocation27_spill] sm:$0xff] }
 0x18e   :  { %1339 = vmatpush1.msra.mxu1 %v6864_v60  ;;  %5279 = vmatprep.subr.mxu0 %v11109_v2  ;;  %v838_v60 = vpop.f32.mrf.mxu0 }
 0x18f   :  { %1340 = vmatprep.subr.mxu1 %v6867_v63  ;;  %5280 = vmatpush3.msra.mxu0 %v7371_v24  ;;  %v11154_v63 = vsub.s32 0, %v7113_v25  ;;  %v909_v18 = vpop.f32.mrf.mxu1 }
 0x190   :  { %1341 = vmatpush1.msra.mxu1 %v6870_v4  ;;  %5281 = vmatprep.subr.mxu0 %v11109_v2 }
 0x191   :  { %1342 = vmatprep.subr.mxu1 %v6873_v8  ;;  %5282 = vmatpush3.msra.mxu0 %v7378_v26  ;;  %v7428_v4 = vrot.slane %v570_v53, %v11154_v63 }
 0x192   :  { %1343 = vmatpush1.msra.mxu1 %v11138_v30  ;;  %5283 = vmatprep.subr.mxu0 %v11109_v2  ;;  %v11156_v30 = vsub.s32 3, %v7113_v25 }
 0x193   :  { %1344 = vmatprep.subr.mxu1 %v11139_v32  ;;  %5284 = vmatpush3.msra.mxu0 %v7387_v28 }
 0x194   :  { %1345 = vmatpush1.msra.mxu1 %v11140_v34  ;;  %5285 = vmatprep.subr.mxu0 %v11109_v2  ;;  %v7438_v32 = vrot.slane %v570_v53, %v11156_v30  ;;  %v11168_v30 = vld [vmem:[#allocation45_spill] sm:$0xff] }
 0x195   :  { %1346 = vmatprep.subr.mxu1 %v11141_v37  ;;  %5286 = vmatpush3.msra.mxu0 %v7394_v31 }
 0x196   :  { %1347 = vmatpush1.msra.mxu1 %v11142_v39  ;;  %5287 = vmatprep.subr.mxu0 %v11109_v2  ;;  %v11157_v39 = vsub.s32 2, %v7113_v25 }
 0x197   :  { %1348 = vmatprep.subr.mxu1 %v11143_v41  ;;  %5288 = vmatpush3.msra.mxu0 %v7401_v35 }
 0x198   :  { %1349 = vmatpush1.msra.mxu1 %v11144_v43  ;;  %5289 = vmatprep.subr.mxu0 %v11109_v2  ;;  %v7443_v41 = vrot.slane %v570_v53, %v11157_v39  ;;  %v11170_v39 = vld [vmem:[#allocation49_spill] sm:$0xff] }
 0x199   :  { %1350 = vmatprep.subr.mxu1 %v11145_v46  ;;  %5290 = vmatpush3.msra.mxu0 %v7408_v38 }
 0x19a   :  { %1351 = vmatpush1.msra.mxu1 %v11146_v48  ;;  %5291 = vmatprep.subr.mxu0 %v11109_v2 }
 0x19b   :  { %1352 = vmatprep.subr.mxu1 %v11147_v50  ;;  %5292 = vmatpush3.msra.mxu0 %v7415_v42 }
 0x19c   :  { %1353 = vmatpush1.msra.mxu1 %v11148_v52  ;;  %1226 = vmatprep.subr.mxu0 %v7420_v45 }
 0x19d   :  { %1354 = vmatprep.subr.mxu1 %v11149_v55 }
 0x19e   :  { %1355 = vmatpush1.msra.mxu1 %v11150_v57 }
 0x19f   :  { %1356 = vmatprep.subr.mxu1 %v11151_v59 }
 0x1a0   :  { %1357 = vmatpush1.msra.mxu1 %v11152_v61 }
 0x1a1   :  { %1468 = vmatprep.subr.mxu1 %v11153_v1 }
 0x221   :  { %v978_v8 = vpop.f32.mrf.mxu0  ;;  %v1049_v21 = vpop.f32.mrf.mxu1 }
 0x222   :  { %v979_v12 = vadd.f32 %v978_v8, %v836_v49  ;;  %v1050_v43 = vadd.f32 %v1049_v21, %v907_v56  ;;  %v11162_v21 = vld [vmem:[#allocation33_spill] sm:$0xff] }
 0x223   :  { %v980_v0 = vpop.f32.mrf.mxu0  ;;  %v1051_v29 = vpop.f32.mrf.mxu1 }
 0x224   :  { %v1054_v27 = vadd.f32 %v979_v12, %v7428_v4  ;;  %v981_v47 = vadd.f32 %v980_v0, %v838_v60  ;;  %v1052_v34 = vadd.f32 %v1051_v29, %v909_v18  ;;  %v1056_v50 = vadd.f32 %v1050_v43, %v7443_v41  ;;  %v11158_v12 = vld [vmem:[#allocation25_spill] sm:$0xff]  ;;  %v11167_v29 = vld [vmem:[#allocation43_spill] sm:$0xff] }
 0x225   :  { %v11160_v0 = vld [vmem:[#allocation29_spill] sm:$0xff]  ;;  %v11171_v43 = vld [vmem:[#allocation51_spill] sm:$0xff] }
 0x226   :  { %v5073_v9 = vmul.f32 -1.442695, %v1054_v27  ;;  %v1055_v40 = vadd.f32 %v981_v47, %v7432_v33  ;;  %v1057_v37 = vadd.f32 %v1052_v34, %v7438_v32  ;;  %v11161_v27 = vld [vmem:[#allocation31_spill] sm:$0xff] }
 0x227   :  { %v11163_v47 = vld [vmem:[#allocation35_spill] sm:$0xff] }
 0x228   :  { %5566 = vpow2.f32 %v5073_v9  ;;  %v5074_v14 = vmul.f32 -1.442695, %v1055_v40  ;;  %v5075_v46 = vmul.f32 -1.442695, %v1057_v37  ;;  %v11164_v9 = vld [vmem:[#allocation37_spill] sm:$0xff]  ;;  %v11165_v40 = vld [vmem:[#allocation39_spill] sm:$0xff] }
 0x229   :  { %v11169_v34 = vld [vmem:[#allocation47_spill] sm:$0xff] }
 0x22a   :  { %5568 = vpow2.f32 %v5074_v14  ;;  %v11166_v14 = vld [vmem:[#allocation41_spill] sm:$0xff] }
 0x22b   :  { %5570 = vpow2.f32 %v5075_v46  ;;  %v7468_v46 = vld [vmem:[#allocation2 + $0x1f0] sm:$0xff] }
 0x235   :  { %v5567_v48 = vpop.eup %5566 }
 0x236   :  { %v1061_v52 = vadd.f32 1.0, %v5567_v48  ;;  %v7472_v48 = vld [vmem:[#allocation2 + $0x1d8] sm:$0xff] }
 0x237   :  { %v5569_v55 = vpop.eup %5568 }
 0x238   :  { %5572 = vrcp.f32 %v1061_v52  ;;  %v1067_v57 = vadd.f32 1.0, %v5569_v55  ;;  %v5571_v59 = vpop.eup %5570  ;;  %v7476_v52 = vld [vmem:[#allocation2 + $0x1d0] sm:$0xff] }
 0x239   :  { %5574 = vtanh.f32 %v1056_v50  ;;  %v1074_v60 = vadd.f32 1.0, %v5571_v59  ;;  %v11172_v50 = vld [vmem:[#allocation53_spill] sm:$0xff]  ;;  %v11173_v55 = vld [vmem:[#allocation55_spill] sm:$0xff] }
 0x23a   :  { %5576 = vrcp.f32 %v1067_v57  ;;  %v7480_v57 = vld [vmem:[#allocation2 + $0x1b8] sm:$0xff]  ;;  %v11174_v59 = vld [vmem:[#allocation57_spill] sm:$0xff] }
 0x23b   :  { %5578 = vrcp.f32 %v1074_v60  ;;  %v11176_v60 = vld [vmem:[#allocation61_spill] sm:$0xff] }
 0x245   :  { %v5573_v61 = vpop.eup %5572 }
 0x246   :  { %v5575_v1 = vpop.eup %5574 }
 0x247   :  { %v5577_v49 = vpop.eup %5576  ;;  %v1078_v53 = vmul.f32 %v5575_v1, %v5573_v61  ;;  %v7484_v61 = vld [vmem:[#allocation2 + $0x1b0] sm:$0xff] }
 0x248   :  { %v1077_v25 = vmul.f32 0.0, %v5577_v49  ;;  %v5579_v56 = vpop.eup %5578  ;;  %v11175_v1 = vld [vmem:[#allocation59_spill] sm:$0xff]  ;;  %v7488_v49 = vld [vmem:[#allocation2 + $0x198] sm:$0xff] }
 0x24a   :  { %v7446_v63 = vadd.f32 %v1078_v53, %v1077_v25  ;;  %v7492_v25 = vld [vmem:[#allocation2 + $0x190] sm:$0xff] }
 0x24b   :  { %v11177_v53 = vld [vmem:[#allocation63_spill] sm:$0xff] }
 0x24c   :  { %5580 = vtanh.f32 %v7446_v63 }
 0x259   :  { %v5581_v8 = vpop.eup %5580 }
 0x25a   :  { %v7449_v18 = vmul.f32 %v5581_v8, %v5579_v56  ;;  %v7496_v56 = vld [vmem:[#allocation2 + $0x178] sm:$0xff]  ;;  %v11178_v8 = vld [vmem:[#allocation65_spill] sm:$0xff] }
 0x25c   :  { %5582 = vtanh.f32 %v7449_v18  ;;  %1391 = vmatmul.mubr.f32.vlgmr.msra.gmra.mxu1 %v7449_v18 }
 0x25d   :  { %1469 = vmatpush1.msra.mxu1 %v11158_v12  ;;  %1532 = vmatprep.mubr.f32.mxu1 %v11109_v2  ;;  %v7500_v12 = vld [vmem:[#allocation2 + $0x170] sm:$0xff] }
 0x25e   :  { %1470 = vmatprep.subr.mxu1 %v11159_v23  ;;  %v11179_v23 = vld [vmem:[#allocation67_spill] sm:$0xff] }
 0x25f   :  { %1471 = vmatpush1.msra.mxu1 %v11160_v0  ;;  %v7504_v0 = vld [vmem:[#allocation2 + $0x158] sm:$0xff] }
 0x260   :  { %1472 = vmatprep.subr.mxu1 %v11161_v27  ;;  %v11180_v27 = vld [vmem:[#allocation69_spill] sm:$0xff] }
 0x261   :  { %1473 = vmatpush1.msra.mxu1 %v11162_v21  ;;  %v7508_v21 = vld [vmem:[#allocation2 + $0x150] sm:$0xff] }
 0x262   :  { %1474 = vmatprep.subr.mxu1 %v11163_v47  ;;  %v11181_v47 = vld [vmem:[#allocation71_spill] sm:$0xff] }
 0x263   :  { %1475 = vmatpush1.msra.mxu1 %v11164_v9  ;;  %v7512_v9 = vld [vmem:[#allocation2 + $0x138] sm:$0xff] }
 0x264   :  { %1476 = vmatprep.subr.mxu1 %v11165_v40  ;;  %v11182_v40 = vld [vmem:[#allocation73_spill] sm:$0xff] }
 0x265   :  { %1477 = vmatpush1.msra.mxu1 %v11166_v14  ;;  %v7516_v14 = vld [vmem:[#allocation2 + $0x130] sm:$0xff] }
 0x266   :  { %1478 = vmatprep.subr.mxu1 %v11167_v29  ;;  %v11183_v29 = vld [vmem:[#allocation75_spill] sm:$0xff] }
 0x267   :  { %1479 = vmatpush1.msra.mxu1 %v11168_v30  ;;  %v7520_v30 = vld [vmem:[#allocation2 + $0x118] sm:$0xff] }
 0x268   :  { %1480 = vmatprep.subr.mxu1 %v11169_v34  ;;  %v11184_v34 = vld [vmem:[#allocation77_spill] sm:$0xff] }
 0x269   :  { %v5583_v37 = vpop.eup %5582  ;;  %1481 = vmatpush1.msra.mxu1 %v11170_v39  ;;  %v11186_v39 = vld [vmem:[#allocation79_spill] sm:$0xff] }
 0x26a   :  { %5294 = vmatmul.mubr.f32.vlgmr.msra.gmra.mxu0 %v5583_v37  ;;  %1482 = vmatprep.subr.mxu1 %v11171_v43  ;;  %v7524_v37 = vld [vmem:[#allocation2 + $0x110] sm:$0xff]  ;;  %v7528_v43 = vld [vmem:[#allocation2 + $0xf8] sm:$0xff] }
 0x26b   :  { %1227 = vmatpush1.msra.mxu0 %v7468_v46  ;;  %1290 = vmatprep.mubr.f32.mxu0 %v11109_v2  ;;  %11185 = vst [vmem:[#allocation9_spill] sm:$0xff] %v7524_v37  ;;  %11187 = vst [vmem:[#allocation10_spill] sm:$0xff] %v7528_v43 }
 0x26c   :  { %1228 = vmatprep.subr.mxu0 %v7472_v48  ;;  %1483 = vmatpush1.msra.mxu1 %v11172_v50  ;;  %v11188_v50 = vld [vmem:[#allocation81_spill] sm:$0xff] }
 0x26d   :  { %1229 = vmatpush1.msra.mxu0 %v7476_v52  ;;  %1484 = vmatprep.subr.mxu1 %v11173_v55  ;;  %v7532_v55 = vld [vmem:[#allocation2 + $0xf0] sm:$0xff] }
 0x26e   :  { %1230 = vmatprep.subr.mxu0 %v7480_v57  ;;  %1485 = vmatpush1.msra.mxu1 %v11174_v59  ;;  %11189 = vst [vmem:[#allocation11_spill] sm:$0xff] %v7532_v55  ;;  %v11190_v59 = vld [vmem:[#allocation83_spill] sm:$0xff] }
 0x26f   :  { %1231 = vmatpush1.msra.mxu0 %v7484_v61  ;;  %1486 = vmatprep.subr.mxu1 %v11175_v1  ;;  %v7536_v1 = vld [vmem:[#allocation2 + $0xd8] sm:$0xff] }
 0x270   :  { %1232 = vmatprep.subr.mxu0 %v7488_v49  ;;  %1487 = vmatpush1.msra.mxu1 %v11176_v60  ;;  %11191 = vst [vmem:[#allocation12_spill] sm:$0xff] %v7536_v1  ;;  %v11192_v60 = vld [vmem:[#allocation85_spill] sm:$0xff] }
 0x271   :  { %1233 = vmatpush1.msra.mxu0 %v7492_v25  ;;  %1488 = vmatprep.subr.mxu1 %v11177_v53  ;;  %v7540_v53 = vld [vmem:[#allocation2 + $0xd0] sm:$0xff] }
 0x272   :  { %1234 = vmatprep.subr.mxu0 %v7496_v56  ;;  %1489 = vmatpush1.msra.mxu1 %v11178_v8  ;;  %11193 = vst [vmem:[#allocation13_spill] sm:$0xff] %v7540_v53  ;;  %v7544_v8 = vld [vmem:[#allocation2 + $0xb8] sm:$0xff] }
 0x273   :  { %1235 = vmatpush1.msra.mxu0 %v7500_v12  ;;  %1490 = vmatprep.subr.mxu1 %v11179_v23  ;;  %11194 = vst [vmem:[#allocation14_spill] sm:$0xff] %v7544_v8  ;;  %v7547_v23 = vld [vmem:[#allocation2 + $0xb0] sm:$0xff] }
 0x274   :  { %1236 = vmatprep.subr.mxu0 %v7504_v0  ;;  %1491 = vmatpush1.msra.mxu1 %v11180_v27  ;;  %11195 = vst [vmem:[#allocation15_spill] sm:$0xff] %v7547_v23  ;;  %v7550_v27 = vld [vmem:[#allocation2 + $0x98] sm:$0xff] }
 0x275   :  { %1237 = vmatpush1.msra.mxu0 %v7508_v21  ;;  %1492 = vmatprep.subr.mxu1 %v11181_v47  ;;  %11196 = vst [vmem:[#allocation16_spill] sm:$0xff] %v7550_v27  ;;  %v7553_v47 = vld [vmem:[#allocation2 + $0x90] sm:$0xff] }
 0x276   :  { %1238 = vmatprep.subr.mxu0 %v7512_v9  ;;  %1493 = vmatpush1.msra.mxu1 %v11182_v40  ;;  %11197 = vst [vmem:[#allocation17_spill] sm:$0xff] %v7553_v47  ;;  %v7556_v40 = vld [vmem:[#allocation2 + $0x78] sm:$0xff] }
 0x277   :  { %1239 = vmatpush1.msra.mxu0 %v7516_v14  ;;  %1494 = vmatprep.subr.mxu1 %v11183_v29  ;;  %11198 = vst [vmem:[#allocation18_spill] sm:$0xff] %v7556_v40  ;;  %v7559_v29 = vld [vmem:[#allocation2 + $0x70] sm:$0xff] }
 0x278   :  { %1240 = vmatprep.subr.mxu0 %v7520_v30  ;;  %1495 = vmatpush1.msra.mxu1 %v11184_v34  ;;  %11199 = vst [vmem:[#allocation19_spill] sm:$0xff] %v7559_v29  ;;  %v7562_v34 = vld [vmem:[#allocation2 + $0x58] sm:$0xff] }
 0x279   :  { %1241 = vmatpush1.msra.mxu0 %v7524_v37  ;;  %1496 = vmatprep.subr.mxu1 %v11186_v39  ;;  %11200 = vst [vmem:[#allocation20_spill] sm:$0xff] %v7562_v34  ;;  %v7565_v39 = vld [vmem:[#allocation2 + $0x50] sm:$0xff] }
 0x27a   :  { %1242 = vmatprep.subr.mxu0 %v7528_v43  ;;  %1497 = vmatpush1.msra.mxu1 %v11188_v50  ;;  %11201 = vst [vmem:[#allocation21_spill] sm:$0xff] %v7565_v39  ;;  %v7568_v50 = vld [vmem:[#allocation2 + $0x38] sm:$0xff] }
 0x27b   :  { %1243 = vmatpush1.msra.mxu0 %v7532_v55  ;;  %1498 = vmatprep.subr.mxu1 %v11190_v59  ;;  %11202 = vst [vmem:[#allocation22_spill] sm:$0xff] %v7568_v50  ;;  %v7571_v59 = vld [vmem:[#allocation2 + $0x30] sm:$0xff] }
 0x27c   :  { %1244 = vmatprep.subr.mxu0 %v7536_v1  ;;  %1499 = vmatpush1.msra.mxu1 %v11192_v60  ;;  %11203 = vst [vmem:[#allocation23_spill] sm:$0xff] %v7571_v59  ;;  %v7574_v60 = vld [vmem:[#allocation2 + $0x18] sm:$0xff] }
 0x27d   :  { %1245 = vmatpush1.msra.mxu0 %v7540_v53  ;;  %5296 = vmatprep.subr.mxu1 %v11109_v2  ;;  %11204 = vst [vmem:[#allocation24_spill] sm:$0xff] %v7574_v60 }
 0x27e   :  { %1246 = vmatprep.subr.mxu0 %v7544_v8 }
 0x27f   :  { %1247 = vmatpush1.msra.mxu0 %v7547_v23 }
 0x280   :  { %1248 = vmatprep.subr.mxu0 %v7550_v27  ;;  %v11250_v27 = vld [vmem:[#allocation46_spill] sm:$0xff] }
 0x281   :  { %1249 = vmatpush1.msra.mxu0 %v7553_v47  ;;  %v11248_v47 = vld [vmem:[#allocation42_spill] sm:$0xff] }
 0x282   :  { %1250 = vmatprep.subr.mxu0 %v7556_v40  ;;  %v11246_v40 = vld [vmem:[#allocation38_spill] sm:$0xff] }
 0x283   :  { %1251 = vmatpush1.msra.mxu0 %v7559_v29  ;;  %v7577_v29 = vld [vmem:[#allocation2 + $0x10] sm:$0xff] }
 0x284   :  { %1252 = vmatprep.subr.mxu0 %v7562_v34  ;;  %11205 = vst [vmem:[#allocation25_spill] sm:$0xff] %v7577_v29  ;;  %v7581_v34 = vld [vmem:[#allocation6 + $0x1f8] sm:$0xff] }
 0x285   :  { %1253 = vmatpush1.msra.mxu0 %v7565_v39  ;;  %11206 = vst [vmem:[#allocation27_spill] sm:$0xff] %v7581_v34  ;;  %v7584_v39 = vld [vmem:[#allocation6 + $0x1f0] sm:$0xff] }
 0x286   :  { %1254 = vmatprep.subr.mxu0 %v7568_v50  ;;  %11207 = vst [vmem:[#allocation29_spill] sm:$0xff] %v7584_v39  ;;  %v11243_v50 = vld [vmem:[#allocation32_spill] sm:$0xff] }
 0x287   :  { %1255 = vmatpush1.msra.mxu0 %v7571_v59  ;;  %v7588_v59 = vld [vmem:[#allocation6 + $0x1d8] sm:$0xff] }
 0x288   :  { %1256 = vmatprep.subr.mxu0 %v7574_v60  ;;  %11208 = vst [vmem:[#allocation31_spill] sm:$0xff] %v7588_v59  ;;  %v7591_v60 = vld [vmem:[#allocation6 + $0x1d0] sm:$0xff] }
 0x289   :  { %1257 = vmatpush1.msra.mxu0 %v7577_v29  ;;  %11209 = vst [vmem:[#allocation33_spill] sm:$0xff] %v7591_v60  ;;  %v7594_v29 = vld [vmem:[#allocation6 + $0x1b8] sm:$0xff] }
 0x28a   :  { %1291 = vmatmul.mubr.f32.vlgmr.msra.gmra.mxu0 %v7221_v51  ;;  %1397 = vmatprep.subr.mxu0 %v7581_v34  ;;  %11210 = vst [vmem:[#allocation35_spill] sm:$0xff] %v7594_v29  ;;  %v7597_v51 = vld [vmem:[#allocation6 + $0x1b0] sm:$0xff]  ;;  %v7600_v34 = vld [vmem:[#allocation6 + $0x198] sm:$0xff] }
 0x28b   :  { %1398 = vmatpush1.msra.mxu0 %v7584_v39  ;;  %1461 = vmatprep.mubr.f32.mxu0 %v11109_v2  ;;  %11211 = vst [vmem:[#allocation37_spill] sm:$0xff] %v7597_v51  ;;  %11212 = vst [vmem:[#allocation39_spill] sm:$0xff] %v7600_v34  ;;  %v7603_v39 = vld [vmem:[#allocation6 + $0x190] sm:$0xff] }
 0x28c   :  { %1399 = vmatprep.subr.mxu0 %v7588_v59  ;;  %11213 = vst [vmem:[#allocation41_spill] sm:$0xff] %v7603_v39  ;;  %v7606_v59 = vld [vmem:[#allocation6 + $0x178] sm:$0xff] }
 0x28d   :  { %1400 = vmatpush1.msra.mxu0 %v7591_v60  ;;  %11214 = vst [vmem:[#allocation43_spill] sm:$0xff] %v7606_v59  ;;  %v7609_v60 = vld [vmem:[#allocation6 + $0x170] sm:$0xff] }
 0x28e   :  { %1401 = vmatprep.subr.mxu0 %v7594_v29  ;;  %11215 = vst [vmem:[#allocation45_spill] sm:$0xff] %v7609_v60  ;;  %v7612_v29 = vld [vmem:[#allocation6 + $0x158] sm:$0xff] }
 0x28f   :  { %1402 = vmatpush1.msra.mxu0 %v7597_v51  ;;  %11216 = vst [vmem:[#allocation47_spill] sm:$0xff] %v7612_v29  ;;  %v7615_v51 = vld [vmem:[#allocation6 + $0x150] sm:$0xff] }
 0x290   :  { %1403 = vmatprep.subr.mxu0 %v7600_v34  ;;  %11217 = vst [vmem:[#allocation49_spill] sm:$0xff] %v7615_v51  ;;  %v7618_v34 = vld [vmem:[#allocation6 + $0x138] sm:$0xff] }
 0x291   :  { %1404 = vmatpush1.msra.mxu0 %v7603_v39  ;;  %11218 = vst [vmem:[#allocation51_spill] sm:$0xff] %v7618_v34  ;;  %v7621_v39 = vld [vmem:[#allocation6 + $0x130] sm:$0xff] }
 0x292   :  { %1405 = vmatprep.subr.mxu0 %v7606_v59  ;;  %11219 = vst [vmem:[#allocation53_spill] sm:$0xff] %v7621_v39  ;;  %v7624_v59 = vld [vmem:[#allocation6 + $0x118] sm:$0xff] }
 0x293   :  { %1406 = vmatpush1.msra.mxu0 %v7609_v60  ;;  %11220 = vst [vmem:[#allocation55_spill] sm:$0xff] %v7624_v59  ;;  %v7627_v60 = vld [vmem:[#allocation6 + $0x110] sm:$0xff] }
 0x294   :  { %1407 = vmatprep.subr.mxu0 %v7612_v29  ;;  %11221 = vst [vmem:[#allocation57_spill] sm:$0xff] %v7627_v60  ;;  %v7630_v29 = vld [vmem:[#allocation6 + $0xf8] sm:$0xff] }
 0x295   :  { %1408 = vmatpush1.msra.mxu0 %v7615_v51  ;;  %11222 = vst [vmem:[#allocation59_spill] sm:$0xff] %v7630_v29  ;;  %v7633_v51 = vld [vmem:[#allocation6 + $0xf0] sm:$0xff] }
 0x296   :  { %1409 = vmatprep.subr.mxu0 %v7618_v34  ;;  %11223 = vst [vmem:[#allocation61_spill] sm:$0xff] %v7633_v51  ;;  %v7636_v34 = vld [vmem:[#allocation6 + $0xd8] sm:$0xff] }
 0x297   :  { %1410 = vmatpush1.msra.mxu0 %v7621_v39  ;;  %11224 = vst [vmem:[#allocation63_spill] sm:$0xff] %v7636_v34  ;;  %v7639_v39 = vld [vmem:[#allocation6 + $0xd0] sm:$0xff] }
 0x298   :  { %1411 = vmatprep.subr.mxu0 %v7624_v59  ;;  %11225 = vst [vmem:[#allocation65_spill] sm:$0xff] %v7639_v39  ;;  %v7642_v59 = vld [vmem:[#allocation6 + $0xb8] sm:$0xff] }
 0x299   :  { %1412 = vmatpush1.msra.mxu0 %v7627_v60  ;;  %11226 = vst [vmem:[#allocation67_spill] sm:$0xff] %v7642_v59  ;;  %v7645_v60 = vld [vmem:[#allocation6 + $0xb0] sm:$0xff] }
 0x29a   :  { %1413 = vmatprep.subr.mxu0 %v7630_v29  ;;  %11227 = vst [vmem:[#allocation69_spill] sm:$0xff] %v7645_v60  ;;  %v7648_v29 = vld [vmem:[#allocation6 + $0x98] sm:$0xff] }
 0x29b   :  { %1414 = vmatpush1.msra.mxu0 %v7633_v51  ;;  %11228 = vst [vmem:[#allocation71_spill] sm:$0xff] %v7648_v29  ;;  %v7651_v51 = vld [vmem:[#allocation6 + $0x90] sm:$0xff] }
 0x29c   :  { %1415 = vmatprep.subr.mxu0 %v7636_v34  ;;  %11229 = vst [vmem:[#allocation73_spill] sm:$0xff] %v7651_v51  ;;  %v7654_v34 = vld [vmem:[#allocation6 + $0x78] sm:$0xff] }
 0x29d   :  { %1416 = vmatpush1.msra.mxu0 %v7639_v39  ;;  %11230 = vst [vmem:[#allocation75_spill] sm:$0xff] %v7654_v34  ;;  %v7657_v39 = vld [vmem:[#allocation6 + $0x70] sm:$0xff] }
 0x29e   :  { %1417 = vmatprep.subr.mxu0 %v7642_v59  ;;  %11231 = vst [vmem:[#allocation77_spill] sm:$0xff] %v7657_v39  ;;  %v7660_v59 = vld [vmem:[#allocation6 + $0x58] sm:$0xff] }
 0x29f   :  { %1418 = vmatpush1.msra.mxu0 %v7645_v60  ;;  %11232 = vst [vmem:[#allocation79_spill] sm:$0xff] %v7660_v59  ;;  %v7663_v60 = vld [vmem:[#allocation6 + $0x50] sm:$0xff] }
 0x2a0   :  { %1419 = vmatprep.subr.mxu0 %v7648_v29  ;;  %11233 = vst [vmem:[#allocation81_spill] sm:$0xff] %v7663_v60  ;;  %v7666_v29 = vld [vmem:[#allocation6 + $0x38] sm:$0xff] }
 0x2a1   :  { %1420 = vmatpush1.msra.mxu0 %v7651_v51  ;;  %11234 = vst [vmem:[#allocation83_spill] sm:$0xff] %v7666_v29  ;;  %v7669_v51 = vld [vmem:[#allocation6 + $0x30] sm:$0xff] }
 0x2a2   :  { %1421 = vmatprep.subr.mxu0 %v7654_v34  ;;  %11235 = vst [vmem:[#allocation85_spill] sm:$0xff] %v7669_v51  ;;  %v7672_v34 = vld [vmem:[#allocation6 + $0x18] sm:$0xff] }
 0x2a3   :  { %1422 = vmatpush1.msra.mxu0 %v7657_v39  ;;  %11236 = vst [vmem:[#allocation114_spill] sm:$0xff] %v7672_v34  ;;  %v7675_v39 = vld [vmem:[#allocation6 + $0x10] sm:$0xff] }
 0x2a4   :  { %1423 = vmatprep.subr.mxu0 %v7660_v59  ;;  %11237 = vst [vmem:[#allocation115_spill] sm:$0xff] %v7675_v39  ;;  %v7679_v59 = vld [vmem:[#allocation4 + $0x1f8] sm:$0xff] }
 0x2a5   :  { %1424 = vmatpush1.msra.mxu0 %v7663_v60  ;;  %11238 = vst [vmem:[#allocation116_spill] sm:$0xff] %v7679_v59  ;;  %v7682_v60 = vld [vmem:[#allocation4 + $0x1f0] sm:$0xff] }
 0x2a6   :  { %1425 = vmatprep.subr.mxu0 %v7666_v29  ;;  %11239 = vst [vmem:[#allocation117_spill] sm:$0xff] %v7682_v60  ;;  %v11241_v29 = vld [vmem:[#allocation28_spill] sm:$0xff] }
 0x2a7   :  { %1426 = vmatpush1.msra.mxu0 %v7669_v51  ;;  %v11240_v51 = vld [vmem:[#allocation26_spill] sm:$0xff] }
 0x2a8   :  { %1427 = vmatprep.subr.mxu0 %v7672_v34  ;;  %v11242_v34 = vld [vmem:[#allocation30_spill] sm:$0xff] }
 0x2a9   :  { %1428 = vmatpush1.msra.mxu0 %v7675_v39  ;;  %v11244_v39 = vld [vmem:[#allocation34_spill] sm:$0xff] }
 0x2aa   :  { %1462 = vmatmul.mubr.f32.vlgmr.msra.gmra.mxu0 %v7449_v18  ;;  %1539 = vmatprep.subr.mxu0 %v7679_v59  ;;  %v11245_v18 = vld [vmem:[#allocation36_spill] sm:$0xff] }
 0x2ab   :  { %1540 = vmatpush1.msra.mxu0 %v7682_v60  ;;  %1603 = vmatprep.mubr.f32.mxu0 %v11109_v2  ;;  %v11247_v59 = vld [vmem:[#allocation40_spill] sm:$0xff] }
 0x2ac   :  { %1541 = vmatprep.subr.mxu0 %v11240_v51  ;;  %v11249_v60 = vld [vmem:[#allocation44_spill] sm:$0xff] }
 0x2ad   :  { %1542 = vmatpush1.msra.mxu0 %v11241_v29  ;;  %v11251_v51 = vld [vmem:[#allocation48_spill] sm:$0xff]  ;;  %v11252_v29 = vld [vmem:[#allocation50_spill] sm:$0xff] }
 0x2ae   :  { %1543 = vmatprep.subr.mxu0 %v11242_v34  ;;  %v11253_v34 = vld [vmem:[#allocation52_spill] sm:$0xff] }
 0x2af   :  { %1544 = vmatpush1.msra.mxu0 %v11243_v50  ;;  %v11254_v50 = vld [vmem:[#allocation54_spill] sm:$0xff] }
 0x2b0   :  { %1545 = vmatprep.subr.mxu0 %v11244_v39  ;;  %v11255_v39 = vld [vmem:[#allocation56_spill] sm:$0xff] }
 0x2b1   :  { %1546 = vmatpush1.msra.mxu0 %v11245_v18  ;;  %v11256_v18 = vld [vmem:[#allocation58_spill] sm:$0xff] }
 0x2b2   :  { %1547 = vmatprep.subr.mxu0 %v11246_v40  ;;  %v11257_v40 = vld [vmem:[#allocation60_spill] sm:$0xff] }
 0x2b3   :  { %1548 = vmatpush1.msra.mxu0 %v11247_v59  ;;  %v11258_v59 = vld [vmem:[#allocation62_spill] sm:$0xff] }
 0x2b4   :  { %1549 = vmatprep.subr.mxu0 %v11248_v47  ;;  %v11259_v47 = vld [vmem:[#allocation64_spill] sm:$0xff] }
 0x2b5   :  { %1550 = vmatpush1.msra.mxu0 %v11249_v60  ;;  %v11260_v60 = vld [vmem:[#allocation66_spill] sm:$0xff] }
 0x2b6   :  { %1551 = vmatprep.subr.mxu0 %v11250_v27  ;;  %v11261_v27 = vld [vmem:[#allocation68_spill] sm:$0xff] }
 0x2b7   :  { %1552 = vmatpush1.msra.mxu0 %v11251_v51  ;;  %v11262_v51 = vld [vmem:[#allocation70_spill] sm:$0xff] }
 0x2b8   :  { %1553 = vmatprep.subr.mxu0 %v11252_v29  ;;  %v11263_v29 = vld [vmem:[#allocation72_spill] sm:$0xff] }
 0x2b9   :  { %1554 = vmatpush1.msra.mxu0 %v11253_v34  ;;  %v11264_v34 = vld [vmem:[#allocation74_spill] sm:$0xff] }
 0x2ba   :  { %1555 = vmatprep.subr.mxu0 %v11254_v50  ;;  %v11265_v50 = vld [vmem:[#allocation76_spill] sm:$0xff] }
 0x2bb   :  { %1556 = vmatpush1.msra.mxu0 %v11255_v39  ;;  %v11266_v39 = vld [vmem:[#allocation78_spill] sm:$0xff] }
 0x2bc   :  { %1557 = vmatprep.subr.mxu0 %v11256_v18  ;;  %v11267_v18 = vld [vmem:[#allocation80_spill] sm:$0xff] }
 0x2bd   :  { %1558 = vmatpush1.msra.mxu0 %v11257_v40  ;;  %v11268_v40 = vld [vmem:[#allocation82_spill] sm:$0xff] }
 0x2be   :  { %1559 = vmatprep.subr.mxu0 %v11258_v59  ;;  %v11269_v59 = vld [vmem:[#allocation84_spill] sm:$0xff] }
 0x2bf   :  { %1560 = vmatpush1.msra.mxu0 %v11259_v47  ;;  %v7716_v47 = vld [vmem:[#allocation2 + $0x1e8] sm:$0xff] }
 0x2c0   :  { %1561 = vmatprep.subr.mxu0 %v11260_v60  ;;  %11270 = vst [vmem:[#allocation26_spill] sm:$0xff] %v7716_v47  ;;  %v1221_v60 = vpop.f32.mrf.mxu1 }
 0x2c1   :  { %1562 = vmatpush1.msra.mxu0 %v11261_v27  ;;  %v7722_v27 = vld [vmem:[%s10545_s8] ss:$0 sm:$0xff] }
 0x2c2   :  { %1563 = vmatprep.subr.mxu0 %v11262_v51  ;;  %11271 = vst [vmem:[#allocation28_spill] sm:$0xff] %v7722_v27 }
 0x2c3   :  { %1564 = vmatpush1.msra.mxu0 %v11263_v29 }
 0x2c4   :  { %1565 = vmatprep.subr.mxu0 %v11264_v34  ;;  %v1223_v34 = vpop.f32.mrf.mxu1 }
 0x2c5   :  { %1566 = vmatpush1.msra.mxu0 %v11265_v50 }
 0x2c6   :  { %1567 = vmatprep.subr.mxu0 %v11266_v39  ;;  %v11272_v39 = vld [vmem:[#allocation88_spill] sm:$0xff] }
 0x2c7   :  { %1568 = vmatpush1.msra.mxu0 %v11267_v18  ;;  %v1298_v18 = vadd.f32 %v1223_v34, %v11272_v39 }
 0x2c8   :  { %1569 = vmatprep.subr.mxu0 %v11268_v40  ;;  %v11273_v40 = vld [vmem:[#allocation86_spill] sm:$0xff] }
 0x2c9   :  { %1570 = vmatpush1.msra.mxu0 %v11269_v59  ;;  %v1297_v59 = vadd.f32 %v1221_v60, %v11273_v40 }
 0x2ca   :  { %1711 = vmatprep.subr.mxu0 %v7716_v47  ;;  %v5077_v47 = vmul.f32 -1.442695, %v1298_v18 }
 0x2cb   :  { %v5076_v23 = vmul.f32 -1.442695, %v1297_v59  ;;  %v7852_v59 = vld [vmem:[#allocation6 + $0x1e0] sm:$0xff] }
 0x2cc   :  { %5584 = vpow2.f32 %v5077_v47  ;;  %11278 = vst [vmem:[#allocation34_spill] sm:$0xff] %v7852_v59 }
 0x2cd   :  { %5586 = vpow2.f32 %v5076_v23 }
 0x2d9   :  { %v5585_v8 = vpop.eup %5584 }
 0x2da   :  { %v5587_v53 = vpop.eup %5586  ;;  %v1310_v1 = vadd.f32 1.0, %v5585_v8 }
 0x2db   :  { %v1304_v55 = vadd.f32 1.0, %v5587_v53 }
 0x2dc   :  { %5588 = vrcp.f32 %v1310_v1 }
 0x2dd   :  { %5590 = vrcp.f32 %v1304_v55 }
 0x2e9   :  { %v5589_v60 = vpop.eup %5588 }
 0x2ea   :  { %v5591_v39 = vpop.eup %5590  ;;  %v1320_v23 = vmul.f32 %v5589_v60, %v7218_v10  ;;  %v7756_v10 = vld [vmem:[#allocation2 + $0x160] sm:$0xff]  ;;  %v7878_v60 = vld [vmem:[#allocation6 + $0x168] sm:$0xff] }
 0x2eb   :  { %11285 = vst [vmem:[#allocation48_spill] sm:$0xff] %v7878_v60 }
 0x32a   :  { %v1149_v51 = vpop.f32.mrf.mxu0 }
 0x32b   :  { %v1150_v29 = vadd.f32 %v7722_v27, %v1149_v51 }
 0x32c   :  { %v5295_v50 = vpop.f32.mrf.mxu0 }
 0x32d   :  { %1154 = vst.msk [vmem:[%s10546_s9] sm:$0xff] %vm1153_vm2, %v1150_v29  ;;  %v11274_v50 = vld [vmem:[#allocation87_spill] sm:$0xff]  ;;  %v11275_v29 = vld [vmem:[#allocation89_spill] sm:$0xff] }
 0x34a   :  { %v1292_v51 = vpop.f32.mrf.mxu0 }
 0x34b   :  { %v1299_v27 = vadd.f32 %v1292_v51, %v11274_v50  ;;  %v7856_v51 = vld [vmem:[#allocation6 + $0x1c8] sm:$0xff] }
 0x34c   :  { %v1294_v43 = vpop.f32.mrf.mxu0  ;;  %11279 = vst [vmem:[#allocation36_spill] sm:$0xff] %v7856_v51  ;;  %v7865_v50 = vld [vmem:[#allocation6 + $0x1a8] sm:$0xff] }
 0x34d   :  { %5592 = vtanh.f32 %v1299_v27  ;;  %v1300_v37 = vadd.f32 %v1294_v43, %v11275_v29  ;;  %v7840_v43 = vld [vmem:[#allocation2 + $0x8] sm:$0xff]  ;;  %11281 = vst [vmem:[#allocation40_spill] sm:$0xff] %v7865_v50  ;;  %v7869_v29 = vld [vmem:[#allocation6 + $0x1a0] sm:$0xff] }
 0x34e   :  { %11282 = vst [vmem:[#allocation42_spill] sm:$0xff] %v7869_v29 }
 0x34f   :  { %v5078_v34 = vmul.f32 -1.442695, %v1300_v37 }
 0x351   :  { %5594 = vpow2.f32 %v5078_v34  ;;  %v7872_v34 = vld [vmem:[#allocation6 + $0x188] sm:$0xff] }
 0x352   :  { %11283 = vst [vmem:[#allocation44_spill] sm:$0xff] %v7872_v34 }
 0x35a   :  { %v5593_v18 = vpop.eup %5592 }
 0x35b   :  { %v1321_v47 = vmul.f32 %v5593_v18, %v5591_v39  ;;  %v7881_v39 = vld [vmem:[#allocation6 + $0x160] sm:$0xff] }
 0x35c   :  { %11286 = vst [vmem:[#allocation50_spill] sm:$0xff] %v7881_v39  ;;  %v7887_v18 = vld [vmem:[#allocation6 + $0x140] sm:$0xff] }
 0x35d   :  { %v7734_v40 = vadd.f32 %v1321_v47, %v1320_v23  ;;  %11288 = vst [vmem:[#allocation54_spill] sm:$0xff] %v7887_v18  ;;  %v7890_v23 = vld [vmem:[#allocation6 + $0x128] sm:$0xff]  ;;  %v7893_v47 = vld [vmem:[#allocation6 + $0x120] sm:$0xff] }
 0x35e   :  { %v5595_v53 = vpop.eup %5594  ;;  %11289 = vst [vmem:[#allocation56_spill] sm:$0xff] %v7890_v23  ;;  %11290 = vst [vmem:[#allocation58_spill] sm:$0xff] %v7893_v47 }
 0x35f   :  { %v1317_v8 = vadd.f32 1.0, %v5595_v53  ;;  %5596 = vtanh.f32 %v7734_v40  ;;  %v7896_v53 = vld [vmem:[#allocation6 + $0x108] sm:$0xff] }
 0x360   :  { %11291 = vst [vmem:[#allocation60_spill] sm:$0xff] %v7896_v53 }
 0x361   :  { %5598 = vrcp.f32 %v1317_v8  ;;  %v7899_v8 = vld [vmem:[#allocation6 + $0x100] sm:$0xff] }
 0x362   :  { %11292 = vst [vmem:[#allocation62_spill] sm:$0xff] %v7899_v8 }
 0x36c   :  { %v5597_v55 = vpop.eup %5596 }
 0x36e   :  { %v5599_v1 = vpop.eup %5598 }
 0x36f   :  { %v7737_v27 = vmul.f32 %v5599_v1, %v5597_v55  ;;  %v7902_v55 = vld [vmem:[#allocation6 + $0xe8] sm:$0xff]  ;;  %v7905_v1 = vld [vmem:[#allocation6 + $0xe0] sm:$0xff] }
 0x370   :  { %11293 = vst [vmem:[#allocation64_spill] sm:$0xff] %v7902_v55  ;;  %11294 = vst [vmem:[#allocation66_spill] sm:$0xff] %v7905_v1 }
 0x371   :  { %5600 = vtanh.f32 %v7737_v27 }
 0x37e   :  { %v5601_v37 = vpop.eup %5600 }
 0x37f   :  { %1533 = vmatmul.mubr.f32.vlgmr.msra.gmra.mxu1 %v5601_v37  ;;  %1604 = vmatmul.mubr.f32.vlgmr.msra.gmra.mxu0 %v5601_v37  ;;  %v7908_v37 = vld [vmem:[#allocation6 + $0xc8] sm:$0xff] }
 0x380   :  { %1712 = vmatpush1.msra.mxu0 %v7224_v62  ;;  %1775 = vmatprep.mubr.f32.mxu0 %v11109_v2  ;;  %v7760_v62 = vld [vmem:[#allocation2 + $0x148] sm:$0xff]  ;;  %11295 = vst [vmem:[#allocation68_spill] sm:$0xff] %v7908_v37 }
 0x381   :  { %1713 = vmatprep.subr.mxu0 %v7228_v19  ;;  %5297 = vmatpush3.msra.mxu1 %v7310_v3  ;;  %v7764_v19 = vld [vmem:[#allocation2 + $0x140] sm:$0xff]  ;;  %v7792_v3 = vld [vmem:[#allocation2 + $0xc8] sm:$0xff] }
 0x382   :  { %1714 = vmatpush1.msra.mxu0 %v7231_v16  ;;  %5298 = vmatprep.subr.mxu1 %v11109_v2  ;;  %v7768_v16 = vld [vmem:[#allocation2 + $0x128] sm:$0xff] }
 0x383   :  { %1715 = vmatprep.subr.mxu0 %v7234_v58  ;;  %5299 = vmatpush3.msra.mxu1 %v7317_v5  ;;  %v7772_v58 = vld [vmem:[#allocation2 + $0x120] sm:$0xff] }
 0x384   :  { %1716 = vmatpush1.msra.mxu0 %v7237_v6  ;;  %5300 = vmatprep.subr.mxu1 %v11109_v2  ;;  %v7776_v6 = vld [vmem:[#allocation2 + $0x108] sm:$0xff]  ;;  %v7796_v5 = vld [vmem:[#allocation2 + $0xc0] sm:$0xff] }
 0x385   :  { %1717 = vmatprep.subr.mxu0 %v7240_v44  ;;  %5301 = vmatpush3.msra.mxu1 %v7324_v7  ;;  %v7780_v44 = vld [vmem:[#allocation2 + $0x100] sm:$0xff]  ;;  %v7800_v7 = vld [vmem:[#allocation2 + $0xa8] sm:$0xff] }
 0x386   :  { %1718 = vmatpush1.msra.mxu0 %v7243_v36  ;;  %5302 = vmatprep.subr.mxu1 %v11109_v2  ;;  %v7784_v36 = vld [vmem:[#allocation2 + $0xe8] sm:$0xff] }
 0x387   :  { %1719 = vmatprep.subr.mxu0 %v7246_v54  ;;  %5303 = vmatpush3.msra.mxu1 %v7331_v11  ;;  %v7788_v54 = vld [vmem:[#allocation2 + $0xe0] sm:$0xff] }
 0x388   :  { %1720 = vmatpush1.msra.mxu0 %v7756_v10  ;;  %5304 = vmatprep.subr.mxu1 %v11109_v2  ;;  %v7804_v11 = vld [vmem:[#allocation2 + $0xa0] sm:$0xff] }
 0x389   :  { %1721 = vmatprep.subr.mxu0 %v7760_v62  ;;  %5305 = vmatpush3.msra.mxu1 %v7338_v13  ;;  %v7808_v13 = vld [vmem:[#allocation2 + $0x88] sm:$0xff] }
 0x38a   :  { %1722 = vmatpush1.msra.mxu0 %v7764_v19  ;;  %5306 = vmatprep.subr.mxu1 %v11109_v2 }
 0x38b   :  { %1723 = vmatprep.subr.mxu0 %v7768_v16  ;;  %5307 = vmatpush3.msra.mxu1 %v7345_v15  ;;  %v7812_v15 = vld [vmem:[#allocation2 + $0x80] sm:$0xff] }
 0x38c   :  { %1724 = vmatpush1.msra.mxu0 %v7772_v58  ;;  %5308 = vmatprep.subr.mxu1 %v11109_v2 }
 0x38d   :  { %1725 = vmatprep.subr.mxu0 %v7776_v6  ;;  %5309 = vmatpush3.msra.mxu1 %v7352_v17  ;;  %v7816_v17 = vld [vmem:[#allocation2 + $0x68] sm:$0xff] }
 0x38e   :  { %1726 = vmatpush1.msra.mxu0 %v7780_v44  ;;  %5310 = vmatprep.subr.mxu1 %v11109_v2 }
 0x38f   :  { %1727 = vmatprep.subr.mxu0 %v7784_v36  ;;  %5311 = vmatpush3.msra.mxu1 %v7359_v20  ;;  %v7820_v20 = vld [vmem:[#allocation2 + $0x60] sm:$0xff] }
 0x390   :  { %1728 = vmatpush1.msra.mxu0 %v7788_v54  ;;  %5312 = vmatprep.subr.mxu1 %v11109_v2 }
 0x391   :  { %1729 = vmatprep.subr.mxu0 %v7792_v3  ;;  %5313 = vmatpush3.msra.mxu1 %v7364_v22  ;;  %v7824_v22 = vld [vmem:[#allocation2 + $0x48] sm:$0xff] }
 0x392   :  { %1730 = vmatpush1.msra.mxu0 %v7796_v5  ;;  %5314 = vmatprep.subr.mxu1 %v11109_v2 }
 0x393   :  { %1731 = vmatprep.subr.mxu0 %v7800_v7  ;;  %5315 = vmatpush3.msra.mxu1 %v7371_v24  ;;  %v7828_v24 = vld [vmem:[#allocation2 + $0x40] sm:$0xff] }
 0x394   :  { %1732 = vmatpush1.msra.mxu0 %v7804_v11  ;;  %5316 = vmatprep.subr.mxu1 %v11109_v2 }
 0x395   :  { %1733 = vmatprep.subr.mxu0 %v7808_v13  ;;  %5317 = vmatpush3.msra.mxu1 %v7378_v26  ;;  %v7832_v26 = vld [vmem:[#allocation2 + $0x28] sm:$0xff] }
 0x396   :  { %1734 = vmatpush1.msra.mxu0 %v7812_v15  ;;  %5318 = vmatprep.subr.mxu1 %v11109_v2 }
 0x397   :  { %1735 = vmatprep.subr.mxu0 %v7816_v17  ;;  %5319 = vmatpush3.msra.mxu1 %v7387_v28  ;;  %v7836_v28 = vld [vmem:[#allocation2 + $0x20] sm:$0xff] }
 0x398   :  { %1736 = vmatpush1.msra.mxu0 %v7820_v20  ;;  %5320 = vmatprep.subr.mxu1 %v11109_v2 }
 0x399   :  { %1737 = vmatprep.subr.mxu0 %v7824_v22  ;;  %5321 = vmatpush3.msra.mxu1 %v7394_v31  ;;  %v7844_v31 = vld [vmem:[#allocation2] sm:$0xff] }
 0x39a   :  { %1738 = vmatpush1.msra.mxu0 %v7828_v24  ;;  %5322 = vmatprep.subr.mxu1 %v11109_v2  ;;  %11276 = vst [vmem:[#allocation30_spill] sm:$0xff] %v7844_v31 }
 0x39b   :  { %1739 = vmatprep.subr.mxu0 %v7832_v26  ;;  %5323 = vmatpush3.msra.mxu1 %v7401_v35  ;;  %v7849_v35 = vld [vmem:[#allocation6 + $0x1e8] sm:$0xff] }
 0x39c   :  { %1740 = vmatpush1.msra.mxu0 %v7836_v28  ;;  %5324 = vmatprep.subr.mxu1 %v11109_v2  ;;  %11277 = vst [vmem:[#allocation32_spill] sm:$0xff] %v7849_v35 }
 0x39d   :  { %1741 = vmatprep.subr.mxu0 %v7840_v43  ;;  %5325 = vmatpush3.msra.mxu1 %v7408_v38  ;;  %v7860_v38 = vld [vmem:[#allocation6 + $0x1c0] sm:$0xff] }
 0x39e   :  { %1742 = vmatpush1.msra.mxu0 %v7844_v31  ;;  %5326 = vmatprep.subr.mxu1 %v11109_v2  ;;  %11280 = vst [vmem:[#allocation38_spill] sm:$0xff] %v7860_v38 }
 0x39f   :  { %1776 = vmatmul.mubr.f32.vlgmr.msra.gmra.mxu0 %v7737_v27  ;;  %1882 = vmatprep.subr.mxu0 %v7849_v35 }
 0x3a0   :  { %1883 = vmatpush1.msra.mxu0 %v7852_v59  ;;  %1946 = vmatprep.mubr.f32.mxu0 %v11109_v2 }
 0x3a1   :  { %1884 = vmatprep.subr.mxu0 %v7856_v51  ;;  %5327 = vmatpush3.msra.mxu1 %v7415_v42  ;;  %v7875_v42 = vld [vmem:[#allocation6 + $0x180] sm:$0xff] }
 0x3a2   :  { %1885 = vmatpush1.msra.mxu0 %v7860_v38  ;;  %5328 = vmatprep.mubr.msk.f32.mxu1 %vm6607_vm1, %v11109_v2  ;;  %11284 = vst [vmem:[#allocation46_spill] sm:$0xff] %v7875_v42 }
 0x3a3   :  { %1886 = vmatprep.subr.mxu0 %v7865_v50  ;;  %1782 = vmatprep.subr.mxu1 %v7420_v45  ;;  %v7884_v45 = vld [vmem:[#allocation6 + $0x148] sm:$0xff] }
 0x3a4   :  { %1887 = vmatpush1.msra.mxu0 %v7869_v29  ;;  %11287 = vst [vmem:[#allocation52_spill] sm:$0xff] %v7884_v45 }
 0x3a5   :  { %1888 = vmatprep.subr.mxu0 %v7872_v34 }
 0x3a6   :  { %1889 = vmatpush1.msra.mxu0 %v7875_v42 }
 0x3a7   :  { %1890 = vmatprep.subr.mxu0 %v7878_v60 }
 0x3a8   :  { %1891 = vmatpush1.msra.mxu0 %v7881_v39 }
 0x3a9   :  { %1892 = vmatprep.subr.mxu0 %v7884_v45 }
 0x3aa   :  { %1893 = vmatpush1.msra.mxu0 %v7887_v18 }
 0x3ab   :  { %1894 = vmatprep.subr.mxu0 %v7890_v23  ;;  %v1463_v23 = vpop.f32.mrf.mxu0 }
 0x3ac   :  { %1895 = vmatpush1.msra.mxu0 %v7893_v47  ;;  %v7911_v47 = vld [vmem:[#allocation6 + $0xc0] sm:$0xff] }
 0x3ad   :  { %1896 = vmatprep.subr.mxu0 %v7896_v53  ;;  %11296 = vst [vmem:[#allocation70_spill] sm:$0xff] %v7911_v47  ;;  %v7914_v53 = vld [vmem:[#allocation6 + $0xa8] sm:$0xff]  ;;  %v1465_v45 = vpop.f32.mrf.mxu0 }
 0x3ae   :  { %1897 = vmatpush1.msra.mxu0 %v7899_v8  ;;  %11297 = vst [vmem:[#allocation72_spill] sm:$0xff] %v7914_v53  ;;  %v7917_v8 = vld [vmem:[#allocation6 + $0xa0] sm:$0xff] }
 0x3af   :  { %1898 = vmatprep.subr.mxu0 %v7902_v55  ;;  %11298 = vst [vmem:[#allocation74_spill] sm:$0xff] %v7917_v8  ;;  %v7920_v55 = vld [vmem:[#allocation6 + $0x88] sm:$0xff] }
 0x3b0   :  { %1899 = vmatpush1.msra.mxu0 %v7905_v1  ;;  %11299 = vst [vmem:[#allocation76_spill] sm:$0xff] %v7920_v55  ;;  %v7923_v1 = vld [vmem:[#allocation6 + $0x80] sm:$0xff] }
 0x3b1   :  { %1900 = vmatprep.subr.mxu0 %v7908_v37  ;;  %11300 = vst [vmem:[#allocation78_spill] sm:$0xff] %v7923_v1  ;;  %v7926_v37 = vld [vmem:[#allocation6 + $0x68] sm:$0xff] }
 0x3b2   :  { %1901 = vmatpush1.msra.mxu0 %v7911_v47  ;;  %11301 = vst [vmem:[#allocation80_spill] sm:$0xff] %v7926_v37  ;;  %v7929_v47 = vld [vmem:[#allocation6 + $0x60] sm:$0xff] }
 0x3b3   :  { %1902 = vmatprep.subr.mxu0 %v7914_v53  ;;  %11302 = vst [vmem:[#allocation82_spill] sm:$0xff] %v7929_v47  ;;  %v7932_v53 = vld [vmem:[#allocation6 + $0x48] sm:$0xff] }
 0x3b4   :  { %1903 = vmatpush1.msra.mxu0 %v7917_v8  ;;  %11303 = vst [vmem:[#allocation84_spill] sm:$0xff] %v7932_v53  ;;  %v7935_v8 = vld [vmem:[#allocation6 + $0x40] sm:$0xff] }
 0x3b5   :  { %1904 = vmatprep.subr.mxu0 %v7920_v55  ;;  %11304 = vst [vmem:[#allocation88_spill] sm:$0xff] %v7935_v8  ;;  %v7938_v55 = vld [vmem:[#allocation6 + $0x28] sm:$0xff] }
 0x3b6   :  { %1905 = vmatpush1.msra.mxu0 %v7923_v1  ;;  %11305 = vst [vmem:[#allocation86_spill] sm:$0xff] %v7938_v55  ;;  %v7941_v1 = vld [vmem:[#allocation6 + $0x20] sm:$0xff] }
 0x3b7   :  { %1906 = vmatprep.subr.mxu0 %v7926_v37  ;;  %11306 = vst [vmem:[#allocation87_spill] sm:$0xff] %v7941_v1  ;;  %v7944_v37 = vld [vmem:[#allocation6 + $0x8] sm:$0xff] }
 0x3b8   :  { %1907 = vmatpush1.msra.mxu0 %v7929_v47  ;;  %11307 = vst [vmem:[#allocation89_spill] sm:$0xff] %v7944_v37  ;;  %v7947_v47 = vld [vmem:[#allocation6] sm:$0xff] }
 0x3b9   :  { %1908 = vmatprep.subr.mxu0 %v7932_v53  ;;  %11308 = vst [vmem:[#allocation118_spill] sm:$0xff] %v7947_v47  ;;  %v7950_v53 = vld [vmem:[#allocation4 + $0x1e8] sm:$0xff] }
 0x3ba   :  { %1909 = vmatpush1.msra.mxu0 %v7935_v8  ;;  %11309 = vst [vmem:[#allocation119_spill] sm:$0xff] %v7950_v53  ;;  %v1392_v8 = vpop.f32.mrf.mxu1 }
 0x3bb   :  { %1910 = vmatprep.subr.mxu0 %v7938_v55 }
 0x3bc   :  { %1911 = vmatpush1.msra.mxu0 %v7941_v1  ;;  %v1394_v18 = vpop.f32.mrf.mxu1 }
 0x3bd   :  { %1912 = vmatprep.subr.mxu0 %v7944_v37 }
 0x3be   :  { %1913 = vmatpush1.msra.mxu0 %v7947_v47 }
 0x3bf   :  { %2024 = vmatprep.subr.mxu0 %v7950_v53 }
 0x43f   :  { %v1534_v55 = vpop.f32.mrf.mxu1  ;;  %v1605_v42 = vpop.f32.mrf.mxu0 }
 0x440   :  { %v1535_v39 = vadd.f32 %v1534_v55, %v1392_v8  ;;  %v1606_v51 = vadd.f32 %v1605_v42, %v1463_v23  ;;  %v7975_v23 = vld [vmem:[#allocation4 + $0x1a8] sm:$0xff] }
 0x441   :  { %v1536_v60 = vpop.f32.mrf.mxu1  ;;  %v1607_v50 = vpop.f32.mrf.mxu0 }
 0x442   :  { %v1610_v1 = vadd.f32 %v1535_v39, %v7428_v4  ;;  %v1537_v34 = vadd.f32 %v1536_v60, %v1394_v18  ;;  %v1608_v38 = vadd.f32 %v1607_v50, %v1465_v45  ;;  %v1612_v8 = vadd.f32 %v1606_v51, %v7443_v41  ;;  %v7972_v45 = vld [vmem:[#allocation4 + $0x1c0] sm:$0xff] }
 0x444   :  { %v5079_v37 = vmul.f32 -1.442695, %v1610_v1  ;;  %v1611_v29 = vadd.f32 %v1537_v34, %v7432_v33  ;;  %v1613_v53 = vadd.f32 %v1608_v38, %v7438_v32  ;;  %v7981_v1 = vld [vmem:[#allocation4 + $0x188] sm:$0xff] }
 0x446   :  { %5602 = vpow2.f32 %v5079_v37  ;;  %v5080_v47 = vmul.f32 -1.442695, %v1611_v29  ;;  %v5081_v59 = vmul.f32 -1.442695, %v1613_v53  ;;  %v7978_v53 = vld [vmem:[#allocation4 + $0x1a0] sm:$0xff] }
 0x447   :  { %v7984_v37 = vld [vmem:[#allocation4 + $0x180] sm:$0xff] }
 0x448   :  { %5604 = vpow2.f32 %v5080_v47 }
 0x449   :  { %5606 = vpow2.f32 %v5081_v59 }
 0x453   :  { %v5603_v35 = vpop.eup %5602 }
 0x454   :  { %v1617_v55 = vadd.f32 1.0, %v5603_v35 }
 0x455   :  { %v5605_v31 = vpop.eup %5604 }
 0x456   :  { %5608 = vrcp.f32 %v1617_v55  ;;  %v1623_v60 = vadd.f32 1.0, %v5605_v31  ;;  %v5607_v34 = vpop.eup %5606  ;;  %v7965_v31 = vld [vmem:[#allocation4 + $0x1e0] sm:$0xff] }
 0x457   :  { %5610 = vtanh.f32 %v1612_v8  ;;  %v1630_v47 = vadd.f32 1.0, %v5607_v34  ;;  %v7987_v8 = vld [vmem:[#allocation4 + $0x168] sm:$0xff]  ;;  %v7990_v55 = vld [vmem:[#allocation4 + $0x160] sm:$0xff] }
 0x458   :  { %5612 = vrcp.f32 %v1623_v60  ;;  %v7993_v60 = vld [vmem:[#allocation4 + $0x148] sm:$0xff]  ;;  %v7996_v34 = vld [vmem:[#allocation4 + $0x140] sm:$0xff] }
 0x459   :  { %5614 = vrcp.f32 %v1630_v47  ;;  %v8005_v47 = vld [vmem:[#allocation4 + $0x108] sm:$0xff] }
 0x463   :  { %v5609_v39 = vpop.eup %5608 }
 0x464   :  { %v5611_v29 = vpop.eup %5610 }
 0x465   :  { %v5613_v18 = vpop.eup %5612  ;;  %v1634_v50 = vmul.f32 %v5611_v29, %v5609_v39  ;;  %v7999_v39 = vld [vmem:[#allocation4 + $0x128] sm:$0xff] }
 0x466   :  { %v1633_v38 = vmul.f32 %v5613_v18, %v7446_v63  ;;  %v5615_v35 = vpop.eup %5614  ;;  %v7969_v63 = vld [vmem:[#allocation4 + $0x1c8] sm:$0xff]  ;;  %v8002_v18 = vld [vmem:[#allocation4 + $0x120] sm:$0xff] }
 0x468   :  { %v7958_v42 = vadd.f32 %v1634_v50, %v1633_v38  ;;  %v8011_v50 = vld [vmem:[#allocation4 + $0x100] sm:$0xff]  ;;  %v8015_v38 = vld [vmem:[#allocation4 + $0xe8] sm:$0xff] }
 0x46a   :  { %5616 = vtanh.f32 %v7958_v42 }
 0x477   :  { %v5617_v51 = vpop.eup %5616 }
 0x478   :  { %v7961_v59 = vmul.f32 %v5617_v51, %v5615_v35  ;;  %v8019_v35 = vld [vmem:[#allocation4 + $0xe0] sm:$0xff]  ;;  %v8063_v51 = vld [vmem:[#allocation4 + $0x28] sm:$0xff] }
 0x47a   :  { %5618 = vtanh.f32 %v7961_v59  ;;  %1947 = vmatmul.mubr.f32.vlgmr.msra.gmra.mxu0 %v7961_v59 }
 0x47b   :  { %2025 = vmatpush1.msra.mxu0 %v7965_v31  ;;  %2088 = vmatprep.mubr.f32.mxu0 %v11109_v2 }
 0x47c   :  { %2026 = vmatprep.subr.mxu0 %v7969_v63 }
 0x47d   :  { %2027 = vmatpush1.msra.mxu0 %v7972_v45 }
 0x47e   :  { %2028 = vmatprep.subr.mxu0 %v7975_v23 }
 0x47f   :  { %2029 = vmatpush1.msra.mxu0 %v7978_v53 }
 0x480   :  { %2030 = vmatprep.subr.mxu0 %v7981_v1 }
 0x481   :  { %2031 = vmatpush1.msra.mxu0 %v7984_v37 }
 0x482   :  { %2032 = vmatprep.subr.mxu0 %v7987_v8 }
 0x483   :  { %2033 = vmatpush1.msra.mxu0 %v7990_v55 }
 0x484   :  { %2034 = vmatprep.subr.mxu0 %v7993_v60 }
 0x485   :  { %2035 = vmatpush1.msra.mxu0 %v7996_v34 }
 0x486   :  { %2036 = vmatprep.subr.mxu0 %v7999_v39 }
 0x487   :  { %v5619_v29 = vpop.eup %5618  ;;  %2037 = vmatpush1.msra.mxu0 %v8002_v18 }
 0x488   :  { %5329 = vmatmul.mubr.f32.vlgmr.msra.gmra.mxu1 %v5619_v29  ;;  %2038 = vmatprep.subr.mxu0 %v8005_v47  ;;  %v8067_v29 = vld [vmem:[#allocation4 + $0x20] sm:$0xff] }
 0x489   :  { %1783 = vmatpush1.msra.mxu1 %v7468_v46  ;;  %1846 = vmatprep.mubr.f32.mxu1 %v11109_v2  ;;  %v8023_v46 = vld [vmem:[#allocation4 + $0xc8] sm:$0xff] }
 0x48a   :  { %1784 = vmatprep.subr.mxu1 %v7472_v48  ;;  %2039 = vmatpush1.msra.mxu0 %v8011_v50  ;;  %11310 = vst [vmem:[#allocation120_spill] sm:$0xff] %v8023_v46  ;;  %v8027_v48 = vld [vmem:[#allocation4 + $0xc0] sm:$0xff] }
 0x48b   :  { %1785 = vmatpush1.msra.mxu1 %v7476_v52  ;;  %2040 = vmatprep.subr.mxu0 %v8015_v38  ;;  %11311 = vst [vmem:[#allocation121_spill] sm:$0xff] %v8027_v48  ;;  %v8031_v52 = vld [vmem:[#allocation4 + $0xa8] sm:$0xff] }
 0x48c   :  { %1786 = vmatprep.subr.mxu1 %v7480_v57  ;;  %2041 = vmatpush1.msra.mxu0 %v8019_v35  ;;  %11312 = vst [vmem:[#allocation122_spill] sm:$0xff] %v8031_v52  ;;  %v8035_v57 = vld [vmem:[#allocation4 + $0xa0] sm:$0xff] }
 0x48d   :  { %1787 = vmatpush1.msra.mxu1 %v7484_v61  ;;  %2042 = vmatprep.subr.mxu0 %v8023_v46  ;;  %11313 = vst [vmem:[#allocation123_spill] sm:$0xff] %v8035_v57  ;;  %v8039_v61 = vld [vmem:[#allocation4 + $0x88] sm:$0xff] }
 0x48e   :  { %1788 = vmatprep.subr.mxu1 %v7488_v49  ;;  %2043 = vmatpush1.msra.mxu0 %v8027_v48  ;;  %11314 = vst [vmem:[#allocation124_spill] sm:$0xff] %v8039_v61  ;;  %v8043_v49 = vld [vmem:[#allocation4 + $0x80] sm:$0xff] }
 0x48f   :  { %1789 = vmatpush1.msra.mxu1 %v7492_v25  ;;  %2044 = vmatprep.subr.mxu0 %v8031_v52  ;;  %11315 = vst [vmem:[#allocation125_spill] sm:$0xff] %v8043_v49  ;;  %v8047_v25 = vld [vmem:[#allocation4 + $0x68] sm:$0xff] }
 0x490   :  { %1790 = vmatprep.subr.mxu1 %v7496_v56  ;;  %2045 = vmatpush1.msra.mxu0 %v8035_v57  ;;  %11316 = vst [vmem:[#allocation126_spill] sm:$0xff] %v8047_v25  ;;  %v8051_v56 = vld [vmem:[#allocation4 + $0x60] sm:$0xff] }
 0x491   :  { %1791 = vmatpush1.msra.mxu1 %v7500_v12  ;;  %2046 = vmatprep.subr.mxu0 %v8039_v61  ;;  %11317 = vst [vmem:[#allocation127_spill] sm:$0xff] %v8051_v56  ;;  %v8055_v12 = vld [vmem:[#allocation4 + $0x48] sm:$0xff] }
 0x492   :  { %1792 = vmatprep.subr.mxu1 %v7504_v0  ;;  %2047 = vmatpush1.msra.mxu0 %v8043_v49  ;;  %11318 = vst [vmem:[#allocation128_spill] sm:$0xff] %v8055_v12  ;;  %v8059_v0 = vld [vmem:[#allocation4 + $0x40] sm:$0xff]  ;;  %v11339_v49 = vld [vmem:[#allocation24_spill] sm:$0xff] }
 0x493   :  { %1793 = vmatpush1.msra.mxu1 %v7508_v21  ;;  %2048 = vmatprep.subr.mxu0 %v8047_v25  ;;  %11319 = vst [vmem:[#allocation129_spill] sm:$0xff] %v8059_v0  ;;  %v11320_v21 = vld [vmem:[#allocation9_spill] sm:$0xff] }
 0x494   :  { %1794 = vmatprep.subr.mxu1 %v7512_v9  ;;  %2049 = vmatpush1.msra.mxu0 %v8051_v56  ;;  %11321 = vst [vmem:[#allocation9_spill] sm:$0xff] %v8063_v51  ;;  %v11322_v9 = vld [vmem:[#allocation10_spill] sm:$0xff]  ;;  %v11336_v25 = vld [vmem:[#allocation21_spill] sm:$0xff] }
 0x495   :  { %1795 = vmatpush1.msra.mxu1 %v7516_v14  ;;  %2050 = vmatprep.subr.mxu0 %v8055_v12  ;;  %11323 = vst [vmem:[#allocation10_spill] sm:$0xff] %v8067_v29  ;;  %v11324_v14 = vld [vmem:[#allocation11_spill] sm:$0xff]  ;;  %v8071_v12 = vld [vmem:[#allocation4 + $0x8] sm:$0xff] }
 0x496   :  { %1796 = vmatprep.subr.mxu1 %v7520_v30  ;;  %2051 = vmatpush1.msra.mxu0 %v8059_v0  ;;  %11325 = vst [vmem:[#allocation11_spill] sm:$0xff] %v8071_v12  ;;  %v11326_v30 = vld [vmem:[#allocation12_spill] sm:$0xff]  ;;  %v8075_v0 = vld [vmem:[#allocation4] sm:$0xff]  ;;  %v11333_v56 = vld [vmem:[#allocation18_spill] sm:$0xff] }
 0x497   :  { %1797 = vmatpush1.msra.mxu1 %v11320_v21  ;;  %2052 = vmatprep.subr.mxu0 %v8063_v51  ;;  %11327 = vst [vmem:[#allocation12_spill] sm:$0xff] %v8075_v0  ;;  %v11328_v21 = vld [vmem:[#allocation13_spill] sm:$0xff]  ;;  %v11330_v51 = vld [vmem:[#allocation15_spill] sm:$0xff] }
 0x498   :  { %1798 = vmatprep.subr.mxu1 %v11322_v9  ;;  %2053 = vmatpush1.msra.mxu0 %v8067_v29  ;;  %v11329_v9 = vld [vmem:[#allocation14_spill] sm:$0xff]  ;;  %v11331_v29 = vld [vmem:[#allocation16_spill] sm:$0xff] }
 0x499   :  { %1799 = vmatpush1.msra.mxu1 %v11324_v14  ;;  %2054 = vmatprep.subr.mxu0 %v8071_v12  ;;  %v11332_v14 = vld [vmem:[#allocation17_spill] sm:$0xff]  ;;  %v11334_v12 = vld [vmem:[#allocation19_spill] sm:$0xff] }
 0x49a   :  { %1800 = vmatprep.subr.mxu1 %v11326_v30  ;;  %2055 = vmatpush1.msra.mxu0 %v8075_v0  ;;  %v11335_v30 = vld [vmem:[#allocation20_spill] sm:$0xff]  ;;  %v11337_v0 = vld [vmem:[#allocation22_spill] sm:$0xff] }
 0x49b   :  { %1801 = vmatpush1.msra.mxu1 %v11328_v21  ;;  %5331 = vmatprep.subr.mxu0 %v11109_v2  ;;  %v11338_v21 = vld [vmem:[#allocation23_spill] sm:$0xff] }
 0x49c   :  { %1802 = vmatprep.subr.mxu1 %v11329_v9  ;;  %v11340_v9 = vld [vmem:[#allocation25_spill] sm:$0xff] }
 0x49d   :  { %1803 = vmatpush1.msra.mxu1 %v11330_v51  ;;  %v11341_v51 = vld [vmem:[#allocation27_spill] sm:$0xff] }
 0x49e   :  { %1804 = vmatprep.subr.mxu1 %v11331_v29  ;;  %v11342_v29 = vld [vmem:[#allocation29_spill] sm:$0xff] }
 0x49f   :  { %1805 = vmatpush1.msra.mxu1 %v11332_v14  ;;  %v11347_v14 = vld [vmem:[#allocation39_spill] sm:$0xff] }
 0x4a0   :  { %1806 = vmatprep.subr.mxu1 %v11333_v56  ;;  %v11343_v56 = vld [vmem:[#allocation31_spill] sm:$0xff] }
 0x4a1   :  { %1807 = vmatpush1.msra.mxu1 %v11334_v12  ;;  %v11344_v12 = vld [vmem:[#allocation33_spill] sm:$0xff] }
 0x4a2   :  { %1808 = vmatprep.subr.mxu1 %v11335_v30  ;;  %v11349_v30 = vld [vmem:[#allocation43_spill] sm:$0xff] }
 0x4a3   :  { %1809 = vmatpush1.msra.mxu1 %v11336_v25  ;;  %v11345_v25 = vld [vmem:[#allocation35_spill] sm:$0xff] }
 0x4a4   :  { %1810 = vmatprep.subr.mxu1 %v11337_v0  ;;  %v11346_v0 = vld [vmem:[#allocation37_spill] sm:$0xff] }
 0x4a5   :  { %1811 = vmatpush1.msra.mxu1 %v11338_v21  ;;  %v11351_v21 = vld [vmem:[#allocation47_spill] sm:$0xff] }
 0x4a6   :  { %1812 = vmatprep.subr.mxu1 %v11339_v49  ;;  %v11348_v49 = vld [vmem:[#allocation41_spill] sm:$0xff] }
 0x4a7   :  { %1813 = vmatpush1.msra.mxu1 %v11340_v9  ;;  %v11352_v9 = vld [vmem:[#allocation49_spill] sm:$0xff] }
 0x4a8   :  { %1847 = vmatmul.mubr.f32.vlgmr.msra.gmra.mxu1 %v7737_v27  ;;  %1953 = vmatprep.subr.mxu1 %v11341_v51  ;;  %v11350_v27 = vld [vmem:[#allocation45_spill] sm:$0xff]  ;;  %v11353_v51 = vld [vmem:[#allocation51_spill] sm:$0xff] }
 0x4a9   :  { %1954 = vmatpush1.msra.mxu1 %v11342_v29  ;;  %2017 = vmatprep.mubr.f32.mxu1 %v11109_v2  ;;  %v11354_v29 = vld [vmem:[#allocation53_spill] sm:$0xff] }
 0x4aa   :  { %1955 = vmatprep.subr.mxu1 %v11343_v56  ;;  %v11355_v56 = vld [vmem:[#allocation55_spill] sm:$0xff] }
 0x4ab   :  { %1956 = vmatpush1.msra.mxu1 %v11344_v12  ;;  %v11356_v12 = vld [vmem:[#allocation57_spill] sm:$0xff] }
 0x4ac   :  { %1957 = vmatprep.subr.mxu1 %v11345_v25  ;;  %v11357_v25 = vld [vmem:[#allocation59_spill] sm:$0xff] }
 0x4ad   :  { %1958 = vmatpush1.msra.mxu1 %v11346_v0  ;;  %v11358_v0 = vld [vmem:[#allocation61_spill] sm:$0xff] }
 0x4ae   :  { %1959 = vmatprep.subr.mxu1 %v11347_v14  ;;  %v11359_v14 = vld [vmem:[#allocation63_spill] sm:$0xff] }
 0x4af   :  { %1960 = vmatpush1.msra.mxu1 %v11348_v49  ;;  %v11360_v49 = vld [vmem:[#allocation65_spill] sm:$0xff] }
 0x4b0   :  { %1961 = vmatprep.subr.mxu1 %v11349_v30  ;;  %v11361_v30 = vld [vmem:[#allocation67_spill] sm:$0xff] }
 0x4b1   :  { %1962 = vmatpush1.msra.mxu1 %v11350_v27  ;;  %v11362_v27 = vld [vmem:[#allocation69_spill] sm:$0xff] }
 0x4b2   :  { %1963 = vmatprep.subr.mxu1 %v11351_v21  ;;  %v11363_v21 = vld [vmem:[#allocation71_spill] sm:$0xff] }
 0x4b3   :  { %1964 = vmatpush1.msra.mxu1 %v11352_v9  ;;  %v11364_v9 = vld [vmem:[#allocation73_spill] sm:$0xff] }
 0x4b4   :  { %1965 = vmatprep.subr.mxu1 %v11353_v51  ;;  %v11365_v51 = vld [vmem:[#allocation75_spill] sm:$0xff] }
 0x4b5   :  { %1966 = vmatpush1.msra.mxu1 %v11354_v29  ;;  %v11366_v29 = vld [vmem:[#allocation77_spill] sm:$0xff] }
 0x4b6   :  { %1967 = vmatprep.subr.mxu1 %v11355_v56  ;;  %v11367_v56 = vld [vmem:[#allocation79_spill] sm:$0xff] }
 0x4b7   :  { %1968 = vmatpush1.msra.mxu1 %v11356_v12  ;;  %v11368_v12 = vld [vmem:[#allocation81_spill] sm:$0xff] }
 0x4b8   :  { %1969 = vmatprep.subr.mxu1 %v11357_v25  ;;  %v11369_v25 = vld [vmem:[#allocation83_spill] sm:$0xff] }
 0x4b9   :  { %1970 = vmatpush1.msra.mxu1 %v11358_v0  ;;  %v11370_v0 = vld [vmem:[#allocation85_spill] sm:$0xff] }
 0x4ba   :  { %1971 = vmatprep.subr.mxu1 %v11359_v14  ;;  %v11371_v14 = vld [vmem:[#allocation114_spill] sm:$0xff] }
 0x4bb   :  { %1972 = vmatpush1.msra.mxu1 %v11360_v49  ;;  %v11372_v49 = vld [vmem:[#allocation115_spill] sm:$0xff] }
 0x4bc   :  { %1973 = vmatprep.subr.mxu1 %v11361_v30  ;;  %v11373_v30 = vld [vmem:[#allocation116_spill] sm:$0xff] }
 0x4bd   :  { %1974 = vmatpush1.msra.mxu1 %v11362_v27  ;;  %v11374_v27 = vld [vmem:[#allocation117_spill] sm:$0xff] }
 0x4be   :  { %1975 = vmatprep.subr.mxu1 %v11363_v21  ;;  %v8130_v21 = vld [vmem:[#allocation4 + $0x1d8] sm:$0xff] }
 0x4bf   :  { %1976 = vmatpush1.msra.mxu1 %v11364_v9  ;;  %11375 = vst [vmem:[#allocation13_spill] sm:$0xff] %v8130_v21  ;;  %v8133_v9 = vld [vmem:[#allocation4 + $0x1d0] sm:$0xff] }
 0x4c0   :  { %1977 = vmatprep.subr.mxu1 %v11365_v51  ;;  %11376 = vst [vmem:[#allocation14_spill] sm:$0xff] %v8133_v9  ;;  %v8136_v51 = vld [vmem:[#allocation4 + $0x1b8] sm:$0xff] }
 0x4c1   :  { %1978 = vmatpush1.msra.mxu1 %v11366_v29  ;;  %11377 = vst [vmem:[#allocation15_spill] sm:$0xff] %v8136_v51  ;;  %v8139_v29 = vld [vmem:[#allocation4 + $0x1b0] sm:$0xff] }
 0x4c2   :  { %1979 = vmatprep.subr.mxu1 %v11367_v56  ;;  %11378 = vst [vmem:[#allocation16_spill] sm:$0xff] %v8139_v29  ;;  %v8145_v56 = vld [vmem:[#allocation4 + $0x190] sm:$0xff] }
 0x4c3   :  { %1980 = vmatpush1.msra.mxu1 %v11368_v12  ;;  %11380 = vst [vmem:[#allocation18_spill] sm:$0xff] %v8145_v56  ;;  %v8148_v12 = vld [vmem:[#allocation4 + $0x178] sm:$0xff] }
 0x4c4   :  { %1981 = vmatprep.subr.mxu1 %v11369_v25  ;;  %11381 = vst [vmem:[#allocation19_spill] sm:$0xff] %v8148_v12  ;;  %v8151_v25 = vld [vmem:[#allocation4 + $0x170] sm:$0xff] }
 0x4c5   :  { %1982 = vmatpush1.msra.mxu1 %v11370_v0  ;;  %11382 = vst [vmem:[#allocation20_spill] sm:$0xff] %v8151_v25  ;;  %v8154_v0 = vld [vmem:[#allocation4 + $0x158] sm:$0xff] }
 0x4c6   :  { %1983 = vmatprep.subr.mxu1 %v11371_v14  ;;  %11383 = vst [vmem:[#allocation21_spill] sm:$0xff] %v8154_v0  ;;  %v8157_v14 = vld [vmem:[#allocation4 + $0x150] sm:$0xff] }
 0x4c7   :  { %1984 = vmatpush1.msra.mxu1 %v11372_v49  ;;  %11384 = vst [vmem:[#allocation22_spill] sm:$0xff] %v8157_v14  ;;  %v8160_v49 = vld [vmem:[#allocation4 + $0x138] sm:$0xff] }
 0x4c8   :  { %2018 = vmatmul.mubr.f32.vlgmr.msra.gmra.mxu1 %v7961_v59  ;;  %2095 = vmatprep.subr.mxu1 %v11373_v30  ;;  %v8142_v59 = vld [vmem:[#allocation4 + $0x198] sm:$0xff]  ;;  %11385 = vst [vmem:[#allocation23_spill] sm:$0xff] %v8160_v49  ;;  %v8163_v30 = vld [vmem:[#allocation4 + $0x130] sm:$0xff] }
 0x4c9   :  { %2096 = vmatpush1.msra.mxu1 %v11374_v27  ;;  %2159 = vmatprep.mubr.f32.mxu1 %v11109_v2  ;;  %11379 = vst [vmem:[#allocation17_spill] sm:$0xff] %v8142_v59  ;;  %11386 = vst [vmem:[#allocation24_spill] sm:$0xff] %v8163_v30  ;;  %v8166_v27 = vld [vmem:[#allocation4 + $0x118] sm:$0xff] }
 0x4ca   :  { %2097 = vmatprep.subr.mxu1 %v8130_v21  ;;  %11387 = vst [vmem:[#allocation25_spill] sm:$0xff] %v8166_v27 }
 0x4cb   :  { %2098 = vmatpush1.msra.mxu1 %v8133_v9 }
 0x4cc   :  { %2099 = vmatprep.subr.mxu1 %v8136_v51 }
 0x4cd   :  { %2100 = vmatpush1.msra.mxu1 %v8139_v29 }
 0x4ce   :  { %2101 = vmatprep.subr.mxu1 %v8142_v59 }
 0x4cf   :  { %2102 = vmatpush1.msra.mxu1 %v8145_v56  ;;  %v11406_v56 = vld [vmem:[#allocation28_spill] sm:$0xff] }
 0x4d0   :  { %2103 = vmatprep.subr.mxu1 %v8148_v12  ;;  %v1777_v12 = vpop.f32.mrf.mxu0 }
 0x4d1   :  { %2104 = vmatpush1.msra.mxu1 %v8151_v25  ;;  %v8169_v25 = vld [vmem:[#allocation4 + $0x110] sm:$0xff] }
 0x4d2   :  { %2105 = vmatprep.subr.mxu1 %v8154_v0  ;;  %11388 = vst [vmem:[#allocation27_spill] sm:$0xff] %v8169_v25  ;;  %v8172_v0 = vld [vmem:[#allocation4 + $0xf8] sm:$0xff]  ;;  %v1779_v29 = vpop.f32.mrf.mxu0 }
 0x4d3   :  { %2106 = vmatpush1.msra.mxu1 %v8157_v14  ;;  %11389 = vst [vmem:[#allocation29_spill] sm:$0xff] %v8172_v0  ;;  %v8175_v14 = vld [vmem:[#allocation4 + $0xf0] sm:$0xff] }
 0x4d4   :  { %2107 = vmatprep.subr.mxu1 %v8160_v49  ;;  %11390 = vst [vmem:[#allocation31_spill] sm:$0xff] %v8175_v14  ;;  %v8178_v49 = vld [vmem:[#allocation4 + $0xd8] sm:$0xff] }
 0x4d5   :  { %2108 = vmatpush1.msra.mxu1 %v8163_v30  ;;  %11391 = vst [vmem:[#allocation33_spill] sm:$0xff] %v8178_v49  ;;  %v8181_v30 = vld [vmem:[#allocation4 + $0xd0] sm:$0xff] }
 0x4d6   :  { %2109 = vmatprep.subr.mxu1 %v8166_v27  ;;  %11392 = vst [vmem:[#allocation35_spill] sm:$0xff] %v8181_v30  ;;  %v8184_v27 = vld [vmem:[#allocation4 + $0xb8] sm:$0xff] }
 0x4d7   :  { %2110 = vmatpush1.msra.mxu1 %v8169_v25  ;;  %11393 = vst [vmem:[#allocation37_spill] sm:$0xff] %v8184_v27  ;;  %v8187_v25 = vld [vmem:[#allocation4 + $0xb0] sm:$0xff] }
 0x4d8   :  { %2111 = vmatprep.subr.mxu1 %v8172_v0  ;;  %11394 = vst [vmem:[#allocation39_spill] sm:$0xff] %v8187_v25  ;;  %v8190_v0 = vld [vmem:[#allocation4 + $0x98] sm:$0xff] }
 0x4d9   :  { %2112 = vmatpush1.msra.mxu1 %v8175_v14  ;;  %11395 = vst [vmem:[#allocation41_spill] sm:$0xff] %v8190_v0  ;;  %v8193_v14 = vld [vmem:[#allocation4 + $0x90] sm:$0xff] }
 0x4da   :  { %2113 = vmatprep.subr.mxu1 %v8178_v49  ;;  %11396 = vst [vmem:[#allocation43_spill] sm:$0xff] %v8193_v14  ;;  %v8196_v49 = vld [vmem:[#allocation4 + $0x78] sm:$0xff] }
 0x4db   :  { %2114 = vmatpush1.msra.mxu1 %v8181_v30  ;;  %11397 = vst [vmem:[#allocation45_spill] sm:$0xff] %v8196_v49  ;;  %v8199_v30 = vld [vmem:[#allocation4 + $0x70] sm:$0xff] }
 0x4dc   :  { %2115 = vmatprep.subr.mxu1 %v8184_v27  ;;  %11398 = vst [vmem:[#allocation47_spill] sm:$0xff] %v8199_v30  ;;  %v8202_v27 = vld [vmem:[#allocation4 + $0x58] sm:$0xff] }
 0x4dd   :  { %2116 = vmatpush1.msra.mxu1 %v8187_v25  ;;  %11399 = vst [vmem:[#allocation49_spill] sm:$0xff] %v8202_v27  ;;  %v8205_v25 = vld [vmem:[#allocation4 + $0x50] sm:$0xff] }
 0x4de   :  { %2117 = vmatprep.subr.mxu1 %v8190_v0  ;;  %11400 = vst [vmem:[#allocation51_spill] sm:$0xff] %v8205_v25  ;;  %v8208_v0 = vld [vmem:[#allocation4 + $0x38] sm:$0xff] }
 0x4df   :  { %2118 = vmatpush1.msra.mxu1 %v8193_v14  ;;  %11401 = vst [vmem:[#allocation53_spill] sm:$0xff] %v8208_v0  ;;  %v8211_v14 = vld [vmem:[#allocation4 + $0x30] sm:$0xff] }
 0x4e0   :  { %2119 = vmatprep.subr.mxu1 %v8196_v49  ;;  %11402 = vst [vmem:[#allocation55_spill] sm:$0xff] %v8211_v14  ;;  %v8214_v49 = vld [vmem:[#allocation4 + $0x18] sm:$0xff] }
 0x4e1   :  { %2120 = vmatpush1.msra.mxu1 %v8199_v30  ;;  %11403 = vst [vmem:[#allocation57_spill] sm:$0xff] %v8214_v49  ;;  %v8217_v30 = vld [vmem:[#allocation4 + $0x10] sm:$0xff] }
 0x4e2   :  { %2121 = vmatprep.subr.mxu1 %v8202_v27  ;;  %11404 = vst [vmem:[#allocation59_spill] sm:$0xff] %v8217_v30  ;;  %v11405_v27 = vld [vmem:[#allocation26_spill] sm:$0xff] }
 0x4e3   :  { %2122 = vmatpush1.msra.mxu1 %v8205_v25 }
 0x4e4   :  { %2123 = vmatprep.subr.mxu1 %v8208_v0 }
 0x4e5   :  { %2124 = vmatpush1.msra.mxu1 %v8211_v14  ;;  %v11407_v14 = vld [vmem:[#allocation92_spill] sm:$0xff] }
 0x4e6   :  { %2125 = vmatprep.subr.mxu1 %v8214_v49  ;;  %v1854_v51 = vadd.f32 %v1779_v29, %v11407_v14  ;;  %v11408_v49 = vld [vmem:[#allocation90_spill] sm:$0xff] }
 0x4e7   :  { %2126 = vmatpush1.msra.mxu1 %v8217_v30  ;;  %v1853_v9 = vadd.f32 %v1777_v12, %v11408_v49 }
 0x4e8   :  { %2267 = vmatprep.subr.mxu1 %v11405_v27  ;;  %v5084_v21 = vmul.f32 -1.442695, %v1854_v51 }
 0x4e9   :  { %v5083_v61 = vmul.f32 -1.442695, %v1853_v9 }
 0x4ea   :  { %5620 = vpow2.f32 %v5084_v21 }
 0x4eb   :  { %5622 = vpow2.f32 %v5083_v61 }
 0x4f7   :  { %v5621_v27 = vpop.eup %5620 }
 0x4f8   :  { %v5623_v30 = vpop.eup %5622  ;;  %v1866_v57 = vadd.f32 1.0, %v5621_v27 }
 0x4f9   :  { %v1860_v52 = vadd.f32 1.0, %v5623_v30 }
 0x4fa   :  { %5624 = vrcp.f32 %v1866_v57 }
 0x4fb   :  { %5626 = vrcp.f32 %v1860_v52 }
 0x507   :  { %v5625_v12 = vpop.eup %5624 }
 0x508   :  { %v5627_v51 = vpop.eup %5626  ;;  %v1876_v61 = vmul.f32 %v5625_v12, %v7734_v40  ;;  %v8241_v40 = vld [vmem:[#allocation2 + $0x1c8] sm:$0xff] }
 0x509   :  { %v8267_v12 = vld [vmem:[#allocation2 + $0x188] sm:$0xff] }
 0x548   :  { %v1705_v25 = vpop.f32.mrf.mxu1 }
 0x549   :  { %v1706_v59 = vadd.f32 %v11406_v56, %v1705_v25  ;;  %v11409_v25 = vld [vmem:[#allocation91_spill] sm:$0xff] }
 0x54a   :  { %v5330_v0 = vpop.f32.mrf.mxu1 }
 0x54b   :  { %5082 = vst.msk [vmem:[%s10546_s9 + $0x8] sm:$0xff] %vm1153_vm2, %v1706_v59  ;;  %v11410_v59 = vld [vmem:[#allocation93_spill] sm:$0xff] }
 0x568   :  { %v1848_v56 = vpop.f32.mrf.mxu1 }
 0x569   :  { %v1855_v0 = vadd.f32 %v1848_v56, %v11409_v25  ;;  %v8247_v56 = vld [vmem:[%s10544_s7 + $0x78] sm:$0xff]  ;;  %v8250_v25 = vld [vmem:[#allocation2 + $0x1c0] sm:$0xff] }
 0x56a   :  { %v1850_v48 = vpop.f32.mrf.mxu1 }
 0x56b   :  { %5628 = vtanh.f32 %v1855_v0  ;;  %v1856_v46 = vadd.f32 %v1850_v48, %v11410_v59  ;;  %v8237_v48 = vld [vmem:[#allocation2 + $0x1e0] sm:$0xff]  ;;  %v8254_v0 = vld [vmem:[#allocation2 + $0x1a8] sm:$0xff]  ;;  %v8260_v59 = vld [vmem:[%s10544_s7 + $0x70] sm:$0xff] }
 0x56d   :  { %v5085_v29 = vmul.f32 -1.442695, %v1856_v46 }
 0x56f   :  { %5630 = vpow2.f32 %v5085_v29  ;;  %v8263_v29 = vld [vmem:[#allocation2 + $0x1a0] sm:$0xff] }
 0x578   :  { %v5629_v9 = vpop.eup %5628 }
 0x579   :  { %v1877_v21 = vmul.f32 %v5629_v9, %v5627_v51  ;;  %v8273_v51 = vld [vmem:[%s10544_s7 + $0x68] sm:$0xff]  ;;  %v8276_v9 = vld [vmem:[#allocation2 + $0x180] sm:$0xff] }
 0x57b   :  { %v8231_v14 = vadd.f32 %v1877_v21, %v1876_v61  ;;  %v8280_v61 = vld [vmem:[#allocation2 + $0x168] sm:$0xff]  ;;  %v8286_v21 = vld [vmem:[%s10544_s7 + $0x60] sm:$0xff] }
 0x57c   :  { %v5631_v49 = vpop.eup %5630 }
 0x57d   :  { %v1873_v30 = vadd.f32 1.0, %v5631_v49  ;;  %5632 = vtanh.f32 %v8231_v14  ;;  %v8295_v49 = vld [vmem:[%s10544_s7 + $0x58] sm:$0xff] }
 0x57f   :  { %5634 = vrcp.f32 %v1873_v30  ;;  %v11427_v30 = vld [vmem:[#allocation50_spill] sm:$0xff] }
 0x58a   :  { %v5633_v52 = vpop.eup %5632 }
 0x58c   :  { %v5635_v57 = vpop.eup %5634 }
 0x58d   :  { %v8234_v27 = vmul.f32 %v5635_v57, %v5633_v52  ;;  %v11428_v52 = vld [vmem:[#allocation52_spill] sm:$0xff]  ;;  %v11429_v57 = vld [vmem:[#allocation54_spill] sm:$0xff] }
 0x58f   :  { %5636 = vtanh.f32 %v8234_v27 }
 0x59c   :  { %v5637_v46 = vpop.eup %5636 }
 0x59d   :  { %2089 = vmatmul.mubr.f32.vlgmr.msra.gmra.mxu0 %v5637_v46  ;;  %2160 = vmatmul.mubr.f32.vlgmr.msra.gmra.mxu1 %v5637_v46  ;;  %v11430_v46 = vld [vmem:[#allocation56_spill] sm:$0xff] }
 0x59e   :  { %2268 = vmatpush1.msra.mxu1 %v8237_v48  ;;  %2331 = vmatprep.mubr.f32.mxu1 %v11109_v2 }
 0x59f   :  { %2269 = vmatprep.subr.mxu1 %v8241_v40  ;;  %5332 = vmatpush3.msra.mxu0 %v8247_v56 }
 0x5a0   :  { %2270 = vmatpush1.msra.mxu1 %v8250_v25  ;;  %5333 = vmatprep.subr.mxu0 %v11109_v2 }
 0x5a1   :  { %2271 = vmatprep.subr.mxu1 %v8254_v0  ;;  %5334 = vmatpush3.msra.mxu0 %v8260_v59 }
 0x5a2   :  { %2272 = vmatpush1.msra.mxu1 %v8263_v29  ;;  %5335 = vmatprep.subr.mxu0 %v11109_v2 }
 0x5a3   :  { %2273 = vmatprep.subr.mxu1 %v8267_v12  ;;  %5336 = vmatpush3.msra.mxu0 %v8273_v51 }
 0x5a4   :  { %2274 = vmatpush1.msra.mxu1 %v8276_v9  ;;  %5337 = vmatprep.subr.mxu0 %v11109_v2 }
 0x5a5   :  { %2275 = vmatprep.subr.mxu1 %v8280_v61  ;;  %5338 = vmatpush3.msra.mxu0 %v8286_v21 }
 0x5a6   :  { %2276 = vmatpush1.msra.mxu1 %v7756_v10  ;;  %5339 = vmatprep.subr.mxu0 %v11109_v2  ;;  %v8304_v10 = vld [vmem:[%s10544_s7 + $0x50] sm:$0xff] }
 0x5a7   :  { %2277 = vmatprep.subr.mxu1 %v7760_v62  ;;  %5340 = vmatpush3.msra.mxu0 %v8295_v49  ;;  %v8313_v62 = vld [vmem:[%s10544_s7 + $0x48] sm:$0xff] }
 0x5a8   :  { %2278 = vmatpush1.msra.mxu1 %v7764_v19  ;;  %5341 = vmatprep.subr.mxu0 %v11109_v2  ;;  %v8322_v19 = vld [vmem:[%s10544_s7 + $0x40] sm:$0xff] }
 0x5a9   :  { %2279 = vmatprep.subr.mxu1 %v7768_v16  ;;  %5342 = vmatpush3.msra.mxu0 %v8304_v10  ;;  %v8331_v16 = vld [vmem:[%s10544_s7 + $0x38] sm:$0xff] }
 0x5aa   :  { %2280 = vmatpush1.msra.mxu1 %v7772_v58  ;;  %5343 = vmatprep.subr.mxu0 %v11109_v2  ;;  %v8340_v58 = vld [vmem:[%s10544_s7 + $0x30] sm:$0xff] }
 0x5ab   :  { %2281 = vmatprep.subr.mxu1 %v7776_v6  ;;  %5344 = vmatpush3.msra.mxu0 %v8313_v62  ;;  %v8349_v6 = vld [vmem:[%s10544_s7 + $0x28] sm:$0xff] }
 0x5ac   :  { %2282 = vmatpush1.msra.mxu1 %v7780_v44  ;;  %5345 = vmatprep.subr.mxu0 %v11109_v2  ;;  %v8358_v44 = vld [vmem:[%s10544_s7 + $0x20] sm:$0xff] }
 0x5ad   :  { %2283 = vmatprep.subr.mxu1 %v7784_v36  ;;  %5346 = vmatpush3.msra.mxu0 %v8322_v19  ;;  %11411 = vst [vmem:[#allocation61_spill] sm:$0xff] %v8358_v44  ;;  %v8367_v36 = vld [vmem:[%s10544_s7 + $0x18] sm:$0xff] }
 0x5ae   :  { %2284 = vmatpush1.msra.mxu1 %v7788_v54  ;;  %5347 = vmatprep.subr.mxu0 %v11109_v2  ;;  %11412 = vst [vmem:[#allocation63_spill] sm:$0xff] %v8367_v36  ;;  %v8376_v54 = vld [vmem:[%s10544_s7 + $0x10] sm:$0xff] }
 0x5af   :  { %2285 = vmatprep.subr.mxu1 %v7792_v3  ;;  %5348 = vmatpush3.msra.mxu0 %v8331_v16  ;;  %11413 = vst [vmem:[#allocation65_spill] sm:$0xff] %v8376_v54  ;;  %v8385_v3 = vld [vmem:[%s10544_s7 + $0x8] sm:$0xff] }
 0x5b0   :  { %2286 = vmatpush1.msra.mxu1 %v7796_v5  ;;  %5349 = vmatprep.subr.mxu0 %v11109_v2  ;;  %11414 = vst [vmem:[#allocation67_spill] sm:$0xff] %v8385_v3  ;;  %v11415_v5 = vld [vmem:[#allocation30_spill] sm:$0xff] }
 0x5b1   :  { %2287 = vmatprep.subr.mxu1 %v7800_v7  ;;  %5350 = vmatpush3.msra.mxu0 %v8340_v58  ;;  %v11416_v7 = vld [vmem:[#allocation32_spill] sm:$0xff] }
 0x5b2   :  { %2288 = vmatpush1.msra.mxu1 %v7804_v11  ;;  %5351 = vmatprep.subr.mxu0 %v11109_v2  ;;  %v11417_v11 = vld [vmem:[#allocation34_spill] sm:$0xff] }
 0x5b3   :  { %2289 = vmatprep.subr.mxu1 %v7808_v13  ;;  %5352 = vmatpush3.msra.mxu0 %v8349_v6  ;;  %v11418_v13 = vld [vmem:[#allocation36_spill] sm:$0xff] }
 0x5b4   :  { %2290 = vmatpush1.msra.mxu1 %v7812_v15  ;;  %5353 = vmatprep.subr.mxu0 %v11109_v2  ;;  %v8398_v15 = vld [vmem:[%s10544_s7] sm:$0xff] }
 0x5b5   :  { %2291 = vmatprep.subr.mxu1 %v7816_v17  ;;  %5354 = vmatpush3.msra.mxu0 %v8358_v44  ;;  %11419 = vst [vmem:[#allocation69_spill] sm:$0xff] %v8398_v15  ;;  %v11420_v17 = vld [vmem:[#allocation38_spill] sm:$0xff] }
 0x5b6   :  { %2292 = vmatpush1.msra.mxu1 %v7820_v20  ;;  %5355 = vmatprep.subr.mxu0 %v11109_v2  ;;  %v11421_v20 = vld [vmem:[#allocation40_spill] sm:$0xff] }
 0x5b7   :  { %2293 = vmatprep.subr.mxu1 %v7824_v22  ;;  %5356 = vmatpush3.msra.mxu0 %v8367_v36  ;;  %v8405_v22 = vld [vmem:[#allocation2 + $0x1f8] sm:$0xff] }
 0x5b8   :  { %2294 = vmatpush1.msra.mxu1 %v7828_v24  ;;  %5357 = vmatprep.subr.mxu0 %v11109_v2  ;;  %11422 = vst [vmem:[#allocation71_spill] sm:$0xff] %v8405_v22  ;;  %v11423_v24 = vld [vmem:[#allocation42_spill] sm:$0xff] }
 0x5b9   :  { %2295 = vmatprep.subr.mxu1 %v7832_v26  ;;  %5358 = vmatpush3.msra.mxu0 %v8376_v54  ;;  %v11424_v26 = vld [vmem:[#allocation44_spill] sm:$0xff] }
 0x5ba   :  { %2296 = vmatpush1.msra.mxu1 %v7836_v28  ;;  %5359 = vmatprep.subr.mxu0 %v11109_v2  ;;  %v11425_v28 = vld [vmem:[#allocation46_spill] sm:$0xff] }
 0x5bb   :  { %2297 = vmatprep.subr.mxu1 %v7840_v43  ;;  %5360 = vmatpush3.msra.mxu0 %v8385_v3  ;;  %v11426_v43 = vld [vmem:[#allocation48_spill] sm:$0xff] }
 0x5bc   :  { %2298 = vmatpush1.msra.mxu1 %v11415_v5  ;;  %5361 = vmatprep.subr.mxu0 %v11109_v2  ;;  %v11431_v5 = vld [vmem:[#allocation58_spill] sm:$0xff] }
 0x5bd   :  { %2332 = vmatmul.mubr.f32.vlgmr.msra.gmra.mxu1 %v8234_v27  ;;  %2438 = vmatprep.subr.mxu1 %v11416_v7  ;;  %v11432_v7 = vld [vmem:[#allocation60_spill] sm:$0xff] }
 0x5be   :  { %2439 = vmatpush1.msra.mxu1 %v11417_v11  ;;  %2502 = vmatprep.mubr.f32.mxu1 %v11109_v2  ;;  %v11433_v11 = vld [vmem:[#allocation62_spill] sm:$0xff] }
 0x5bf   :  { %2440 = vmatprep.subr.mxu1 %v11418_v13  ;;  %5362 = vmatpush3.msra.mxu0 %v8398_v15  ;;  %v11434_v13 = vld [vmem:[#allocation64_spill] sm:$0xff] }
 0x5c0   :  { %2441 = vmatpush1.msra.mxu1 %v11420_v17  ;;  %5363 = vmatprep.mubr.msk.f32.mxu0 %vm6607_vm1, %v11109_v2  ;;  %v11435_v17 = vld [vmem:[#allocation66_spill] sm:$0xff] }
 0x5c1   :  { %2442 = vmatprep.subr.mxu1 %v11421_v20  ;;  %2338 = vmatprep.subr.mxu0 %v8405_v22  ;;  %v11436_v20 = vld [vmem:[#allocation68_spill] sm:$0xff] }
 0x5c2   :  { %2443 = vmatpush1.msra.mxu1 %v11423_v24  ;;  %v11437_v24 = vld [vmem:[#allocation70_spill] sm:$0xff] }
 0x5c3   :  { %2444 = vmatprep.subr.mxu1 %v11424_v26  ;;  %v11438_v26 = vld [vmem:[#allocation72_spill] sm:$0xff] }
 0x5c4   :  { %2445 = vmatpush1.msra.mxu1 %v11425_v28  ;;  %v11439_v28 = vld [vmem:[#allocation74_spill] sm:$0xff] }
 0x5c5   :  { %2446 = vmatprep.subr.mxu1 %v11426_v43  ;;  %v11440_v43 = vld [vmem:[#allocation76_spill] sm:$0xff] }
 0x5c6   :  { %2447 = vmatpush1.msra.mxu1 %v11427_v30  ;;  %v11441_v30 = vld [vmem:[#allocation78_spill] sm:$0xff] }
 0x5c7   :  { %2448 = vmatprep.subr.mxu1 %v11428_v52  ;;  %v11442_v52 = vld [vmem:[#allocation80_spill] sm:$0xff] }
 0x5c8   :  { %2449 = vmatpush1.msra.mxu1 %v11429_v57  ;;  %v11443_v57 = vld [vmem:[#allocation82_spill] sm:$0xff] }
 0x5c9   :  { %2450 = vmatprep.subr.mxu1 %v11430_v46  ;;  %v11444_v46 = vld [vmem:[#allocation84_spill] sm:$0xff] }
 0x5ca   :  { %2451 = vmatpush1.msra.mxu1 %v11431_v5  ;;  %v11445_v5 = vld [vmem:[#allocation88_spill] sm:$0xff] }
 0x5cb   :  { %2452 = vmatprep.subr.mxu1 %v11432_v7  ;;  %v11446_v7 = vld [vmem:[#allocation86_spill] sm:$0xff] }
 0x5cc   :  { %2453 = vmatpush1.msra.mxu1 %v11433_v11  ;;  %v11447_v11 = vld [vmem:[#allocation87_spill] sm:$0xff] }
 0x5cd   :  { %2454 = vmatprep.subr.mxu1 %v11434_v13  ;;  %v11448_v13 = vld [vmem:[#allocation89_spill] sm:$0xff] }
 0x5ce   :  { %2455 = vmatpush1.msra.mxu1 %v11435_v17  ;;  %v11449_v17 = vld [vmem:[#allocation118_spill] sm:$0xff] }
 0x5cf   :  { %2456 = vmatprep.subr.mxu1 %v11436_v20  ;;  %v11450_v20 = vld [vmem:[#allocation119_spill] sm:$0xff] }
 0x5d0   :  { %2457 = vmatpush1.msra.mxu1 %v11437_v24  ;;  %v1948_v24 = vpop.f32.mrf.mxu0 }
 0x5d1   :  { %2458 = vmatprep.subr.mxu1 %v11438_v26  ;;  %v2019_v26 = vpop.f32.mrf.mxu1 }
 0x5d2   :  { %2459 = vmatpush1.msra.mxu1 %v11439_v28  ;;  %v1950_v28 = vpop.f32.mrf.mxu0 }
 0x5d3   :  { %2460 = vmatprep.subr.mxu1 %v11440_v43 }
 0x5d4   :  { %2461 = vmatpush1.msra.mxu1 %v11441_v30  ;;  %v2021_v30 = vpop.f32.mrf.mxu1 }
 0x5d5   :  { %2462 = vmatprep.subr.mxu1 %v11442_v52 }
 0x5d6   :  { %2463 = vmatpush1.msra.mxu1 %v11443_v57 }
 0x5d7   :  { %2464 = vmatprep.subr.mxu1 %v11444_v46 }
 0x5d8   :  { %2465 = vmatpush1.msra.mxu1 %v11445_v5 }
 0x5d9   :  { %2466 = vmatprep.subr.mxu1 %v11446_v7 }
 0x5da   :  { %2467 = vmatpush1.msra.mxu1 %v11447_v11 }
 0x5db   :  { %2468 = vmatprep.subr.mxu1 %v11448_v13 }
 0x5dc   :  { %2469 = vmatpush1.msra.mxu1 %v11449_v17 }
 0x5dd   :  { %2580 = vmatprep.subr.mxu1 %v11450_v20 }
 0x65d   :  { %v2090_v43 = vpop.f32.mrf.mxu0  ;;  %v2161_v5 = vpop.f32.mrf.mxu1 }
 0x65e   :  { %v2091_v52 = vadd.f32 %v2090_v43, %v1948_v24  ;;  %v2162_v3 = vadd.f32 %v2161_v5, %v2019_v26  ;;  %v8507_v5 = vld [vmem:[#allocation2 + $0x138] sm:$0xff] }
 0x65f   :  { %v2092_v57 = vpop.f32.mrf.mxu0  ;;  %v2163_v15 = vpop.f32.mrf.mxu1 }
 0x660   :  { %v2166_v46 = vadd.f32 %v2091_v52, %v7428_v4  ;;  %v2093_v22 = vadd.f32 %v2092_v57, %v1950_v28  ;;  %v2164_v17 = vadd.f32 %v2163_v15, %v2021_v30  ;;  %v2168_v24 = vadd.f32 %v2162_v3, %v7443_v41 }
 0x662   :  { %v5086_v7 = vmul.f32 -1.442695, %v2166_v46  ;;  %v2167_v11 = vadd.f32 %v2093_v22, %v7432_v33  ;;  %v2169_v20 = vadd.f32 %v2164_v17, %v7438_v32  ;;  %v11459_v17 = vld [vmem:[#allocation128_spill] sm:$0xff] }
 0x664   :  { %5638 = vpow2.f32 %v5086_v7  ;;  %v5087_v13 = vmul.f32 -1.442695, %v2167_v11  ;;  %v5088_v54 = vmul.f32 -1.442695, %v2169_v20  ;;  %v11458_v11 = vld [vmem:[#allocation127_spill] sm:$0xff]  ;;  %v8515_v20 = vld [vmem:[#allocation2 + $0x118] sm:$0xff] }
 0x666   :  { %5640 = vpow2.f32 %v5087_v13  ;;  %v8511_v13 = vld [vmem:[#allocation2 + $0x130] sm:$0xff] }
 0x667   :  { %5642 = vpow2.f32 %v5088_v54 }
 0x671   :  { %v5639_v36 = vpop.eup %5638 }
 0x672   :  { %v2173_v43 = vadd.f32 1.0, %v5639_v36 }
 0x673   :  { %v5641_v44 = vpop.eup %5640 }
 0x674   :  { %5644 = vrcp.f32 %v2173_v43  ;;  %v2179_v28 = vadd.f32 1.0, %v5641_v44  ;;  %v5643_v22 = vpop.eup %5642  ;;  %v11457_v44 = vld [vmem:[#allocation126_spill] sm:$0xff]  ;;  %v8519_v43 = vld [vmem:[#allocation2 + $0x110] sm:$0xff] }
 0x675   :  { %5646 = vtanh.f32 %v2168_v24  ;;  %v2186_v7 = vadd.f32 1.0, %v5643_v22  ;;  %v11460_v24 = vld [vmem:[#allocation129_spill] sm:$0xff]  ;;  %v8523_v22 = vld [vmem:[#allocation2 + $0xf8] sm:$0xff] }
 0x676   :  { %5648 = vrcp.f32 %v2179_v28  ;;  %v11461_v28 = vld [vmem:[#allocation9_spill] sm:$0xff] }
 0x677   :  { %5650 = vrcp.f32 %v2186_v7  ;;  %v8531_v7 = vld [vmem:[#allocation2 + $0xd8] sm:$0xff] }
 0x681   :  { %v5645_v52 = vpop.eup %5644 }
 0x682   :  { %v5647_v57 = vpop.eup %5646 }
 0x683   :  { %v5649_v46 = vpop.eup %5648  ;;  %v2190_v15 = vmul.f32 %v5647_v57, %v5645_v52  ;;  %v11462_v52 = vld [vmem:[#allocation10_spill] sm:$0xff]  ;;  %v8527_v57 = vld [vmem:[#allocation2 + $0xf0] sm:$0xff] }
 0x684   :  { %v2189_v30 = vmul.f32 %v5649_v46, %v7958_v42  ;;  %v5651_v36 = vpop.eup %5650  ;;  %v11463_v46 = vld [vmem:[#allocation11_spill] sm:$0xff] }
 0x686   :  { %v8441_v26 = vadd.f32 %v2190_v15, %v2189_v30  ;;  %v11464_v15 = vld [vmem:[#allocation12_spill] sm:$0xff]  ;;  %v8535_v30 = vld [vmem:[#allocation2 + $0xd0] sm:$0xff] }
 0x688   :  { %5652 = vtanh.f32 %v8441_v26 }
 0x695   :  { %v5653_v3 = vpop.eup %5652 }
 0x696   :  { %v8444_v54 = vmul.f32 %v5653_v3, %v5651_v36  ;;  %v8539_v36 = vld [vmem:[#allocation2 + $0xb8] sm:$0xff]  ;;  %v8542_v3 = vld [vmem:[#allocation2 + $0xb0] sm:$0xff] }
 0x697   :  { %11465 = vst [vmem:[#allocation73_spill] sm:$0xff] %v8542_v3 }
 0x698   :  { %5654 = vtanh.f32 %v8444_v54  ;;  %2503 = vmatmul.mubr.f32.vlgmr.msra.gmra.mxu1 %v8444_v54 }
 0x699   :  { %2581 = vmatpush1.msra.mxu1 %v7965_v31  ;;  %2644 = vmatprep.mubr.f32.mxu1 %v11109_v2  ;;  %v8463_v31 = vld [vmem:[#allocation2 + $0x1f0] sm:$0xff] }
 0x69a   :  { %2582 = vmatprep.subr.mxu1 %v7969_v63  ;;  %v8467_v63 = vld [vmem:[#allocation2 + $0x1d8] sm:$0xff] }
 0x69b   :  { %2583 = vmatpush1.msra.mxu1 %v7972_v45  ;;  %v8471_v45 = vld [vmem:[#allocation2 + $0x1d0] sm:$0xff] }
 0x69c   :  { %2584 = vmatprep.subr.mxu1 %v7975_v23  ;;  %v8475_v23 = vld [vmem:[#allocation2 + $0x1b8] sm:$0xff] }
 0x69d   :  { %2585 = vmatpush1.msra.mxu1 %v7978_v53  ;;  %v8479_v53 = vld [vmem:[#allocation2 + $0x1b0] sm:$0xff] }
 0x69e   :  { %2586 = vmatprep.subr.mxu1 %v7981_v1  ;;  %v11451_v1 = vld [vmem:[#allocation120_spill] sm:$0xff] }
 0x69f   :  { %2587 = vmatpush1.msra.mxu1 %v7984_v37  ;;  %v8483_v37 = vld [vmem:[#allocation2 + $0x198] sm:$0xff] }
 0x6a0   :  { %2588 = vmatprep.subr.mxu1 %v7987_v8  ;;  %v11452_v8 = vld [vmem:[#allocation121_spill] sm:$0xff] }
 0x6a1   :  { %2589 = vmatpush1.msra.mxu1 %v7990_v55  ;;  %v8487_v55 = vld [vmem:[#allocation2 + $0x190] sm:$0xff] }
 0x6a2   :  { %2590 = vmatprep.subr.mxu1 %v7993_v60  ;;  %v11453_v60 = vld [vmem:[#allocation122_spill] sm:$0xff] }
 0x6a3   :  { %2591 = vmatpush1.msra.mxu1 %v7996_v34  ;;  %v8491_v34 = vld [vmem:[#allocation2 + $0x178] sm:$0xff] }
 0x6a4   :  { %2592 = vmatprep.subr.mxu1 %v7999_v39  ;;  %v11454_v39 = vld [vmem:[#allocation123_spill] sm:$0xff] }
 0x6a5   :  { %v5655_v42 = vpop.eup %5654  ;;  %2593 = vmatpush1.msra.mxu1 %v8002_v18  ;;  %v8495_v18 = vld [vmem:[#allocation2 + $0x170] sm:$0xff] }
 0x6a6   :  { %5364 = vmatmul.mubr.f32.vlgmr.msra.gmra.mxu0 %v5655_v42  ;;  %2594 = vmatprep.subr.mxu1 %v8005_v47  ;;  %v11455_v47 = vld [vmem:[#allocation124_spill] sm:$0xff] }
 0x6a7   :  { %2339 = vmatpush1.msra.mxu0 %v8463_v31  ;;  %2402 = vmatprep.mubr.f32.mxu0 %v11109_v2  ;;  %v8545_v42 = vld [vmem:[#allocation2 + $0x98] sm:$0xff] }
 0x6a8   :  { %2340 = vmatprep.subr.mxu0 %v8467_v63  ;;  %2595 = vmatpush1.msra.mxu1 %v8011_v50  ;;  %v8499_v50 = vld [vmem:[#allocation2 + $0x158] sm:$0xff]  ;;  %11466 = vst [vmem:[#allocation75_spill] sm:$0xff] %v8545_v42 }
 0x6a9   :  { %2341 = vmatpush1.msra.mxu0 %v8471_v45  ;;  %2596 = vmatprep.subr.mxu1 %v8015_v38  ;;  %v11456_v38 = vld [vmem:[#allocation125_spill] sm:$0xff] }
 0x6aa   :  { %2342 = vmatprep.subr.mxu0 %v8475_v23  ;;  %2597 = vmatpush1.msra.mxu1 %v8019_v35  ;;  %v8503_v35 = vld [vmem:[#allocation2 + $0x150] sm:$0xff] }
 0x6ab   :  { %2343 = vmatpush1.msra.mxu0 %v8479_v53  ;;  %2598 = vmatprep.subr.mxu1 %v11451_v1  ;;  %v8548_v1 = vld [vmem:[#allocation2 + $0x90] sm:$0xff] }
 0x6ac   :  { %2344 = vmatprep.subr.mxu0 %v8483_v37  ;;  %2599 = vmatpush1.msra.mxu1 %v11452_v8  ;;  %11467 = vst [vmem:[#allocation77_spill] sm:$0xff] %v8548_v1  ;;  %v8551_v8 = vld [vmem:[#allocation2 + $0x78] sm:$0xff] }
 0x6ad   :  { %2345 = vmatpush1.msra.mxu0 %v8487_v55  ;;  %2600 = vmatprep.subr.mxu1 %v11453_v60  ;;  %11468 = vst [vmem:[#allocation79_spill] sm:$0xff] %v8551_v8  ;;  %v8554_v60 = vld [vmem:[#allocation2 + $0x70] sm:$0xff] }
 0x6ae   :  { %2346 = vmatprep.subr.mxu0 %v8491_v34  ;;  %2601 = vmatpush1.msra.mxu1 %v11454_v39  ;;  %11469 = vst [vmem:[#allocation81_spill] sm:$0xff] %v8554_v60  ;;  %v8557_v39 = vld [vmem:[#allocation2 + $0x58] sm:$0xff] }
 0x6af   :  { %2347 = vmatpush1.msra.mxu0 %v8495_v18  ;;  %2602 = vmatprep.subr.mxu1 %v11455_v47  ;;  %11470 = vst [vmem:[#allocation83_spill] sm:$0xff] %v8557_v39  ;;  %v8560_v47 = vld [vmem:[#allocation2 + $0x50] sm:$0xff] }
 0x6b0   :  { %2348 = vmatprep.subr.mxu0 %v8499_v50  ;;  %2603 = vmatpush1.msra.mxu1 %v11456_v38  ;;  %11471 = vst [vmem:[#allocation85_spill] sm:$0xff] %v8560_v47  ;;  %v8563_v38 = vld [vmem:[#allocation2 + $0x38] sm:$0xff] }
 0x6b1   :  { %2349 = vmatpush1.msra.mxu0 %v8503_v35  ;;  %2604 = vmatprep.subr.mxu1 %v11457_v44  ;;  %11472 = vst [vmem:[#allocation114_spill] sm:$0xff] %v8563_v38  ;;  %v8566_v44 = vld [vmem:[#allocation2 + $0x30] sm:$0xff] }
 0x6b2   :  { %2350 = vmatprep.subr.mxu0 %v8507_v5  ;;  %2605 = vmatpush1.msra.mxu1 %v11458_v11  ;;  %11473 = vst [vmem:[#allocation115_spill] sm:$0xff] %v8566_v44  ;;  %v8569_v11 = vld [vmem:[#allocation2 + $0x18] sm:$0xff] }
 0x6b3   :  { %2351 = vmatpush1.msra.mxu0 %v8511_v13  ;;  %2606 = vmatprep.subr.mxu1 %v11459_v17  ;;  %11474 = vst [vmem:[#allocation116_spill] sm:$0xff] %v8569_v11  ;;  %v8572_v17 = vld [vmem:[#allocation2 + $0x10] sm:$0xff] }
 0x6b4   :  { %2352 = vmatprep.subr.mxu0 %v8515_v20  ;;  %2607 = vmatpush1.msra.mxu1 %v11460_v24  ;;  %11475 = vst [vmem:[#allocation117_spill] sm:$0xff] %v8572_v17  ;;  %v8576_v24 = vld [vmem:[#allocation6 + $0x1f8] sm:$0xff] }
 0x6b5   :  { %2353 = vmatpush1.msra.mxu0 %v8519_v43  ;;  %2608 = vmatprep.subr.mxu1 %v11461_v28  ;;  %11476 = vst [vmem:[#allocation26_spill] sm:$0xff] %v8576_v24  ;;  %v8579_v28 = vld [vmem:[#allocation6 + $0x1f0] sm:$0xff] }
 0x6b6   :  { %2354 = vmatprep.subr.mxu0 %v8523_v22  ;;  %2609 = vmatpush1.msra.mxu1 %v11462_v52  ;;  %11477 = vst [vmem:[#allocation28_spill] sm:$0xff] %v8579_v28  ;;  %v8583_v52 = vld [vmem:[#allocation6 + $0x1d8] sm:$0xff] }
 0x6b7   :  { %2355 = vmatpush1.msra.mxu0 %v8527_v57  ;;  %2610 = vmatprep.subr.mxu1 %v11463_v46  ;;  %11478 = vst [vmem:[#allocation92_spill] sm:$0xff] %v8583_v52  ;;  %v8586_v46 = vld [vmem:[#allocation6 + $0x1d0] sm:$0xff] }
 0x6b8   :  { %2356 = vmatprep.subr.mxu0 %v8531_v7  ;;  %2611 = vmatpush1.msra.mxu1 %v11464_v15  ;;  %11479 = vst [vmem:[#allocation90_spill] sm:$0xff] %v8586_v46  ;;  %v8589_v15 = vld [vmem:[#allocation6 + $0x1b8] sm:$0xff] }
 0x6b9   :  { %2357 = vmatpush1.msra.mxu0 %v8535_v30  ;;  %5366 = vmatprep.subr.mxu1 %v11109_v2  ;;  %11480 = vst [vmem:[#allocation91_spill] sm:$0xff] %v8589_v15 }
 0x6ba   :  { %2358 = vmatprep.subr.mxu0 %v8539_v36 }
 0x6bb   :  { %2359 = vmatpush1.msra.mxu0 %v8542_v3 }
 0x6bc   :  { %2360 = vmatprep.subr.mxu0 %v8545_v42 }
 0x6bd   :  { %2361 = vmatpush1.msra.mxu0 %v8548_v1 }
 0x6be   :  { %2362 = vmatprep.subr.mxu0 %v8551_v8 }
 0x6bf   :  { %2363 = vmatpush1.msra.mxu0 %v8554_v60 }
 0x6c0   :  { %2364 = vmatprep.subr.mxu0 %v8557_v39 }
 0x6c1   :  { %2365 = vmatpush1.msra.mxu0 %v8560_v47 }
 0x6c2   :  { %2366 = vmatprep.subr.mxu0 %v8563_v38  ;;  %v11520_v38 = vld [vmem:[#allocation23_spill] sm:$0xff] }
 0x6c3   :  { %2367 = vmatpush1.msra.mxu0 %v8566_v44  ;;  %v11518_v44 = vld [vmem:[#allocation21_spill] sm:$0xff] }
 0x6c4   :  { %2368 = vmatprep.subr.mxu0 %v8569_v11  ;;  %v11516_v11 = vld [vmem:[#allocation19_spill] sm:$0xff] }
 0x6c5   :  { %2369 = vmatpush1.msra.mxu0 %v8572_v17  ;;  %v11513_v17 = vld [vmem:[#allocation16_spill] sm:$0xff] }
 0x6c6   :  { %2403 = vmatmul.mubr.f32.vlgmr.msra.gmra.mxu0 %v8234_v27  ;;  %2509 = vmatprep.subr.mxu0 %v8576_v24  ;;  %v8592_v27 = vld [vmem:[#allocation6 + $0x1b0] sm:$0xff]  ;;  %v8595_v24 = vld [vmem:[#allocation6 + $0x198] sm:$0xff] }
 0x6c7   :  { %2510 = vmatpush1.msra.mxu0 %v8579_v28  ;;  %2573 = vmatprep.mubr.f32.mxu0 %v11109_v2  ;;  %11481 = vst [vmem:[#allocation93_spill] sm:$0xff] %v8592_v27  ;;  %11482 = vst [vmem:[#allocation30_spill] sm:$0xff] %v8595_v24  ;;  %v8598_v28 = vld [vmem:[#allocation6 + $0x190] sm:$0xff] }
 0x6c8   :  { %2511 = vmatprep.subr.mxu0 %v8583_v52  ;;  %11483 = vst [vmem:[#allocation32_spill] sm:$0xff] %v8598_v28  ;;  %v8601_v52 = vld [vmem:[#allocation6 + $0x178] sm:$0xff] }
 0x6c9   :  { %2512 = vmatpush1.msra.mxu0 %v8586_v46  ;;  %11484 = vst [vmem:[#allocation34_spill] sm:$0xff] %v8601_v52  ;;  %v8604_v46 = vld [vmem:[#allocation6 + $0x170] sm:$0xff] }
 0x6ca   :  { %2513 = vmatprep.subr.mxu0 %v8589_v15  ;;  %11485 = vst [vmem:[#allocation36_spill] sm:$0xff] %v8604_v46  ;;  %v8607_v15 = vld [vmem:[#allocation6 + $0x158] sm:$0xff] }
 0x6cb   :  { %2514 = vmatpush1.msra.mxu0 %v8592_v27  ;;  %11486 = vst [vmem:[#allocation38_spill] sm:$0xff] %v8607_v15  ;;  %v8610_v27 = vld [vmem:[#allocation6 + $0x150] sm:$0xff] }
 0x6cc   :  { %2515 = vmatprep.subr.mxu0 %v8595_v24  ;;  %11487 = vst [vmem:[#allocation40_spill] sm:$0xff] %v8610_v27  ;;  %v8613_v24 = vld [vmem:[#allocation6 + $0x138] sm:$0xff] }
 0x6cd   :  { %2516 = vmatpush1.msra.mxu0 %v8598_v28  ;;  %11488 = vst [vmem:[#allocation42_spill] sm:$0xff] %v8613_v24  ;;  %v8616_v28 = vld [vmem:[#allocation6 + $0x130] sm:$0xff] }
 0x6ce   :  { %2517 = vmatprep.subr.mxu0 %v8601_v52  ;;  %11489 = vst [vmem:[#allocation44_spill] sm:$0xff] %v8616_v28  ;;  %v8619_v52 = vld [vmem:[#allocation6 + $0x118] sm:$0xff] }
 0x6cf   :  { %2518 = vmatpush1.msra.mxu0 %v8604_v46  ;;  %11490 = vst [vmem:[#allocation46_spill] sm:$0xff] %v8619_v52  ;;  %v8622_v46 = vld [vmem:[#allocation6 + $0x110] sm:$0xff] }
 0x6d0   :  { %2519 = vmatprep.subr.mxu0 %v8607_v15  ;;  %11491 = vst [vmem:[#allocation48_spill] sm:$0xff] %v8622_v46  ;;  %v8625_v15 = vld [vmem:[#allocation6 + $0xf8] sm:$0xff] }
 0x6d1   :  { %2520 = vmatpush1.msra.mxu0 %v8610_v27  ;;  %11492 = vst [vmem:[#allocation50_spill] sm:$0xff] %v8625_v15  ;;  %v8628_v27 = vld [vmem:[#allocation6 + $0xf0] sm:$0xff] }
 0x6d2   :  { %2521 = vmatprep.subr.mxu0 %v8613_v24  ;;  %11493 = vst [vmem:[#allocation52_spill] sm:$0xff] %v8628_v27  ;;  %v8631_v24 = vld [vmem:[#allocation6 + $0xd8] sm:$0xff] }
 0x6d3   :  { %2522 = vmatpush1.msra.mxu0 %v8616_v28  ;;  %11494 = vst [vmem:[#allocation54_spill] sm:$0xff] %v8631_v24  ;;  %v8634_v28 = vld [vmem:[#allocation6 + $0xd0] sm:$0xff] }
 0x6d4   :  { %2523 = vmatprep.subr.mxu0 %v8619_v52  ;;  %11495 = vst [vmem:[#allocation56_spill] sm:$0xff] %v8634_v28  ;;  %v8637_v52 = vld [vmem:[#allocation6 + $0xb8] sm:$0xff] }
 0x6d5   :  { %2524 = vmatpush1.msra.mxu0 %v8622_v46  ;;  %11496 = vst [vmem:[#allocation58_spill] sm:$0xff] %v8637_v52  ;;  %v8640_v46 = vld [vmem:[#allocation6 + $0xb0] sm:$0xff] }
 0x6d6   :  { %2525 = vmatprep.subr.mxu0 %v8625_v15  ;;  %11497 = vst [vmem:[#allocation60_spill] sm:$0xff] %v8640_v46  ;;  %v8643_v15 = vld [vmem:[#allocation6 + $0x98] sm:$0xff] }
 0x6d7   :  { %2526 = vmatpush1.msra.mxu0 %v8628_v27  ;;  %11498 = vst [vmem:[#allocation62_spill] sm:$0xff] %v8643_v15  ;;  %v8646_v27 = vld [vmem:[#allocation6 + $0x90] sm:$0xff] }
 0x6d8   :  { %2527 = vmatprep.subr.mxu0 %v8631_v24  ;;  %11499 = vst [vmem:[#allocation64_spill] sm:$0xff] %v8646_v27  ;;  %v8649_v24 = vld [vmem:[#allocation6 + $0x78] sm:$0xff] }
 0x6d9   :  { %2528 = vmatpush1.msra.mxu0 %v8634_v28  ;;  %11500 = vst [vmem:[#allocation66_spill] sm:$0xff] %v8649_v24  ;;  %v8652_v28 = vld [vmem:[#allocation6 + $0x70] sm:$0xff] }
 0x6da   :  { %2529 = vmatprep.subr.mxu0 %v8637_v52  ;;  %11501 = vst [vmem:[#allocation68_spill] sm:$0xff] %v8652_v28  ;;  %v8655_v52 = vld [vmem:[#allocation6 + $0x58] sm:$0xff] }
 0x6db   :  { %2530 = vmatpush1.msra.mxu0 %v8640_v46  ;;  %11502 = vst [vmem:[#allocation70_spill] sm:$0xff] %v8655_v52  ;;  %v8658_v46 = vld [vmem:[#allocation6 + $0x50] sm:$0xff] }
 0x6dc   :  { %2531 = vmatprep.subr.mxu0 %v8643_v15  ;;  %11503 = vst [vmem:[#allocation72_spill] sm:$0xff] %v8658_v46  ;;  %v8661_v15 = vld [vmem:[#allocation6 + $0x38] sm:$0xff] }
 0x6dd   :  { %2532 = vmatpush1.msra.mxu0 %v8646_v27  ;;  %11504 = vst [vmem:[#allocation74_spill] sm:$0xff] %v8661_v15  ;;  %v8664_v27 = vld [vmem:[#allocation6 + $0x30] sm:$0xff] }
 0x6de   :  { %2533 = vmatprep.subr.mxu0 %v8649_v24  ;;  %11505 = vst [vmem:[#allocation76_spill] sm:$0xff] %v8664_v27  ;;  %v8667_v24 = vld [vmem:[#allocation6 + $0x18] sm:$0xff] }
 0x6df   :  { %2534 = vmatpush1.msra.mxu0 %v8652_v28  ;;  %11506 = vst [vmem:[#allocation78_spill] sm:$0xff] %v8667_v24  ;;  %v8670_v28 = vld [vmem:[#allocation6 + $0x10] sm:$0xff] }
 0x6e0   :  { %2535 = vmatprep.subr.mxu0 %v8655_v52  ;;  %11507 = vst [vmem:[#allocation80_spill] sm:$0xff] %v8670_v28  ;;  %v8674_v52 = vld [vmem:[#allocation4 + $0x1f8] sm:$0xff] }
 0x6e1   :  { %2536 = vmatpush1.msra.mxu0 %v8658_v46  ;;  %11508 = vst [vmem:[#allocation82_spill] sm:$0xff] %v8674_v52  ;;  %v8677_v46 = vld [vmem:[#allocation4 + $0x1f0] sm:$0xff] }
 0x6e2   :  { %2537 = vmatprep.subr.mxu0 %v8661_v15  ;;  %11509 = vst [vmem:[#allocation84_spill] sm:$0xff] %v8677_v46  ;;  %v11511_v15 = vld [vmem:[#allocation14_spill] sm:$0xff] }
 0x6e3   :  { %2538 = vmatpush1.msra.mxu0 %v8664_v27  ;;  %v11510_v27 = vld [vmem:[#allocation13_spill] sm:$0xff] }
 0x6e4   :  { %2539 = vmatprep.subr.mxu0 %v8667_v24  ;;  %v11512_v24 = vld [vmem:[#allocation15_spill] sm:$0xff] }
 0x6e5   :  { %2540 = vmatpush1.msra.mxu0 %v8670_v28  ;;  %v11514_v28 = vld [vmem:[#allocation17_spill] sm:$0xff] }
 0x6e6   :  { %2574 = vmatmul.mubr.f32.vlgmr.msra.gmra.mxu0 %v8444_v54  ;;  %2651 = vmatprep.subr.mxu0 %v8674_v52  ;;  %v11515_v54 = vld [vmem:[#allocation18_spill] sm:$0xff]  ;;  %v11517_v52 = vld [vmem:[#allocation20_spill] sm:$0xff] }
 0x6e7   :  { %2652 = vmatpush1.msra.mxu0 %v8677_v46  ;;  %2715 = vmatprep.mubr.f32.mxu0 %v11109_v2  ;;  %v11519_v46 = vld [vmem:[#allocation22_spill] sm:$0xff] }
 0x6e8   :  { %2653 = vmatprep.subr.mxu0 %v11510_v27  ;;  %v11521_v27 = vld [vmem:[#allocation24_spill] sm:$0xff] }
 0x6e9   :  { %2654 = vmatpush1.msra.mxu0 %v11511_v15  ;;  %v11522_v15 = vld [vmem:[#allocation25_spill] sm:$0xff] }
 0x6ea   :  { %2655 = vmatprep.subr.mxu0 %v11512_v24  ;;  %v11523_v24 = vld [vmem:[#allocation27_spill] sm:$0xff] }
 0x6eb   :  { %2656 = vmatpush1.msra.mxu0 %v11513_v17  ;;  %v11524_v17 = vld [vmem:[#allocation29_spill] sm:$0xff] }
 0x6ec   :  { %2657 = vmatprep.subr.mxu0 %v11514_v28  ;;  %v11525_v28 = vld [vmem:[#allocation31_spill] sm:$0xff] }
 0x6ed   :  { %2658 = vmatpush1.msra.mxu0 %v11515_v54  ;;  %v11526_v54 = vld [vmem:[#allocation33_spill] sm:$0xff] }
 0x6ee   :  { %2659 = vmatprep.subr.mxu0 %v11516_v11  ;;  %v11527_v11 = vld [vmem:[#allocation35_spill] sm:$0xff] }
 0x6ef   :  { %2660 = vmatpush1.msra.mxu0 %v11517_v52  ;;  %v11528_v52 = vld [vmem:[#allocation37_spill] sm:$0xff] }
 0x6f0   :  { %2661 = vmatprep.subr.mxu0 %v11518_v44  ;;  %v11529_v44 = vld [vmem:[#allocation39_spill] sm:$0xff] }
 0x6f1   :  { %2662 = vmatpush1.msra.mxu0 %v11519_v46  ;;  %v11530_v46 = vld [vmem:[#allocation41_spill] sm:$0xff] }
 0x6f2   :  { %2663 = vmatprep.subr.mxu0 %v11520_v38  ;;  %v11531_v38 = vld [vmem:[#allocation43_spill] sm:$0xff] }
 0x6f3   :  { %2664 = vmatpush1.msra.mxu0 %v11521_v27  ;;  %v11532_v27 = vld [vmem:[#allocation45_spill] sm:$0xff] }
 0x6f4   :  { %2665 = vmatprep.subr.mxu0 %v11522_v15  ;;  %v11533_v15 = vld [vmem:[#allocation47_spill] sm:$0xff] }
 0x6f5   :  { %2666 = vmatpush1.msra.mxu0 %v11523_v24  ;;  %v11534_v24 = vld [vmem:[#allocation49_spill] sm:$0xff] }
 0x6f6   :  { %2667 = vmatprep.subr.mxu0 %v11524_v17  ;;  %v11535_v17 = vld [vmem:[#allocation51_spill] sm:$0xff] }
 0x6f7   :  { %2668 = vmatpush1.msra.mxu0 %v11525_v28  ;;  %v11536_v28 = vld [vmem:[#allocation53_spill] sm:$0xff] }
 0x6f8   :  { %2669 = vmatprep.subr.mxu0 %v11526_v54  ;;  %v11537_v54 = vld [vmem:[#allocation55_spill] sm:$0xff] }
 0x6f9   :  { %2670 = vmatpush1.msra.mxu0 %v11527_v11  ;;  %v11538_v11 = vld [vmem:[#allocation57_spill] sm:$0xff] }
 0x6fa   :  { %2671 = vmatprep.subr.mxu0 %v11528_v52  ;;  %v11539_v52 = vld [vmem:[#allocation59_spill] sm:$0xff] }
 0x6fb   :  { %2672 = vmatpush1.msra.mxu0 %v11529_v44  ;;  %v8711_v44 = vld [vmem:[#allocation2 + $0x1e8] sm:$0xff] }
 0x6fc   :  { %2673 = vmatprep.subr.mxu0 %v11530_v46  ;;  %11540 = vst [vmem:[#allocation88_spill] sm:$0xff] %v8711_v44  ;;  %v2333_v46 = vpop.f32.mrf.mxu1 }
 0x6fd   :  { %2674 = vmatpush1.msra.mxu0 %v11531_v38 }
 0x6fe   :  { %2675 = vmatprep.subr.mxu0 %v11532_v27  ;;  %v8717_v27 = vld [vmem:[%s10545_s8] ss:$0 sm:$0xff] }
 0x6ff   :  { %2676 = vmatpush1.msra.mxu0 %v11533_v15  ;;  %11541 = vst [vmem:[#allocation86_spill] sm:$0xff] %v8717_v27 }
 0x700   :  { %2677 = vmatprep.subr.mxu0 %v11534_v24  ;;  %v2335_v24 = vpop.f32.mrf.mxu1 }
 0x701   :  { %2678 = vmatpush1.msra.mxu0 %v11535_v17 }
 0x702   :  { %2679 = vmatprep.subr.mxu0 %v11536_v28  ;;  %v11542_v28 = vld [vmem:[#allocation96_spill] sm:$0xff] }
 0x703   :  { %2680 = vmatpush1.msra.mxu0 %v11537_v54  ;;  %v2410_v54 = vadd.f32 %v2335_v24, %v11542_v28 }
 0x704   :  { %2681 = vmatprep.subr.mxu0 %v11538_v11  ;;  %v11543_v11 = vld [vmem:[#allocation94_spill] sm:$0xff] }
 0x705   :  { %2682 = vmatpush1.msra.mxu0 %v11539_v52  ;;  %v2409_v52 = vadd.f32 %v2333_v46, %v11543_v11 }
 0x706   :  { %2823 = vmatprep.subr.mxu0 %v8711_v44  ;;  %v5091_v44 = vmul.f32 -1.442695, %v2410_v54 }
 0x707   :  { %v5090_v47 = vmul.f32 -1.442695, %v2409_v52  ;;  %v8827_v52 = vld [vmem:[#allocation2 + $0x28] sm:$0xff] }
 0x708   :  { %5656 = vpow2.f32 %v5091_v44  ;;  %11551 = vst [vmem:[#allocation119_spill] sm:$0xff] %v8827_v52 }
 0x709   :  { %5658 = vpow2.f32 %v5090_v47 }
 0x715   :  { %v5657_v39 = vpop.eup %5656 }
 0x716   :  { %v5659_v60 = vpop.eup %5658  ;;  %v2422_v8 = vadd.f32 1.0, %v5657_v39 }
 0x717   :  { %v2416_v1 = vadd.f32 1.0, %v5659_v60 }
 0x718   :  { %5660 = vrcp.f32 %v2422_v8 }
 0x719   :  { %5662 = vrcp.f32 %v2416_v1 }
 0x725   :  { %v5661_v46 = vpop.eup %5660 }
 0x726   :  { %v5663_v28 = vpop.eup %5662  ;;  %v2432_v47 = vmul.f32 %v5661_v46, %v8231_v14  ;;  %v8751_v14 = vld [vmem:[#allocation2 + $0x160] sm:$0xff] }
 0x727   :  { %v8839_v46 = vld [vmem:[#allocation2] sm:$0xff] }
 0x728   :  { %11556 = vst [vmem:[#allocation122_spill] sm:$0xff] %v8839_v46 }
 0x766   :  { %v2261_v38 = vpop.f32.mrf.mxu0 }
 0x767   :  { %v2262_v15 = vadd.f32 %v8717_v27, %v2261_v38 }
 0x768   :  { %v5365_v17 = vpop.f32.mrf.mxu0 }
 0x769   :  { %5089 = vst.msk [vmem:[%s10546_s9 + $0x10] sm:$0xff] %vm1153_vm2, %v2262_v15  ;;  %v11544_v17 = vld [vmem:[#allocation95_spill] sm:$0xff]  ;;  %v11545_v15 = vld [vmem:[#allocation97_spill] sm:$0xff] }
 0x786   :  { %v2404_v38 = vpop.f32.mrf.mxu0 }
 0x787   :  { %v2411_v27 = vadd.f32 %v2404_v38, %v11544_v17  ;;  %v11552_v38 = vld [vmem:[#allocation65_spill] sm:$0xff] }
 0x788   :  { %v2406_v42 = vpop.f32.mrf.mxu0  ;;  %v8831_v17 = vld [vmem:[#allocation2 + $0x20] sm:$0xff] }
 0x789   :  { %5664 = vtanh.f32 %v2411_v27  ;;  %v2412_v3 = vadd.f32 %v2406_v42, %v11545_v15  ;;  %v8823_v42 = vld [vmem:[#allocation2 + $0x40] sm:$0xff]  ;;  %11553 = vst [vmem:[#allocation120_spill] sm:$0xff] %v8831_v17  ;;  %v8835_v15 = vld [vmem:[#allocation2 + $0x8] sm:$0xff] }
 0x78a   :  { %11550 = vst [vmem:[#allocation118_spill] sm:$0xff] %v8823_v42  ;;  %11554 = vst [vmem:[#allocation121_spill] sm:$0xff] %v8835_v15 }
 0x78b   :  { %v5092_v24 = vmul.f32 -1.442695, %v2412_v3 }
 0x78d   :  { %5666 = vpow2.f32 %v5092_v24  ;;  %v11555_v24 = vld [vmem:[#allocation67_spill] sm:$0xff] }
 0x796   :  { %v5665_v54 = vpop.eup %5664 }
 0x797   :  { %v2433_v44 = vmul.f32 %v5665_v54, %v5663_v28  ;;  %v8844_v28 = vld [vmem:[#allocation6 + $0x1e8] sm:$0xff]  ;;  %v8847_v54 = vld [vmem:[#allocation6 + $0x1e0] sm:$0xff] }
 0x798   :  { %11557 = vst [vmem:[#allocation123_spill] sm:$0xff] %v8844_v28  ;;  %11558 = vst [vmem:[#allocation124_spill] sm:$0xff] %v8847_v54 }
 0x799   :  { %v8729_v11 = vadd.f32 %v2433_v44, %v2432_v47  ;;  %v8851_v47 = vld [vmem:[#allocation6 + $0x1c8] sm:$0xff]  ;;  %v11560_v44 = vld [vmem:[#allocation69_spill] sm:$0xff] }
 0x79a   :  { %v5667_v60 = vpop.eup %5666  ;;  %11559 = vst [vmem:[#allocation125_spill] sm:$0xff] %v8851_v47 }
 0x79b   :  { %v2429_v39 = vadd.f32 1.0, %v5667_v60  ;;  %5668 = vtanh.f32 %v8729_v11  ;;  %v8855_v60 = vld [vmem:[#allocation6 + $0x1c0] sm:$0xff] }
 0x79c   :  { %11561 = vst [vmem:[#allocation126_spill] sm:$0xff] %v8855_v60 }
 0x79d   :  { %5670 = vrcp.f32 %v2429_v39  ;;  %v8860_v39 = vld [vmem:[#allocation6 + $0x1a8] sm:$0xff] }
 0x79e   :  { %11562 = vst [vmem:[#allocation127_spill] sm:$0xff] %v8860_v39 }
 0x7a8   :  { %v5669_v1 = vpop.eup %5668 }
 0x7aa   :  { %v5671_v8 = vpop.eup %5670 }
 0x7ab   :  { %v8732_v27 = vmul.f32 %v5671_v8, %v5669_v1  ;;  %v11563_v1 = vld [vmem:[#allocation71_spill] sm:$0xff]  ;;  %v8864_v8 = vld [vmem:[#allocation6 + $0x1a0] sm:$0xff] }
 0x7ac   :  { %11564 = vst [vmem:[#allocation128_spill] sm:$0xff] %v8864_v8 }
 0x7ad   :  { %5672 = vtanh.f32 %v8732_v27 }
 0x7ba   :  { %v5673_v3 = vpop.eup %5672 }
 0x7bb   :  { %2645 = vmatmul.mubr.f32.vlgmr.msra.gmra.mxu1 %v5673_v3  ;;  %2716 = vmatmul.mubr.f32.vlgmr.msra.gmra.mxu0 %v5673_v3  ;;  %v8867_v3 = vld [vmem:[#allocation6 + $0x188] sm:$0xff] }
 0x7bc   :  { %2824 = vmatpush1.msra.mxu0 %v8237_v48  ;;  %2887 = vmatprep.mubr.f32.mxu0 %v11109_v2  ;;  %v8755_v48 = vld [vmem:[#allocation2 + $0x148] sm:$0xff]  ;;  %11565 = vst [vmem:[#allocation129_spill] sm:$0xff] %v8867_v3 }
 0x7bd   :  { %2825 = vmatprep.subr.mxu0 %v8241_v40  ;;  %5367 = vmatpush3.msra.mxu1 %v8247_v56  ;;  %v8759_v40 = vld [vmem:[#allocation2 + $0x140] sm:$0xff]  ;;  %v8763_v56 = vld [vmem:[#allocation2 + $0x128] sm:$0xff] }
 0x7be   :  { %2826 = vmatpush1.msra.mxu0 %v8250_v25  ;;  %5368 = vmatprep.subr.mxu1 %v11109_v2  ;;  %v8767_v25 = vld [vmem:[#allocation2 + $0x120] sm:$0xff] }
 0x7bf   :  { %2827 = vmatprep.subr.mxu0 %v8254_v0  ;;  %5369 = vmatpush3.msra.mxu1 %v8260_v59  ;;  %v8771_v0 = vld [vmem:[#allocation2 + $0x108] sm:$0xff]  ;;  %v8775_v59 = vld [vmem:[#allocation2 + $0x100] sm:$0xff] }
 0x7c0   :  { %2828 = vmatpush1.msra.mxu0 %v8263_v29  ;;  %5370 = vmatprep.subr.mxu1 %v11109_v2  ;;  %v8779_v29 = vld [vmem:[#allocation2 + $0xe8] sm:$0xff] }
 0x7c1   :  { %2829 = vmatprep.subr.mxu0 %v8267_v12  ;;  %5371 = vmatpush3.msra.mxu1 %v8273_v51  ;;  %v8783_v12 = vld [vmem:[#allocation2 + $0xe0] sm:$0xff]  ;;  %v8787_v51 = vld [vmem:[#allocation2 + $0xc8] sm:$0xff] }
 0x7c2   :  { %2830 = vmatpush1.msra.mxu0 %v8276_v9  ;;  %5372 = vmatprep.subr.mxu1 %v11109_v2  ;;  %v8791_v9 = vld [vmem:[#allocation2 + $0xc0] sm:$0xff] }
 0x7c3   :  { %2831 = vmatprep.subr.mxu0 %v8280_v61  ;;  %5373 = vmatpush3.msra.mxu1 %v8286_v21  ;;  %v8795_v61 = vld [vmem:[#allocation2 + $0xa8] sm:$0xff]  ;;  %v8799_v21 = vld [vmem:[#allocation2 + $0xa0] sm:$0xff] }
 0x7c4   :  { %2832 = vmatpush1.msra.mxu0 %v8751_v14  ;;  %5374 = vmatprep.subr.mxu1 %v11109_v2 }
 0x7c5   :  { %2833 = vmatprep.subr.mxu0 %v8755_v48  ;;  %5375 = vmatpush3.msra.mxu1 %v8295_v49  ;;  %v8803_v49 = vld [vmem:[#allocation2 + $0x88] sm:$0xff] }
 0x7c6   :  { %2834 = vmatpush1.msra.mxu0 %v8759_v40  ;;  %5376 = vmatprep.subr.mxu1 %v11109_v2 }
 0x7c7   :  { %2835 = vmatprep.subr.mxu0 %v8763_v56  ;;  %5377 = vmatpush3.msra.mxu1 %v8304_v10  ;;  %v8807_v10 = vld [vmem:[#allocation2 + $0x80] sm:$0xff] }
 0x7c8   :  { %2836 = vmatpush1.msra.mxu0 %v8767_v25  ;;  %5378 = vmatprep.subr.mxu1 %v11109_v2 }
 0x7c9   :  { %2837 = vmatprep.subr.mxu0 %v8771_v0  ;;  %5379 = vmatpush3.msra.mxu1 %v8313_v62  ;;  %v8811_v62 = vld [vmem:[#allocation2 + $0x68] sm:$0xff] }
 0x7ca   :  { %2838 = vmatpush1.msra.mxu0 %v8775_v59  ;;  %5380 = vmatprep.subr.mxu1 %v11109_v2 }
 0x7cb   :  { %2839 = vmatprep.subr.mxu0 %v8779_v29  ;;  %5381 = vmatpush3.msra.mxu1 %v8322_v19  ;;  %v11546_v19 = vld [vmem:[#allocation61_spill] sm:$0xff] }
 0x7cc   :  { %2840 = vmatpush1.msra.mxu0 %v8783_v12  ;;  %5382 = vmatprep.subr.mxu1 %v11109_v2 }
 0x7cd   :  { %2841 = vmatprep.subr.mxu0 %v8787_v51  ;;  %5383 = vmatpush3.msra.mxu1 %v8331_v16  ;;  %v8815_v16 = vld [vmem:[#allocation2 + $0x60] sm:$0xff] }
 0x7ce   :  { %2842 = vmatpush1.msra.mxu0 %v8791_v9  ;;  %5384 = vmatprep.subr.mxu1 %v11109_v2  ;;  %11547 = vst [vmem:[#allocation87_spill] sm:$0xff] %v8815_v16 }
 0x7cf   :  { %2843 = vmatprep.subr.mxu0 %v8795_v61  ;;  %5385 = vmatpush3.msra.mxu1 %v8340_v58  ;;  %v8819_v58 = vld [vmem:[#allocation2 + $0x48] sm:$0xff] }
 0x7d0   :  { %2844 = vmatpush1.msra.mxu0 %v8799_v21  ;;  %5386 = vmatprep.subr.mxu1 %v11109_v2  ;;  %11548 = vst [vmem:[#allocation89_spill] sm:$0xff] %v8819_v58 }
 0x7d1   :  { %2845 = vmatprep.subr.mxu0 %v8803_v49  ;;  %5387 = vmatpush3.msra.mxu1 %v8349_v6  ;;  %v11549_v6 = vld [vmem:[#allocation63_spill] sm:$0xff] }
 0x7d2   :  { %2846 = vmatpush1.msra.mxu0 %v8807_v10  ;;  %5388 = vmatprep.subr.mxu1 %v11109_v2 }
 0x7d3   :  { %2847 = vmatprep.subr.mxu0 %v8811_v62  ;;  %5389 = vmatpush3.msra.mxu1 %v11546_v19  ;;  %v8870_v19 = vld [vmem:[#allocation6 + $0x180] sm:$0xff] }
 0x7d4   :  { %2848 = vmatpush1.msra.mxu0 %v8815_v16  ;;  %5390 = vmatprep.subr.mxu1 %v11109_v2  ;;  %11566 = vst [vmem:[#allocation9_spill] sm:$0xff] %v8870_v19 }
 0x7d5   :  { %2849 = vmatprep.subr.mxu0 %v8819_v58  ;;  %5391 = vmatpush3.msra.mxu1 %v11549_v6  ;;  %v8873_v6 = vld [vmem:[#allocation6 + $0x168] sm:$0xff] }
 0x7d6   :  { %2850 = vmatpush1.msra.mxu0 %v8823_v42  ;;  %5392 = vmatprep.subr.mxu1 %v11109_v2  ;;  %11567 = vst [vmem:[#allocation10_spill] sm:$0xff] %v8873_v6 }
 0x7d7   :  { %2851 = vmatprep.subr.mxu0 %v8827_v52  ;;  %5393 = vmatpush3.msra.mxu1 %v11552_v38  ;;  %v8876_v38 = vld [vmem:[#allocation6 + $0x160] sm:$0xff] }
 0x7d8   :  { %2852 = vmatpush1.msra.mxu0 %v8831_v17  ;;  %5394 = vmatprep.subr.mxu1 %v11109_v2  ;;  %11568 = vst [vmem:[#allocation11_spill] sm:$0xff] %v8876_v38 }
 0x7d9   :  { %2853 = vmatprep.subr.mxu0 %v8835_v15  ;;  %5395 = vmatpush3.msra.mxu1 %v11555_v24  ;;  %v8879_v24 = vld [vmem:[#allocation6 + $0x148] sm:$0xff] }
 0x7da   :  { %2854 = vmatpush1.msra.mxu0 %v8839_v46  ;;  %5396 = vmatprep.subr.mxu1 %v11109_v2  ;;  %11569 = vst [vmem:[#allocation12_spill] sm:$0xff] %v8879_v24 }
 0x7db   :  { %2888 = vmatmul.mubr.f32.vlgmr.msra.gmra.mxu0 %v8732_v27  ;;  %2994 = vmatprep.subr.mxu0 %v8844_v28 }
 0x7dc   :  { %2995 = vmatpush1.msra.mxu0 %v8847_v54  ;;  %3058 = vmatprep.mubr.f32.mxu0 %v11109_v2 }
 0x7dd   :  { %2996 = vmatprep.subr.mxu0 %v8851_v47  ;;  %5397 = vmatpush3.msra.mxu1 %v11560_v44  ;;  %v8882_v44 = vld [vmem:[#allocation6 + $0x140] sm:$0xff] }
 0x7de   :  { %2997 = vmatpush1.msra.mxu0 %v8855_v60  ;;  %5398 = vmatprep.mubr.msk.f32.mxu1 %vm6607_vm1, %v11109_v2  ;;  %11570 = vst [vmem:[#allocation13_spill] sm:$0xff] %v8882_v44 }
 0x7df   :  { %2998 = vmatprep.subr.mxu0 %v8860_v39  ;;  %2894 = vmatprep.subr.mxu1 %v11563_v1  ;;  %v8885_v1 = vld [vmem:[#allocation6 + $0x128] sm:$0xff] }
 0x7e0   :  { %2999 = vmatpush1.msra.mxu0 %v8864_v8  ;;  %11571 = vst [vmem:[#allocation14_spill] sm:$0xff] %v8885_v1 }
 0x7e1   :  { %3000 = vmatprep.subr.mxu0 %v8867_v3  ;;  %v2575_v3 = vpop.f32.mrf.mxu0 }
 0x7e2   :  { %3001 = vmatpush1.msra.mxu0 %v8870_v19  ;;  %v8888_v19 = vld [vmem:[#allocation6 + $0x120] sm:$0xff] }
 0x7e3   :  { %3002 = vmatprep.subr.mxu0 %v8873_v6  ;;  %11572 = vst [vmem:[#allocation15_spill] sm:$0xff] %v8888_v19  ;;  %v8891_v6 = vld [vmem:[#allocation6 + $0x108] sm:$0xff]  ;;  %v2577_v39 = vpop.f32.mrf.mxu0 }
 0x7e4   :  { %3003 = vmatpush1.msra.mxu0 %v8876_v38  ;;  %11573 = vst [vmem:[#allocation16_spill] sm:$0xff] %v8891_v6  ;;  %v8894_v38 = vld [vmem:[#allocation6 + $0x100] sm:$0xff] }
 0x7e5   :  { %3004 = vmatprep.subr.mxu0 %v8879_v24  ;;  %11574 = vst [vmem:[#allocation17_spill] sm:$0xff] %v8894_v38  ;;  %v8897_v24 = vld [vmem:[#allocation6 + $0xe8] sm:$0xff] }
 0x7e6   :  { %3005 = vmatpush1.msra.mxu0 %v8882_v44  ;;  %11575 = vst [vmem:[#allocation18_spill] sm:$0xff] %v8897_v24  ;;  %v8900_v44 = vld [vmem:[#allocation6 + $0xe0] sm:$0xff] }
 0x7e7   :  { %3006 = vmatprep.subr.mxu0 %v8885_v1  ;;  %11576 = vst [vmem:[#allocation19_spill] sm:$0xff] %v8900_v44  ;;  %v8903_v1 = vld [vmem:[#allocation6 + $0xc8] sm:$0xff] }
 0x7e8   :  { %3007 = vmatpush1.msra.mxu0 %v8888_v19  ;;  %11577 = vst [vmem:[#allocation20_spill] sm:$0xff] %v8903_v1  ;;  %v8906_v19 = vld [vmem:[#allocation6 + $0xc0] sm:$0xff] }
 0x7e9   :  { %3008 = vmatprep.subr.mxu0 %v8891_v6  ;;  %11578 = vst [vmem:[#allocation21_spill] sm:$0xff] %v8906_v19  ;;  %v8909_v6 = vld [vmem:[#allocation6 + $0xa8] sm:$0xff] }
 0x7ea   :  { %3009 = vmatpush1.msra.mxu0 %v8894_v38  ;;  %11579 = vst [vmem:[#allocation22_spill] sm:$0xff] %v8909_v6  ;;  %v8912_v38 = vld [vmem:[#allocation6 + $0xa0] sm:$0xff] }
 0x7eb   :  { %3010 = vmatprep.subr.mxu0 %v8897_v24  ;;  %11580 = vst [vmem:[#allocation23_spill] sm:$0xff] %v8912_v38  ;;  %v8915_v24 = vld [vmem:[#allocation6 + $0x88] sm:$0xff] }
 0x7ec   :  { %3011 = vmatpush1.msra.mxu0 %v8900_v44  ;;  %11581 = vst [vmem:[#allocation24_spill] sm:$0xff] %v8915_v24  ;;  %v8918_v44 = vld [vmem:[#allocation6 + $0x80] sm:$0xff] }
 0x7ed   :  { %3012 = vmatprep.subr.mxu0 %v8903_v1  ;;  %11582 = vst [vmem:[#allocation25_spill] sm:$0xff] %v8918_v44  ;;  %v8921_v1 = vld [vmem:[#allocation6 + $0x68] sm:$0xff] }
 0x7ee   :  { %3013 = vmatpush1.msra.mxu0 %v8906_v19  ;;  %11583 = vst [vmem:[#allocation27_spill] sm:$0xff] %v8921_v1  ;;  %v8924_v19 = vld [vmem:[#allocation6 + $0x60] sm:$0xff] }
 0x7ef   :  { %3014 = vmatprep.subr.mxu0 %v8909_v6  ;;  %11584 = vst [vmem:[#allocation29_spill] sm:$0xff] %v8924_v19  ;;  %v8927_v6 = vld [vmem:[#allocation6 + $0x48] sm:$0xff] }
 0x7f0   :  { %3015 = vmatpush1.msra.mxu0 %v8912_v38  ;;  %11585 = vst [vmem:[#allocation31_spill] sm:$0xff] %v8927_v6  ;;  %v8930_v38 = vld [vmem:[#allocation6 + $0x40] sm:$0xff] }
 0x7f1   :  { %3016 = vmatprep.subr.mxu0 %v8915_v24  ;;  %11586 = vst [vmem:[#allocation33_spill] sm:$0xff] %v8930_v38  ;;  %v8933_v24 = vld [vmem:[#allocation6 + $0x28] sm:$0xff] }
 0x7f2   :  { %3017 = vmatpush1.msra.mxu0 %v8918_v44  ;;  %11587 = vst [vmem:[#allocation35_spill] sm:$0xff] %v8933_v24  ;;  %v8936_v44 = vld [vmem:[#allocation6 + $0x20] sm:$0xff] }
 0x7f3   :  { %3018 = vmatprep.subr.mxu0 %v8921_v1  ;;  %11588 = vst [vmem:[#allocation37_spill] sm:$0xff] %v8936_v44  ;;  %v8939_v1 = vld [vmem:[#allocation6 + $0x8] sm:$0xff] }
 0x7f4   :  { %3019 = vmatpush1.msra.mxu0 %v8924_v19  ;;  %11589 = vst [vmem:[#allocation39_spill] sm:$0xff] %v8939_v1  ;;  %v8942_v19 = vld [vmem:[#allocation6] sm:$0xff] }
 0x7f5   :  { %3020 = vmatprep.subr.mxu0 %v8927_v6  ;;  %11590 = vst [vmem:[#allocation41_spill] sm:$0xff] %v8942_v19  ;;  %v8945_v6 = vld [vmem:[#allocation4 + $0x1e8] sm:$0xff] }
 0x7f6   :  { %3021 = vmatpush1.msra.mxu0 %v8930_v38  ;;  %11591 = vst [vmem:[#allocation43_spill] sm:$0xff] %v8945_v6  ;;  %v2504_v38 = vpop.f32.mrf.mxu1 }
 0x7f7   :  { %3022 = vmatprep.subr.mxu0 %v8933_v24 }
 0x7f8   :  { %3023 = vmatpush1.msra.mxu0 %v8936_v44  ;;  %v2506_v8 = vpop.f32.mrf.mxu1 }
 0x7f9   :  { %3024 = vmatprep.subr.mxu0 %v8939_v1 }
 0x7fa   :  { %3025 = vmatpush1.msra.mxu0 %v8942_v19 }
 0x7fb   :  { %3136 = vmatprep.subr.mxu0 %v8945_v6 }
 0x87b   :  { %v2646_v24 = vpop.f32.mrf.mxu1  ;;  %v2717_v54 = vpop.f32.mrf.mxu0 }
 0x87c   :  { %v2647_v60 = vadd.f32 %v2646_v24, %v2504_v38  ;;  %v2718_v52 = vadd.f32 %v2717_v54, %v2575_v3  ;;  %v8970_v3 = vld [vmem:[#allocation4 + $0x1a8] sm:$0xff] }
 0x87d   :  { %v2648_v47 = vpop.f32.mrf.mxu1  ;;  %v2719_v15 = vpop.f32.mrf.mxu0 }
 0x87e   :  { %v2722_v44 = vadd.f32 %v2647_v60, %v7428_v4  ;;  %v2649_v28 = vadd.f32 %v2648_v47, %v2506_v8  ;;  %v2720_v17 = vadd.f32 %v2719_v15, %v2577_v39  ;;  %v2724_v38 = vadd.f32 %v2718_v52, %v7443_v41  ;;  %v8967_v39 = vld [vmem:[#allocation4 + $0x1c0] sm:$0xff] }
 0x880   :  { %v5093_v1 = vmul.f32 -1.442695, %v2722_v44  ;;  %v2723_v46 = vadd.f32 %v2649_v28, %v7432_v33  ;;  %v2725_v6 = vadd.f32 %v2720_v17, %v7438_v32  ;;  %v8976_v44 = vld [vmem:[#allocation4 + $0x188] sm:$0xff] }
 0x882   :  { %5674 = vpow2.f32 %v5093_v1  ;;  %v5094_v19 = vmul.f32 -1.442695, %v2723_v46  ;;  %v5095_v42 = vmul.f32 -1.442695, %v2725_v6  ;;  %v8973_v6 = vld [vmem:[#allocation4 + $0x1a0] sm:$0xff] }
 0x883   :  { %v8979_v1 = vld [vmem:[#allocation4 + $0x180] sm:$0xff] }
 0x884   :  { %5676 = vpow2.f32 %v5094_v19 }
 0x885   :  { %5678 = vpow2.f32 %v5095_v42 }
 0x88f   :  { %v5675_v58 = vpop.eup %5674 }
 0x890   :  { %v2729_v24 = vadd.f32 1.0, %v5675_v58 }
 0x891   :  { %v5677_v16 = vpop.eup %5676 }
 0x892   :  { %5680 = vrcp.f32 %v2729_v24  ;;  %v2735_v47 = vadd.f32 1.0, %v5677_v16  ;;  %v5679_v28 = vpop.eup %5678  ;;  %v8960_v16 = vld [vmem:[#allocation4 + $0x1e0] sm:$0xff] }
 0x893   :  { %5682 = vtanh.f32 %v2724_v38  ;;  %v2742_v19 = vadd.f32 1.0, %v5679_v28  ;;  %v8982_v38 = vld [vmem:[#allocation4 + $0x168] sm:$0xff]  ;;  %v8985_v24 = vld [vmem:[#allocation4 + $0x160] sm:$0xff] }
 0x894   :  { %5684 = vrcp.f32 %v2735_v47  ;;  %v8988_v47 = vld [vmem:[#allocation4 + $0x148] sm:$0xff]  ;;  %v8991_v28 = vld [vmem:[#allocation4 + $0x140] sm:$0xff] }
 0x895   :  { %5686 = vrcp.f32 %v2742_v19  ;;  %v9000_v19 = vld [vmem:[#allocation4 + $0x108] sm:$0xff] }
 0x89f   :  { %v5681_v60 = vpop.eup %5680 }
 0x8a0   :  { %v5683_v46 = vpop.eup %5682 }
 0x8a1   :  { %v5685_v8 = vpop.eup %5684  ;;  %v2746_v15 = vmul.f32 %v5683_v46, %v5681_v60  ;;  %v8994_v60 = vld [vmem:[#allocation4 + $0x128] sm:$0xff] }
 0x8a2   :  { %v2745_v17 = vmul.f32 %v5685_v8, %v8441_v26  ;;  %v5687_v58 = vpop.eup %5686  ;;  %v8964_v26 = vld [vmem:[#allocation4 + $0x1c8] sm:$0xff]  ;;  %v8997_v8 = vld [vmem:[#allocation4 + $0x120] sm:$0xff] }
 0x8a4   :  { %v8953_v54 = vadd.f32 %v2746_v15, %v2745_v17  ;;  %v9006_v15 = vld [vmem:[#allocation4 + $0x100] sm:$0xff]  ;;  %v9010_v17 = vld [vmem:[#allocation4 + $0xe8] sm:$0xff] }
 0x8a6   :  { %5688 = vtanh.f32 %v8953_v54 }
 0x8b3   :  { %v5689_v52 = vpop.eup %5688 }
 0x8b4   :  { %v8956_v42 = vmul.f32 %v5689_v52, %v5687_v58  ;;  %v9014_v58 = vld [vmem:[#allocation4 + $0xe0] sm:$0xff]  ;;  %v11603_v52 = vld [vmem:[#allocation79_spill] sm:$0xff] }
 0x8b6   :  { %5690 = vtanh.f32 %v8956_v42  ;;  %3059 = vmatmul.mubr.f32.vlgmr.msra.gmra.mxu0 %v8956_v42 }
 0x8b7   :  { %3137 = vmatpush1.msra.mxu0 %v8960_v16  ;;  %3200 = vmatprep.mubr.f32.mxu0 %v11109_v2 }
 0x8b8   :  { %3138 = vmatprep.subr.mxu0 %v8964_v26 }
 0x8b9   :  { %3139 = vmatpush1.msra.mxu0 %v8967_v39 }
 0x8ba   :  { %3140 = vmatprep.subr.mxu0 %v8970_v3 }
 0x8bb   :  { %3141 = vmatpush1.msra.mxu0 %v8973_v6 }
 0x8bc   :  { %3142 = vmatprep.subr.mxu0 %v8976_v44 }
 0x8bd   :  { %3143 = vmatpush1.msra.mxu0 %v8979_v1 }
 0x8be   :  { %3144 = vmatprep.subr.mxu0 %v8982_v38 }
 0x8bf   :  { %3145 = vmatpush1.msra.mxu0 %v8985_v24 }
 0x8c0   :  { %3146 = vmatprep.subr.mxu0 %v8988_v47 }
 0x8c1   :  { %3147 = vmatpush1.msra.mxu0 %v8991_v28 }
 0x8c2   :  { %3148 = vmatprep.subr.mxu0 %v8994_v60 }
 0x8c3   :  { %v5691_v46 = vpop.eup %5690  ;;  %3149 = vmatpush1.msra.mxu0 %v8997_v8 }
 0x8c4   :  { %5399 = vmatmul.mubr.f32.vlgmr.msra.gmra.mxu1 %v5691_v46  ;;  %3150 = vmatprep.subr.mxu0 %v9000_v19  ;;  %v11604_v46 = vld [vmem:[#allocation81_spill] sm:$0xff] }
 0x8c5   :  { %2895 = vmatpush1.msra.mxu1 %v8463_v31  ;;  %2958 = vmatprep.mubr.f32.mxu1 %v11109_v2  ;;  %v9018_v31 = vld [vmem:[#allocation4 + $0xc8] sm:$0xff] }
 0x8c6   :  { %2896 = vmatprep.subr.mxu1 %v8467_v63  ;;  %3151 = vmatpush1.msra.mxu0 %v9006_v15  ;;  %v9022_v63 = vld [vmem:[#allocation4 + $0xc0] sm:$0xff] }
 0x8c7   :  { %2897 = vmatpush1.msra.mxu1 %v8471_v45  ;;  %3152 = vmatprep.subr.mxu0 %v9010_v17  ;;  %v9026_v45 = vld [vmem:[#allocation4 + $0xa8] sm:$0xff] }
 0x8c8   :  { %2898 = vmatprep.subr.mxu1 %v8475_v23  ;;  %3153 = vmatpush1.msra.mxu0 %v9014_v58  ;;  %v9030_v23 = vld [vmem:[#allocation4 + $0xa0] sm:$0xff] }
 0x8c9   :  { %2899 = vmatpush1.msra.mxu1 %v8479_v53  ;;  %3154 = vmatprep.subr.mxu0 %v9018_v31  ;;  %v9034_v53 = vld [vmem:[#allocation4 + $0x88] sm:$0xff] }
 0x8ca   :  { %2900 = vmatprep.subr.mxu1 %v8483_v37  ;;  %3155 = vmatpush1.msra.mxu0 %v9022_v63  ;;  %v9038_v37 = vld [vmem:[#allocation4 + $0x80] sm:$0xff] }
 0x8cb   :  { %2901 = vmatpush1.msra.mxu1 %v8487_v55  ;;  %3156 = vmatprep.subr.mxu0 %v9026_v45  ;;  %v9042_v55 = vld [vmem:[#allocation4 + $0x68] sm:$0xff] }
 0x8cc   :  { %2902 = vmatprep.subr.mxu1 %v8491_v34  ;;  %3157 = vmatpush1.msra.mxu0 %v9030_v23  ;;  %11592 = vst [vmem:[#allocation45_spill] sm:$0xff] %v9042_v55  ;;  %v9046_v34 = vld [vmem:[#allocation4 + $0x60] sm:$0xff] }
 0x8cd   :  { %2903 = vmatpush1.msra.mxu1 %v8495_v18  ;;  %3158 = vmatprep.subr.mxu0 %v9034_v53  ;;  %11593 = vst [vmem:[#allocation47_spill] sm:$0xff] %v9046_v34  ;;  %v9050_v18 = vld [vmem:[#allocation4 + $0x48] sm:$0xff] }
 0x8ce   :  { %2904 = vmatprep.subr.mxu1 %v8499_v50  ;;  %3159 = vmatpush1.msra.mxu0 %v9038_v37  ;;  %11594 = vst [vmem:[#allocation49_spill] sm:$0xff] %v9050_v18  ;;  %v9054_v50 = vld [vmem:[#allocation4 + $0x40] sm:$0xff] }
 0x8cf   :  { %2905 = vmatpush1.msra.mxu1 %v8503_v35  ;;  %3160 = vmatprep.subr.mxu0 %v9042_v55  ;;  %11595 = vst [vmem:[#allocation51_spill] sm:$0xff] %v9054_v50  ;;  %v9058_v35 = vld [vmem:[#allocation4 + $0x28] sm:$0xff] }
 0x8d0   :  { %2906 = vmatprep.subr.mxu1 %v8507_v5  ;;  %3161 = vmatpush1.msra.mxu0 %v9046_v34  ;;  %11596 = vst [vmem:[#allocation53_spill] sm:$0xff] %v9058_v35  ;;  %v9062_v5 = vld [vmem:[#allocation4 + $0x20] sm:$0xff] }
 0x8d1   :  { %2907 = vmatpush1.msra.mxu1 %v8511_v13  ;;  %3162 = vmatprep.subr.mxu0 %v9050_v18  ;;  %11597 = vst [vmem:[#allocation55_spill] sm:$0xff] %v9062_v5  ;;  %v9066_v13 = vld [vmem:[#allocation4 + $0x8] sm:$0xff] }
 0x8d2   :  { %2908 = vmatprep.subr.mxu1 %v8515_v20  ;;  %3163 = vmatpush1.msra.mxu0 %v9054_v50  ;;  %11598 = vst [vmem:[#allocation57_spill] sm:$0xff] %v9066_v13  ;;  %v9070_v20 = vld [vmem:[#allocation4] sm:$0xff] }
 0x8d3   :  { %2909 = vmatpush1.msra.mxu1 %v8519_v43  ;;  %3164 = vmatprep.subr.mxu0 %v9058_v35  ;;  %11599 = vst [vmem:[#allocation59_spill] sm:$0xff] %v9070_v20  ;;  %v11600_v43 = vld [vmem:[#allocation73_spill] sm:$0xff] }
 0x8d4   :  { %2910 = vmatprep.subr.mxu1 %v8523_v22  ;;  %3165 = vmatpush1.msra.mxu0 %v9062_v5  ;;  %v11601_v22 = vld [vmem:[#allocation75_spill] sm:$0xff]  ;;  %v11609_v5 = vld [vmem:[#allocation116_spill] sm:$0xff] }
 0x8d5   :  { %2911 = vmatpush1.msra.mxu1 %v8527_v57  ;;  %3166 = vmatprep.subr.mxu0 %v9066_v13  ;;  %v11602_v57 = vld [vmem:[#allocation77_spill] sm:$0xff] }
 0x8d6   :  { %2912 = vmatprep.subr.mxu1 %v8531_v7  ;;  %3167 = vmatpush1.msra.mxu0 %v9070_v20  ;;  %v11605_v7 = vld [vmem:[#allocation83_spill] sm:$0xff]  ;;  %v11606_v13 = vld [vmem:[#allocation85_spill] sm:$0xff]  ;;  %v11607_v20 = vld [vmem:[#allocation114_spill] sm:$0xff] }
 0x8d7   :  { %2913 = vmatpush1.msra.mxu1 %v8535_v30  ;;  %5401 = vmatprep.subr.mxu0 %v11109_v2  ;;  %v11608_v30 = vld [vmem:[#allocation115_spill] sm:$0xff] }
 0x8d8   :  { %2914 = vmatprep.subr.mxu1 %v8539_v36  ;;  %v11610_v36 = vld [vmem:[#allocation117_spill] sm:$0xff] }
 0x8d9   :  { %2915 = vmatpush1.msra.mxu1 %v11600_v43  ;;  %v11611_v43 = vld [vmem:[#allocation26_spill] sm:$0xff] }
 0x8da   :  { %2916 = vmatprep.subr.mxu1 %v11601_v22  ;;  %v11612_v22 = vld [vmem:[#allocation28_spill] sm:$0xff] }
 0x8db   :  { %2917 = vmatpush1.msra.mxu1 %v11602_v57  ;;  %v11613_v57 = vld [vmem:[#allocation92_spill] sm:$0xff] }
 0x8dc   :  { %2918 = vmatprep.subr.mxu1 %v11603_v52  ;;  %v11614_v52 = vld [vmem:[#allocation90_spill] sm:$0xff] }
 0x8dd   :  { %2919 = vmatpush1.msra.mxu1 %v11604_v46  ;;  %v11617_v46 = vld [vmem:[#allocation30_spill] sm:$0xff] }
 0x8de   :  { %2920 = vmatprep.subr.mxu1 %v11605_v7  ;;  %v11619_v7 = vld [vmem:[#allocation34_spill] sm:$0xff] }
 0x8df   :  { %2921 = vmatpush1.msra.mxu1 %v11606_v13  ;;  %v11615_v13 = vld [vmem:[#allocation91_spill] sm:$0xff] }
 0x8e0   :  { %2922 = vmatprep.subr.mxu1 %v11607_v20  ;;  %v11616_v20 = vld [vmem:[#allocation93_spill] sm:$0xff] }
 0x8e1   :  { %2923 = vmatpush1.msra.mxu1 %v11608_v30  ;;  %v11621_v30 = vld [vmem:[#allocation38_spill] sm:$0xff] }
 0x8e2   :  { %2924 = vmatprep.subr.mxu1 %v11609_v5  ;;  %v11618_v5 = vld [vmem:[#allocation32_spill] sm:$0xff] }
 0x8e3   :  { %2925 = vmatpush1.msra.mxu1 %v11610_v36  ;;  %v11622_v36 = vld [vmem:[#allocation40_spill] sm:$0xff] }
 0x8e4   :  { %2959 = vmatmul.mubr.f32.vlgmr.msra.gmra.mxu1 %v8732_v27  ;;  %3065 = vmatprep.subr.mxu1 %v11611_v43  ;;  %v11620_v27 = vld [vmem:[#allocation36_spill] sm:$0xff]  ;;  %v11623_v43 = vld [vmem:[#allocation42_spill] sm:$0xff] }
 0x8e5   :  { %3066 = vmatpush1.msra.mxu1 %v11612_v22  ;;  %3129 = vmatprep.mubr.f32.mxu1 %v11109_v2  ;;  %v11624_v22 = vld [vmem:[#allocation44_spill] sm:$0xff] }
 0x8e6   :  { %3067 = vmatprep.subr.mxu1 %v11613_v57  ;;  %v11625_v57 = vld [vmem:[#allocation46_spill] sm:$0xff] }
 0x8e7   :  { %3068 = vmatpush1.msra.mxu1 %v11614_v52  ;;  %v11626_v52 = vld [vmem:[#allocation48_spill] sm:$0xff] }
 0x8e8   :  { %3069 = vmatprep.subr.mxu1 %v11615_v13  ;;  %v11627_v13 = vld [vmem:[#allocation50_spill] sm:$0xff] }
 0x8e9   :  { %3070 = vmatpush1.msra.mxu1 %v11616_v20  ;;  %v11628_v20 = vld [vmem:[#allocation52_spill] sm:$0xff] }
 0x8ea   :  { %3071 = vmatprep.subr.mxu1 %v11617_v46  ;;  %v11629_v46 = vld [vmem:[#allocation54_spill] sm:$0xff] }
 0x8eb   :  { %3072 = vmatpush1.msra.mxu1 %v11618_v5  ;;  %v11630_v5 = vld [vmem:[#allocation56_spill] sm:$0xff] }
 0x8ec   :  { %3073 = vmatprep.subr.mxu1 %v11619_v7  ;;  %v11631_v7 = vld [vmem:[#allocation58_spill] sm:$0xff] }
 0x8ed   :  { %3074 = vmatpush1.msra.mxu1 %v11620_v27  ;;  %v11632_v27 = vld [vmem:[#allocation60_spill] sm:$0xff] }
 0x8ee   :  { %3075 = vmatprep.subr.mxu1 %v11621_v30  ;;  %v11633_v30 = vld [vmem:[#allocation62_spill] sm:$0xff] }
 0x8ef   :  { %3076 = vmatpush1.msra.mxu1 %v11622_v36  ;;  %v11634_v36 = vld [vmem:[#allocation64_spill] sm:$0xff] }
 0x8f0   :  { %3077 = vmatprep.subr.mxu1 %v11623_v43  ;;  %v11635_v43 = vld [vmem:[#allocation66_spill] sm:$0xff] }
 0x8f1   :  { %3078 = vmatpush1.msra.mxu1 %v11624_v22  ;;  %v11636_v22 = vld [vmem:[#allocation68_spill] sm:$0xff] }
 0x8f2   :  { %3079 = vmatprep.subr.mxu1 %v11625_v57  ;;  %v11637_v57 = vld [vmem:[#allocation70_spill] sm:$0xff] }
 0x8f3   :  { %3080 = vmatpush1.msra.mxu1 %v11626_v52  ;;  %v11638_v52 = vld [vmem:[#allocation72_spill] sm:$0xff] }
 0x8f4   :  { %3081 = vmatprep.subr.mxu1 %v11627_v13  ;;  %v11639_v13 = vld [vmem:[#allocation74_spill] sm:$0xff] }
 0x8f5   :  { %3082 = vmatpush1.msra.mxu1 %v11628_v20  ;;  %v11640_v20 = vld [vmem:[#allocation76_spill] sm:$0xff] }
 0x8f6   :  { %3083 = vmatprep.subr.mxu1 %v11629_v46  ;;  %v11641_v46 = vld [vmem:[#allocation78_spill] sm:$0xff] }
 0x8f7   :  { %3084 = vmatpush1.msra.mxu1 %v11630_v5  ;;  %v11642_v5 = vld [vmem:[#allocation80_spill] sm:$0xff] }
 0x8f8   :  { %3085 = vmatprep.subr.mxu1 %v11631_v7  ;;  %v11643_v7 = vld [vmem:[#allocation82_spill] sm:$0xff] }
 0x8f9   :  { %3086 = vmatpush1.msra.mxu1 %v11632_v27  ;;  %v11644_v27 = vld [vmem:[#allocation84_spill] sm:$0xff] }
 0x8fa   :  { %3087 = vmatprep.subr.mxu1 %v11633_v30  ;;  %v9125_v30 = vld [vmem:[#allocation4 + $0x1d8] sm:$0xff] }
 0x8fb   :  { %3088 = vmatpush1.msra.mxu1 %v11634_v36  ;;  %11645 = vst [vmem:[#allocation96_spill] sm:$0xff] %v9125_v30  ;;  %v9128_v36 = vld [vmem:[#allocation4 + $0x1d0] sm:$0xff] }
 0x8fc   :  { %3089 = vmatprep.subr.mxu1 %v11635_v43  ;;  %11646 = vst [vmem:[#allocation94_spill] sm:$0xff] %v9128_v36  ;;  %v9131_v43 = vld [vmem:[#allocation4 + $0x1b8] sm:$0xff] }
 0x8fd   :  { %3090 = vmatpush1.msra.mxu1 %v11636_v22  ;;  %11647 = vst [vmem:[#allocation95_spill] sm:$0xff] %v9131_v43  ;;  %v9134_v22 = vld [vmem:[#allocation4 + $0x1b0] sm:$0xff] }
 0x8fe   :  { %3091 = vmatprep.subr.mxu1 %v11637_v57  ;;  %11648 = vst [vmem:[#allocation97_spill] sm:$0xff] %v9134_v22  ;;  %v9140_v57 = vld [vmem:[#allocation4 + $0x190] sm:$0xff] }
 0x8ff   :  { %3092 = vmatpush1.msra.mxu1 %v11638_v52  ;;  %11650 = vst [vmem:[#allocation63_spill] sm:$0xff] %v9140_v57  ;;  %v9143_v52 = vld [vmem:[#allocation4 + $0x178] sm:$0xff] }
 0x900   :  { %3093 = vmatprep.subr.mxu1 %v11639_v13  ;;  %11651 = vst [vmem:[#allocation65_spill] sm:$0xff] %v9143_v52  ;;  %v9146_v13 = vld [vmem:[#allocation4 + $0x170] sm:$0xff] }
 0x901   :  { %3094 = vmatpush1.msra.mxu1 %v11640_v20  ;;  %11652 = vst [vmem:[#allocation67_spill] sm:$0xff] %v9146_v13  ;;  %v9149_v20 = vld [vmem:[#allocation4 + $0x158] sm:$0xff] }
 0x902   :  { %3095 = vmatprep.subr.mxu1 %v11641_v46  ;;  %11653 = vst [vmem:[#allocation69_spill] sm:$0xff] %v9149_v20  ;;  %v9152_v46 = vld [vmem:[#allocation4 + $0x150] sm:$0xff] }
 0x903   :  { %3096 = vmatpush1.msra.mxu1 %v11642_v5  ;;  %11654 = vst [vmem:[#allocation71_spill] sm:$0xff] %v9152_v46  ;;  %v9155_v5 = vld [vmem:[#allocation4 + $0x138] sm:$0xff] }
 0x904   :  { %3130 = vmatmul.mubr.f32.vlgmr.msra.gmra.mxu1 %v8956_v42  ;;  %3207 = vmatprep.subr.mxu1 %v11643_v7  ;;  %v9137_v42 = vld [vmem:[#allocation4 + $0x198] sm:$0xff]  ;;  %11655 = vst [vmem:[#allocation73_spill] sm:$0xff] %v9155_v5  ;;  %v9158_v7 = vld [vmem:[#allocation4 + $0x130] sm:$0xff] }
 0x905   :  { %3208 = vmatpush1.msra.mxu1 %v11644_v27  ;;  %3271 = vmatprep.mubr.f32.mxu1 %v11109_v2  ;;  %11649 = vst [vmem:[#allocation61_spill] sm:$0xff] %v9137_v42  ;;  %11656 = vst [vmem:[#allocation75_spill] sm:$0xff] %v9158_v7  ;;  %v9161_v27 = vld [vmem:[#allocation4 + $0x118] sm:$0xff] }
 0x906   :  { %3209 = vmatprep.subr.mxu1 %v9125_v30  ;;  %11657 = vst [vmem:[#allocation77_spill] sm:$0xff] %v9161_v27 }
 0x907   :  { %3210 = vmatpush1.msra.mxu1 %v9128_v36 }
 0x908   :  { %3211 = vmatprep.subr.mxu1 %v9131_v43 }
 0x909   :  { %3212 = vmatpush1.msra.mxu1 %v9134_v22 }
 0x90a   :  { %3213 = vmatprep.subr.mxu1 %v9137_v42 }
 0x90b   :  { %3214 = vmatpush1.msra.mxu1 %v9140_v57  ;;  %v11676_v57 = vld [vmem:[#allocation86_spill] sm:$0xff] }
 0x90c   :  { %3215 = vmatprep.subr.mxu1 %v9143_v52  ;;  %v2889_v52 = vpop.f32.mrf.mxu0 }
 0x90d   :  { %3216 = vmatpush1.msra.mxu1 %v9146_v13  ;;  %v9164_v13 = vld [vmem:[#allocation4 + $0x110] sm:$0xff] }
 0x90e   :  { %3217 = vmatprep.subr.mxu1 %v9149_v20  ;;  %11658 = vst [vmem:[#allocation79_spill] sm:$0xff] %v9164_v13  ;;  %v9167_v20 = vld [vmem:[#allocation4 + $0xf8] sm:$0xff]  ;;  %v2891_v22 = vpop.f32.mrf.mxu0 }
 0x90f   :  { %3218 = vmatpush1.msra.mxu1 %v9152_v46  ;;  %11659 = vst [vmem:[#allocation81_spill] sm:$0xff] %v9167_v20  ;;  %v9170_v46 = vld [vmem:[#allocation4 + $0xf0] sm:$0xff] }
 0x910   :  { %3219 = vmatprep.subr.mxu1 %v9155_v5  ;;  %11660 = vst [vmem:[#allocation83_spill] sm:$0xff] %v9170_v46  ;;  %v9173_v5 = vld [vmem:[#allocation4 + $0xd8] sm:$0xff] }
 0x911   :  { %3220 = vmatpush1.msra.mxu1 %v9158_v7  ;;  %11661 = vst [vmem:[#allocation85_spill] sm:$0xff] %v9173_v5  ;;  %v9176_v7 = vld [vmem:[#allocation4 + $0xd0] sm:$0xff] }
 0x912   :  { %3221 = vmatprep.subr.mxu1 %v9161_v27  ;;  %11662 = vst [vmem:[#allocation114_spill] sm:$0xff] %v9176_v7  ;;  %v9179_v27 = vld [vmem:[#allocation4 + $0xb8] sm:$0xff] }
 0x913   :  { %3222 = vmatpush1.msra.mxu1 %v9164_v13  ;;  %11663 = vst [vmem:[#allocation115_spill] sm:$0xff] %v9179_v27  ;;  %v9182_v13 = vld [vmem:[#allocation4 + $0xb0] sm:$0xff] }
 0x914   :  { %3223 = vmatprep.subr.mxu1 %v9167_v20  ;;  %11664 = vst [vmem:[#allocation116_spill] sm:$0xff] %v9182_v13  ;;  %v9185_v20 = vld [vmem:[#allocation4 + $0x98] sm:$0xff] }
 0x915   :  { %3224 = vmatpush1.msra.mxu1 %v9170_v46  ;;  %11665 = vst [vmem:[#allocation117_spill] sm:$0xff] %v9185_v20  ;;  %v9188_v46 = vld [vmem:[#allocation4 + $0x90] sm:$0xff] }
 0x916   :  { %3225 = vmatprep.subr.mxu1 %v9173_v5  ;;  %11666 = vst [vmem:[#allocation26_spill] sm:$0xff] %v9188_v46  ;;  %v9191_v5 = vld [vmem:[#allocation4 + $0x78] sm:$0xff] }
 0x917   :  { %3226 = vmatpush1.msra.mxu1 %v9176_v7  ;;  %11667 = vst [vmem:[#allocation28_spill] sm:$0xff] %v9191_v5  ;;  %v9194_v7 = vld [vmem:[#allocation4 + $0x70] sm:$0xff] }
 0x918   :  { %3227 = vmatprep.subr.mxu1 %v9179_v27  ;;  %11668 = vst [vmem:[#allocation92_spill] sm:$0xff] %v9194_v7  ;;  %v9197_v27 = vld [vmem:[#allocation4 + $0x58] sm:$0xff] }
 0x919   :  { %3228 = vmatpush1.msra.mxu1 %v9182_v13  ;;  %11669 = vst [vmem:[#allocation90_spill] sm:$0xff] %v9197_v27  ;;  %v9200_v13 = vld [vmem:[#allocation4 + $0x50] sm:$0xff] }
 0x91a   :  { %3229 = vmatprep.subr.mxu1 %v9185_v20  ;;  %11670 = vst [vmem:[#allocation91_spill] sm:$0xff] %v9200_v13  ;;  %v9203_v20 = vld [vmem:[#allocation4 + $0x38] sm:$0xff] }
 0x91b   :  { %3230 = vmatpush1.msra.mxu1 %v9188_v46  ;;  %11671 = vst [vmem:[#allocation93_spill] sm:$0xff] %v9203_v20  ;;  %v9206_v46 = vld [vmem:[#allocation4 + $0x30] sm:$0xff] }
 0x91c   :  { %3231 = vmatprep.subr.mxu1 %v9191_v5  ;;  %11672 = vst [vmem:[#allocation30_spill] sm:$0xff] %v9206_v46  ;;  %v9209_v5 = vld [vmem:[#allocation4 + $0x18] sm:$0xff] }
 0x91d   :  { %3232 = vmatpush1.msra.mxu1 %v9194_v7  ;;  %11673 = vst [vmem:[#allocation32_spill] sm:$0xff] %v9209_v5  ;;  %v9212_v7 = vld [vmem:[#allocation4 + $0x10] sm:$0xff] }
 0x91e   :  { %3233 = vmatprep.subr.mxu1 %v9197_v27  ;;  %11674 = vst [vmem:[#allocation34_spill] sm:$0xff] %v9212_v7  ;;  %v11675_v27 = vld [vmem:[#allocation88_spill] sm:$0xff] }
 0x91f   :  { %3234 = vmatpush1.msra.mxu1 %v9200_v13 }
 0x920   :  { %3235 = vmatprep.subr.mxu1 %v9203_v20 }
 0x921   :  { %3236 = vmatpush1.msra.mxu1 %v9206_v46  ;;  %v11677_v46 = vld [vmem:[#allocation100_spill] sm:$0xff] }
 0x922   :  { %3237 = vmatprep.subr.mxu1 %v9209_v5  ;;  %v2966_v43 = vadd.f32 %v2891_v22, %v11677_v46  ;;  %v11678_v5 = vld [vmem:[#allocation98_spill] sm:$0xff] }
 0x923   :  { %3238 = vmatpush1.msra.mxu1 %v9212_v7  ;;  %v2965_v36 = vadd.f32 %v2889_v52, %v11678_v5 }
 0x924   :  { %3379 = vmatprep.subr.mxu1 %v11675_v27  ;;  %v5098_v30 = vmul.f32 -1.442695, %v2966_v43 }
 0x925   :  { %v5097_v35 = vmul.f32 -1.442695, %v2965_v36 }
 0x926   :  { %5692 = vpow2.f32 %v5098_v30 }
 0x927   :  { %5694 = vpow2.f32 %v5097_v35 }
 0x933   :  { %v5693_v27 = vpop.eup %5692 }
 0x934   :  { %v5695_v7 = vpop.eup %5694  ;;  %v2978_v50 = vadd.f32 1.0, %v5693_v27 }
 0x935   :  { %v2972_v18 = vadd.f32 1.0, %v5695_v7 }
 0x936   :  { %5696 = vrcp.f32 %v2978_v50 }
 0x937   :  { %5698 = vrcp.f32 %v2972_v18 }
 0x943   :  { %v5697_v52 = vpop.eup %5696 }
 0x944   :  { %v5699_v43 = vpop.eup %5698  ;;  %v2988_v35 = vmul.f32 %v5697_v52, %v8729_v11  ;;  %v9236_v11 = vld [vmem:[#allocation2 + $0x1c8] sm:$0xff] }
 0x945   :  { %v9262_v52 = vld [vmem:[#allocation2 + $0x188] sm:$0xff] }
 0x984   :  { %v2817_v13 = vpop.f32.mrf.mxu1 }
 0x985   :  { %v2818_v42 = vadd.f32 %v11676_v57, %v2817_v13  ;;  %v11679_v13 = vld [vmem:[#allocation99_spill] sm:$0xff] }
 0x986   :  { %v5400_v20 = vpop.f32.mrf.mxu1 }
 0x987   :  { %5096 = vst.msk [vmem:[%s10546_s9 + $0x18] sm:$0xff] %vm1153_vm2, %v2818_v42  ;;  %v11680_v42 = vld [vmem:[#allocation101_spill] sm:$0xff] }
 0x9a4   :  { %v2960_v57 = vpop.f32.mrf.mxu1 }
 0x9a5   :  { %v2967_v20 = vadd.f32 %v2960_v57, %v11679_v13  ;;  %v9242_v57 = vld [vmem:[%s10544_s7 + $0x78] sm:$0xff]  ;;  %v9245_v13 = vld [vmem:[#allocation2 + $0x1c0] sm:$0xff] }
 0x9a6   :  { %v2962_v34 = vpop.f32.mrf.mxu1 }
 0x9a7   :  { %5700 = vtanh.f32 %v2967_v20  ;;  %v2968_v55 = vadd.f32 %v2962_v34, %v11680_v42  ;;  %v9232_v34 = vld [vmem:[#allocation2 + $0x1e0] sm:$0xff]  ;;  %v9249_v20 = vld [vmem:[#allocation2 + $0x1a8] sm:$0xff]  ;;  %v9255_v42 = vld [vmem:[%s10544_s7 + $0x70] sm:$0xff] }
 0x9a9   :  { %v5099_v22 = vmul.f32 -1.442695, %v2968_v55 }
 0x9ab   :  { %5702 = vpow2.f32 %v5099_v22  ;;  %v9258_v22 = vld [vmem:[#allocation2 + $0x1a0] sm:$0xff] }
 0x9b4   :  { %v5701_v36 = vpop.eup %5700 }
 0x9b5   :  { %v2989_v30 = vmul.f32 %v5701_v36, %v5699_v43  ;;  %v9268_v43 = vld [vmem:[%s10544_s7 + $0x68] sm:$0xff]  ;;  %v9271_v36 = vld [vmem:[#allocation2 + $0x180] sm:$0xff] }
 0x9b7   :  { %v9226_v46 = vadd.f32 %v2989_v30, %v2988_v35  ;;  %v9275_v35 = vld [vmem:[#allocation2 + $0x168] sm:$0xff]  ;;  %v9281_v30 = vld [vmem:[%s10544_s7 + $0x60] sm:$0xff] }
 0x9b8   :  { %v5703_v5 = vpop.eup %5702 }
 0x9b9   :  { %v2985_v7 = vadd.f32 1.0, %v5703_v5  ;;  %5704 = vtanh.f32 %v9226_v46  ;;  %v9290_v5 = vld [vmem:[%s10544_s7 + $0x58] sm:$0xff] }
 0x9bb   :  { %5706 = vrcp.f32 %v2985_v7  ;;  %v11697_v7 = vld [vmem:[#allocation122_spill] sm:$0xff] }
 0x9c6   :  { %v5705_v18 = vpop.eup %5704 }
 0x9c8   :  { %v5707_v50 = vpop.eup %5706 }
 0x9c9   :  { %v9229_v27 = vmul.f32 %v5707_v50, %v5705_v18  ;;  %v11698_v18 = vld [vmem:[#allocation123_spill] sm:$0xff]  ;;  %v11699_v50 = vld [vmem:[#allocation124_spill] sm:$0xff] }
 0x9cb   :  { %5708 = vtanh.f32 %v9229_v27 }
 0x9d8   :  { %v5709_v55 = vpop.eup %5708 }
 0x9d9   :  { %3201 = vmatmul.mubr.f32.vlgmr.msra.gmra.mxu0 %v5709_v55  ;;  %3272 = vmatmul.mubr.f32.vlgmr.msra.gmra.mxu1 %v5709_v55  ;;  %v11700_v55 = vld [vmem:[#allocation125_spill] sm:$0xff] }
 0x9da   :  { %3380 = vmatpush1.msra.mxu1 %v9232_v34  ;;  %3443 = vmatprep.mubr.f32.mxu1 %v11109_v2 }
 0x9db   :  { %3381 = vmatprep.subr.mxu1 %v9236_v11  ;;  %5402 = vmatpush3.msra.mxu0 %v9242_v57 }
 0x9dc   :  { %3382 = vmatpush1.msra.mxu1 %v9245_v13  ;;  %5403 = vmatprep.subr.mxu0 %v11109_v2 }
 0x9dd   :  { %3383 = vmatprep.subr.mxu1 %v9249_v20  ;;  %5404 = vmatpush3.msra.mxu0 %v9255_v42 }
 0x9de   :  { %3384 = vmatpush1.msra.mxu1 %v9258_v22  ;;  %5405 = vmatprep.subr.mxu0 %v11109_v2 }
 0x9df   :  { %3385 = vmatprep.subr.mxu1 %v9262_v52  ;;  %5406 = vmatpush3.msra.mxu0 %v9268_v43 }
 0x9e0   :  { %3386 = vmatpush1.msra.mxu1 %v9271_v36  ;;  %5407 = vmatprep.subr.mxu0 %v11109_v2 }
 0x9e1   :  { %3387 = vmatprep.subr.mxu1 %v9275_v35  ;;  %5408 = vmatpush3.msra.mxu0 %v9281_v30 }
 0x9e2   :  { %3388 = vmatpush1.msra.mxu1 %v8751_v14  ;;  %5409 = vmatprep.subr.mxu0 %v11109_v2  ;;  %v9299_v14 = vld [vmem:[%s10544_s7 + $0x50] sm:$0xff] }
 0x9e3   :  { %3389 = vmatprep.subr.mxu1 %v8755_v48  ;;  %5410 = vmatpush3.msra.mxu0 %v9290_v5  ;;  %11681 = vst [vmem:[#allocation36_spill] sm:$0xff] %v9299_v14  ;;  %v9308_v48 = vld [vmem:[%s10544_s7 + $0x48] sm:$0xff] }
 0x9e4   :  { %3390 = vmatpush1.msra.mxu1 %v8759_v40  ;;  %5411 = vmatprep.subr.mxu0 %v11109_v2  ;;  %11682 = vst [vmem:[#allocation38_spill] sm:$0xff] %v9308_v48  ;;  %v9317_v40 = vld [vmem:[%s10544_s7 + $0x40] sm:$0xff] }
 0x9e5   :  { %3391 = vmatprep.subr.mxu1 %v8763_v56  ;;  %5412 = vmatpush3.msra.mxu0 %v9299_v14  ;;  %11683 = vst [vmem:[#allocation40_spill] sm:$0xff] %v9317_v40  ;;  %v9326_v56 = vld [vmem:[%s10544_s7 + $0x38] sm:$0xff] }
 0x9e6   :  { %3392 = vmatpush1.msra.mxu1 %v8767_v25  ;;  %5413 = vmatprep.subr.mxu0 %v11109_v2  ;;  %11684 = vst [vmem:[#allocation42_spill] sm:$0xff] %v9326_v56  ;;  %v9335_v25 = vld [vmem:[%s10544_s7 + $0x30] sm:$0xff] }
 0x9e7   :  { %3393 = vmatprep.subr.mxu1 %v8771_v0  ;;  %5414 = vmatpush3.msra.mxu0 %v9308_v48  ;;  %11685 = vst [vmem:[#allocation44_spill] sm:$0xff] %v9335_v25  ;;  %v9344_v0 = vld [vmem:[%s10544_s7 + $0x28] sm:$0xff] }
 0x9e8   :  { %3394 = vmatpush1.msra.mxu1 %v8775_v59  ;;  %5415 = vmatprep.subr.mxu0 %v11109_v2  ;;  %11686 = vst [vmem:[#allocation46_spill] sm:$0xff] %v9344_v0  ;;  %v9353_v59 = vld [vmem:[%s10544_s7 + $0x20] sm:$0xff] }
 0x9e9   :  { %3395 = vmatprep.subr.mxu1 %v8779_v29  ;;  %5416 = vmatpush3.msra.mxu0 %v9317_v40  ;;  %11687 = vst [vmem:[#allocation48_spill] sm:$0xff] %v9353_v59  ;;  %v11688_v29 = vld [vmem:[#allocation87_spill] sm:$0xff] }
 0x9ea   :  { %3396 = vmatpush1.msra.mxu1 %v8783_v12  ;;  %5417 = vmatprep.subr.mxu0 %v11109_v2  ;;  %v11689_v12 = vld [vmem:[#allocation89_spill] sm:$0xff] }
 0x9eb   :  { %3397 = vmatprep.subr.mxu1 %v8787_v51  ;;  %5418 = vmatpush3.msra.mxu0 %v9326_v56  ;;  %v9362_v51 = vld [vmem:[%s10544_s7 + $0x18] sm:$0xff] }
 0x9ec   :  { %3398 = vmatpush1.msra.mxu1 %v8791_v9  ;;  %5419 = vmatprep.subr.mxu0 %v11109_v2  ;;  %11690 = vst [vmem:[#allocation50_spill] sm:$0xff] %v9362_v51  ;;  %v11691_v9 = vld [vmem:[#allocation118_spill] sm:$0xff] }
 0x9ed   :  { %3399 = vmatprep.subr.mxu1 %v8795_v61  ;;  %5420 = vmatpush3.msra.mxu0 %v9335_v25  ;;  %v11692_v61 = vld [vmem:[#allocation119_spill] sm:$0xff] }
 0x9ee   :  { %3400 = vmatpush1.msra.mxu1 %v8799_v21  ;;  %5421 = vmatprep.subr.mxu0 %v11109_v2  ;;  %v9371_v21 = vld [vmem:[%s10544_s7 + $0x10] sm:$0xff] }
 0x9ef   :  { %3401 = vmatprep.subr.mxu1 %v8803_v49  ;;  %5422 = vmatpush3.msra.mxu0 %v9344_v0  ;;  %11693 = vst [vmem:[#allocation52_spill] sm:$0xff] %v9371_v21  ;;  %v11694_v49 = vld [vmem:[#allocation120_spill] sm:$0xff] }
 0x9f0   :  { %3402 = vmatpush1.msra.mxu1 %v8807_v10  ;;  %5423 = vmatprep.subr.mxu0 %v11109_v2  ;;  %v11695_v10 = vld [vmem:[#allocation121_spill] sm:$0xff] }
 0x9f1   :  { %3403 = vmatprep.subr.mxu1 %v8811_v62  ;;  %5424 = vmatpush3.msra.mxu0 %v9353_v59  ;;  %v9380_v62 = vld [vmem:[%s10544_s7 + $0x8] sm:$0xff] }
 0x9f2   :  { %3404 = vmatpush1.msra.mxu1 %v11688_v29  ;;  %5425 = vmatprep.subr.mxu0 %v11109_v2  ;;  %11696 = vst [vmem:[#allocation54_spill] sm:$0xff] %v9380_v62  ;;  %v9393_v29 = vld [vmem:[%s10544_s7] sm:$0xff] }
 0x9f3   :  { %3405 = vmatprep.subr.mxu1 %v11689_v12  ;;  %5426 = vmatpush3.msra.mxu0 %v9362_v51  ;;  %11701 = vst [vmem:[#allocation56_spill] sm:$0xff] %v9393_v29  ;;  %v11702_v12 = vld [vmem:[#allocation126_spill] sm:$0xff] }
 0x9f4   :  { %3406 = vmatpush1.msra.mxu1 %v11691_v9  ;;  %5427 = vmatprep.subr.mxu0 %v11109_v2  ;;  %v11703_v9 = vld [vmem:[#allocation127_spill] sm:$0xff] }
 0x9f5   :  { %3407 = vmatprep.subr.mxu1 %v11692_v61  ;;  %5428 = vmatpush3.msra.mxu0 %v9371_v21  ;;  %v9400_v61 = vld [vmem:[#allocation2 + $0x1f8] sm:$0xff] }
 0x9f6   :  { %3408 = vmatpush1.msra.mxu1 %v11694_v49  ;;  %5429 = vmatprep.subr.mxu0 %v11109_v2  ;;  %11704 = vst [vmem:[#allocation58_spill] sm:$0xff] %v9400_v61  ;;  %v11705_v49 = vld [vmem:[#allocation128_spill] sm:$0xff] }
 0x9f7   :  { %3409 = vmatprep.subr.mxu1 %v11695_v10  ;;  %5430 = vmatpush3.msra.mxu0 %v9380_v62  ;;  %v11706_v10 = vld [vmem:[#allocation129_spill] sm:$0xff]  ;;  %v11714_v62 = vld [vmem:[#allocation16_spill] sm:$0xff] }
 0x9f8   :  { %3410 = vmatpush1.msra.mxu1 %v11697_v7  ;;  %5431 = vmatprep.subr.mxu0 %v11109_v2  ;;  %v11707_v7 = vld [vmem:[#allocation9_spill] sm:$0xff] }
 0x9f9   :  { %3444 = vmatmul.mubr.f32.vlgmr.msra.gmra.mxu1 %v9229_v27  ;;  %3550 = vmatprep.subr.mxu1 %v11698_v18  ;;  %v11708_v18 = vld [vmem:[#allocation10_spill] sm:$0xff] }
 0x9fa   :  { %3551 = vmatpush1.msra.mxu1 %v11699_v50  ;;  %3614 = vmatprep.mubr.f32.mxu1 %v11109_v2  ;;  %v11709_v50 = vld [vmem:[#allocation11_spill] sm:$0xff] }
 0x9fb   :  { %3552 = vmatprep.subr.mxu1 %v11700_v55  ;;  %5432 = vmatpush3.msra.mxu0 %v9393_v29  ;;  %v11710_v55 = vld [vmem:[#allocation12_spill] sm:$0xff]  ;;  %v11712_v29 = vld [vmem:[#allocation14_spill] sm:$0xff] }
 0x9fc   :  { %3553 = vmatpush1.msra.mxu1 %v11702_v12  ;;  %5433 = vmatprep.mubr.msk.f32.mxu0 %vm6607_vm1, %v11109_v2  ;;  %v11711_v12 = vld [vmem:[#allocation13_spill] sm:$0xff] }
 0x9fd   :  { %3554 = vmatprep.subr.mxu1 %v11703_v9  ;;  %3450 = vmatprep.subr.mxu0 %v9400_v61  ;;  %v11713_v9 = vld [vmem:[#allocation15_spill] sm:$0xff]  ;;  %v11715_v61 = vld [vmem:[#allocation17_spill] sm:$0xff] }
 0x9fe   :  { %3555 = vmatpush1.msra.mxu1 %v11705_v49  ;;  %v11716_v49 = vld [vmem:[#allocation18_spill] sm:$0xff] }
 0x9ff   :  { %3556 = vmatprep.subr.mxu1 %v11706_v10  ;;  %v11717_v10 = vld [vmem:[#allocation19_spill] sm:$0xff] }
 0xa00   :  { %3557 = vmatpush1.msra.mxu1 %v11707_v7  ;;  %v11718_v7 = vld [vmem:[#allocation20_spill] sm:$0xff] }
 0xa01   :  { %3558 = vmatprep.subr.mxu1 %v11708_v18  ;;  %v11719_v18 = vld [vmem:[#allocation21_spill] sm:$0xff] }
 0xa02   :  { %3559 = vmatpush1.msra.mxu1 %v11709_v50  ;;  %v11720_v50 = vld [vmem:[#allocation22_spill] sm:$0xff] }
 0xa03   :  { %3560 = vmatprep.subr.mxu1 %v11710_v55  ;;  %v11721_v55 = vld [vmem:[#allocation23_spill] sm:$0xff] }
 0xa04   :  { %3561 = vmatpush1.msra.mxu1 %v11711_v12  ;;  %v11722_v12 = vld [vmem:[#allocation24_spill] sm:$0xff] }
 0xa05   :  { %3562 = vmatprep.subr.mxu1 %v11712_v29  ;;  %v11723_v29 = vld [vmem:[#allocation25_spill] sm:$0xff] }
 0xa06   :  { %3563 = vmatpush1.msra.mxu1 %v11713_v9  ;;  %v11724_v9 = vld [vmem:[#allocation27_spill] sm:$0xff] }
 0xa07   :  { %3564 = vmatprep.subr.mxu1 %v11714_v62  ;;  %v11725_v62 = vld [vmem:[#allocation29_spill] sm:$0xff] }
 0xa08   :  { %3565 = vmatpush1.msra.mxu1 %v11715_v61  ;;  %v11726_v61 = vld [vmem:[#allocation31_spill] sm:$0xff] }
 0xa09   :  { %3566 = vmatprep.subr.mxu1 %v11716_v49  ;;  %v11727_v49 = vld [vmem:[#allocation33_spill] sm:$0xff] }
 0xa0a   :  { %3567 = vmatpush1.msra.mxu1 %v11717_v10  ;;  %v11728_v10 = vld [vmem:[#allocation35_spill] sm:$0xff] }
 0xa0b   :  { %3568 = vmatprep.subr.mxu1 %v11718_v7  ;;  %v11729_v7 = vld [vmem:[#allocation37_spill] sm:$0xff] }
 0xa0c   :  { %3569 = vmatpush1.msra.mxu1 %v11719_v18  ;;  %v11730_v18 = vld [vmem:[#allocation39_spill] sm:$0xff] }
 0xa0d   :  { %3570 = vmatprep.subr.mxu1 %v11720_v50  ;;  %v11731_v50 = vld [vmem:[#allocation41_spill] sm:$0xff] }
 0xa0e   :  { %3571 = vmatpush1.msra.mxu1 %v11721_v55  ;;  %v11732_v55 = vld [vmem:[#allocation43_spill] sm:$0xff] }
 0xa0f   :  { %3572 = vmatprep.subr.mxu1 %v11722_v12  ;;  %v3060_v12 = vpop.f32.mrf.mxu0 }
 0xa10   :  { %3573 = vmatpush1.msra.mxu1 %v11723_v29  ;;  %v3131_v29 = vpop.f32.mrf.mxu1 }
 0xa11   :  { %3574 = vmatprep.subr.mxu1 %v11724_v9  ;;  %v3062_v21 = vpop.f32.mrf.mxu0 }
 0xa12   :  { %3575 = vmatpush1.msra.mxu1 %v11725_v62  ;;  %v3133_v51 = vpop.f32.mrf.mxu1 }
 0xa13   :  { %3576 = vmatprep.subr.mxu1 %v11726_v61 }
 0xa14   :  { %3577 = vmatpush1.msra.mxu1 %v11727_v49 }
 0xa15   :  { %3578 = vmatprep.subr.mxu1 %v11728_v10 }
 0xa16   :  { %3579 = vmatpush1.msra.mxu1 %v11729_v7 }
 0xa17   :  { %3580 = vmatprep.subr.mxu1 %v11730_v18 }
 0xa18   :  { %3581 = vmatpush1.msra.mxu1 %v11731_v50 }
 0xa19   :  { %3692 = vmatprep.subr.mxu1 %v11732_v55 }
 0xa99   :  { %v3202_v9 = vpop.f32.mrf.mxu0  ;;  %v3273_v49 = vpop.f32.mrf.mxu1 }
 0xa9a   :  { %v3203_v62 = vadd.f32 %v3202_v9, %v3060_v12  ;;  %v3274_v56 = vadd.f32 %v3273_v49, %v3131_v29  ;;  %v9526_v49 = vld [vmem:[#allocation2 + $0xd8] sm:$0xff] }
 0xa9b   :  { %v3204_v59 = vpop.f32.mrf.mxu0  ;;  %v3275_v25 = vpop.f32.mrf.mxu1 }
 0xa9c   :  { %v3278_v61 = vadd.f32 %v3203_v62, %v7428_v4  ;;  %v3205_v0 = vadd.f32 %v3204_v59, %v3062_v21  ;;  %v3276_v50 = vadd.f32 %v3275_v25, %v3133_v51  ;;  %v3280_v12 = vadd.f32 %v3274_v56, %v7443_v41 }
 0xa9e   :  { %v5100_v10 = vmul.f32 -1.442695, %v3278_v61  ;;  %v3279_v7 = vadd.f32 %v3205_v0, %v7432_v33  ;;  %v3281_v55 = vadd.f32 %v3276_v50, %v7438_v32  ;;  %v9534_v50 = vld [vmem:[#allocation2 + $0xb8] sm:$0xff] }
 0xaa0   :  { %5710 = vpow2.f32 %v5100_v10  ;;  %v5101_v18 = vmul.f32 -1.442695, %v3279_v7  ;;  %v5102_v40 = vmul.f32 -1.442695, %v3281_v55  ;;  %v11740_v7 = vld [vmem:[#allocation59_spill] sm:$0xff] }
 0xaa1   :  { %v9537_v55 = vld [vmem:[#allocation2 + $0xb0] sm:$0xff] }
 0xaa2   :  { %5712 = vpow2.f32 %v5101_v18  ;;  %v9530_v18 = vld [vmem:[#allocation2 + $0xd0] sm:$0xff] }
 0xaa3   :  { %5714 = vpow2.f32 %v5102_v40 }
 0xaad   :  { %v5711_v48 = vpop.eup %5710 }
 0xaae   :  { %v3285_v9 = vadd.f32 1.0, %v5711_v48 }
 0xaaf   :  { %v5713_v14 = vpop.eup %5712 }
 0xab0   :  { %5716 = vrcp.f32 %v3285_v9  ;;  %v3291_v59 = vadd.f32 1.0, %v5713_v14  ;;  %v5715_v0 = vpop.eup %5714  ;;  %v11739_v14 = vld [vmem:[#allocation57_spill] sm:$0xff]  ;;  %v9543_v9 = vld [vmem:[#allocation2 + $0x90] sm:$0xff] }
 0xab1   :  { %5718 = vtanh.f32 %v3280_v12  ;;  %v3298_v10 = vadd.f32 1.0, %v5715_v0  ;;  %v9540_v12 = vld [vmem:[#allocation2 + $0x98] sm:$0xff]  ;;  %v9549_v0 = vld [vmem:[#allocation2 + $0x70] sm:$0xff] }
 0xab2   :  { %5720 = vrcp.f32 %v3291_v59  ;;  %v9546_v59 = vld [vmem:[#allocation2 + $0x78] sm:$0xff] }
 0xab3   :  { %5722 = vrcp.f32 %v3298_v10  ;;  %v9561_v10 = vld [vmem:[#allocation2 + $0x30] sm:$0xff] }
 0xab4   :  { %11743 = vst [vmem:[#allocation64_spill] sm:$0xff] %v9561_v10 }
 0xabd   :  { %v5717_v21 = vpop.eup %5716 }
 0xabe   :  { %v5719_v62 = vpop.eup %5718 }
 0xabf   :  { %v5721_v61 = vpop.eup %5720  ;;  %v3302_v25 = vmul.f32 %v5719_v62, %v5717_v21  ;;  %v9552_v21 = vld [vmem:[#allocation2 + $0x58] sm:$0xff]  ;;  %v9555_v62 = vld [vmem:[#allocation2 + $0x50] sm:$0xff] }
 0xac0   :  { %v3301_v51 = vmul.f32 %v5721_v61, %v8953_v54  ;;  %v5723_v48 = vpop.eup %5722  ;;  %11741 = vst [vmem:[#allocation60_spill] sm:$0xff] %v9555_v62  ;;  %v9558_v61 = vld [vmem:[#allocation2 + $0x38] sm:$0xff] }
 0xac1   :  { %11742 = vst [vmem:[#allocation62_spill] sm:$0xff] %v9558_v61 }
 0xac2   :  { %v9436_v29 = vadd.f32 %v3302_v25, %v3301_v51  ;;  %v9564_v25 = vld [vmem:[#allocation2 + $0x18] sm:$0xff]  ;;  %v9567_v51 = vld [vmem:[#allocation2 + $0x10] sm:$0xff] }
 0xac3   :  { %11744 = vst [vmem:[#allocation66_spill] sm:$0xff] %v9564_v25  ;;  %11745 = vst [vmem:[#allocation68_spill] sm:$0xff] %v9567_v51 }
 0xac4   :  { %5724 = vtanh.f32 %v9436_v29 }
 0xad1   :  { %v5725_v56 = vpop.eup %5724 }
 0xad2   :  { %v9439_v40 = vmul.f32 %v5725_v56, %v5723_v48  ;;  %v9571_v48 = vld [vmem:[#allocation6 + $0x1f8] sm:$0xff]  ;;  %v9574_v56 = vld [vmem:[#allocation6 + $0x1f0] sm:$0xff] }
 0xad3   :  { %11746 = vst [vmem:[#allocation70_spill] sm:$0xff] %v9571_v48  ;;  %11747 = vst [vmem:[#allocation72_spill] sm:$0xff] %v9574_v56 }
 0xad4   :  { %5726 = vtanh.f32 %v9439_v40  ;;  %3615 = vmatmul.mubr.f32.vlgmr.msra.gmra.mxu1 %v9439_v40 }
 0xad5   :  { %3693 = vmatpush1.msra.mxu1 %v8960_v16  ;;  %3756 = vmatprep.mubr.f32.mxu1 %v11109_v2  ;;  %v9458_v16 = vld [vmem:[#allocation2 + $0x1f0] sm:$0xff] }
 0xad6   :  { %3694 = vmatprep.subr.mxu1 %v8964_v26  ;;  %v9462_v26 = vld [vmem:[#allocation2 + $0x1d8] sm:$0xff] }
 0xad7   :  { %3695 = vmatpush1.msra.mxu1 %v8967_v39  ;;  %v9466_v39 = vld [vmem:[#allocation2 + $0x1d0] sm:$0xff] }
 0xad8   :  { %3696 = vmatprep.subr.mxu1 %v8970_v3  ;;  %v9470_v3 = vld [vmem:[#allocation2 + $0x1b8] sm:$0xff] }
 0xad9   :  { %3697 = vmatpush1.msra.mxu1 %v8973_v6  ;;  %v9474_v6 = vld [vmem:[#allocation2 + $0x1b0] sm:$0xff] }
 0xada   :  { %3698 = vmatprep.subr.mxu1 %v8976_v44  ;;  %v9478_v44 = vld [vmem:[#allocation2 + $0x198] sm:$0xff] }
 0xadb   :  { %3699 = vmatpush1.msra.mxu1 %v8979_v1  ;;  %v9482_v1 = vld [vmem:[#allocation2 + $0x190] sm:$0xff] }
 0xadc   :  { %3700 = vmatprep.subr.mxu1 %v8982_v38  ;;  %v9486_v38 = vld [vmem:[#allocation2 + $0x178] sm:$0xff] }
 0xadd   :  { %3701 = vmatpush1.msra.mxu1 %v8985_v24  ;;  %v9490_v24 = vld [vmem:[#allocation2 + $0x170] sm:$0xff] }
 0xade   :  { %3702 = vmatprep.subr.mxu1 %v8988_v47  ;;  %v9494_v47 = vld [vmem:[#allocation2 + $0x158] sm:$0xff] }
 0xadf   :  { %3703 = vmatpush1.msra.mxu1 %v8991_v28  ;;  %v9498_v28 = vld [vmem:[#allocation2 + $0x150] sm:$0xff] }
 0xae0   :  { %3704 = vmatprep.subr.mxu1 %v8994_v60  ;;  %v11733_v60 = vld [vmem:[#allocation45_spill] sm:$0xff] }
 0xae1   :  { %v5727_v54 = vpop.eup %5726  ;;  %3705 = vmatpush1.msra.mxu1 %v8997_v8  ;;  %v9502_v8 = vld [vmem:[#allocation2 + $0x138] sm:$0xff] }
 0xae2   :  { %5434 = vmatmul.mubr.f32.vlgmr.msra.gmra.mxu0 %v5727_v54  ;;  %3706 = vmatprep.subr.mxu1 %v9000_v19  ;;  %v11734_v19 = vld [vmem:[#allocation47_spill] sm:$0xff]  ;;  %v9578_v54 = vld [vmem:[#allocation6 + $0x1d8] sm:$0xff] }
 0xae3   :  { %3451 = vmatpush1.msra.mxu0 %v9458_v16  ;;  %3514 = vmatprep.mubr.f32.mxu0 %v11109_v2  ;;  %11748 = vst [vmem:[#allocation74_spill] sm:$0xff] %v9578_v54 }
 0xae4   :  { %3452 = vmatprep.subr.mxu0 %v9462_v26  ;;  %3707 = vmatpush1.msra.mxu1 %v9006_v15  ;;  %v9506_v15 = vld [vmem:[#allocation2 + $0x130] sm:$0xff] }
 0xae5   :  { %3453 = vmatpush1.msra.mxu0 %v9466_v39  ;;  %3708 = vmatprep.subr.mxu1 %v9010_v17  ;;  %v11735_v17 = vld [vmem:[#allocation49_spill] sm:$0xff] }
 0xae6   :  { %3454 = vmatprep.subr.mxu0 %v9470_v3  ;;  %3709 = vmatpush1.msra.mxu1 %v9014_v58  ;;  %v9510_v58 = vld [vmem:[#allocation2 + $0x118] sm:$0xff] }
 0xae7   :  { %3455 = vmatpush1.msra.mxu0 %v9474_v6  ;;  %3710 = vmatprep.subr.mxu1 %v9018_v31  ;;  %v11736_v31 = vld [vmem:[#allocation51_spill] sm:$0xff] }
 0xae8   :  { %3456 = vmatprep.subr.mxu0 %v9478_v44  ;;  %3711 = vmatpush1.msra.mxu1 %v9022_v63  ;;  %v9514_v63 = vld [vmem:[#allocation2 + $0x110] sm:$0xff] }
 0xae9   :  { %3457 = vmatpush1.msra.mxu0 %v9482_v1  ;;  %3712 = vmatprep.subr.mxu1 %v9026_v45  ;;  %v11737_v45 = vld [vmem:[#allocation53_spill] sm:$0xff] }
 0xaea   :  { %3458 = vmatprep.subr.mxu0 %v9486_v38  ;;  %3713 = vmatpush1.msra.mxu1 %v9030_v23  ;;  %v9518_v23 = vld [vmem:[#allocation2 + $0xf8] sm:$0xff] }
 0xaeb   :  { %3459 = vmatpush1.msra.mxu0 %v9490_v24  ;;  %3714 = vmatprep.subr.mxu1 %v9034_v53  ;;  %v11738_v53 = vld [vmem:[#allocation55_spill] sm:$0xff] }
 0xaec   :  { %3460 = vmatprep.subr.mxu0 %v9494_v47  ;;  %3715 = vmatpush1.msra.mxu1 %v9038_v37  ;;  %v9522_v37 = vld [vmem:[#allocation2 + $0xf0] sm:$0xff] }
 0xaed   :  { %3461 = vmatpush1.msra.mxu0 %v9498_v28  ;;  %3716 = vmatprep.subr.mxu1 %v11733_v60  ;;  %v9581_v60 = vld [vmem:[#allocation6 + $0x1d0] sm:$0xff] }
 0xaee   :  { %3462 = vmatprep.subr.mxu0 %v9502_v8  ;;  %3717 = vmatpush1.msra.mxu1 %v11734_v19  ;;  %11749 = vst [vmem:[#allocation76_spill] sm:$0xff] %v9581_v60  ;;  %v9584_v19 = vld [vmem:[#allocation6 + $0x1b8] sm:$0xff] }
 0xaef   :  { %3463 = vmatpush1.msra.mxu0 %v9506_v15  ;;  %3718 = vmatprep.subr.mxu1 %v11735_v17  ;;  %11750 = vst [vmem:[#allocation78_spill] sm:$0xff] %v9584_v19  ;;  %v9590_v17 = vld [vmem:[#allocation6 + $0x198] sm:$0xff] }
 0xaf0   :  { %3464 = vmatprep.subr.mxu0 %v9510_v58  ;;  %3719 = vmatpush1.msra.mxu1 %v11736_v31  ;;  %11752 = vst [vmem:[#allocation82_spill] sm:$0xff] %v9590_v17  ;;  %v9593_v31 = vld [vmem:[#allocation6 + $0x190] sm:$0xff] }
 0xaf1   :  { %3465 = vmatpush1.msra.mxu0 %v9514_v63  ;;  %3720 = vmatprep.subr.mxu1 %v11737_v45  ;;  %11753 = vst [vmem:[#allocation84_spill] sm:$0xff] %v9593_v31  ;;  %v9596_v45 = vld [vmem:[#allocation6 + $0x178] sm:$0xff] }
 0xaf2   :  { %3466 = vmatprep.subr.mxu0 %v9518_v23  ;;  %3721 = vmatpush1.msra.mxu1 %v11738_v53  ;;  %11754 = vst [vmem:[#allocation88_spill] sm:$0xff] %v9596_v45  ;;  %v9599_v53 = vld [vmem:[#allocation6 + $0x170] sm:$0xff] }
 0xaf3   :  { %3467 = vmatpush1.msra.mxu0 %v9522_v37  ;;  %3722 = vmatprep.subr.mxu1 %v11739_v14  ;;  %11755 = vst [vmem:[#allocation86_spill] sm:$0xff] %v9599_v53  ;;  %v9602_v14 = vld [vmem:[#allocation6 + $0x158] sm:$0xff] }
 0xaf4   :  { %3468 = vmatprep.subr.mxu0 %v9526_v49  ;;  %3723 = vmatpush1.msra.mxu1 %v11740_v7  ;;  %11756 = vst [vmem:[#allocation100_spill] sm:$0xff] %v9602_v14  ;;  %v9605_v7 = vld [vmem:[#allocation6 + $0x150] sm:$0xff] }
 0xaf5   :  { %3469 = vmatpush1.msra.mxu0 %v9530_v18  ;;  %5436 = vmatprep.subr.mxu1 %v11109_v2  ;;  %11757 = vst [vmem:[#allocation98_spill] sm:$0xff] %v9605_v7 }
 0xaf6   :  { %3470 = vmatprep.subr.mxu0 %v9534_v50 }
 0xaf7   :  { %3471 = vmatpush1.msra.mxu0 %v9537_v55 }
 0xaf8   :  { %3472 = vmatprep.subr.mxu0 %v9540_v12 }
 0xaf9   :  { %3473 = vmatpush1.msra.mxu0 %v9543_v9 }
 0xafa   :  { %3474 = vmatprep.subr.mxu0 %v9546_v59 }
 0xafb   :  { %3475 = vmatpush1.msra.mxu0 %v9549_v0 }
 0xafc   :  { %3476 = vmatprep.subr.mxu0 %v9552_v21 }
 0xafd   :  { %3477 = vmatpush1.msra.mxu0 %v9555_v62 }
 0xafe   :  { %3478 = vmatprep.subr.mxu0 %v9558_v61 }
 0xaff   :  { %3479 = vmatpush1.msra.mxu0 %v9561_v10 }
 0xb00   :  { %3480 = vmatprep.subr.mxu0 %v9564_v25 }
 0xb01   :  { %3481 = vmatpush1.msra.mxu0 %v9567_v51 }
 0xb02   :  { %3515 = vmatmul.mubr.f32.vlgmr.msra.gmra.mxu0 %v9229_v27  ;;  %3621 = vmatprep.subr.mxu0 %v9571_v48  ;;  %v9587_v27 = vld [vmem:[#allocation6 + $0x1b0] sm:$0xff] }
 0xb03   :  { %3622 = vmatpush1.msra.mxu0 %v9574_v56  ;;  %3685 = vmatprep.mubr.f32.mxu0 %v11109_v2  ;;  %11751 = vst [vmem:[#allocation80_spill] sm:$0xff] %v9587_v27 }
 0xb04   :  { %3623 = vmatprep.subr.mxu0 %v9578_v54  ;;  %v11790_v54 = vld [vmem:[#allocation73_spill] sm:$0xff] }
 0xb05   :  { %3624 = vmatpush1.msra.mxu0 %v9581_v60  ;;  %v11788_v60 = vld [vmem:[#allocation69_spill] sm:$0xff] }
 0xb06   :  { %3625 = vmatprep.subr.mxu0 %v9584_v19  ;;  %v11786_v19 = vld [vmem:[#allocation65_spill] sm:$0xff] }
 0xb07   :  { %3626 = vmatpush1.msra.mxu0 %v9587_v27  ;;  %v11783_v27 = vld [vmem:[#allocation97_spill] sm:$0xff] }
 0xb08   :  { %3627 = vmatprep.subr.mxu0 %v9590_v17  ;;  %v9608_v17 = vld [vmem:[#allocation6 + $0x138] sm:$0xff] }
 0xb09   :  { %3628 = vmatpush1.msra.mxu0 %v9593_v31  ;;  %11758 = vst [vmem:[#allocation99_spill] sm:$0xff] %v9608_v17  ;;  %v9611_v31 = vld [vmem:[#allocation6 + $0x130] sm:$0xff] }
 0xb0a   :  { %3629 = vmatprep.subr.mxu0 %v9596_v45  ;;  %11759 = vst [vmem:[#allocation101_spill] sm:$0xff] %v9611_v31  ;;  %v9614_v45 = vld [vmem:[#allocation6 + $0x118] sm:$0xff] }
 0xb0b   :  { %3630 = vmatpush1.msra.mxu0 %v9599_v53  ;;  %11760 = vst [vmem:[#allocation87_spill] sm:$0xff] %v9614_v45  ;;  %v9617_v53 = vld [vmem:[#allocation6 + $0x110] sm:$0xff] }
 0xb0c   :  { %3631 = vmatprep.subr.mxu0 %v9602_v14  ;;  %11761 = vst [vmem:[#allocation89_spill] sm:$0xff] %v9617_v53  ;;  %v9620_v14 = vld [vmem:[#allocation6 + $0xf8] sm:$0xff] }
 0xb0d   :  { %3632 = vmatpush1.msra.mxu0 %v9605_v7  ;;  %11762 = vst [vmem:[#allocation118_spill] sm:$0xff] %v9620_v14  ;;  %v9623_v7 = vld [vmem:[#allocation6 + $0xf0] sm:$0xff] }
 0xb0e   :  { %3633 = vmatprep.subr.mxu0 %v9608_v17  ;;  %11763 = vst [vmem:[#allocation119_spill] sm:$0xff] %v9623_v7  ;;  %v9626_v17 = vld [vmem:[#allocation6 + $0xd8] sm:$0xff] }
 0xb0f   :  { %3634 = vmatpush1.msra.mxu0 %v9611_v31  ;;  %11764 = vst [vmem:[#allocation120_spill] sm:$0xff] %v9626_v17  ;;  %v9629_v31 = vld [vmem:[#allocation6 + $0xd0] sm:$0xff] }
 0xb10   :  { %3635 = vmatprep.subr.mxu0 %v9614_v45  ;;  %11765 = vst [vmem:[#allocation121_spill] sm:$0xff] %v9629_v31  ;;  %v9632_v45 = vld [vmem:[#allocation6 + $0xb8] sm:$0xff] }
 0xb11   :  { %3636 = vmatpush1.msra.mxu0 %v9617_v53  ;;  %11766 = vst [vmem:[#allocation122_spill] sm:$0xff] %v9632_v45  ;;  %v9635_v53 = vld [vmem:[#allocation6 + $0xb0] sm:$0xff] }
 0xb12   :  { %3637 = vmatprep.subr.mxu0 %v9620_v14  ;;  %11767 = vst [vmem:[#allocation123_spill] sm:$0xff] %v9635_v53  ;;  %v9638_v14 = vld [vmem:[#allocation6 + $0x98] sm:$0xff] }
 0xb13   :  { %3638 = vmatpush1.msra.mxu0 %v9623_v7  ;;  %11768 = vst [vmem:[#allocation124_spill] sm:$0xff] %v9638_v14  ;;  %v9641_v7 = vld [vmem:[#allocation6 + $0x90] sm:$0xff] }
 0xb14   :  { %3639 = vmatprep.subr.mxu0 %v9626_v17  ;;  %11769 = vst [vmem:[#allocation125_spill] sm:$0xff] %v9641_v7  ;;  %v9644_v17 = vld [vmem:[#allocation6 + $0x78] sm:$0xff] }
 0xb15   :  { %3640 = vmatpush1.msra.mxu0 %v9629_v31  ;;  %11770 = vst [vmem:[#allocation126_spill] sm:$0xff] %v9644_v17  ;;  %v9647_v31 = vld [vmem:[#allocation6 + $0x70] sm:$0xff] }
 0xb16   :  { %3641 = vmatprep.subr.mxu0 %v9632_v45  ;;  %11771 = vst [vmem:[#allocation127_spill] sm:$0xff] %v9647_v31  ;;  %v9650_v45 = vld [vmem:[#allocation6 + $0x58] sm:$0xff] }
 0xb17   :  { %3642 = vmatpush1.msra.mxu0 %v9635_v53  ;;  %11772 = vst [vmem:[#allocation128_spill] sm:$0xff] %v9650_v45  ;;  %v9653_v53 = vld [vmem:[#allocation6 + $0x50] sm:$0xff] }
 0xb18   :  { %3643 = vmatprep.subr.mxu0 %v9638_v14  ;;  %11773 = vst [vmem:[#allocation129_spill] sm:$0xff] %v9653_v53  ;;  %v9656_v14 = vld [vmem:[#allocation6 + $0x38] sm:$0xff] }
 0xb19   :  { %3644 = vmatpush1.msra.mxu0 %v9641_v7  ;;  %11774 = vst [vmem:[#allocation9_spill] sm:$0xff] %v9656_v14  ;;  %v9659_v7 = vld [vmem:[#allocation6 + $0x30] sm:$0xff] }
 0xb1a   :  { %3645 = vmatprep.subr.mxu0 %v9644_v17  ;;  %11775 = vst [vmem:[#allocation10_spill] sm:$0xff] %v9659_v7  ;;  %v9662_v17 = vld [vmem:[#allocation6 + $0x18] sm:$0xff] }
 0xb1b   :  { %3646 = vmatpush1.msra.mxu0 %v9647_v31  ;;  %11776 = vst [vmem:[#allocation11_spill] sm:$0xff] %v9662_v17  ;;  %v9665_v31 = vld [vmem:[#allocation6 + $0x10] sm:$0xff] }
 0xb1c   :  { %3647 = vmatprep.subr.mxu0 %v9650_v45  ;;  %11777 = vst [vmem:[#allocation12_spill] sm:$0xff] %v9665_v31  ;;  %v9669_v45 = vld [vmem:[#allocation4 + $0x1f8] sm:$0xff] }
 0xb1d   :  { %3648 = vmatpush1.msra.mxu0 %v9653_v53  ;;  %11778 = vst [vmem:[#allocation13_spill] sm:$0xff] %v9669_v45  ;;  %v9672_v53 = vld [vmem:[#allocation4 + $0x1f0] sm:$0xff] }
 0xb1e   :  { %3649 = vmatprep.subr.mxu0 %v9656_v14  ;;  %11779 = vst [vmem:[#allocation14_spill] sm:$0xff] %v9672_v53  ;;  %v11781_v14 = vld [vmem:[#allocation94_spill] sm:$0xff] }
 0xb1f   :  { %3650 = vmatpush1.msra.mxu0 %v9659_v7  ;;  %v11780_v7 = vld [vmem:[#allocation96_spill] sm:$0xff] }
 0xb20   :  { %3651 = vmatprep.subr.mxu0 %v9662_v17  ;;  %v11782_v17 = vld [vmem:[#allocation95_spill] sm:$0xff] }
 0xb21   :  { %3652 = vmatpush1.msra.mxu0 %v9665_v31  ;;  %v11784_v31 = vld [vmem:[#allocation61_spill] sm:$0xff] }
 0xb22   :  { %3686 = vmatmul.mubr.f32.vlgmr.msra.gmra.mxu0 %v9439_v40  ;;  %3763 = vmatprep.subr.mxu0 %v9669_v45  ;;  %v11785_v40 = vld [vmem:[#allocation63_spill] sm:$0xff] }
 0xb23   :  { %3764 = vmatpush1.msra.mxu0 %v9672_v53  ;;  %3827 = vmatprep.mubr.f32.mxu0 %v11109_v2  ;;  %v11787_v45 = vld [vmem:[#allocation67_spill] sm:$0xff] }
 0xb24   :  { %3765 = vmatprep.subr.mxu0 %v11780_v7  ;;  %v11789_v53 = vld [vmem:[#allocation71_spill] sm:$0xff] }
 0xb25   :  { %3766 = vmatpush1.msra.mxu0 %v11781_v14  ;;  %v11791_v7 = vld [vmem:[#allocation75_spill] sm:$0xff]  ;;  %v11792_v14 = vld [vmem:[#allocation77_spill] sm:$0xff] }
 0xb26   :  { %3767 = vmatprep.subr.mxu0 %v11782_v17  ;;  %v11793_v17 = vld [vmem:[#allocation79_spill] sm:$0xff] }
 0xb27   :  { %3768 = vmatpush1.msra.mxu0 %v11783_v27  ;;  %v11794_v27 = vld [vmem:[#allocation81_spill] sm:$0xff] }
 0xb28   :  { %3769 = vmatprep.subr.mxu0 %v11784_v31  ;;  %v11795_v31 = vld [vmem:[#allocation83_spill] sm:$0xff] }
 0xb29   :  { %3770 = vmatpush1.msra.mxu0 %v11785_v40  ;;  %v11796_v40 = vld [vmem:[#allocation85_spill] sm:$0xff] }
 0xb2a   :  { %3771 = vmatprep.subr.mxu0 %v11786_v19  ;;  %v11797_v19 = vld [vmem:[#allocation114_spill] sm:$0xff] }
 0xb2b   :  { %3772 = vmatpush1.msra.mxu0 %v11787_v45  ;;  %v11798_v45 = vld [vmem:[#allocation115_spill] sm:$0xff] }
 0xb2c   :  { %3773 = vmatprep.subr.mxu0 %v11788_v60  ;;  %v11799_v60 = vld [vmem:[#allocation116_spill] sm:$0xff] }
 0xb2d   :  { %3774 = vmatpush1.msra.mxu0 %v11789_v53  ;;  %v11800_v53 = vld [vmem:[#allocation117_spill] sm:$0xff] }
 0xb2e   :  { %3775 = vmatprep.subr.mxu0 %v11790_v54  ;;  %v11801_v54 = vld [vmem:[#allocation26_spill] sm:$0xff] }
 0xb2f   :  { %3776 = vmatpush1.msra.mxu0 %v11791_v7  ;;  %v11802_v7 = vld [vmem:[#allocation28_spill] sm:$0xff] }
 0xb30   :  { %3777 = vmatprep.subr.mxu0 %v11792_v14  ;;  %v11803_v14 = vld [vmem:[#allocation92_spill] sm:$0xff] }
 0xb31   :  { %3778 = vmatpush1.msra.mxu0 %v11793_v17  ;;  %v11804_v17 = vld [vmem:[#allocation90_spill] sm:$0xff] }
 0xb32   :  { %3779 = vmatprep.subr.mxu0 %v11794_v27  ;;  %v11805_v27 = vld [vmem:[#allocation91_spill] sm:$0xff] }
 0xb33   :  { %3780 = vmatpush1.msra.mxu0 %v11795_v31  ;;  %v11806_v31 = vld [vmem:[#allocation93_spill] sm:$0xff] }
 0xb34   :  { %3781 = vmatprep.subr.mxu0 %v11796_v40  ;;  %v11807_v40 = vld [vmem:[#allocation30_spill] sm:$0xff] }
 0xb35   :  { %3782 = vmatpush1.msra.mxu0 %v11797_v19  ;;  %v11808_v19 = vld [vmem:[#allocation32_spill] sm:$0xff] }
 0xb36   :  { %3783 = vmatprep.subr.mxu0 %v11798_v45  ;;  %v11809_v45 = vld [vmem:[#allocation34_spill] sm:$0xff] }
 0xb37   :  { %3784 = vmatpush1.msra.mxu0 %v11799_v60  ;;  %v9706_v60 = vld [vmem:[#allocation2 + $0x1e8] sm:$0xff] }
 0xb38   :  { %3785 = vmatprep.subr.mxu0 %v11800_v53  ;;  %11810 = vst [vmem:[#allocation15_spill] sm:$0xff] %v9706_v60  ;;  %v3445_v53 = vpop.f32.mrf.mxu1 }
 0xb39   :  { %3786 = vmatpush1.msra.mxu0 %v11801_v54 }
 0xb3a   :  { %3787 = vmatprep.subr.mxu0 %v11802_v7  ;;  %v9712_v7 = vld [vmem:[%s10545_s8] ss:$0 sm:$0xff] }
 0xb3b   :  { %3788 = vmatpush1.msra.mxu0 %v11803_v14  ;;  %11811 = vst [vmem:[#allocation16_spill] sm:$0xff] %v9712_v7 }
 0xb3c   :  { %3789 = vmatprep.subr.mxu0 %v11804_v17  ;;  %v3447_v17 = vpop.f32.mrf.mxu1 }
 0xb3d   :  { %3790 = vmatpush1.msra.mxu0 %v11805_v27 }
 0xb3e   :  { %3791 = vmatprep.subr.mxu0 %v11806_v31  ;;  %v11812_v31 = vld [vmem:[#allocation104_spill] sm:$0xff] }
 0xb3f   :  { %3792 = vmatpush1.msra.mxu0 %v11807_v40  ;;  %v3522_v40 = vadd.f32 %v3447_v17, %v11812_v31 }
 0xb40   :  { %3793 = vmatprep.subr.mxu0 %v11808_v19  ;;  %v11813_v19 = vld [vmem:[#allocation102_spill] sm:$0xff] }
 0xb41   :  { %3794 = vmatpush1.msra.mxu0 %v11809_v45  ;;  %v3521_v45 = vadd.f32 %v3445_v53, %v11813_v19 }
 0xb42   :  { %3935 = vmatprep.subr.mxu0 %v9706_v60  ;;  %v5105_v60 = vmul.f32 -1.442695, %v3522_v40 }
 0xb43   :  { %v5104_v56 = vmul.f32 -1.442695, %v3521_v45  ;;  %v9790_v45 = vld [vmem:[#allocation2 + $0xa8] sm:$0xff] }
 0xb44   :  { %5728 = vpow2.f32 %v5105_v60  ;;  %11821 = vst [vmem:[#allocation18_spill] sm:$0xff] %v9790_v45 }
 0xb45   :  { %5730 = vpow2.f32 %v5104_v56 }
 0xb51   :  { %v5729_v48 = vpop.eup %5728 }
 0xb52   :  { %v5731_v51 = vpop.eup %5730  ;;  %v3534_v25 = vadd.f32 1.0, %v5729_v48 }
 0xb53   :  { %v3528_v10 = vadd.f32 1.0, %v5731_v51 }
 0xb54   :  { %5732 = vrcp.f32 %v3534_v25 }
 0xb55   :  { %5734 = vrcp.f32 %v3528_v10 }
 0xb61   :  { %v5733_v53 = vpop.eup %5732 }
 0xb62   :  { %v5735_v31 = vpop.eup %5734  ;;  %v3544_v56 = vmul.f32 %v5733_v53, %v9226_v46  ;;  %v9746_v46 = vld [vmem:[#allocation2 + $0x160] sm:$0xff] }
 0xb63   :  { %v9802_v53 = vld [vmem:[#allocation2 + $0x80] sm:$0xff] }
 0xb64   :  { %11826 = vst [vmem:[#allocation21_spill] sm:$0xff] %v9802_v53 }
 0xba2   :  { %v3373_v54 = vpop.f32.mrf.mxu0 }
 0xba3   :  { %v3374_v14 = vadd.f32 %v9712_v7, %v3373_v54 }
 0xba4   :  { %v5435_v27 = vpop.f32.mrf.mxu0 }
 0xba5   :  { %5103 = vst.msk [vmem:[%s10546_s9 + $0x20] sm:$0xff] %vm1153_vm2, %v3374_v14  ;;  %v11814_v27 = vld [vmem:[#allocation103_spill] sm:$0xff]  ;;  %v11815_v14 = vld [vmem:[#allocation105_spill] sm:$0xff] }
 0xbc2   :  { %v3516_v54 = vpop.f32.mrf.mxu0 }
 0xbc3   :  { %v3523_v7 = vadd.f32 %v3516_v54, %v11814_v27  ;;  %v11822_v54 = vld [vmem:[#allocation44_spill] sm:$0xff]  ;;  %v9794_v27 = vld [vmem:[#allocation2 + $0xa0] sm:$0xff] }
 0xbc4   :  { %v3518_v61 = vpop.f32.mrf.mxu0  ;;  %11823 = vst [vmem:[#allocation19_spill] sm:$0xff] %v9794_v27 }
 0xbc5   :  { %5736 = vtanh.f32 %v3523_v7  ;;  %v3524_v62 = vadd.f32 %v3518_v61, %v11815_v14  ;;  %v9786_v61 = vld [vmem:[#allocation2 + $0xc0] sm:$0xff]  ;;  %v9798_v14 = vld [vmem:[#allocation2 + $0x88] sm:$0xff] }
 0xbc6   :  { %11820 = vst [vmem:[#allocation17_spill] sm:$0xff] %v9786_v61  ;;  %11824 = vst [vmem:[#allocation20_spill] sm:$0xff] %v9798_v14 }
 0xbc7   :  { %v5106_v17 = vmul.f32 -1.442695, %v3524_v62 }
 0xbc9   :  { %5738 = vpow2.f32 %v5106_v17  ;;  %v11825_v17 = vld [vmem:[#allocation46_spill] sm:$0xff] }
 0xbd2   :  { %v5737_v40 = vpop.eup %5736 }
 0xbd3   :  { %v3545_v60 = vmul.f32 %v5737_v40, %v5735_v31  ;;  %v9806_v31 = vld [vmem:[#allocation2 + $0x68] sm:$0xff]  ;;  %v11828_v40 = vld [vmem:[#allocation48_spill] sm:$0xff] }
 0xbd4   :  { %11827 = vst [vmem:[#allocation22_spill] sm:$0xff] %v9806_v31 }
 0xbd5   :  { %v9724_v19 = vadd.f32 %v3545_v60, %v3544_v56  ;;  %v9810_v56 = vld [vmem:[#allocation2 + $0x60] sm:$0xff]  ;;  %v9814_v60 = vld [vmem:[#allocation2 + $0x48] sm:$0xff] }
 0xbd6   :  { %v5739_v51 = vpop.eup %5738  ;;  %11829 = vst [vmem:[#allocation23_spill] sm:$0xff] %v9810_v56  ;;  %11830 = vst [vmem:[#allocation24_spill] sm:$0xff] %v9814_v60 }
 0xbd7   :  { %v3541_v48 = vadd.f32 1.0, %v5739_v51  ;;  %5740 = vtanh.f32 %v9724_v19  ;;  %v11831_v51 = vld [vmem:[#allocation50_spill] sm:$0xff] }
 0xbd9   :  { %5742 = vrcp.f32 %v3541_v48  ;;  %v9818_v48 = vld [vmem:[#allocation2 + $0x40] sm:$0xff] }
 0xbda   :  { %11832 = vst [vmem:[#allocation25_spill] sm:$0xff] %v9818_v48 }
 0xbe4   :  { %v5741_v10 = vpop.eup %5740 }
 0xbe6   :  { %v5743_v25 = vpop.eup %5742 }
 0xbe7   :  { %v9727_v7 = vmul.f32 %v5743_v25, %v5741_v10  ;;  %v9822_v10 = vld [vmem:[#allocation2 + $0x28] sm:$0xff]  ;;  %v11834_v25 = vld [vmem:[#allocation52_spill] sm:$0xff] }
 0xbe8   :  { %11833 = vst [vmem:[#allocation27_spill] sm:$0xff] %v9822_v10 }
 0xbe9   :  { %5744 = vtanh.f32 %v9727_v7 }
 0xbf6   :  { %v5745_v62 = vpop.eup %5744 }
 0xbf7   :  { %3757 = vmatmul.mubr.f32.vlgmr.msra.gmra.mxu1 %v5745_v62  ;;  %3828 = vmatmul.mubr.f32.vlgmr.msra.gmra.mxu0 %v5745_v62  ;;  %v9826_v62 = vld [vmem:[#allocation2 + $0x20] sm:$0xff] }
 0xbf8   :  { %3936 = vmatpush1.msra.mxu0 %v9232_v34  ;;  %3999 = vmatprep.mubr.f32.mxu0 %v11109_v2  ;;  %v9750_v34 = vld [vmem:[#allocation2 + $0x148] sm:$0xff]  ;;  %11835 = vst [vmem:[#allocation29_spill] sm:$0xff] %v9826_v62 }
 0xbf9   :  { %3937 = vmatprep.subr.mxu0 %v9236_v11  ;;  %5437 = vmatpush3.msra.mxu1 %v9242_v57  ;;  %v9754_v11 = vld [vmem:[#allocation2 + $0x140] sm:$0xff]  ;;  %v9758_v57 = vld [vmem:[#allocation2 + $0x128] sm:$0xff] }
 0xbfa   :  { %3938 = vmatpush1.msra.mxu0 %v9245_v13  ;;  %5438 = vmatprep.subr.mxu1 %v11109_v2  ;;  %v11816_v13 = vld [vmem:[#allocation36_spill] sm:$0xff] }
 0xbfb   :  { %3939 = vmatprep.subr.mxu0 %v9249_v20  ;;  %5439 = vmatpush3.msra.mxu1 %v9255_v42  ;;  %v9762_v20 = vld [vmem:[#allocation2 + $0x120] sm:$0xff]  ;;  %v9766_v42 = vld [vmem:[#allocation2 + $0x108] sm:$0xff] }
 0xbfc   :  { %3940 = vmatpush1.msra.mxu0 %v9258_v22  ;;  %5440 = vmatprep.subr.mxu1 %v11109_v2  ;;  %v11817_v22 = vld [vmem:[#allocation38_spill] sm:$0xff] }
 0xbfd   :  { %3941 = vmatprep.subr.mxu0 %v9262_v52  ;;  %5441 = vmatpush3.msra.mxu1 %v9268_v43  ;;  %v9770_v52 = vld [vmem:[#allocation2 + $0x100] sm:$0xff]  ;;  %v9774_v43 = vld [vmem:[#allocation2 + $0xe8] sm:$0xff] }
 0xbfe   :  { %3942 = vmatpush1.msra.mxu0 %v9271_v36  ;;  %5442 = vmatprep.subr.mxu1 %v11109_v2  ;;  %v11818_v36 = vld [vmem:[#allocation40_spill] sm:$0xff] }
 0xbff   :  { %3943 = vmatprep.subr.mxu0 %v9275_v35  ;;  %5443 = vmatpush3.msra.mxu1 %v9281_v30  ;;  %v9778_v35 = vld [vmem:[#allocation2 + $0xe0] sm:$0xff]  ;;  %v9782_v30 = vld [vmem:[#allocation2 + $0xc8] sm:$0xff] }
 0xc00   :  { %3944 = vmatpush1.msra.mxu0 %v9746_v46  ;;  %5444 = vmatprep.subr.mxu1 %v11109_v2 }
 0xc01   :  { %3945 = vmatprep.subr.mxu0 %v9750_v34  ;;  %5445 = vmatpush3.msra.mxu1 %v9290_v5  ;;  %v11819_v5 = vld [vmem:[#allocation42_spill] sm:$0xff] }
 0xc02   :  { %3946 = vmatpush1.msra.mxu0 %v9754_v11  ;;  %5446 = vmatprep.subr.mxu1 %v11109_v2 }
 0xc03   :  { %3947 = vmatprep.subr.mxu0 %v9758_v57  ;;  %5447 = vmatpush3.msra.mxu1 %v11816_v13  ;;  %v9830_v13 = vld [vmem:[#allocation2 + $0x8] sm:$0xff] }
 0xc04   :  { %3948 = vmatpush1.msra.mxu0 %v9762_v20  ;;  %5448 = vmatprep.subr.mxu1 %v11109_v2  ;;  %11836 = vst [vmem:[#allocation31_spill] sm:$0xff] %v9830_v13 }
 0xc05   :  { %3949 = vmatprep.subr.mxu0 %v9766_v42  ;;  %5449 = vmatpush3.msra.mxu1 %v11817_v22  ;;  %v11837_v22 = vld [vmem:[#allocation54_spill] sm:$0xff] }
 0xc06   :  { %3950 = vmatpush1.msra.mxu0 %v9770_v52  ;;  %5450 = vmatprep.subr.mxu1 %v11109_v2 }
 0xc07   :  { %3951 = vmatprep.subr.mxu0 %v9774_v43  ;;  %5451 = vmatpush3.msra.mxu1 %v11818_v36  ;;  %v9834_v36 = vld [vmem:[#allocation2] sm:$0xff] }
 0xc08   :  { %3952 = vmatpush1.msra.mxu0 %v9778_v35  ;;  %5452 = vmatprep.subr.mxu1 %v11109_v2  ;;  %11838 = vst [vmem:[#allocation33_spill] sm:$0xff] %v9834_v36 }
 0xc09   :  { %3953 = vmatprep.subr.mxu0 %v9782_v30  ;;  %5453 = vmatpush3.msra.mxu1 %v11819_v5  ;;  %v9839_v5 = vld [vmem:[#allocation6 + $0x1e8] sm:$0xff] }
 0xc0a   :  { %3954 = vmatpush1.msra.mxu0 %v9786_v61  ;;  %5454 = vmatprep.subr.mxu1 %v11109_v2  ;;  %11839 = vst [vmem:[#allocation35_spill] sm:$0xff] %v9839_v5 }
 0xc0b   :  { %3955 = vmatprep.subr.mxu0 %v9790_v45  ;;  %5455 = vmatpush3.msra.mxu1 %v11822_v54  ;;  %v9842_v54 = vld [vmem:[#allocation6 + $0x1e0] sm:$0xff] }
 0xc0c   :  { %3956 = vmatpush1.msra.mxu0 %v9794_v27  ;;  %5456 = vmatprep.subr.mxu1 %v11109_v2  ;;  %11840 = vst [vmem:[#allocation37_spill] sm:$0xff] %v9842_v54 }
 0xc0d   :  { %3957 = vmatprep.subr.mxu0 %v9798_v14  ;;  %5457 = vmatpush3.msra.mxu1 %v11825_v17  ;;  %v9846_v17 = vld [vmem:[#allocation6 + $0x1c8] sm:$0xff] }
 0xc0e   :  { %3958 = vmatpush1.msra.mxu0 %v9802_v53  ;;  %5458 = vmatprep.subr.mxu1 %v11109_v2  ;;  %11841 = vst [vmem:[#allocation39_spill] sm:$0xff] %v9846_v17 }
 0xc0f   :  { %3959 = vmatprep.subr.mxu0 %v9806_v31  ;;  %5459 = vmatpush3.msra.mxu1 %v11828_v40  ;;  %v11842_v40 = vld [vmem:[#allocation56_spill] sm:$0xff] }
 0xc10   :  { %3960 = vmatpush1.msra.mxu0 %v9810_v56  ;;  %5460 = vmatprep.subr.mxu1 %v11109_v2 }
 0xc11   :  { %3961 = vmatprep.subr.mxu0 %v9814_v60  ;;  %5461 = vmatpush3.msra.mxu1 %v11831_v51  ;;  %v9850_v51 = vld [vmem:[#allocation6 + $0x1c0] sm:$0xff] }
 0xc12   :  { %3962 = vmatpush1.msra.mxu0 %v9818_v48  ;;  %5462 = vmatprep.subr.mxu1 %v11109_v2  ;;  %11843 = vst [vmem:[#allocation41_spill] sm:$0xff] %v9850_v51 }
 0xc13   :  { %3963 = vmatprep.subr.mxu0 %v9822_v10  ;;  %5463 = vmatpush3.msra.mxu1 %v11834_v25  ;;  %v9855_v25 = vld [vmem:[#allocation6 + $0x1a8] sm:$0xff] }
 0xc14   :  { %3964 = vmatpush1.msra.mxu0 %v9826_v62  ;;  %5464 = vmatprep.subr.mxu1 %v11109_v2  ;;  %11844 = vst [vmem:[#allocation43_spill] sm:$0xff] %v9855_v25 }
 0xc15   :  { %3965 = vmatprep.subr.mxu0 %v9830_v13  ;;  %5465 = vmatpush3.msra.mxu1 %v11837_v22  ;;  %v11845_v22 = vld [vmem:[#allocation58_spill] sm:$0xff] }
 0xc16   :  { %3966 = vmatpush1.msra.mxu0 %v9834_v36  ;;  %5466 = vmatprep.subr.mxu1 %v11109_v2 }
 0xc17   :  { %4000 = vmatmul.mubr.f32.vlgmr.msra.gmra.mxu0 %v9727_v7  ;;  %4106 = vmatprep.subr.mxu0 %v9839_v5  ;;  %v9871_v5 = vld [vmem:[#allocation6 + $0x160] sm:$0xff] }
 0xc18   :  { %4107 = vmatpush1.msra.mxu0 %v9842_v54  ;;  %4170 = vmatprep.mubr.f32.mxu0 %v11109_v2  ;;  %v9859_v54 = vld [vmem:[#allocation6 + $0x1a0] sm:$0xff]  ;;  %11850 = vst [vmem:[#allocation53_spill] sm:$0xff] %v9871_v5 }
 0xc19   :  { %4108 = vmatprep.subr.mxu0 %v9846_v17  ;;  %5467 = vmatpush3.msra.mxu1 %v11842_v40  ;;  %11846 = vst [vmem:[#allocation45_spill] sm:$0xff] %v9859_v54  ;;  %v9862_v17 = vld [vmem:[#allocation6 + $0x188] sm:$0xff]  ;;  %v9865_v40 = vld [vmem:[#allocation6 + $0x180] sm:$0xff] }
 0xc1a   :  { %4109 = vmatpush1.msra.mxu0 %v9850_v51  ;;  %5468 = vmatprep.mubr.msk.f32.mxu1 %vm6607_vm1, %v11109_v2  ;;  %11847 = vst [vmem:[#allocation47_spill] sm:$0xff] %v9862_v17  ;;  %11848 = vst [vmem:[#allocation49_spill] sm:$0xff] %v9865_v40  ;;  %v9868_v51 = vld [vmem:[#allocation6 + $0x168] sm:$0xff] }
 0xc1b   :  { %4110 = vmatprep.subr.mxu0 %v9855_v25  ;;  %4006 = vmatprep.subr.mxu1 %v11845_v22  ;;  %11849 = vst [vmem:[#allocation51_spill] sm:$0xff] %v9868_v51  ;;  %v9874_v22 = vld [vmem:[#allocation6 + $0x148] sm:$0xff]  ;;  %v3687_v25 = vpop.f32.mrf.mxu0 }
 0xc1c   :  { %4111 = vmatpush1.msra.mxu0 %v9859_v54  ;;  %11851 = vst [vmem:[#allocation55_spill] sm:$0xff] %v9874_v22  ;;  %v9877_v54 = vld [vmem:[#allocation6 + $0x140] sm:$0xff] }
 0xc1d   :  { %4112 = vmatprep.subr.mxu0 %v9862_v17  ;;  %11852 = vst [vmem:[#allocation57_spill] sm:$0xff] %v9877_v54  ;;  %v9880_v17 = vld [vmem:[#allocation6 + $0x128] sm:$0xff]  ;;  %v3689_v13 = vpop.f32.mrf.mxu0 }
 0xc1e   :  { %4113 = vmatpush1.msra.mxu0 %v9865_v40  ;;  %11853 = vst [vmem:[#allocation59_spill] sm:$0xff] %v9880_v17  ;;  %v9883_v40 = vld [vmem:[#allocation6 + $0x120] sm:$0xff] }
 0xc1f   :  { %4114 = vmatprep.subr.mxu0 %v9868_v51  ;;  %11854 = vst [vmem:[#allocation96_spill] sm:$0xff] %v9883_v40  ;;  %v9886_v51 = vld [vmem:[#allocation6 + $0x108] sm:$0xff] }
 0xc20   :  { %4115 = vmatpush1.msra.mxu0 %v9871_v5  ;;  %11855 = vst [vmem:[#allocation94_spill] sm:$0xff] %v9886_v51  ;;  %v9889_v5 = vld [vmem:[#allocation6 + $0x100] sm:$0xff] }
 0xc21   :  { %4116 = vmatprep.subr.mxu0 %v9874_v22  ;;  %11856 = vst [vmem:[#allocation95_spill] sm:$0xff] %v9889_v5  ;;  %v9892_v22 = vld [vmem:[#allocation6 + $0xe8] sm:$0xff] }
 0xc22   :  { %4117 = vmatpush1.msra.mxu0 %v9877_v54  ;;  %11857 = vst [vmem:[#allocation97_spill] sm:$0xff] %v9892_v22  ;;  %v9895_v54 = vld [vmem:[#allocation6 + $0xe0] sm:$0xff] }
 0xc23   :  { %4118 = vmatprep.subr.mxu0 %v9880_v17  ;;  %11858 = vst [vmem:[#allocation61_spill] sm:$0xff] %v9895_v54  ;;  %v9898_v17 = vld [vmem:[#allocation6 + $0xc8] sm:$0xff] }
 0xc24   :  { %4119 = vmatpush1.msra.mxu0 %v9883_v40  ;;  %11859 = vst [vmem:[#allocation63_spill] sm:$0xff] %v9898_v17  ;;  %v9901_v40 = vld [vmem:[#allocation6 + $0xc0] sm:$0xff] }
 0xc25   :  { %4120 = vmatprep.subr.mxu0 %v9886_v51  ;;  %11860 = vst [vmem:[#allocation65_spill] sm:$0xff] %v9901_v40  ;;  %v9904_v51 = vld [vmem:[#allocation6 + $0xa8] sm:$0xff] }
 0xc26   :  { %4121 = vmatpush1.msra.mxu0 %v9889_v5  ;;  %11861 = vst [vmem:[#allocation67_spill] sm:$0xff] %v9904_v51  ;;  %v9907_v5 = vld [vmem:[#allocation6 + $0xa0] sm:$0xff] }
 0xc27   :  { %4122 = vmatprep.subr.mxu0 %v9892_v22  ;;  %11862 = vst [vmem:[#allocation69_spill] sm:$0xff] %v9907_v5  ;;  %v9910_v22 = vld [vmem:[#allocation6 + $0x88] sm:$0xff] }
 0xc28   :  { %4123 = vmatpush1.msra.mxu0 %v9895_v54  ;;  %11863 = vst [vmem:[#allocation71_spill] sm:$0xff] %v9910_v22  ;;  %v9913_v54 = vld [vmem:[#allocation6 + $0x80] sm:$0xff] }
 0xc29   :  { %4124 = vmatprep.subr.mxu0 %v9898_v17  ;;  %11864 = vst [vmem:[#allocation73_spill] sm:$0xff] %v9913_v54  ;;  %v9916_v17 = vld [vmem:[#allocation6 + $0x68] sm:$0xff] }
 0xc2a   :  { %4125 = vmatpush1.msra.mxu0 %v9901_v40  ;;  %11865 = vst [vmem:[#allocation75_spill] sm:$0xff] %v9916_v17  ;;  %v9919_v40 = vld [vmem:[#allocation6 + $0x60] sm:$0xff] }
 0xc2b   :  { %4126 = vmatprep.subr.mxu0 %v9904_v51  ;;  %11866 = vst [vmem:[#allocation77_spill] sm:$0xff] %v9919_v40  ;;  %v9922_v51 = vld [vmem:[#allocation6 + $0x48] sm:$0xff] }
 0xc2c   :  { %4127 = vmatpush1.msra.mxu0 %v9907_v5  ;;  %11867 = vst [vmem:[#allocation79_spill] sm:$0xff] %v9922_v51  ;;  %v9925_v5 = vld [vmem:[#allocation6 + $0x40] sm:$0xff] }
 0xc2d   :  { %4128 = vmatprep.subr.mxu0 %v9910_v22  ;;  %11868 = vst [vmem:[#allocation81_spill] sm:$0xff] %v9925_v5  ;;  %v9928_v22 = vld [vmem:[#allocation6 + $0x28] sm:$0xff] }
 0xc2e   :  { %4129 = vmatpush1.msra.mxu0 %v9913_v54  ;;  %11869 = vst [vmem:[#allocation83_spill] sm:$0xff] %v9928_v22  ;;  %v9931_v54 = vld [vmem:[#allocation6 + $0x20] sm:$0xff] }
 0xc2f   :  { %4130 = vmatprep.subr.mxu0 %v9916_v17  ;;  %11870 = vst [vmem:[#allocation85_spill] sm:$0xff] %v9931_v54  ;;  %v9934_v17 = vld [vmem:[#allocation6 + $0x8] sm:$0xff] }
 0xc30   :  { %4131 = vmatpush1.msra.mxu0 %v9919_v40  ;;  %11871 = vst [vmem:[#allocation114_spill] sm:$0xff] %v9934_v17  ;;  %v9937_v40 = vld [vmem:[#allocation6] sm:$0xff] }
 0xc31   :  { %4132 = vmatprep.subr.mxu0 %v9922_v51  ;;  %11872 = vst [vmem:[#allocation115_spill] sm:$0xff] %v9937_v40  ;;  %v9940_v51 = vld [vmem:[#allocation4 + $0x1e8] sm:$0xff] }
 0xc32   :  { %4133 = vmatpush1.msra.mxu0 %v9925_v5  ;;  %11873 = vst [vmem:[#allocation116_spill] sm:$0xff] %v9940_v51  ;;  %v3616_v5 = vpop.f32.mrf.mxu1 }
 0xc33   :  { %4134 = vmatprep.subr.mxu0 %v9928_v22 }
 0xc34   :  { %4135 = vmatpush1.msra.mxu0 %v9931_v54  ;;  %v3618_v36 = vpop.f32.mrf.mxu1 }
 0xc35   :  { %4136 = vmatprep.subr.mxu0 %v9934_v17 }
 0xc36   :  { %4137 = vmatpush1.msra.mxu0 %v9937_v40 }
 0xc37   :  { %4248 = vmatprep.subr.mxu0 %v9940_v51 }
 0xcb7   :  { %v3758_v22 = vpop.f32.mrf.mxu1  ;;  %v3829_v48 = vpop.f32.mrf.mxu0 }
 0xcb8   :  { %v3759_v62 = vadd.f32 %v3758_v22, %v3616_v5  ;;  %v3830_v14 = vadd.f32 %v3829_v48, %v3687_v25  ;;  %v9971_v25 = vld [vmem:[#allocation4 + $0x188] sm:$0xff] }
 0xcb9   :  { %v3760_v10 = vpop.f32.mrf.mxu1  ;;  %v3831_v31 = vpop.f32.mrf.mxu0 }
 0xcba   :  { %v3834_v54 = vadd.f32 %v3759_v62, %v7428_v4  ;;  %v3761_v60 = vadd.f32 %v3760_v10, %v3618_v36  ;;  %v3832_v53 = vadd.f32 %v3831_v31, %v3689_v13  ;;  %v3836_v5 = vadd.f32 %v3830_v14, %v7443_v41  ;;  %v9962_v13 = vld [vmem:[#allocation4 + $0x1c0] sm:$0xff] }
 0xcbc   :  { %v5107_v17 = vmul.f32 -1.442695, %v3834_v54  ;;  %v3835_v56 = vadd.f32 %v3761_v60, %v7432_v33  ;;  %v3837_v51 = vadd.f32 %v3832_v53, %v7438_v32 }
 0xcbe   :  { %5746 = vpow2.f32 %v5107_v17  ;;  %v5108_v40 = vmul.f32 -1.442695, %v3835_v56  ;;  %v5109_v27 = vmul.f32 -1.442695, %v3837_v51  ;;  %v9965_v17 = vld [vmem:[#allocation4 + $0x1a8] sm:$0xff]  ;;  %v9968_v51 = vld [vmem:[#allocation4 + $0x1a0] sm:$0xff] }
 0xcc0   :  { %5748 = vpow2.f32 %v5108_v40  ;;  %v9974_v40 = vld [vmem:[#allocation4 + $0x180] sm:$0xff] }
 0xcc1   :  { %5750 = vpow2.f32 %v5109_v27 }
 0xccb   :  { %v5747_v45 = vpop.eup %5746 }
 0xccc   :  { %v3841_v22 = vadd.f32 1.0, %v5747_v45 }
 0xccd   :  { %v5749_v61 = vpop.eup %5748 }
 0xcce   :  { %5752 = vrcp.f32 %v3841_v22  ;;  %v3847_v10 = vadd.f32 1.0, %v5749_v61  ;;  %v5751_v60 = vpop.eup %5750  ;;  %v9955_v61 = vld [vmem:[#allocation4 + $0x1e0] sm:$0xff] }
 0xccf   :  { %5754 = vtanh.f32 %v3836_v5  ;;  %v3854_v54 = vadd.f32 1.0, %v5751_v60  ;;  %v9977_v5 = vld [vmem:[#allocation4 + $0x168] sm:$0xff]  ;;  %v9980_v22 = vld [vmem:[#allocation4 + $0x160] sm:$0xff] }
 0xcd0   :  { %5756 = vrcp.f32 %v3847_v10  ;;  %v9983_v10 = vld [vmem:[#allocation4 + $0x148] sm:$0xff]  ;;  %v9986_v60 = vld [vmem:[#allocation4 + $0x140] sm:$0xff] }
 0xcd1   :  { %5758 = vrcp.f32 %v3854_v54  ;;  %v9995_v54 = vld [vmem:[#allocation4 + $0x108] sm:$0xff] }
 0xcdb   :  { %v5753_v62 = vpop.eup %5752 }
 0xcdc   :  { %v5755_v56 = vpop.eup %5754 }
 0xcdd   :  { %v5757_v36 = vpop.eup %5756  ;;  %v3858_v31 = vmul.f32 %v5755_v56, %v5753_v62  ;;  %v9989_v62 = vld [vmem:[#allocation4 + $0x128] sm:$0xff] }
 0xcde   :  { %v3857_v53 = vmul.f32 %v5757_v36, %v9436_v29  ;;  %v5759_v45 = vpop.eup %5758  ;;  %v9959_v29 = vld [vmem:[#allocation4 + $0x1c8] sm:$0xff]  ;;  %v9992_v36 = vld [vmem:[#allocation4 + $0x120] sm:$0xff] }
 0xce0   :  { %v9948_v48 = vadd.f32 %v3858_v31, %v3857_v53  ;;  %v10001_v31 = vld [vmem:[#allocation4 + $0x100] sm:$0xff]  ;;  %v10005_v53 = vld [vmem:[#allocation4 + $0xe8] sm:$0xff] }
 0xce2   :  { %5760 = vtanh.f32 %v9948_v48 }
 0xcef   :  { %v5761_v14 = vpop.eup %5760 }
 0xcf0   :  { %v9951_v27 = vmul.f32 %v5761_v14, %v5759_v45  ;;  %v10009_v45 = vld [vmem:[#allocation4 + $0xe0] sm:$0xff]  ;;  %v11888_v14 = vld [vmem:[#allocation84_spill] sm:$0xff] }
 0xcf2   :  { %5762 = vtanh.f32 %v9951_v27  ;;  %4171 = vmatmul.mubr.f32.vlgmr.msra.gmra.mxu0 %v9951_v27 }
 0xcf3   :  { %4249 = vmatpush1.msra.mxu0 %v9955_v61  ;;  %4312 = vmatprep.mubr.f32.mxu0 %v11109_v2 }
 0xcf4   :  { %4250 = vmatprep.subr.mxu0 %v9959_v29 }
 0xcf5   :  { %4251 = vmatpush1.msra.mxu0 %v9962_v13 }
 0xcf6   :  { %4252 = vmatprep.subr.mxu0 %v9965_v17 }
 0xcf7   :  { %4253 = vmatpush1.msra.mxu0 %v9968_v51 }
 0xcf8   :  { %4254 = vmatprep.subr.mxu0 %v9971_v25 }
 0xcf9   :  { %4255 = vmatpush1.msra.mxu0 %v9974_v40 }
 0xcfa   :  { %4256 = vmatprep.subr.mxu0 %v9977_v5 }
 0xcfb   :  { %4257 = vmatpush1.msra.mxu0 %v9980_v22 }
 0xcfc   :  { %4258 = vmatprep.subr.mxu0 %v9983_v10 }
 0xcfd   :  { %4259 = vmatpush1.msra.mxu0 %v9986_v60 }
 0xcfe   :  { %4260 = vmatprep.subr.mxu0 %v9989_v62 }
 0xcff   :  { %v5763_v56 = vpop.eup %5762  ;;  %4261 = vmatpush1.msra.mxu0 %v9992_v36 }
 0xd00   :  { %5469 = vmatmul.mubr.f32.vlgmr.msra.gmra.mxu1 %v5763_v56  ;;  %4262 = vmatprep.subr.mxu0 %v9995_v54  ;;  %v11889_v56 = vld [vmem:[#allocation88_spill] sm:$0xff] }
 0xd01   :  { %4007 = vmatpush1.msra.mxu1 %v9458_v16  ;;  %4070 = vmatprep.mubr.f32.mxu1 %v11109_v2  ;;  %v10013_v16 = vld [vmem:[#allocation4 + $0xc8] sm:$0xff] }
 0xd02   :  { %4008 = vmatprep.subr.mxu1 %v9462_v26  ;;  %4263 = vmatpush1.msra.mxu0 %v10001_v31  ;;  %v10017_v26 = vld [vmem:[#allocation4 + $0xc0] sm:$0xff] }
 0xd03   :  { %4009 = vmatpush1.msra.mxu1 %v9466_v39  ;;  %4264 = vmatprep.subr.mxu0 %v10005_v53  ;;  %v10021_v39 = vld [vmem:[#allocation4 + $0xa8] sm:$0xff] }
 0xd04   :  { %4010 = vmatprep.subr.mxu1 %v9470_v3  ;;  %4265 = vmatpush1.msra.mxu0 %v10009_v45  ;;  %v10025_v3 = vld [vmem:[#allocation4 + $0xa0] sm:$0xff] }
 0xd05   :  { %4011 = vmatpush1.msra.mxu1 %v9474_v6  ;;  %4266 = vmatprep.subr.mxu0 %v10013_v16  ;;  %v10029_v6 = vld [vmem:[#allocation4 + $0x88] sm:$0xff] }
 0xd06   :  { %4012 = vmatprep.subr.mxu1 %v9478_v44  ;;  %4267 = vmatpush1.msra.mxu0 %v10017_v26  ;;  %v10033_v44 = vld [vmem:[#allocation4 + $0x80] sm:$0xff] }
 0xd07   :  { %4013 = vmatpush1.msra.mxu1 %v9482_v1  ;;  %4268 = vmatprep.subr.mxu0 %v10021_v39  ;;  %v10037_v1 = vld [vmem:[#allocation4 + $0x68] sm:$0xff] }
 0xd08   :  { %4014 = vmatprep.subr.mxu1 %v9486_v38  ;;  %4269 = vmatpush1.msra.mxu0 %v10025_v3  ;;  %v10041_v38 = vld [vmem:[#allocation4 + $0x60] sm:$0xff] }
 0xd09   :  { %4015 = vmatpush1.msra.mxu1 %v9490_v24  ;;  %4270 = vmatprep.subr.mxu0 %v10029_v6  ;;  %v10045_v24 = vld [vmem:[#allocation4 + $0x48] sm:$0xff] }
 0xd0a   :  { %4016 = vmatprep.subr.mxu1 %v9494_v47  ;;  %4271 = vmatpush1.msra.mxu0 %v10033_v44  ;;  %v10049_v47 = vld [vmem:[#allocation4 + $0x40] sm:$0xff] }
 0xd0b   :  { %4017 = vmatpush1.msra.mxu1 %v9498_v28  ;;  %4272 = vmatprep.subr.mxu0 %v10037_v1  ;;  %v10053_v28 = vld [vmem:[#allocation4 + $0x28] sm:$0xff] }
 0xd0c   :  { %4018 = vmatprep.subr.mxu1 %v9502_v8  ;;  %4273 = vmatpush1.msra.mxu0 %v10041_v38  ;;  %v10057_v8 = vld [vmem:[#allocation4 + $0x20] sm:$0xff] }
 0xd0d   :  { %4019 = vmatpush1.msra.mxu1 %v9506_v15  ;;  %4274 = vmatprep.subr.mxu0 %v10045_v24  ;;  %v10061_v15 = vld [vmem:[#allocation4 + $0x8] sm:$0xff] }
 0xd0e   :  { %4020 = vmatprep.subr.mxu1 %v9510_v58  ;;  %4275 = vmatpush1.msra.mxu0 %v10049_v47  ;;  %11874 = vst [vmem:[#allocation117_spill] sm:$0xff] %v10061_v15  ;;  %v10065_v58 = vld [vmem:[#allocation4] sm:$0xff] }
 0xd0f   :  { %4021 = vmatpush1.msra.mxu1 %v9514_v63  ;;  %4276 = vmatprep.subr.mxu0 %v10053_v28  ;;  %11875 = vst [vmem:[#allocation26_spill] sm:$0xff] %v10065_v58  ;;  %v11876_v63 = vld [vmem:[#allocation60_spill] sm:$0xff] }
 0xd10   :  { %4022 = vmatprep.subr.mxu1 %v9518_v23  ;;  %4277 = vmatpush1.msra.mxu0 %v10057_v8  ;;  %v11877_v23 = vld [vmem:[#allocation62_spill] sm:$0xff] }
 0xd11   :  { %4023 = vmatpush1.msra.mxu1 %v9522_v37  ;;  %4278 = vmatprep.subr.mxu0 %v10061_v15  ;;  %v11878_v37 = vld [vmem:[#allocation64_spill] sm:$0xff] }
 0xd12   :  { %4024 = vmatprep.subr.mxu1 %v9526_v49  ;;  %4279 = vmatpush1.msra.mxu0 %v10065_v58  ;;  %v11879_v49 = vld [vmem:[#allocation66_spill] sm:$0xff] }
 0xd13   :  { %4025 = vmatpush1.msra.mxu1 %v9530_v18  ;;  %5471 = vmatprep.subr.mxu0 %v11109_v2  ;;  %v11880_v18 = vld [vmem:[#allocation68_spill] sm:$0xff] }
 0xd14   :  { %4026 = vmatprep.subr.mxu1 %v9534_v50  ;;  %v11881_v50 = vld [vmem:[#allocation70_spill] sm:$0xff] }
 0xd15   :  { %4027 = vmatpush1.msra.mxu1 %v9537_v55  ;;  %v11882_v55 = vld [vmem:[#allocation72_spill] sm:$0xff] }
 0xd16   :  { %4028 = vmatprep.subr.mxu1 %v9540_v12  ;;  %v11883_v12 = vld [vmem:[#allocation74_spill] sm:$0xff] }
 0xd17   :  { %4029 = vmatpush1.msra.mxu1 %v9543_v9  ;;  %v11884_v9 = vld [vmem:[#allocation76_spill] sm:$0xff] }
 0xd18   :  { %4030 = vmatprep.subr.mxu1 %v9546_v59  ;;  %v11885_v59 = vld [vmem:[#allocation78_spill] sm:$0xff] }
 0xd19   :  { %4031 = vmatpush1.msra.mxu1 %v9549_v0  ;;  %v11886_v0 = vld [vmem:[#allocation80_spill] sm:$0xff] }
 0xd1a   :  { %4032 = vmatprep.subr.mxu1 %v9552_v21  ;;  %v11887_v21 = vld [vmem:[#allocation82_spill] sm:$0xff] }
 0xd1b   :  { %4033 = vmatpush1.msra.mxu1 %v11876_v63  ;;  %v11891_v63 = vld [vmem:[#allocation100_spill] sm:$0xff] }
 0xd1c   :  { %4034 = vmatprep.subr.mxu1 %v11877_v23  ;;  %v11892_v23 = vld [vmem:[#allocation98_spill] sm:$0xff] }
 0xd1d   :  { %4035 = vmatpush1.msra.mxu1 %v11878_v37  ;;  %v11893_v37 = vld [vmem:[#allocation99_spill] sm:$0xff] }
 0xd1e   :  { %4036 = vmatprep.subr.mxu1 %v11879_v49  ;;  %v11894_v49 = vld [vmem:[#allocation101_spill] sm:$0xff] }
 0xd1f   :  { %4037 = vmatpush1.msra.mxu1 %v11880_v18  ;;  %v11895_v18 = vld [vmem:[#allocation87_spill] sm:$0xff] }
 0xd20   :  { %4071 = vmatmul.mubr.f32.vlgmr.msra.gmra.mxu1 %v9727_v7  ;;  %4177 = vmatprep.subr.mxu1 %v11881_v50  ;;  %v11890_v7 = vld [vmem:[#allocation86_spill] sm:$0xff]  ;;  %v11896_v50 = vld [vmem:[#allocation89_spill] sm:$0xff] }
 0xd21   :  { %4178 = vmatpush1.msra.mxu1 %v11882_v55  ;;  %4241 = vmatprep.mubr.f32.mxu1 %v11109_v2  ;;  %v11897_v55 = vld [vmem:[#allocation118_spill] sm:$0xff] }
 0xd22   :  { %4179 = vmatprep.subr.mxu1 %v11883_v12  ;;  %v11898_v12 = vld [vmem:[#allocation119_spill] sm:$0xff] }
 0xd23   :  { %4180 = vmatpush1.msra.mxu1 %v11884_v9  ;;  %v11899_v9 = vld [vmem:[#allocation120_spill] sm:$0xff] }
 0xd24   :  { %4181 = vmatprep.subr.mxu1 %v11885_v59  ;;  %v11900_v59 = vld [vmem:[#allocation121_spill] sm:$0xff] }
 0xd25   :  { %4182 = vmatpush1.msra.mxu1 %v11886_v0  ;;  %v11901_v0 = vld [vmem:[#allocation122_spill] sm:$0xff] }
 0xd26   :  { %4183 = vmatprep.subr.mxu1 %v11887_v21  ;;  %v11902_v21 = vld [vmem:[#allocation123_spill] sm:$0xff] }
 0xd27   :  { %4184 = vmatpush1.msra.mxu1 %v11888_v14  ;;  %v11903_v14 = vld [vmem:[#allocation124_spill] sm:$0xff] }
 0xd28   :  { %4185 = vmatprep.subr.mxu1 %v11889_v56  ;;  %v11904_v56 = vld [vmem:[#allocation125_spill] sm:$0xff] }
 0xd29   :  { %4186 = vmatpush1.msra.mxu1 %v11890_v7  ;;  %v11905_v7 = vld [vmem:[#allocation126_spill] sm:$0xff] }
 0xd2a   :  { %4187 = vmatprep.subr.mxu1 %v11891_v63  ;;  %v11906_v63 = vld [vmem:[#allocation127_spill] sm:$0xff] }
 0xd2b   :  { %4188 = vmatpush1.msra.mxu1 %v11892_v23  ;;  %v11907_v23 = vld [vmem:[#allocation128_spill] sm:$0xff] }
 0xd2c   :  { %4189 = vmatprep.subr.mxu1 %v11893_v37  ;;  %v11908_v37 = vld [vmem:[#allocation129_spill] sm:$0xff] }
 0xd2d   :  { %4190 = vmatpush1.msra.mxu1 %v11894_v49  ;;  %v11909_v49 = vld [vmem:[#allocation9_spill] sm:$0xff] }
 0xd2e   :  { %4191 = vmatprep.subr.mxu1 %v11895_v18  ;;  %v11910_v18 = vld [vmem:[#allocation10_spill] sm:$0xff] }
 0xd2f   :  { %4192 = vmatpush1.msra.mxu1 %v11896_v50  ;;  %v11911_v50 = vld [vmem:[#allocation11_spill] sm:$0xff] }
 0xd30   :  { %4193 = vmatprep.subr.mxu1 %v11897_v55  ;;  %v11912_v55 = vld [vmem:[#allocation12_spill] sm:$0xff] }
 0xd31   :  { %4194 = vmatpush1.msra.mxu1 %v11898_v12  ;;  %v11913_v12 = vld [vmem:[#allocation13_spill] sm:$0xff] }
 0xd32   :  { %4195 = vmatprep.subr.mxu1 %v11899_v9  ;;  %v11914_v9 = vld [vmem:[#allocation14_spill] sm:$0xff] }
 0xd33   :  { %4196 = vmatpush1.msra.mxu1 %v11900_v59  ;;  %v10120_v59 = vld [vmem:[#allocation4 + $0x1d8] sm:$0xff] }
 0xd34   :  { %4197 = vmatprep.subr.mxu1 %v11901_v0  ;;  %11915 = vst [vmem:[#allocation28_spill] sm:$0xff] %v10120_v59  ;;  %v10123_v0 = vld [vmem:[#allocation4 + $0x1d0] sm:$0xff] }
 0xd35   :  { %4198 = vmatpush1.msra.mxu1 %v11902_v21  ;;  %11916 = vst [vmem:[#allocation92_spill] sm:$0xff] %v10123_v0  ;;  %v10126_v21 = vld [vmem:[#allocation4 + $0x1b8] sm:$0xff] }
 0xd36   :  { %4199 = vmatprep.subr.mxu1 %v11903_v14  ;;  %11917 = vst [vmem:[#allocation90_spill] sm:$0xff] %v10126_v21  ;;  %v10129_v14 = vld [vmem:[#allocation4 + $0x1b0] sm:$0xff] }
 0xd37   :  { %4200 = vmatpush1.msra.mxu1 %v11904_v56  ;;  %11918 = vst [vmem:[#allocation91_spill] sm:$0xff] %v10129_v14  ;;  %v10135_v56 = vld [vmem:[#allocation4 + $0x190] sm:$0xff] }
 0xd38   :  { %4201 = vmatprep.subr.mxu1 %v11905_v7  ;;  %11920 = vst [vmem:[#allocation30_spill] sm:$0xff] %v10135_v56  ;;  %v10138_v7 = vld [vmem:[#allocation4 + $0x178] sm:$0xff] }
 0xd39   :  { %4202 = vmatpush1.msra.mxu1 %v11906_v63  ;;  %11921 = vst [vmem:[#allocation32_spill] sm:$0xff] %v10138_v7  ;;  %v10141_v63 = vld [vmem:[#allocation4 + $0x170] sm:$0xff] }
 0xd3a   :  { %4203 = vmatprep.subr.mxu1 %v11907_v23  ;;  %11922 = vst [vmem:[#allocation34_spill] sm:$0xff] %v10141_v63  ;;  %v10144_v23 = vld [vmem:[#allocation4 + $0x158] sm:$0xff] }
 0xd3b   :  { %4204 = vmatpush1.msra.mxu1 %v11908_v37  ;;  %11923 = vst [vmem:[#allocation104_spill] sm:$0xff] %v10144_v23  ;;  %v10147_v37 = vld [vmem:[#allocation4 + $0x150] sm:$0xff] }
 0xd3c   :  { %4205 = vmatprep.subr.mxu1 %v11909_v49  ;;  %11924 = vst [vmem:[#allocation102_spill] sm:$0xff] %v10147_v37  ;;  %v10150_v49 = vld [vmem:[#allocation4 + $0x138] sm:$0xff] }
 0xd3d   :  { %4206 = vmatpush1.msra.mxu1 %v11910_v18  ;;  %11925 = vst [vmem:[#allocation103_spill] sm:$0xff] %v10150_v49  ;;  %v10153_v18 = vld [vmem:[#allocation4 + $0x130] sm:$0xff] }
 0xd3e   :  { %4207 = vmatprep.subr.mxu1 %v11911_v50  ;;  %11926 = vst [vmem:[#allocation105_spill] sm:$0xff] %v10153_v18  ;;  %v10156_v50 = vld [vmem:[#allocation4 + $0x118] sm:$0xff] }
 0xd3f   :  { %4208 = vmatpush1.msra.mxu1 %v11912_v55  ;;  %11927 = vst [vmem:[#allocation36_spill] sm:$0xff] %v10156_v50  ;;  %v10159_v55 = vld [vmem:[#allocation4 + $0x110] sm:$0xff] }
 0xd40   :  { %4242 = vmatmul.mubr.f32.vlgmr.msra.gmra.mxu1 %v9951_v27  ;;  %4319 = vmatprep.subr.mxu1 %v11913_v12  ;;  %v10132_v27 = vld [vmem:[#allocation4 + $0x198] sm:$0xff]  ;;  %11928 = vst [vmem:[#allocation38_spill] sm:$0xff] %v10159_v55 }
 0xd41   :  { %4320 = vmatpush1.msra.mxu1 %v11914_v9  ;;  %4383 = vmatprep.mubr.f32.mxu1 %v11109_v2  ;;  %11919 = vst [vmem:[#allocation93_spill] sm:$0xff] %v10132_v27  ;;  %v10162_v12 = vld [vmem:[#allocation4 + $0xf8] sm:$0xff]  ;;  %v10165_v9 = vld [vmem:[#allocation4 + $0xf0] sm:$0xff] }
 0xd42   :  { %4321 = vmatprep.subr.mxu1 %v10120_v59  ;;  %11929 = vst [vmem:[#allocation40_spill] sm:$0xff] %v10162_v12  ;;  %11930 = vst [vmem:[#allocation42_spill] sm:$0xff] %v10165_v9 }
 0xd43   :  { %4322 = vmatpush1.msra.mxu1 %v10123_v0 }
 0xd44   :  { %4323 = vmatprep.subr.mxu1 %v10126_v21 }
 0xd45   :  { %4324 = vmatpush1.msra.mxu1 %v10129_v14 }
 0xd46   :  { %4325 = vmatprep.subr.mxu1 %v10132_v27 }
 0xd47   :  { %4326 = vmatpush1.msra.mxu1 %v10135_v56 }
 0xd48   :  { %4327 = vmatprep.subr.mxu1 %v10138_v7 }
 0xd49   :  { %4328 = vmatpush1.msra.mxu1 %v10141_v63 }
 0xd4a   :  { %4329 = vmatprep.subr.mxu1 %v10144_v23  ;;  %v11946_v23 = vld [vmem:[#allocation16_spill] sm:$0xff] }
 0xd4b   :  { %4330 = vmatpush1.msra.mxu1 %v10147_v37  ;;  %v4001_v37 = vpop.f32.mrf.mxu0 }
 0xd4c   :  { %4331 = vmatprep.subr.mxu1 %v10150_v49  ;;  %v10168_v49 = vld [vmem:[#allocation4 + $0xd8] sm:$0xff] }
 0xd4d   :  { %4332 = vmatpush1.msra.mxu1 %v10153_v18  ;;  %11931 = vst [vmem:[#allocation44_spill] sm:$0xff] %v10168_v49  ;;  %v10171_v18 = vld [vmem:[#allocation4 + $0xd0] sm:$0xff]  ;;  %v4003_v7 = vpop.f32.mrf.mxu0 }
 0xd4e   :  { %4333 = vmatprep.subr.mxu1 %v10156_v50  ;;  %11932 = vst [vmem:[#allocation46_spill] sm:$0xff] %v10171_v18  ;;  %v10174_v50 = vld [vmem:[#allocation4 + $0xb8] sm:$0xff] }
 0xd4f   :  { %4334 = vmatpush1.msra.mxu1 %v10159_v55  ;;  %11933 = vst [vmem:[#allocation48_spill] sm:$0xff] %v10174_v50  ;;  %v10177_v55 = vld [vmem:[#allocation4 + $0xb0] sm:$0xff] }
 0xd50   :  { %4335 = vmatprep.subr.mxu1 %v10162_v12  ;;  %11934 = vst [vmem:[#allocation50_spill] sm:$0xff] %v10177_v55  ;;  %v10180_v12 = vld [vmem:[#allocation4 + $0x98] sm:$0xff] }
 0xd51   :  { %4336 = vmatpush1.msra.mxu1 %v10165_v9  ;;  %11935 = vst [vmem:[#allocation52_spill] sm:$0xff] %v10180_v12  ;;  %v10183_v9 = vld [vmem:[#allocation4 + $0x90] sm:$0xff] }
 0xd52   :  { %4337 = vmatprep.subr.mxu1 %v10168_v49  ;;  %11936 = vst [vmem:[#allocation54_spill] sm:$0xff] %v10183_v9  ;;  %v10186_v49 = vld [vmem:[#allocation4 + $0x78] sm:$0xff] }
 0xd53   :  { %4338 = vmatpush1.msra.mxu1 %v10171_v18  ;;  %11937 = vst [vmem:[#allocation56_spill] sm:$0xff] %v10186_v49  ;;  %v10189_v18 = vld [vmem:[#allocation4 + $0x70] sm:$0xff] }
 0xd54   :  { %4339 = vmatprep.subr.mxu1 %v10174_v50  ;;  %11938 = vst [vmem:[#allocation58_spill] sm:$0xff] %v10189_v18  ;;  %v10192_v50 = vld [vmem:[#allocation4 + $0x58] sm:$0xff] }
 0xd55   :  { %4340 = vmatpush1.msra.mxu1 %v10177_v55  ;;  %11939 = vst [vmem:[#allocation60_spill] sm:$0xff] %v10192_v50  ;;  %v10195_v55 = vld [vmem:[#allocation4 + $0x50] sm:$0xff] }
 0xd56   :  { %4341 = vmatprep.subr.mxu1 %v10180_v12  ;;  %11940 = vst [vmem:[#allocation62_spill] sm:$0xff] %v10195_v55  ;;  %v10198_v12 = vld [vmem:[#allocation4 + $0x38] sm:$0xff] }
 0xd57   :  { %4342 = vmatpush1.msra.mxu1 %v10183_v9  ;;  %11941 = vst [vmem:[#allocation64_spill] sm:$0xff] %v10198_v12  ;;  %v10201_v9 = vld [vmem:[#allocation4 + $0x30] sm:$0xff] }
 0xd58   :  { %4343 = vmatprep.subr.mxu1 %v10186_v49  ;;  %11942 = vst [vmem:[#allocation66_spill] sm:$0xff] %v10201_v9  ;;  %v10204_v49 = vld [vmem:[#allocation4 + $0x18] sm:$0xff] }
 0xd59   :  { %4344 = vmatpush1.msra.mxu1 %v10189_v18  ;;  %11943 = vst [vmem:[#allocation68_spill] sm:$0xff] %v10204_v49  ;;  %v10207_v18 = vld [vmem:[#allocation4 + $0x10] sm:$0xff] }
 0xd5a   :  { %4345 = vmatprep.subr.mxu1 %v10192_v50  ;;  %11944 = vst [vmem:[#allocation70_spill] sm:$0xff] %v10207_v18  ;;  %v11945_v50 = vld [vmem:[#allocation15_spill] sm:$0xff] }
 0xd5b   :  { %4346 = vmatpush1.msra.mxu1 %v10195_v55 }
 0xd5c   :  { %4347 = vmatprep.subr.mxu1 %v10198_v12 }
 0xd5d   :  { %4348 = vmatpush1.msra.mxu1 %v10201_v9  ;;  %v11947_v9 = vld [vmem:[#allocation108_spill] sm:$0xff] }
 0xd5e   :  { %4349 = vmatprep.subr.mxu1 %v10204_v49  ;;  %v4078_v56 = vadd.f32 %v4003_v7, %v11947_v9  ;;  %v11948_v49 = vld [vmem:[#allocation106_spill] sm:$0xff] }
 0xd5f   :  { %4350 = vmatpush1.msra.mxu1 %v10207_v18  ;;  %v4077_v27 = vadd.f32 %v4001_v37, %v11948_v49 }
 0xd60   :  { %4491 = vmatprep.subr.mxu1 %v11945_v50  ;;  %v5112_v14 = vmul.f32 -1.442695, %v4078_v56 }
 0xd61   :  { %v5111_v21 = vmul.f32 -1.442695, %v4077_v27 }
 0xd62   :  { %5764 = vpow2.f32 %v5112_v14 }
 0xd63   :  { %5766 = vpow2.f32 %v5111_v21 }
 0xd6f   :  { %v5765_v50 = vpop.eup %5764 }
 0xd70   :  { %v5767_v18 = vpop.eup %5766  ;;  %v4090_v0 = vadd.f32 1.0, %v5765_v50 }
 0xd71   :  { %v4084_v59 = vadd.f32 1.0, %v5767_v18 }
 0xd72   :  { %5768 = vrcp.f32 %v4090_v0 }
 0xd73   :  { %5770 = vrcp.f32 %v4084_v59 }
 0xd7f   :  { %v5769_v37 = vpop.eup %5768 }
 0xd80   :  { %v5771_v56 = vpop.eup %5770  ;;  %v4100_v21 = vmul.f32 %v5769_v37, %v9724_v19  ;;  %v6447_v19 = vld [vmem:[#allocation2 + $0x1c8] sm:$0xff] }
 0xd81   :  { %v6453_v37 = vld [vmem:[#allocation2 + $0x188] sm:$0xff] }
 0xdc0   :  { %v3929_v55 = vpop.f32.mrf.mxu1 }
 0xdc1   :  { %v3930_v63 = vadd.f32 %v11946_v23, %v3929_v55  ;;  %v11949_v55 = vld [vmem:[#allocation107_spill] sm:$0xff] }
 0xdc2   :  { %v5470_v12 = vpop.f32.mrf.mxu1 }
 0xdc3   :  { %5110 = vst.msk [vmem:[%s10546_s9 + $0x28] sm:$0xff] %vm1153_vm2, %v3930_v63  ;;  %v11950_v63 = vld [vmem:[#allocation109_spill] sm:$0xff] }
 0xde0   :  { %v4072_v23 = vpop.f32.mrf.mxu1 }
 0xde1   :  { %v4079_v12 = vadd.f32 %v4072_v23, %v11949_v55  ;;  %v10231_v23 = vld [vmem:[%s10544_s7 + $0x78] sm:$0xff]  ;;  %v6449_v55 = vld [vmem:[#allocation2 + $0x1c0] sm:$0xff] }
 0xde2   :  { %v4074_v58 = vpop.f32.mrf.mxu1 }
 0xde3   :  { %5772 = vtanh.f32 %v4079_v12  ;;  %v4080_v15 = vadd.f32 %v4074_v58, %v11950_v63  ;;  %v6446_v58 = vld [vmem:[#allocation2 + $0x1e0] sm:$0xff]  ;;  %v6450_v12 = vld [vmem:[#allocation2 + $0x1a8] sm:$0xff]  ;;  %v10238_v63 = vld [vmem:[%s10544_s7 + $0x70] sm:$0xff] }
 0xde5   :  { %v5113_v7 = vmul.f32 -1.442695, %v4080_v15 }
 0xde7   :  { %5774 = vpow2.f32 %v5113_v7  ;;  %v6452_v7 = vld [vmem:[#allocation2 + $0x1a0] sm:$0xff] }
 0xdf0   :  { %v5773_v27 = vpop.eup %5772 }
 0xdf1   :  { %v4101_v14 = vmul.f32 %v5773_v27, %v5771_v56  ;;  %v10245_v56 = vld [vmem:[%s10544_s7 + $0x68] sm:$0xff]  ;;  %v6455_v27 = vld [vmem:[#allocation2 + $0x180] sm:$0xff] }
 0xdf3   :  { %v10221_v49 = vadd.f32 %v4101_v14, %v4100_v21  ;;  %v6456_v21 = vld [vmem:[#allocation2 + $0x168] sm:$0xff]  ;;  %v10252_v14 = vld [vmem:[%s10544_s7 + $0x60] sm:$0xff] }
 0xdf4   :  { %v5775_v18 = vpop.eup %5774 }
 0xdf5   :  { %v4097_v9 = vadd.f32 1.0, %v5775_v18  ;;  %5776 = vtanh.f32 %v10221_v49  ;;  %v10261_v18 = vld [vmem:[%s10544_s7 + $0x58] sm:$0xff] }
 0xdf7   :  { %5778 = vrcp.f32 %v4097_v9  ;;  %v11959_v9 = vld [vmem:[#allocation21_spill] sm:$0xff] }
 0xe02   :  { %v5777_v59 = vpop.eup %5776 }
 0xe04   :  { %v5779_v0 = vpop.eup %5778 }
 0xe05   :  { %v10224_v50 = vmul.f32 %v5779_v0, %v5777_v59  ;;  %v11960_v59 = vld [vmem:[#allocation22_spill] sm:$0xff]  ;;  %v10324_v0 = vld [vmem:[%s10544_s7 + $0x20] sm:$0xff] }
 0xe06   :  { %11961 = vst [vmem:[#allocation80_spill] sm:$0xff] %v10324_v0 }
 0xe07   :  { %5780 = vtanh.f32 %v10224_v50 }
 0xe14   :  { %v5781_v15 = vpop.eup %5780 }
 0xe15   :  { %4313 = vmatmul.mubr.f32.vlgmr.msra.gmra.mxu0 %v5781_v15  ;;  %4384 = vmatmul.mubr.f32.vlgmr.msra.gmra.mxu1 %v5781_v15  ;;  %v11962_v15 = vld [vmem:[#allocation23_spill] sm:$0xff] }
 0xe16   :  { %4492 = vmatpush1.msra.mxu1 %v6446_v58  ;;  %4555 = vmatprep.mubr.f32.mxu1 %v11109_v2  ;;  %v11963_v58 = vld [vmem:[#allocation24_spill] sm:$0xff] }
 0xe17   :  { %4493 = vmatprep.subr.mxu1 %v6447_v19  ;;  %5472 = vmatpush3.msra.mxu0 %v10231_v23  ;;  %v10333_v19 = vld [vmem:[%s10544_s7 + $0x18] sm:$0xff] }
 0xe18   :  { %4494 = vmatpush1.msra.mxu1 %v6449_v55  ;;  %5473 = vmatprep.subr.mxu0 %v11109_v2  ;;  %11964 = vst [vmem:[#allocation82_spill] sm:$0xff] %v10333_v19  ;;  %v11965_v55 = vld [vmem:[#allocation25_spill] sm:$0xff] }
 0xe19   :  { %4495 = vmatprep.subr.mxu1 %v6450_v12  ;;  %5474 = vmatpush3.msra.mxu0 %v10238_v63  ;;  %v11966_v12 = vld [vmem:[#allocation27_spill] sm:$0xff] }
 0xe1a   :  { %4496 = vmatpush1.msra.mxu1 %v6452_v7  ;;  %5475 = vmatprep.subr.mxu0 %v11109_v2  ;;  %v10342_v7 = vld [vmem:[%s10544_s7 + $0x10] sm:$0xff] }
 0xe1b   :  { %4497 = vmatprep.subr.mxu1 %v6453_v37  ;;  %5476 = vmatpush3.msra.mxu0 %v10245_v56  ;;  %11967 = vst [vmem:[#allocation84_spill] sm:$0xff] %v10342_v7  ;;  %v11968_v37 = vld [vmem:[#allocation29_spill] sm:$0xff] }
 0xe1c   :  { %4498 = vmatpush1.msra.mxu1 %v6455_v27  ;;  %5477 = vmatprep.subr.mxu0 %v11109_v2  ;;  %v11969_v27 = vld [vmem:[#allocation31_spill] sm:$0xff] }
 0xe1d   :  { %4499 = vmatprep.subr.mxu1 %v6456_v21  ;;  %5478 = vmatpush3.msra.mxu0 %v10252_v14  ;;  %v10351_v21 = vld [vmem:[%s10544_s7 + $0x8] sm:$0xff] }
 0xe1e   :  { %4500 = vmatpush1.msra.mxu1 %v9746_v46  ;;  %5479 = vmatprep.subr.mxu0 %v11109_v2  ;;  %v10270_v46 = vld [vmem:[%s10544_s7 + $0x50] sm:$0xff]  ;;  %11970 = vst [vmem:[#allocation88_spill] sm:$0xff] %v10351_v21 }
 0xe1f   :  { %4501 = vmatprep.subr.mxu1 %v9750_v34  ;;  %5480 = vmatpush3.msra.mxu0 %v10261_v18  ;;  %v10279_v34 = vld [vmem:[%s10544_s7 + $0x48] sm:$0xff] }
 0xe20   :  { %4502 = vmatpush1.msra.mxu1 %v9754_v11  ;;  %5481 = vmatprep.subr.mxu0 %v11109_v2  ;;  %v10288_v11 = vld [vmem:[%s10544_s7 + $0x40] sm:$0xff] }
 0xe21   :  { %4503 = vmatprep.subr.mxu1 %v9758_v57  ;;  %5482 = vmatpush3.msra.mxu0 %v10270_v46  ;;  %11951 = vst [vmem:[#allocation72_spill] sm:$0xff] %v10288_v11  ;;  %v10297_v57 = vld [vmem:[%s10544_s7 + $0x38] sm:$0xff] }
 0xe22   :  { %4504 = vmatpush1.msra.mxu1 %v9762_v20  ;;  %5483 = vmatprep.subr.mxu0 %v11109_v2  ;;  %11952 = vst [vmem:[#allocation74_spill] sm:$0xff] %v10297_v57  ;;  %v11953_v20 = vld [vmem:[#allocation17_spill] sm:$0xff] }
 0xe23   :  { %4505 = vmatprep.subr.mxu1 %v9766_v42  ;;  %5484 = vmatpush3.msra.mxu0 %v10279_v34  ;;  %v11954_v42 = vld [vmem:[#allocation18_spill] sm:$0xff] }
 0xe24   :  { %4506 = vmatpush1.msra.mxu1 %v9770_v52  ;;  %5485 = vmatprep.subr.mxu0 %v11109_v2  ;;  %v10306_v52 = vld [vmem:[%s10544_s7 + $0x30] sm:$0xff] }
 0xe25   :  { %4507 = vmatprep.subr.mxu1 %v9774_v43  ;;  %5486 = vmatpush3.msra.mxu0 %v10288_v11  ;;  %11955 = vst [vmem:[#allocation76_spill] sm:$0xff] %v10306_v52  ;;  %v11956_v43 = vld [vmem:[#allocation19_spill] sm:$0xff] }
 0xe26   :  { %4508 = vmatpush1.msra.mxu1 %v9778_v35  ;;  %5487 = vmatprep.subr.mxu0 %v11109_v2  ;;  %v11957_v35 = vld [vmem:[#allocation20_spill] sm:$0xff] }
 0xe27   :  { %4509 = vmatprep.subr.mxu1 %v9782_v30  ;;  %5488 = vmatpush3.msra.mxu0 %v10297_v57  ;;  %v10315_v30 = vld [vmem:[%s10544_s7 + $0x28] sm:$0xff] }
 0xe28   :  { %4510 = vmatpush1.msra.mxu1 %v11953_v20  ;;  %5489 = vmatprep.subr.mxu0 %v11109_v2  ;;  %11958 = vst [vmem:[#allocation78_spill] sm:$0xff] %v10315_v30  ;;  %v11971_v20 = vld [vmem:[#allocation33_spill] sm:$0xff] }
 0xe29   :  { %4511 = vmatprep.subr.mxu1 %v11954_v42  ;;  %5490 = vmatpush3.msra.mxu0 %v10306_v52  ;;  %v11972_v42 = vld [vmem:[#allocation35_spill] sm:$0xff] }
 0xe2a   :  { %4512 = vmatpush1.msra.mxu1 %v11956_v43  ;;  %5491 = vmatprep.subr.mxu0 %v11109_v2  ;;  %v11973_v43 = vld [vmem:[#allocation37_spill] sm:$0xff] }
 0xe2b   :  { %4513 = vmatprep.subr.mxu1 %v11957_v35  ;;  %5492 = vmatpush3.msra.mxu0 %v10315_v30  ;;  %v11974_v35 = vld [vmem:[#allocation39_spill] sm:$0xff] }
 0xe2c   :  { %4514 = vmatpush1.msra.mxu1 %v11959_v9  ;;  %5493 = vmatprep.subr.mxu0 %v11109_v2  ;;  %v10364_v9 = vld [vmem:[%s10544_s7] sm:$0xff] }
 0xe2d   :  { %4515 = vmatprep.subr.mxu1 %v11960_v59  ;;  %5494 = vmatpush3.msra.mxu0 %v10324_v0  ;;  %11975 = vst [vmem:[#allocation86_spill] sm:$0xff] %v10364_v9  ;;  %v11976_v59 = vld [vmem:[#allocation41_spill] sm:$0xff] }
 0xe2e   :  { %4516 = vmatpush1.msra.mxu1 %v11962_v15  ;;  %5495 = vmatprep.subr.mxu0 %v11109_v2  ;;  %v11977_v15 = vld [vmem:[#allocation43_spill] sm:$0xff] }
 0xe2f   :  { %4517 = vmatprep.subr.mxu1 %v11963_v58  ;;  %5496 = vmatpush3.msra.mxu0 %v10333_v19  ;;  %v6470_v58 = vld [vmem:[#allocation2 + $0x1f8] sm:$0xff] }
 0xe30   :  { %4518 = vmatpush1.msra.mxu1 %v11965_v55  ;;  %5497 = vmatprep.subr.mxu0 %v11109_v2  ;;  %v11978_v55 = vld [vmem:[#allocation45_spill] sm:$0xff] }
 0xe31   :  { %4519 = vmatprep.subr.mxu1 %v11966_v12  ;;  %5498 = vmatpush3.msra.mxu0 %v10342_v7  ;;  %v11979_v12 = vld [vmem:[#allocation47_spill] sm:$0xff] }
 0xe32   :  { %4520 = vmatpush1.msra.mxu1 %v11968_v37  ;;  %5499 = vmatprep.subr.mxu0 %v11109_v2  ;;  %v11980_v37 = vld [vmem:[#allocation49_spill] sm:$0xff] }
 0xe33   :  { %4521 = vmatprep.subr.mxu1 %v11969_v27  ;;  %5500 = vmatpush3.msra.mxu0 %v10351_v21  ;;  %v11981_v27 = vld [vmem:[#allocation51_spill] sm:$0xff] }
 0xe34   :  { %4522 = vmatpush1.msra.mxu1 %v11971_v20  ;;  %5501 = vmatprep.subr.mxu0 %v11109_v2  ;;  %v11982_v20 = vld [vmem:[#allocation53_spill] sm:$0xff] }
 0xe35   :  { %4556 = vmatmul.mubr.f32.vlgmr.msra.gmra.mxu1 %v10224_v50  ;;  %4662 = vmatprep.subr.mxu1 %v11972_v42  ;;  %v11983_v42 = vld [vmem:[#allocation55_spill] sm:$0xff] }
 0xe36   :  { %4663 = vmatpush1.msra.mxu1 %v11973_v43  ;;  %4726 = vmatprep.mubr.f32.mxu1 %v11109_v2  ;;  %v11984_v43 = vld [vmem:[#allocation57_spill] sm:$0xff] }
 0xe37   :  { %4664 = vmatprep.subr.mxu1 %v11974_v35  ;;  %5502 = vmatpush3.msra.mxu0 %v10364_v9  ;;  %v11985_v35 = vld [vmem:[#allocation59_spill] sm:$0xff] }
 0xe38   :  { %4665 = vmatpush1.msra.mxu1 %v11976_v59  ;;  %5503 = vmatprep.mubr.msk.f32.mxu0 %vm6607_vm1, %v11109_v2  ;;  %v11986_v59 = vld [vmem:[#allocation96_spill] sm:$0xff] }
 0xe39   :  { %4666 = vmatprep.subr.mxu1 %v11977_v15  ;;  %4562 = vmatprep.subr.mxu0 %v6470_v58  ;;  %v11987_v15 = vld [vmem:[#allocation94_spill] sm:$0xff]  ;;  %v11988_v58 = vld [vmem:[#allocation95_spill] sm:$0xff] }
 0xe3a   :  { %4667 = vmatpush1.msra.mxu1 %v11978_v55  ;;  %v11989_v55 = vld [vmem:[#allocation97_spill] sm:$0xff] }
 0xe3b   :  { %4668 = vmatprep.subr.mxu1 %v11979_v12  ;;  %v11990_v12 = vld [vmem:[#allocation61_spill] sm:$0xff] }
 0xe3c   :  { %4669 = vmatpush1.msra.mxu1 %v11980_v37  ;;  %v11991_v37 = vld [vmem:[#allocation63_spill] sm:$0xff] }
 0xe3d   :  { %4670 = vmatprep.subr.mxu1 %v11981_v27  ;;  %v11992_v27 = vld [vmem:[#allocation65_spill] sm:$0xff] }
 0xe3e   :  { %4671 = vmatpush1.msra.mxu1 %v11982_v20  ;;  %v11993_v20 = vld [vmem:[#allocation67_spill] sm:$0xff] }
 0xe3f   :  { %4672 = vmatprep.subr.mxu1 %v11983_v42  ;;  %v11994_v42 = vld [vmem:[#allocation69_spill] sm:$0xff] }
 0xe40   :  { %4673 = vmatpush1.msra.mxu1 %v11984_v43  ;;  %v11995_v43 = vld [vmem:[#allocation71_spill] sm:$0xff] }
 0xe41   :  { %4674 = vmatprep.subr.mxu1 %v11985_v35  ;;  %v11996_v35 = vld [vmem:[#allocation73_spill] sm:$0xff] }
 0xe42   :  { %4675 = vmatpush1.msra.mxu1 %v11986_v59  ;;  %v11997_v59 = vld [vmem:[#allocation75_spill] sm:$0xff] }
 0xe43   :  { %4676 = vmatprep.subr.mxu1 %v11987_v15  ;;  %v11998_v15 = vld [vmem:[#allocation77_spill] sm:$0xff] }
 0xe44   :  { %4677 = vmatpush1.msra.mxu1 %v11988_v58  ;;  %v11999_v58 = vld [vmem:[#allocation79_spill] sm:$0xff] }
 0xe45   :  { %4678 = vmatprep.subr.mxu1 %v11989_v55  ;;  %v12000_v55 = vld [vmem:[#allocation81_spill] sm:$0xff] }
 0xe46   :  { %4679 = vmatpush1.msra.mxu1 %v11990_v12  ;;  %v12001_v12 = vld [vmem:[#allocation83_spill] sm:$0xff] }
 0xe47   :  { %4680 = vmatprep.subr.mxu1 %v11991_v37  ;;  %v12002_v37 = vld [vmem:[#allocation85_spill] sm:$0xff] }
 0xe48   :  { %4681 = vmatpush1.msra.mxu1 %v11992_v27  ;;  %v12003_v27 = vld [vmem:[#allocation114_spill] sm:$0xff] }
 0xe49   :  { %4682 = vmatprep.subr.mxu1 %v11993_v20  ;;  %v12004_v20 = vld [vmem:[#allocation115_spill] sm:$0xff] }
 0xe4a   :  { %4683 = vmatpush1.msra.mxu1 %v11994_v42  ;;  %v12005_v42 = vld [vmem:[#allocation116_spill] sm:$0xff] }
 0xe4b   :  { %4684 = vmatprep.subr.mxu1 %v11995_v43  ;;  %v4172_v43 = vpop.f32.mrf.mxu0 }
 0xe4c   :  { %4685 = vmatpush1.msra.mxu1 %v11996_v35  ;;  %v4243_v35 = vpop.f32.mrf.mxu1 }
 0xe4d   :  { %4686 = vmatprep.subr.mxu1 %v11997_v59  ;;  %v4174_v9 = vpop.f32.mrf.mxu0 }
 0xe4e   :  { %4687 = vmatpush1.msra.mxu1 %v11998_v15  ;;  %v4245_v21 = vpop.f32.mrf.mxu1 }
 0xe4f   :  { %4688 = vmatprep.subr.mxu1 %v11999_v58 }
 0xe50   :  { %4689 = vmatpush1.msra.mxu1 %v12000_v55 }
 0xe51   :  { %4690 = vmatprep.subr.mxu1 %v12001_v12 }
 0xe52   :  { %4691 = vmatpush1.msra.mxu1 %v12002_v37 }
 0xe53   :  { %4692 = vmatprep.subr.mxu1 %v12003_v27 }
 0xe54   :  { %4693 = vmatpush1.msra.mxu1 %v12004_v20 }
 0xe55   :  { %4804 = vmatprep.subr.mxu1 %v12005_v42 }
 0xed5   :  { %v4314_v59 = vpop.f32.mrf.mxu0  ;;  %v4385_v55 = vpop.f32.mrf.mxu1 }
 0xed6   :  { %v4315_v15 = vadd.f32 %v4314_v59, %v4172_v43  ;;  %v4386_v30 = vadd.f32 %v4385_v55, %v4243_v35  ;;  %v6499_v55 = vld [vmem:[#allocation2 + $0x30] sm:$0xff] }
 0xed7   :  { %v4316_v7 = vpop.f32.mrf.mxu0  ;;  %v4387_v0 = vpop.f32.mrf.mxu1 }
 0xed8   :  { %v4390_v58 = vadd.f32 %v4315_v15, %v7428_v4  ;;  %v4317_v19 = vadd.f32 %v4316_v7, %v4174_v9  ;;  %v4388_v20 = vadd.f32 %v4387_v0, %v4245_v21  ;;  %v4392_v43 = vadd.f32 %v4386_v30, %v7443_v41 }
 0xeda   :  { %v5114_v12 = vmul.f32 -1.442695, %v4390_v58  ;;  %v4391_v37 = vadd.f32 %v4317_v19, %v7432_v33  ;;  %v4393_v42 = vadd.f32 %v4388_v20, %v7438_v32  ;;  %v6502_v20 = vld [vmem:[#allocation6 + $0x1f8] sm:$0xff] }
 0xedc   :  { %5782 = vpow2.f32 %v5114_v12  ;;  %v5115_v27 = vmul.f32 -1.442695, %v4391_v37  ;;  %v5116_v52 = vmul.f32 -1.442695, %v4393_v42  ;;  %v6500_v37 = vld [vmem:[#allocation2 + $0x18] sm:$0xff]  ;;  %v6503_v42 = vld [vmem:[#allocation6 + $0x1f0] sm:$0xff] }
 0xede   :  { %5784 = vpow2.f32 %v5115_v27  ;;  %v6501_v27 = vld [vmem:[#allocation2 + $0x10] sm:$0xff] }
 0xedf   :  { %5786 = vpow2.f32 %v5116_v52 }
 0xee9   :  { %v5783_v57 = vpop.eup %5782 }
 0xeea   :  { %v4397_v59 = vadd.f32 1.0, %v5783_v57 }
 0xeeb   :  { %v5785_v11 = vpop.eup %5784 }
 0xeec   :  { %5788 = vrcp.f32 %v4397_v59  ;;  %v4403_v7 = vadd.f32 1.0, %v5785_v11  ;;  %v5787_v19 = vpop.eup %5786  ;;  %v6498_v11 = vld [vmem:[#allocation2 + $0x38] sm:$0xff]  ;;  %v6505_v59 = vld [vmem:[#allocation6 + $0x1d0] sm:$0xff] }
 0xeed   :  { %5790 = vtanh.f32 %v4392_v43  ;;  %v4410_v12 = vadd.f32 1.0, %v5787_v19  ;;  %v6504_v43 = vld [vmem:[#allocation6 + $0x1d8] sm:$0xff]  ;;  %v6507_v19 = vld [vmem:[#allocation6 + $0x1b0] sm:$0xff] }
 0xeee   :  { %5792 = vrcp.f32 %v4403_v7  ;;  %v6506_v7 = vld [vmem:[#allocation6 + $0x1b8] sm:$0xff] }
 0xeef   :  { %5794 = vrcp.f32 %v4410_v12  ;;  %v6512_v12 = vld [vmem:[#allocation6 + $0x158] sm:$0xff] }
 0xef9   :  { %v5789_v9 = vpop.eup %5788 }
 0xefa   :  { %v5791_v15 = vpop.eup %5790 }
 0xefb   :  { %v5793_v58 = vpop.eup %5792  ;;  %v4414_v0 = vmul.f32 %v5791_v15, %v5789_v9  ;;  %v6508_v9 = vld [vmem:[#allocation6 + $0x198] sm:$0xff]  ;;  %v6509_v15 = vld [vmem:[#allocation6 + $0x190] sm:$0xff] }
 0xefc   :  { %v4413_v21 = vmul.f32 %v5793_v58, %v9948_v48  ;;  %v5795_v57 = vpop.eup %5794  ;;  %v6510_v58 = vld [vmem:[#allocation6 + $0x178] sm:$0xff] }
 0xefe   :  { %v10404_v35 = vadd.f32 %v4414_v0, %v4413_v21  ;;  %v6513_v0 = vld [vmem:[#allocation6 + $0x150] sm:$0xff]  ;;  %v6514_v21 = vld [vmem:[#allocation6 + $0x138] sm:$0xff] }
 0xf00   :  { %5796 = vtanh.f32 %v10404_v35 }
 0xf0d   :  { %v5797_v30 = vpop.eup %5796 }
 0xf0e   :  { %v10407_v52 = vmul.f32 %v5797_v30, %v5795_v57  ;;  %v6515_v57 = vld [vmem:[#allocation6 + $0x130] sm:$0xff]  ;;  %v6516_v30 = vld [vmem:[#allocation6 + $0x118] sm:$0xff] }
 0xf10   :  { %5798 = vtanh.f32 %v10407_v52  ;;  %4727 = vmatmul.mubr.f32.vlgmr.msra.gmra.mxu1 %v10407_v52 }
 0xf11   :  { %4805 = vmatpush1.msra.mxu1 %v9955_v61  ;;  %4868 = vmatprep.mubr.f32.mxu1 %v11109_v2  ;;  %v6471_v61 = vld [vmem:[#allocation2 + $0x1f0] sm:$0xff] }
 0xf12   :  { %4806 = vmatprep.subr.mxu1 %v9959_v29  ;;  %v6472_v29 = vld [vmem:[#allocation2 + $0x1d8] sm:$0xff] }
 0xf13   :  { %4807 = vmatpush1.msra.mxu1 %v9962_v13  ;;  %v6473_v13 = vld [vmem:[#allocation2 + $0x1d0] sm:$0xff] }
 0xf14   :  { %4808 = vmatprep.subr.mxu1 %v9965_v17  ;;  %v6474_v17 = vld [vmem:[#allocation2 + $0x1b8] sm:$0xff] }
 0xf15   :  { %4809 = vmatpush1.msra.mxu1 %v9968_v51  ;;  %v6475_v51 = vld [vmem:[#allocation2 + $0x1b0] sm:$0xff] }
 0xf16   :  { %4810 = vmatprep.subr.mxu1 %v9971_v25  ;;  %v6476_v25 = vld [vmem:[#allocation2 + $0x198] sm:$0xff] }
 0xf17   :  { %4811 = vmatpush1.msra.mxu1 %v9974_v40  ;;  %v6477_v40 = vld [vmem:[#allocation2 + $0x190] sm:$0xff] }
 0xf18   :  { %4812 = vmatprep.subr.mxu1 %v9977_v5  ;;  %v6478_v5 = vld [vmem:[#allocation2 + $0x178] sm:$0xff] }
 0xf19   :  { %4813 = vmatpush1.msra.mxu1 %v9980_v22  ;;  %v6479_v22 = vld [vmem:[#allocation2 + $0x170] sm:$0xff] }
 0xf1a   :  { %4814 = vmatprep.subr.mxu1 %v9983_v10  ;;  %v6480_v10 = vld [vmem:[#allocation2 + $0x158] sm:$0xff] }
 0xf1b   :  { %4815 = vmatpush1.msra.mxu1 %v9986_v60  ;;  %v6481_v60 = vld [vmem:[#allocation2 + $0x150] sm:$0xff] }
 0xf1c   :  { %4816 = vmatprep.subr.mxu1 %v9989_v62  ;;  %v6482_v62 = vld [vmem:[#allocation2 + $0x138] sm:$0xff] }
 0xf1d   :  { %v5799_v48 = vpop.eup %5798  ;;  %4817 = vmatpush1.msra.mxu1 %v9992_v36  ;;  %v6483_v36 = vld [vmem:[#allocation2 + $0x130] sm:$0xff] }
 0xf1e   :  { %5504 = vmatmul.mubr.f32.vlgmr.msra.gmra.mxu0 %v5799_v48  ;;  %4818 = vmatprep.subr.mxu1 %v9995_v54  ;;  %v6484_v54 = vld [vmem:[#allocation2 + $0x118] sm:$0xff]  ;;  %v6517_v48 = vld [vmem:[#allocation6 + $0x110] sm:$0xff] }
 0xf1f   :  { %4563 = vmatpush1.msra.mxu0 %v6471_v61  ;;  %4626 = vmatprep.mubr.f32.mxu0 %v11109_v2  ;;  %v6518_v61 = vld [vmem:[#allocation6 + $0xf8] sm:$0xff] }
 0xf20   :  { %4564 = vmatprep.subr.mxu0 %v6472_v29  ;;  %4819 = vmatpush1.msra.mxu1 %v10001_v31  ;;  %v6485_v31 = vld [vmem:[#allocation2 + $0x110] sm:$0xff] }
 0xf21   :  { %4565 = vmatpush1.msra.mxu0 %v6473_v13  ;;  %4820 = vmatprep.subr.mxu1 %v10005_v53  ;;  %v6486_v53 = vld [vmem:[#allocation2 + $0xf8] sm:$0xff]  ;;  %v6519_v29 = vld [vmem:[#allocation6 + $0xf0] sm:$0xff] }
 0xf22   :  { %4566 = vmatprep.subr.mxu0 %v6474_v17  ;;  %4821 = vmatpush1.msra.mxu1 %v10009_v45  ;;  %v6487_v45 = vld [vmem:[#allocation2 + $0xf0] sm:$0xff]  ;;  %v6520_v13 = vld [vmem:[#allocation6 + $0xd8] sm:$0xff] }
 0xf23   :  { %4567 = vmatpush1.msra.mxu0 %v6475_v51  ;;  %4822 = vmatprep.subr.mxu1 %v10013_v16  ;;  %v12006_v16 = vld [vmem:[#allocation117_spill] sm:$0xff]  ;;  %v6521_v17 = vld [vmem:[#allocation6 + $0xd0] sm:$0xff]  ;;  %v6522_v51 = vld [vmem:[#allocation6 + $0xb8] sm:$0xff] }
 0xf24   :  { %4568 = vmatprep.subr.mxu0 %v6476_v25  ;;  %4823 = vmatpush1.msra.mxu1 %v10017_v26  ;;  %v6488_v26 = vld [vmem:[#allocation2 + $0xd8] sm:$0xff]  ;;  %v6523_v25 = vld [vmem:[#allocation6 + $0xb0] sm:$0xff] }
 0xf25   :  { %4569 = vmatpush1.msra.mxu0 %v6477_v40  ;;  %4824 = vmatprep.subr.mxu1 %v10021_v39  ;;  %v12007_v39 = vld [vmem:[#allocation26_spill] sm:$0xff]  ;;  %v6524_v40 = vld [vmem:[#allocation6 + $0x98] sm:$0xff] }
 0xf26   :  { %4570 = vmatprep.subr.mxu0 %v6478_v5  ;;  %4825 = vmatpush1.msra.mxu1 %v10025_v3  ;;  %v6489_v3 = vld [vmem:[#allocation2 + $0xd0] sm:$0xff] }
 0xf27   :  { %4571 = vmatpush1.msra.mxu0 %v6479_v22  ;;  %4826 = vmatprep.subr.mxu1 %v10029_v6  ;;  %v6490_v6 = vld [vmem:[#allocation2 + $0xb8] sm:$0xff]  ;;  %v6525_v5 = vld [vmem:[#allocation6 + $0x90] sm:$0xff] }
 0xf28   :  { %4572 = vmatprep.subr.mxu0 %v6480_v10  ;;  %4827 = vmatpush1.msra.mxu1 %v10033_v44  ;;  %v6491_v44 = vld [vmem:[#allocation2 + $0xb0] sm:$0xff]  ;;  %v6526_v22 = vld [vmem:[#allocation6 + $0x78] sm:$0xff] }
 0xf29   :  { %4573 = vmatpush1.msra.mxu0 %v6481_v60  ;;  %4828 = vmatprep.subr.mxu1 %v10037_v1  ;;  %v6492_v1 = vld [vmem:[#allocation2 + $0x98] sm:$0xff]  ;;  %v6527_v10 = vld [vmem:[#allocation6 + $0x70] sm:$0xff] }
 0xf2a   :  { %4574 = vmatprep.subr.mxu0 %v6482_v62  ;;  %4829 = vmatpush1.msra.mxu1 %v10041_v38  ;;  %v6493_v38 = vld [vmem:[#allocation2 + $0x90] sm:$0xff]  ;;  %v6528_v60 = vld [vmem:[#allocation6 + $0x58] sm:$0xff] }
 0xf2b   :  { %4575 = vmatpush1.msra.mxu0 %v6483_v36  ;;  %4830 = vmatprep.subr.mxu1 %v10045_v24  ;;  %v6494_v24 = vld [vmem:[#allocation2 + $0x78] sm:$0xff]  ;;  %v6529_v62 = vld [vmem:[#allocation6 + $0x50] sm:$0xff] }
 0xf2c   :  { %4576 = vmatprep.subr.mxu0 %v6484_v54  ;;  %4831 = vmatpush1.msra.mxu1 %v10049_v47  ;;  %v6495_v47 = vld [vmem:[#allocation2 + $0x70] sm:$0xff]  ;;  %v6530_v36 = vld [vmem:[#allocation6 + $0x38] sm:$0xff] }
 0xf2d   :  { %4577 = vmatpush1.msra.mxu0 %v6485_v31  ;;  %4832 = vmatprep.subr.mxu1 %v10053_v28  ;;  %v6496_v28 = vld [vmem:[#allocation2 + $0x58] sm:$0xff]  ;;  %v6531_v54 = vld [vmem:[#allocation6 + $0x30] sm:$0xff] }
 0xf2e   :  { %4578 = vmatprep.subr.mxu0 %v6486_v53  ;;  %4833 = vmatpush1.msra.mxu1 %v10057_v8  ;;  %v6497_v8 = vld [vmem:[#allocation2 + $0x50] sm:$0xff]  ;;  %v6532_v31 = vld [vmem:[#allocation6 + $0x18] sm:$0xff] }
 0xf2f   :  { %4579 = vmatpush1.msra.mxu0 %v6487_v45  ;;  %4834 = vmatprep.subr.mxu1 %v12006_v16  ;;  %v6533_v53 = vld [vmem:[#allocation6 + $0x10] sm:$0xff]  ;;  %v6534_v45 = vld [vmem:[#allocation4 + $0x1f8] sm:$0xff] }
 0xf30   :  { %4580 = vmatprep.subr.mxu0 %v6488_v26  ;;  %4835 = vmatpush1.msra.mxu1 %v12007_v39  ;;  %v6535_v16 = vld [vmem:[#allocation4 + $0x1f0] sm:$0xff]  ;;  %v12008_v26 = vld [vmem:[#allocation28_spill] sm:$0xff] }
 0xf31   :  { %4581 = vmatpush1.msra.mxu0 %v6489_v3  ;;  %5506 = vmatprep.subr.mxu1 %v11109_v2  ;;  %v12009_v39 = vld [vmem:[#allocation92_spill] sm:$0xff]  ;;  %v12010_v3 = vld [vmem:[#allocation90_spill] sm:$0xff] }
 0xf32   :  { %4582 = vmatprep.subr.mxu0 %v6490_v6  ;;  %v12011_v6 = vld [vmem:[#allocation91_spill] sm:$0xff] }
 0xf33   :  { %4583 = vmatpush1.msra.mxu0 %v6491_v44  ;;  %v12012_v44 = vld [vmem:[#allocation93_spill] sm:$0xff] }
 0xf34   :  { %4584 = vmatprep.subr.mxu0 %v6492_v1  ;;  %v12013_v1 = vld [vmem:[#allocation30_spill] sm:$0xff] }
 0xf35   :  { %4585 = vmatpush1.msra.mxu0 %v6493_v38  ;;  %v12014_v38 = vld [vmem:[#allocation32_spill] sm:$0xff] }
 0xf36   :  { %4586 = vmatprep.subr.mxu0 %v6494_v24  ;;  %v12016_v24 = vld [vmem:[#allocation104_spill] sm:$0xff] }
 0xf37   :  { %4587 = vmatpush1.msra.mxu0 %v6495_v47  ;;  %v12017_v47 = vld [vmem:[#allocation102_spill] sm:$0xff] }
 0xf38   :  { %4588 = vmatprep.subr.mxu0 %v6496_v28  ;;  %v12018_v28 = vld [vmem:[#allocation103_spill] sm:$0xff] }
 0xf39   :  { %4589 = vmatpush1.msra.mxu0 %v6497_v8  ;;  %v12019_v8 = vld [vmem:[#allocation105_spill] sm:$0xff] }
 0xf3a   :  { %4590 = vmatprep.subr.mxu0 %v6498_v11  ;;  %v12020_v11 = vld [vmem:[#allocation36_spill] sm:$0xff] }
 0xf3b   :  { %4591 = vmatpush1.msra.mxu0 %v6499_v55  ;;  %v12021_v55 = vld [vmem:[#allocation38_spill] sm:$0xff] }
 0xf3c   :  { %4592 = vmatprep.subr.mxu0 %v6500_v37  ;;  %v12022_v37 = vld [vmem:[#allocation40_spill] sm:$0xff] }
 0xf3d   :  { %4593 = vmatpush1.msra.mxu0 %v6501_v27  ;;  %v12023_v27 = vld [vmem:[#allocation42_spill] sm:$0xff] }
 0xf3e   :  { %4627 = vmatmul.mubr.f32.vlgmr.msra.gmra.mxu0 %v10224_v50  ;;  %4733 = vmatprep.subr.mxu0 %v6502_v20  ;;  %v6511_v50 = vld [vmem:[#allocation6 + $0x170] sm:$0xff]  ;;  %v12024_v20 = vld [vmem:[#allocation44_spill] sm:$0xff] }
 0xf3f   :  { %4734 = vmatpush1.msra.mxu0 %v6503_v42  ;;  %4797 = vmatprep.mubr.f32.mxu0 %v11109_v2  ;;  %v12025_v42 = vld [vmem:[#allocation46_spill] sm:$0xff] }
 0xf40   :  { %4735 = vmatprep.subr.mxu0 %v6504_v43  ;;  %v12026_v43 = vld [vmem:[#allocation48_spill] sm:$0xff] }
 0xf41   :  { %4736 = vmatpush1.msra.mxu0 %v6505_v59  ;;  %v12027_v59 = vld [vmem:[#allocation50_spill] sm:$0xff] }
 0xf42   :  { %4737 = vmatprep.subr.mxu0 %v6506_v7  ;;  %v12028_v7 = vld [vmem:[#allocation52_spill] sm:$0xff] }
 0xf43   :  { %4738 = vmatpush1.msra.mxu0 %v6507_v19  ;;  %v12029_v19 = vld [vmem:[#allocation54_spill] sm:$0xff] }
 0xf44   :  { %4739 = vmatprep.subr.mxu0 %v6508_v9  ;;  %v12030_v9 = vld [vmem:[#allocation56_spill] sm:$0xff] }
 0xf45   :  { %4740 = vmatpush1.msra.mxu0 %v6509_v15  ;;  %v12031_v15 = vld [vmem:[#allocation58_spill] sm:$0xff] }
 0xf46   :  { %4741 = vmatprep.subr.mxu0 %v6510_v58  ;;  %v12032_v58 = vld [vmem:[#allocation60_spill] sm:$0xff] }
 0xf47   :  { %4742 = vmatpush1.msra.mxu0 %v6511_v50  ;;  %v12033_v50 = vld [vmem:[#allocation62_spill] sm:$0xff] }
 0xf48   :  { %4743 = vmatprep.subr.mxu0 %v6512_v12  ;;  %v12034_v12 = vld [vmem:[#allocation64_spill] sm:$0xff] }
 0xf49   :  { %4744 = vmatpush1.msra.mxu0 %v6513_v0  ;;  %v12035_v0 = vld [vmem:[#allocation66_spill] sm:$0xff] }
 0xf4a   :  { %4745 = vmatprep.subr.mxu0 %v6514_v21  ;;  %v12036_v21 = vld [vmem:[#allocation68_spill] sm:$0xff] }
 0xf4b   :  { %4746 = vmatpush1.msra.mxu0 %v6515_v57  ;;  %v12037_v57 = vld [vmem:[#allocation70_spill] sm:$0xff] }
 0xf4c   :  { %4747 = vmatprep.subr.mxu0 %v6516_v30  ;;  %v4557_v30 = vpop.f32.mrf.mxu1 }
 0xf4d   :  { %4748 = vmatpush1.msra.mxu0 %v6517_v48 }
 0xf4e   :  { %4749 = vmatprep.subr.mxu0 %v6518_v61  ;;  %v10482_v61 = vld [vmem:[%s10545_s8] ss:$0 sm:$0xff] }
 0xf4f   :  { %4750 = vmatpush1.msra.mxu0 %v6519_v29 }
 0xf50   :  { %4751 = vmatprep.subr.mxu0 %v6520_v13  ;;  %v4559_v13 = vpop.f32.mrf.mxu1 }
 0xf51   :  { %4752 = vmatpush1.msra.mxu0 %v6521_v17 }
 0xf52   :  { %4753 = vmatprep.subr.mxu0 %v6522_v51  ;;  %v12038_v51 = vld [vmem:[#allocation112_spill] sm:$0xff] }
 0xf53   :  { %4754 = vmatpush1.msra.mxu0 %v6523_v25  ;;  %v4634_v25 = vadd.f32 %v4559_v13, %v12038_v51 }
 0xf54   :  { %4755 = vmatprep.subr.mxu0 %v6524_v40  ;;  %v12039_v40 = vld [vmem:[#allocation110_spill] sm:$0xff] }
 0xf55   :  { %4756 = vmatpush1.msra.mxu0 %v6525_v5  ;;  %v4633_v5 = vadd.f32 %v4557_v30, %v12039_v40 }
 0xf56   :  { %4757 = vmatprep.subr.mxu0 %v6526_v22  ;;  %v5119_v22 = vmul.f32 -1.442695, %v4634_v25 }
 0xf57   :  { %4758 = vmatpush1.msra.mxu0 %v6527_v10  ;;  %v5118_v10 = vmul.f32 -1.442695, %v4633_v5 }
 0xf58   :  { %4759 = vmatprep.subr.mxu0 %v6528_v60  ;;  %5800 = vpow2.f32 %v5119_v22 }
 0xf59   :  { %4760 = vmatpush1.msra.mxu0 %v6529_v62  ;;  %5802 = vpow2.f32 %v5118_v10 }
 0xf5a   :  { %4761 = vmatprep.subr.mxu0 %v6530_v36 }
 0xf5b   :  { %4762 = vmatpush1.msra.mxu0 %v6531_v54 }
 0xf5c   :  { %4763 = vmatprep.subr.mxu0 %v6532_v31 }
 0xf5d   :  { %4764 = vmatpush1.msra.mxu0 %v6533_v53  ;;  %v12040_v53 = vld [vmem:[#allocation111_spill] sm:$0xff] }
 0xf5e   :  { %4798 = vmatmul.mubr.f32.vlgmr.msra.gmra.mxu0 %v10407_v52  ;;  %4875 = vmatprep.subr.mxu0 %v6534_v45  ;;  %v12015_v52 = vld [vmem:[#allocation34_spill] sm:$0xff] }
 0xf5f   :  { %4876 = vmatpush1.msra.mxu0 %v6535_v16  ;;  %4939 = vmatprep.mubr.f32.mxu0 %v11109_v2 }
 0xf60   :  { %4877 = vmatprep.subr.mxu0 %v12008_v26  ;;  %v12041_v26 = vld [vmem:[#allocation113_spill] sm:$0xff] }
 0xf61   :  { %4878 = vmatpush1.msra.mxu0 %v12009_v39 }
 0xf62   :  { %4879 = vmatprep.subr.mxu0 %v12010_v3 }
 0xf63   :  { %4880 = vmatpush1.msra.mxu0 %v12011_v6 }
 0xf64   :  { %4881 = vmatprep.subr.mxu0 %v12012_v44 }
 0xf65   :  { %4882 = vmatpush1.msra.mxu0 %v12013_v1  ;;  %v5801_v60 = vpop.eup %5800 }
 0xf66   :  { %4883 = vmatprep.subr.mxu0 %v12014_v38  ;;  %v5803_v62 = vpop.eup %5802  ;;  %v4646_v36 = vadd.f32 1.0, %v5801_v60 }
 0xf67   :  { %4884 = vmatpush1.msra.mxu0 %v12015_v52  ;;  %v4640_v54 = vadd.f32 1.0, %v5803_v62 }
 0xf68   :  { %4885 = vmatprep.subr.mxu0 %v12016_v24  ;;  %5804 = vrcp.f32 %v4646_v36 }
 0xf69   :  { %4886 = vmatpush1.msra.mxu0 %v12017_v47  ;;  %5806 = vrcp.f32 %v4640_v54 }
 0xf6a   :  { %4887 = vmatprep.subr.mxu0 %v12018_v28 }
 0xf6b   :  { %4888 = vmatpush1.msra.mxu0 %v12019_v8 }
 0xf6c   :  { %4889 = vmatprep.subr.mxu0 %v12020_v11 }
 0xf6d   :  { %4890 = vmatpush1.msra.mxu0 %v12021_v55 }
 0xf6e   :  { %4891 = vmatprep.subr.mxu0 %v12022_v37 }
 0xf6f   :  { %4892 = vmatpush1.msra.mxu0 %v12023_v27  ;;  %v12050_v27 = vld [vmem:[#allocation86_spill] sm:$0xff] }
 0xf70   :  { %4893 = vmatprep.subr.mxu0 %v12024_v20 }
 0xf71   :  { %4894 = vmatpush1.msra.mxu0 %v12025_v42 }
 0xf72   :  { %4895 = vmatprep.subr.mxu0 %v12026_v43 }
 0xf73   :  { %4896 = vmatpush1.msra.mxu0 %v12027_v59 }
 0xf74   :  { %4897 = vmatprep.subr.mxu0 %v12028_v7 }
 0xf75   :  { %4898 = vmatpush1.msra.mxu0 %v12029_v19  ;;  %v5805_v6 = vpop.eup %5804 }
 0xf76   :  { %4899 = vmatprep.subr.mxu0 %v12030_v9  ;;  %v5807_v44 = vpop.eup %5806  ;;  %v4656_v38 = vmul.f32 %v5805_v6, %v10221_v49  ;;  %v12042_v49 = vld [vmem:[#allocation72_spill] sm:$0xff] }
 0xf77   :  { %4900 = vmatpush1.msra.mxu0 %v12031_v15 }
 0xf78   :  { %4901 = vmatprep.subr.mxu0 %v12032_v58 }
 0xf79   :  { %4902 = vmatpush1.msra.mxu0 %v12033_v50 }
 0xf7a   :  { %4903 = vmatprep.subr.mxu0 %v12034_v12 }
 0xf7b   :  { %4904 = vmatpush1.msra.mxu0 %v12035_v0 }
 0xf7c   :  { %4905 = vmatprep.subr.mxu0 %v12036_v21 }
 0xf7d   :  { %4906 = vmatpush1.msra.mxu0 %v12037_v57 }
 0xfd0   :  { %v4728_v20 = vpop.f32.mrf.mxu1 }
 0xfd2   :  { %v4730_v43 = vpop.f32.mrf.mxu1 }
 0xfde   :  { %v4485_v48 = vpop.f32.mrf.mxu0 }
 0xfdf   :  { %v4486_v29 = vadd.f32 %v10482_v61, %v4485_v48 }
 0xfe0   :  { %v5505_v17 = vpop.f32.mrf.mxu0 }
 0xfe1   :  { %5117 = vst.msk [vmem:[%s10546_s9 + $0x30] sm:$0xff] %vm1153_vm2, %v4486_v29 }
 0xffe   :  { %v4628_v31 = vpop.f32.mrf.mxu0 }
 0xfff   :  { %v4635_v45 = vadd.f32 %v4628_v31, %v12040_v53 }
0x1000   :  { %v4630_v16 = vpop.f32.mrf.mxu0 }
0x1001   :  { %5808 = vtanh.f32 %v4635_v45  ;;  %v4636_v39 = vadd.f32 %v4630_v16, %v12041_v26 }
0x1003   :  { %v5120_v3 = vmul.f32 -1.442695, %v4636_v39 }
0x1005   :  { %5810 = vpow2.f32 %v5120_v3 }
0x100e   :  { %v5809_v1 = vpop.eup %5808 }
0x100f   :  { %v4657_v52 = vmul.f32 %v5809_v1, %v5807_v44 }
0x1011   :  { %v4658_v24 = vadd.f32 %v4657_v52, %v4656_v38 }
0x1012   :  { %v5811_v47 = vpop.eup %5810 }
0x1013   :  { %v4653_v28 = vadd.f32 1.0, %v5811_v47  ;;  %5812 = vtanh.f32 %v4658_v24 }
0x1015   :  { %5814 = vrcp.f32 %v4653_v28 }
0x101e   :  { %v4799_v42 = vpop.f32.mrf.mxu0 }
0x1020   :  { %v5813_v8 = vpop.eup %5812  ;;  %v4801_v7 = vpop.f32.mrf.mxu0 }
0x1022   :  { %v5815_v11 = vpop.eup %5814 }
0x1023   :  { %v4660_v55 = vmul.f32 %v5815_v11, %v5813_v8 }
0x1025   :  { %5816 = vtanh.f32 %v4660_v55 }
0x1032   :  { %v5817_v37 = vpop.eup %5816 }
0x1033   :  { %4869 = vmatmul.mubr.f32.vlgmr.msra.gmra.mxu1 %v5817_v37  ;;  %4940 = vmatmul.mubr.f32.vlgmr.msra.gmra.mxu0 %v5817_v37 }
0x1034   :  { %5507 = vmatpush3.msra.mxu1 %v10231_v23  ;;  %5538 = vmatprep.mubr.msk.f32.mxu1 %vm6607_vm1, %v11109_v2  ;;  %v12043_v23 = vld [vmem:[#allocation74_spill] sm:$0xff] }
0x1035   :  { %5508 = vmatprep.subr.mxu1 %v11109_v2 }
0x1036   :  { %5509 = vmatpush3.msra.mxu1 %v10238_v63  ;;  %v12044_v63 = vld [vmem:[#allocation76_spill] sm:$0xff] }
0x1037   :  { %5510 = vmatprep.subr.mxu1 %v11109_v2 }
0x1038   :  { %5511 = vmatpush3.msra.mxu1 %v10245_v56  ;;  %v12045_v56 = vld [vmem:[#allocation78_spill] sm:$0xff] }
0x1039   :  { %5512 = vmatprep.subr.mxu1 %v11109_v2 }
0x103a   :  { %5513 = vmatpush3.msra.mxu1 %v10252_v14  ;;  %v12046_v14 = vld [vmem:[#allocation80_spill] sm:$0xff] }
0x103b   :  { %5514 = vmatprep.subr.mxu1 %v11109_v2 }
0x103c   :  { %5515 = vmatpush3.msra.mxu1 %v10261_v18  ;;  %v12047_v18 = vld [vmem:[#allocation82_spill] sm:$0xff] }
0x103d   :  { %5516 = vmatprep.subr.mxu1 %v11109_v2 }
0x103e   :  { %5517 = vmatpush3.msra.mxu1 %v10270_v46  ;;  %v12048_v46 = vld [vmem:[#allocation84_spill] sm:$0xff] }
0x103f   :  { %5518 = vmatprep.subr.mxu1 %v11109_v2 }
0x1040   :  { %5519 = vmatpush3.msra.mxu1 %v10279_v34  ;;  %v12049_v34 = vld [vmem:[#allocation88_spill] sm:$0xff] }
0x1041   :  { %5520 = vmatprep.subr.mxu1 %v11109_v2 }
0x1042   :  { %5521 = vmatpush3.msra.mxu1 %v12042_v49 }
0x1043   :  { %5522 = vmatprep.subr.mxu1 %v11109_v2 }
0x1044   :  { %5523 = vmatpush3.msra.mxu1 %v12043_v23 }
0x1045   :  { %5524 = vmatprep.subr.mxu1 %v11109_v2 }
0x1046   :  { %5525 = vmatpush3.msra.mxu1 %v12044_v63 }
0x1047   :  { %5526 = vmatprep.subr.mxu1 %v11109_v2 }
0x1048   :  { %5527 = vmatpush3.msra.mxu1 %v12045_v56 }
0x1049   :  { %5528 = vmatprep.subr.mxu1 %v11109_v2 }
0x104a   :  { %5529 = vmatpush3.msra.mxu1 %v12046_v14 }
0x104b   :  { %5530 = vmatprep.subr.mxu1 %v11109_v2 }
0x104c   :  { %5531 = vmatpush3.msra.mxu1 %v12047_v18 }
0x104d   :  { %5532 = vmatprep.subr.mxu1 %v11109_v2 }
0x104e   :  { %5533 = vmatpush3.msra.mxu1 %v12048_v46 }
0x104f   :  { %5534 = vmatprep.subr.mxu1 %v11109_v2 }
0x1050   :  { %5535 = vmatpush3.msra.mxu1 %v12049_v34 }
0x1051   :  { %5536 = vmatprep.subr.mxu1 %v11109_v2 }
0x1052   :  { %5537 = vmatpush3.msra.mxu1 %v12050_v27 }
0x10f3   :  { %v4870_v59 = vpop.f32.mrf.mxu1  ;;  %v4941_v58 = vpop.f32.mrf.mxu0 }
0x10f4   :  { %v4871_v19 = vadd.f32 %v4870_v59, %v4728_v20  ;;  %v4942_v48 = vadd.f32 %v4941_v58, %v4799_v42 }
0x10f5   :  { %v4872_v9 = vpop.f32.mrf.mxu1  ;;  %v4943_v57 = vpop.f32.mrf.mxu0 }
0x10f6   :  { %v4946_v15 = vadd.f32 %v4871_v19, %v7428_v4  ;;  %v4873_v50 = vadd.f32 %v4872_v9, %v4730_v43  ;;  %v4944_v2 = vadd.f32 %v4943_v57, %v4801_v7  ;;  %v4948_v17 = vadd.f32 %v4942_v48, %v7443_v41 }
0x10f8   :  { %v5121_v12 = vmul.f32 -1.442695, %v4946_v15  ;;  %v4947_v0 = vadd.f32 %v4873_v50, %v7432_v33  ;;  %v4949_v30 = vadd.f32 %v4944_v2, %v7438_v32 }
0x10fa   :  { %5818 = vpow2.f32 %v5121_v12  ;;  %v5122_v21 = vmul.f32 -1.442695, %v4947_v0  ;;  %v5123_v29 = vmul.f32 -1.442695, %v4949_v30 }
0x10fc   :  { %5820 = vpow2.f32 %v5122_v21 }
0x10fd   :  { %5822 = vpow2.f32 %v5123_v29 }
0x1107   :  { %v5819_v13 = vpop.eup %5818 }
0x1108   :  { %v4953_v51 = vadd.f32 1.0, %v5819_v13 }
0x1109   :  { %v5821_v25 = vpop.eup %5820 }
0x110a   :  { %5824 = vrcp.f32 %v4953_v51  ;;  %v4959_v4 = vadd.f32 1.0, %v5821_v25  ;;  %v5823_v33 = vpop.eup %5822 }
0x110b   :  { %5826 = vtanh.f32 %v4948_v17  ;;  %v4966_v10 = vadd.f32 1.0, %v5823_v33 }
0x110c   :  { %5828 = vrcp.f32 %v4959_v4 }
0x110d   :  { %5830 = vrcp.f32 %v4966_v10 }
0x1117   :  { %v5825_v40 = vpop.eup %5824 }
0x1118   :  { %v5827_v5 = vpop.eup %5826 }
0x1119   :  { %v5829_v22 = vpop.eup %5828  ;;  %v4970_v60 = vmul.f32 %v5827_v5, %v5825_v40 }
0x111a   :  { %v4969_v32 = vmul.f32 %v5829_v22, %v10404_v35  ;;  %v5831_v36 = vpop.eup %5830 }
0x111c   :  { %v4971_v62 = vadd.f32 %v4970_v60, %v4969_v32 }
0x111e   :  { %5832 = vtanh.f32 %v4971_v62 }
0x112b   :  { %v5833_v41 = vpop.eup %5832 }
0x112c   :  { %v4973_v54 = vmul.f32 %v5833_v41, %v5831_v36 }
0x112e   :  { %5834 = vtanh.f32 %v4973_v54 }
0x113b   :  { %v5835_v31 = vpop.eup %5834 }
0x113c   :  { %5539 = vmatmul.mubr.f32.vlgmr.msra.gmra.mxu1 %v5835_v31 }
0x11fc   :  { %v5041_v53 = vpop.f32.mrf.mxu1 }
0x11fd   :  { %v5042_v45 = vadd.f32 %v10482_v61, %v5041_v53 }
0x11fe   :  { %v5540_v16 = vpop.f32.mrf.mxu1 }
0x11ff   :  { %5124 = vst.msk [vmem:[%s10546_s9 + $0x38] sm:$0xff] %vm1153_vm2, %v5042_v45 }
0x1200   :  { %5051 = vsyncpa [#allocation3], 1 }
0x1201   :  { %5052 = vsyncpa [#allocation5], 1 }

</bundles_post_ra>
